<compile_context>
chip_gen: v5e
topology: v5e:2x2
jax: 0.10.0
libtpu: 0.0.40
codegen_flags: <defaults>
</compile_context>

<pallas_src>
import jax
import jax.numpy as jnp
from jax.experimental import pallas as pl
from jax.experimental.pallas import tpu as pltpu

# Logical (PyTorch) dims
D_IN, H1, H2, H3, N_CLASSES = 4, 2000, 1000, 300, 3
# Lane-aligned (padded) dims used inside the kernel
H1P, H2P, H3P, OUTP = 2048, 1024, 384, 128
_NEG = -1e30  # bias fill for padded logit columns -> exp underflows to exactly 0

_PARAM_ORDER = ("w1", "b1", "w2", "b2", "w3", "b3", "w4", "b4")


def _mlp_kernel(x_ref, w1_ref, b1_ref, w2_ref, b2_ref, w3_ref, b3_ref,
                w4_ref, b4_ref, o_ref):
    # bf16 operands into the MXU, f32 accumulation.
    h = jnp.dot(x_ref[...].astype(jnp.bfloat16), w1_ref[...],
                preferred_element_type=jnp.float32)
    h = jnp.maximum(h + b1_ref[...], 0.0)

    h = jnp.dot(h.astype(jnp.bfloat16), w2_ref[...],
                preferred_element_type=jnp.float32)
    h = jnp.maximum(h + b2_ref[...], 0.0)

    h = jnp.dot(h.astype(jnp.bfloat16), w3_ref[...],
                preferred_element_type=jnp.float32)
    h = jnp.maximum(h + b3_ref[...], 0.0)

    # Final head: padded logit columns carry a -1e30 bias, so softmax over the
    # 128-wide (lane-dense) output equals softmax over the 3 real classes.
    logits = jnp.dot(h.astype(jnp.bfloat16), w4_ref[...],
                     preferred_element_type=jnp.float32) + b4_ref[...]
    m = jnp.max(logits, axis=1, keepdims=True)
    e = jnp.exp(logits - m)
    o_ref[...] = (e / jnp.sum(e, axis=1, keepdims=True)).astype(o_ref.dtype)


def _round_up(n, m):
    return ((n + m - 1) // m) * m


def net_forward(x, packed, *, max_batch_tile=512):
    """x: (B, 4) float32. packed: padded/cast params from pack_params().
    Returns (B, 3) float32 softmax probabilities (matches PyTorch forward)."""
    B = x.shape[0]
    tb = min(_round_up(B, 8), max_batch_tile)   # batch tile, multiple of 8
    b_pad = _round_up(B, tb)
    if b_pad != B:
        x = jnp.pad(x, ((0, b_pad - B), (0, 0)))

    def const_spec(a):
        # Full-array block, constant index map: DMA'd once, VMEM-resident across
        # all batch-grid steps (no re-fetch when the block index does not change).
        return pl.BlockSpec(a.shape, lambda i: (0,) * a.ndim)

    weights = [packed[k] for k in _PARAM_ORDER]

    flops = 2 * b_pad * (D_IN * H1P + H1P * H2P + H2P * H3P + H3P * OUTP)
    weight_bytes = sum(int(a.size) * a.dtype.itemsize for a in weights)
    bytes_accessed = weight_bytes + b_pad * (D_IN + OUTP) * 4
    cost = pl.CostEstimate(flops=flops, transcendentals=b_pad * OUTP,
                           bytes_accessed=bytes_accessed)

    out = pl.pallas_call(
        _mlp_kernel,
        out_shape=jax.ShapeDtypeStruct((b_pad, OUTP), jnp.float32),
        grid=(b_pad // tb,),
        in_specs=[pl.BlockSpec((tb, D_IN), lambda i: (i, 0))] +
                 [const_spec(a) for a in weights],
        out_specs=pl.BlockSpec((tb, OUTP), lambda i: (i, 0)),
        compiler_params=pltpu.CompilerParams(
            dimension_semantics=("parallel",),   # megacore batch sharding on v7x
            vmem_limit_bytes=48 << 20,           # headroom vs. v7x's 64 MiB VMEM
        ),
        cost_estimate=cost,
    )(x, *weights)

    return out[:B, :N_CLASSES]


def init_params(key):
    """PyTorch nn.Linear default init U(-1/sqrt(fan_in), +1/sqrt(fan_in)).
    Weights stored as (in, out) so the kernel computes y = x @ W + b."""
    dims = [(D_IN, H1), (H1, H2), (H2, H3), (H3, N_CLASSES)]
    params = {}
    keys = jax.random.split(key, 2 * len(dims))
    for i, (fan_in, fan_out) in enumerate(dims):
        bound = 1.0 / (fan_in ** 0.5)
        params[f"w{i+1}"] = jax.random.uniform(
            keys[2 * i], (fan_in, fan_out), jnp.float32, -bound, bound)
        params[f"b{i+1}"] = jax.random.uniform(
            keys[2 * i + 1], (1, fan_out), jnp.float32, -bound, bound)
    return params


def pack_params(params):
    """Pad to lane-aligned shapes and cast weights to bf16 (biases stay f32).
    Zero padding keeps the real units numerically unchanged; the head's padded
    logit columns get a -1e30 bias so the softmax ignores them."""
    pads = {
        "w1": (D_IN, H1P), "b1": (1, H1P),
        "w2": (H1P, H2P),  "b2": (1, H2P),
        "w3": (H2P, H3P),  "b3": (1, H3P),
        "w4": (H3P, OUTP), "b4": (1, OUTP),
    }
    packed = {}
    for name, shape in pads.items():
        src = params[name]
        fill = _NEG if name == "b4" else 0.0
        dst = jnp.full(shape, fill, jnp.float32)
        dst = dst.at[:src.shape[0], :src.shape[1]].set(src)
        if name.startswith("w"):
            dst = dst.astype(jnp.bfloat16)
        packed[name] = dst
    return packed


if __name__ == "__main__":
    key = jax.random.PRNGKey(0)
    pkey, xkey = jax.random.split(key)

    params = init_params(pkey)
    packed = pack_params(params)
    x = jax.random.normal(xkey, (8, D_IN), jnp.float32)  # iris-like batch of 8

    out = net_forward(x, packed)
    out = jax.block_until_ready(out)

    # sanity: shape, non-negativity, rows of a softmax sum to 1
    assert out.shape == (8, N_CLASSES)
    assert bool(jnp.all(out >= 0.0))
    assert jnp.allclose(jnp.sum(out, axis=1), 1.0, atol=1e-5)

    print("KERNEL_OK")
</pallas_src>

<mosaic_0001>
module attributes {stable_mosaic.version = 11 : i64} {
  func.func @_mlp_kernel(%arg0: i32, %arg1: memref<8x4xf32, #tpu.memory_space<vmem>>, %arg2: memref<4x2048xbf16, #tpu.memory_space<vmem>>, %arg3: memref<1x2048xf32, #tpu.memory_space<vmem>>, %arg4: memref<2048x1024xbf16, #tpu.memory_space<vmem>>, %arg5: memref<1x1024xf32, #tpu.memory_space<vmem>>, %arg6: memref<1024x384xbf16, #tpu.memory_space<vmem>>, %arg7: memref<1x384xf32, #tpu.memory_space<vmem>>, %arg8: memref<384x128xbf16, #tpu.memory_space<vmem>>, %arg9: memref<1x128xf32, #tpu.memory_space<vmem>>, %arg10: memref<8x128xf32, #tpu.memory_space<vmem>>) attributes {dimension_semantics = [#tpu.dimension_semantics<parallel>], iteration_bounds = array<i64: 1>, scalar_prefetch = 0 : i64, scratch_operands = 0 : i64, tpu.core_type = #tpu.core_type<tc>, window_params = [{transform_indices = @transform_0, window_bounds = array<i64: 8, 4>}, {pipeline_mode = #tpu.pipeline_mode<synchronous>, transform_indices = @transform_1, window_bounds = array<i64: 4, 2048>}, {pipeline_mode = #tpu.pipeline_mode<synchronous>, transform_indices = @transform_2, window_bounds = array<i64: 1, 2048>}, {pipeline_mode = #tpu.pipeline_mode<synchronous>, transform_indices = @transform_3, window_bounds = array<i64: 2048, 1024>}, {pipeline_mode = #tpu.pipeline_mode<synchronous>, transform_indices = @transform_4, window_bounds = array<i64: 1, 1024>}, {pipeline_mode = #tpu.pipeline_mode<synchronous>, transform_indices = @transform_5, window_bounds = array<i64: 1024, 384>}, {pipeline_mode = #tpu.pipeline_mode<synchronous>, transform_indices = @transform_6, window_bounds = array<i64: 1, 384>}, {pipeline_mode = #tpu.pipeline_mode<synchronous>, transform_indices = @transform_7, window_bounds = array<i64: 384, 128>}, {pipeline_mode = #tpu.pipeline_mode<synchronous>, transform_indices = @transform_8, window_bounds = array<i64: 1, 128>}, {transform_indices = @transform_9, window_bounds = array<i64: 8, 128>}]} {
    %c0 = arith.constant 0 : index
    %c0_0 = arith.constant 0 : index
    %0 = vector.load %arg1[%c0, %c0_0] : memref<8x4xf32, #tpu.memory_space<vmem>>, vector<8x4xf32>
    %1 = arith.truncf %0 : vector<8x4xf32> to vector<8x4xbf16>
    %c0_1 = arith.constant 0 : index
    %c0_2 = arith.constant 0 : index
    %2 = vector.load %arg2[%c0_1, %c0_2] : memref<4x2048xbf16, #tpu.memory_space<vmem>>, vector<4x2048xbf16>
    %cst = arith.constant dense<0.000000e+00> : vector<8x2048xf32>
    %3 = tpu.matmul %1, %2, %cst {dimension_numbers = #tpu.dot_dimension_numbers<[1], [0], [0], [1], [0, 0, 1, 1], [], []>} : vector<8x4xbf16>, vector<4x2048xbf16>, vector<8x2048xf32> -> vector<8x2048xf32>
    %c0_3 = arith.constant 0 : index
    %c0_4 = arith.constant 0 : index
    %4 = vector.load %arg3[%c0_3, %c0_4] : memref<1x2048xf32, #tpu.memory_space<vmem>>, vector<1x2048xf32>
    %5 = vector.broadcast %4 : vector<1x2048xf32> to vector<8x2048xf32>
    %6 = arith.addf %3, %5 : vector<8x2048xf32>
    %cst_5 = arith.constant 0.000000e+00 : f32
    %7 = vector.broadcast %cst_5 : f32 to vector<8x2048xf32>
    %8 = arith.maximumf %6, %7 : vector<8x2048xf32>
    %9 = arith.truncf %8 : vector<8x2048xf32> to vector<8x2048xbf16>
    %c0_6 = arith.constant 0 : index
    %c0_7 = arith.constant 0 : index
    %10 = vector.load %arg4[%c0_6, %c0_7] : memref<2048x1024xbf16, #tpu.memory_space<vmem>>, vector<2048x1024xbf16>
    %cst_8 = arith.constant dense<0.000000e+00> : vector<8x1024xf32>
    %11 = tpu.matmul %9, %10, %cst_8 {dimension_numbers = #tpu.dot_dimension_numbers<[1], [0], [0], [1], [0, 0, 1, 1], [], []>} : vector<8x2048xbf16>, vector<2048x1024xbf16>, vector<8x1024xf32> -> vector<8x1024xf32>
    %c0_9 = arith.constant 0 : index
    %c0_10 = arith.constant 0 : index
    %12 = vector.load %arg5[%c0_9, %c0_10] : memref<1x1024xf32, #tpu.memory_space<vmem>>, vector<1x1024xf32>
    %13 = vector.broadcast %12 : vector<1x1024xf32> to vector<8x1024xf32>
    %14 = arith.addf %11, %13 : vector<8x1024xf32>
    %cst_11 = arith.constant 0.000000e+00 : f32
    %15 = vector.broadcast %cst_11 : f32 to vector<8x1024xf32>
    %16 = arith.maximumf %14, %15 : vector<8x1024xf32>
    %17 = arith.truncf %16 : vector<8x1024xf32> to vector<8x1024xbf16>
    %c0_12 = arith.constant 0 : index
    %c0_13 = arith.constant 0 : index
    %18 = vector.load %arg6[%c0_12, %c0_13] : memref<1024x384xbf16, #tpu.memory_space<vmem>>, vector<1024x384xbf16>
    %cst_14 = arith.constant dense<0.000000e+00> : vector<8x384xf32>
    %19 = tpu.matmul %17, %18, %cst_14 {dimension_numbers = #tpu.dot_dimension_numbers<[1], [0], [0], [1], [0, 0, 1, 1], [], []>} : vector<8x1024xbf16>, vector<1024x384xbf16>, vector<8x384xf32> -> vector<8x384xf32>
    %c0_15 = arith.constant 0 : index
    %c0_16 = arith.constant 0 : index
    %20 = vector.load %arg7[%c0_15, %c0_16] : memref<1x384xf32, #tpu.memory_space<vmem>>, vector<1x384xf32>
    %21 = vector.broadcast %20 : vector<1x384xf32> to vector<8x384xf32>
    %22 = arith.addf %19, %21 : vector<8x384xf32>
    %cst_17 = arith.constant 0.000000e+00 : f32
    %23 = vector.broadcast %cst_17 : f32 to vector<8x384xf32>
    %24 = arith.maximumf %22, %23 : vector<8x384xf32>
    %25 = arith.truncf %24 : vector<8x384xf32> to vector<8x384xbf16>
    %c0_18 = arith.constant 0 : index
    %c0_19 = arith.constant 0 : index
    %26 = vector.load %arg8[%c0_18, %c0_19] : memref<384x128xbf16, #tpu.memory_space<vmem>>, vector<384x128xbf16>
    %cst_20 = arith.constant dense<0.000000e+00> : vector<8x128xf32>
    %27 = tpu.matmul %25, %26, %cst_20 {dimension_numbers = #tpu.dot_dimension_numbers<[1], [0], [0], [1], [0, 0, 1, 1], [], []>} : vector<8x384xbf16>, vector<384x128xbf16>, vector<8x128xf32> -> vector<8x128xf32>
    %c0_21 = arith.constant 0 : index
    %c0_22 = arith.constant 0 : index
    %28 = vector.load %arg9[%c0_21, %c0_22] : memref<1x128xf32, #tpu.memory_space<vmem>>, vector<1x128xf32>
    %29 = vector.broadcast %28 : vector<1x128xf32> to vector<8x128xf32>
    %30 = arith.addf %27, %29 : vector<8x128xf32>
    %cst_23 = arith.constant dense<0xFF800000> : vector<8xf32>
    %31 = vector.multi_reduction <maximumf>, %30, %cst_23 [1] : vector<8x128xf32> to vector<8xf32>
    %32 = vector.shape_cast %31 : vector<8xf32> to vector<8x1xf32>
    %33 = vector.broadcast %32 : vector<8x1xf32> to vector<8x128xf32>
    %34 = arith.subf %30, %33 : vector<8x128xf32>
    %35 = math.exp %34 : vector<8x128xf32>
    %cst_24 = arith.constant dense<0.000000e+00> : vector<8xf32>
    %36 = vector.multi_reduction <add>, %35, %cst_24 [1] : vector<8x128xf32> to vector<8xf32>
    %37 = vector.shape_cast %36 : vector<8xf32> to vector<8x1xf32>
    %38 = vector.broadcast %37 : vector<8x1xf32> to vector<8x128xf32>
    %39 = arith.divf %35, %38 : vector<8x128xf32>
    %c0_25 = arith.constant 0 : index
    %c0_26 = arith.constant 0 : index
    %40 = vector.load %arg10[%c0_25, %c0_26] : memref<8x128xf32, #tpu.memory_space<vmem>>, vector<8x128xf32>
    tpu.vector_store %arg10[%c0_25, %c0_26], %39 {strides = array<i32>} : memref<8x128xf32, #tpu.memory_space<vmem>>, vector<8x128xf32>,
    return
  }
  func.func @transform_0(%arg0: i32) -> (i32, i32) {
    %c0_i32 = arith.constant 0 : i32
    %c0_i32_0 = arith.constant 0 : i32
    return %arg0, %c0_i32 : i32, i32
  }
  func.func @transform_1(%arg0: i32) -> (i32, i32) {
    %c0_i32 = arith.constant 0 : i32
    %c0_i32_0 = arith.constant 0 : i32
    %c0_i32_1 = arith.constant 0 : i32
    return %c0_i32, %c0_i32_0 : i32, i32
  }
  func.func @transform_2(%arg0: i32) -> (i32, i32) {
    %c0_i32 = arith.constant 0 : i32
    %c0_i32_0 = arith.constant 0 : i32
    %c0_i32_1 = arith.constant 0 : i32
    return %c0_i32, %c0_i32_0 : i32, i32
  }
  func.func @transform_3(%arg0: i32) -> (i32, i32) {
    %c0_i32 = arith.constant 0 : i32
    %c0_i32_0 = arith.constant 0 : i32
    %c0_i32_1 = arith.constant 0 : i32
    return %c0_i32, %c0_i32_0 : i32, i32
  }
  func.func @transform_4(%arg0: i32) -> (i32, i32) {
    %c0_i32 = arith.constant 0 : i32
    %c0_i32_0 = arith.constant 0 : i32
    %c0_i32_1 = arith.constant 0 : i32
    return %c0_i32, %c0_i32_0 : i32, i32
  }
  func.func @transform_5(%arg0: i32) -> (i32, i32) {
    %c0_i32 = arith.constant 0 : i32
    %c0_i32_0 = arith.constant 0 : i32
    %c0_i32_1 = arith.constant 0 : i32
    return %c0_i32, %c0_i32_0 : i32, i32
  }
  func.func @transform_6(%arg0: i32) -> (i32, i32) {
    %c0_i32 = arith.constant 0 : i32
    %c0_i32_0 = arith.constant 0 : i32
    %c0_i32_1 = arith.constant 0 : i32
    return %c0_i32, %c0_i32_0 : i32, i32
  }
  func.func @transform_7(%arg0: i32) -> (i32, i32) {
    %c0_i32 = arith.constant 0 : i32
    %c0_i32_0 = arith.constant 0 : i32
    %c0_i32_1 = arith.constant 0 : i32
    return %c0_i32, %c0_i32_0 : i32, i32
  }
  func.func @transform_8(%arg0: i32) -> (i32, i32) {
    %c0_i32 = arith.constant 0 : i32
    %c0_i32_0 = arith.constant 0 : i32
    %c0_i32_1 = arith.constant 0 : i32
    return %c0_i32, %c0_i32_0 : i32, i32
  }
  func.func @transform_9(%arg0: i32) -> (i32, i32) {
    %c0_i32 = arith.constant 0 : i32
    %c0_i32_0 = arith.constant 0 : i32
    return %arg0, %c0_i32 : i32, i32
  }
}

</mosaic_0001>

<bundles_post_ra>
// kernel: tpu_custom_call.1
= control target key start
LH: loop header
LB: loop body
LE: loop exit
PB: predicated region body
PF: predicated region fallthrough
CT: control target
= control target key end

     0   :  { %14 = vsyncpa [#allocation3], 0  ;;  %s17223_s0 = inlined_call_operand.vmem [shape: f32[8,4], index: 0, kind: input, shape index: {}]   ;;  %s17224_s1 = inlined_call_operand.hbm [shape: bf16[4,2048], index: 1, kind: input, shape index: {}]   ;;  %s17225_s2 = inlined_call_operand.hbm [shape: f32[1,2048], index: 2, kind: input, shape index: {}]   ;;  %s17226_s3 = inlined_call_operand.hbm [shape: bf16[2048,1024], index: 3, kind: input, shape index: {}]   ;;  %s17227_s4 = inlined_call_operand.hbm [shape: f32[1,1024], index: 4, kind: input, shape index: {}]   ;;  %s17228_s5 = inlined_call_operand.hbm [shape: bf16[1024,384], index: 5, kind: input, shape index: {}]   ;;  %s17229_s6 = inlined_call_operand.hbm [shape: f32[1,384], index: 6, kind: input, shape index: {}]   ;;  %s17230_s7 = inlined_call_operand.hbm [shape: bf16[384,128], index: 7, kind: input, shape index: {}]   ;;  %s17231_s8 = inlined_call_operand.hbm [shape: f32[1,128], index: 8, kind: input, shape index: {}]   ;;  %s17232_s9 = inlined_call_operand.hbm [shape: f32[8,128], index: 9, kind: output, shape index: {}]  }
   0x1   :  { %15 = vsyncpa [#allocation6], 0 }
   0x2   :  { %16 = vsyncpa [#allocation9], 0 }
   0x3   :  { %17 = vsyncpa [#allocation12], 0 }
   0x4   :  { %18 = vsyncpa [#allocation15], 0  ;;  %s38_s11 = sshll.u32 %s17225_s2, 4  ;;  %s39_s11 = int_to_ptr.hbm [resolvable:$true] %s38_s11 }
   0x5   :  { %19 = vsyncpa [#allocation4], 0  ;;  %s16690_s12 = smov [#allocation5]   ;;  %s62_s16 = sshll.u32 %s17227_s4, 4  ;;  %s63_s16 = int_to_ptr.hbm [resolvable:$true] %s62_s16 }
   0x6   :  { %s40_s13 = sshll.u32 %s16690_s12, 4  ;;  %s16691_s17 = smov [#allocation8]   ;;  %s41_s13 = int_to_ptr.vmem [resolvable:$true] %s40_s13 }
   0x7   :  { %43 = dma.hbm_to_vmem [thread:$0]  %s39_s11, 256, %s41_s13, [#allocation6]  }
   0x8   :  { %s64_s18 = sshll.u32 %s16691_s17, 4  ;;  %s86_s21 = sshll.u32 %s17229_s6, 4  ;;  %s65_s18 = int_to_ptr.vmem [resolvable:$true] %s64_s18  ;;  %s87_s21 = int_to_ptr.hbm [resolvable:$true] %s86_s21 }
   0x9   :  { %67 = dma.hbm_to_vmem [thread:$0]  %s63_s16, 128, %s65_s18, [#allocation9]  }
   0xa   :  { %s27_s23 = sshll.u32 %s17224_s1, 4  ;;  %s16692_s24 = smov [#allocation11]   ;;  %s28_s23 = int_to_ptr.hbm [resolvable:$true] %s27_s23 }
   0xb   :  { %s88_s25 = sshll.u32 %s16692_s24, 4  ;;  %s16693_s4 = smov [#allocation2]   ;;  %s89_s25 = int_to_ptr.vmem [resolvable:$true] %s88_s25 }
   0xc   :  { %91 = dma.hbm_to_vmem [thread:$0]  %s87_s21, 48, %s89_s25, [#allocation12]  }
   0xd   :  { %s29_s26 = sshll.u32 %s16693_s4, 4  ;;  %s48_s29 = sshll.u32 %s17226_s3, 4  ;;  %s30_s26 = int_to_ptr.vmem [resolvable:$true] %s29_s26  ;;  %s49_s29 = int_to_ptr.hbm [resolvable:$true] %s48_s29 }
   0xe   :  { %32 = dma.hbm_to_vmem [thread:$0]  %s28_s23, 512, %s30_s26, [#allocation3]  }
   0xf   :  { %s16694_s6 = smov [#allocation7]   ;;  %s72_s1 = sshll.u32 %s17228_s5, 4  ;;  %s73_s1 = int_to_ptr.hbm [resolvable:$true] %s72_s1 }
  0x10   :  { %s50_s30 = sshll.u32 %s16694_s6, 4  ;;  %s16695_s12 = smov 512   ;;  %s51_s30 = int_to_ptr.vmem [resolvable:$true] %s50_s30 }
  0x11   :  { %s16696_s13 = smov 32   ;;  %s16697_s14 = smov [#allocation10]  }
  0x12   :  { %56 = dma.hbm_to_vmem [thread:$0]  %s49_s29, 131072, %s51_s30, [#allocation6], %s16695_s12, %s16695_s12, %s16696_s13  }
  0x13   :  { %s74_s15 = sshll.u32 %s16697_s14, 4  ;;  %s16698_s16 = smov 192   ;;  %s75_s15 = int_to_ptr.vmem [resolvable:$true] %s74_s15 }
  0x14   :  { %s16699_s17 = smov 12   ;;  %s96_s19 = sshll.u32 %s17230_s7, 4  ;;  %s97_s19 = int_to_ptr.hbm [resolvable:$true] %s96_s19 }
  0x15   :  { %80 = dma.hbm_to_vmem [thread:$0]  %s73_s1, 24576, %s75_s15, [#allocation9], %s16698_s16, %s16698_s16, %s16699_s17  }
  0x16   :  { %s16700_s20 = smov [#allocation13]   ;;  %s110_s22 = sshll.u32 %s17231_s8, 4  ;;  %s111_s22 = int_to_ptr.hbm [resolvable:$true] %s110_s22 }
  0x17   :  { %s98_s21 = sshll.u32 %s16700_s20, 4  ;;  %s16701_s23 = smov 64   ;;  %s99_s21 = int_to_ptr.vmem [resolvable:$true] %s98_s21 }
  0x18   :  { %s16702_s24 = smov 4   ;;  %s16703_s25 = smov [#allocation14]  }
  0x19   :  { %104 = dma.hbm_to_vmem [thread:$0]  %s97_s19, 3072, %s99_s21, [#allocation12], %s16701_s23, %s16701_s23, %s16702_s24  }
  0x1a   :  { %s112_s4 = sshll.u32 %s16703_s25, 4  ;;  %s113_s4 = int_to_ptr.vmem [resolvable:$true] %s112_s4 }
  0x1b   :  { %115 = dma.hbm_to_vmem [thread:$0]  %s111_s22, 16, %s113_s4, [#allocation15]  }
  0x1c   :  { %16678 = dma.done.wait [#allocation3], 512  }
  0x1d   :  { %16679 = vsyncadd [#allocation3], 4294966784 }
  0x1e   :  { %16680 = dma.done.wait [#allocation6], 131328  }
  0x1f   :  { %16681 = vsyncadd [#allocation6], 4294835968 }
  0x20   :  { %16682 = dma.done.wait [#allocation9], 24704  }
  0x21   :  { %16683 = vsyncadd [#allocation9], 4294942592 }
  0x22   :  { %16684 = dma.done.wait [#allocation12], 3120  }
  0x23   :  { %16685 = vsyncadd [#allocation12], 4294964176 }
  0x24   :  { %16686 = dma.done.wait [#allocation15], 16  }
  0x25   :  { %16687 = vsyncadd [#allocation15], 4294967280  ;;  %v151_v0 = vld [vmem:[#allocation2] sm:$0xff]  ;;  %v152_v1 = vld [vmem:[#allocation2 + $0x8] sm:$0xff]  ;;  %vm220_vm0 = vcmask 1041408   ;;  %vm216_vm1 = vcmask 31744  }
  0x26   :  { %192 = vst [vmem:[#allocation1] ss:$4 sm:$0xff] %v151_v0  ;;  %v149_v2 = vld [vmem:[%s17223_s0] sm:$0xff]  ;;  %v153_v3 = vld [vmem:[#allocation2 + $0x10] sm:$0xff]  ;;  %s16704_s0 = smov [#allocation16]   ;;  %s10206_s29 = sshll.u32 %s17232_s9, 4  ;;  %s10207_s29 = int_to_ptr.hbm [resolvable:$true] %s10206_s29 }
  0x27   :  { %195 = vst [vmem:[#allocation1 + $0x20] ss:$4 sm:$0xff] %v152_v1  ;;  %v16784_v9 = vpack.c.bf16 %v149_v2, %v149_v2  ;;  %v154_v16 = vld [vmem:[#allocation2 + $0x18] sm:$0xff]  ;;  %v10718_v36 = vld [vmem:[#allocation7 + $0x3c0] sm:$0xf]  ;;  %s10204_s26 = sshll.u32 %s16704_s0, 4  ;;  %s10205_s26 = int_to_ptr.vmem [resolvable:$true] %s10204_s26 }
  0x28   :  { %v15320_v38 = vld [vmem:[#allocation7 + $0x3dc] sm:$0xf0] }
  0x29   :  { %v10719_v40 = vor.u32 %v15320_v38, %v10718_v36  ;;  %v10686_v41 = vld [vmem:[#allocation7 + $0x380] sm:$0xf] }
  0x2a   :  { %v15312_v42 = vld [vmem:[#allocation7 + $0x39c] sm:$0xf0] }
  0x2b   :  { %v10462_v43 = vld [vmem:[#allocation7 + $0x1c0] sm:$0xf]  ;;  %v10687_v47 = vor.u32 %v15312_v42, %v10686_v41 }
  0x2c   :  { %v15256_v44 = vld [vmem:[#allocation7 + $0x1dc] sm:$0xf0] }
  0x2d   :  { %v196_v4 = vld.sshfl [vmem:[#allocation1] sm:$0xff pattern:$0x73625140]  ;;  %v197_v5 = vld.sshfl [vmem:[#allocation1 + $0x8] sm:$0xff pattern:$0x73625140]  ;;  %v10463_v48 = vor.u32 %v15256_v44, %v10462_v43 }
  0x2e   :  { %v221_v6 = vsel %vm220_vm0, %v196_v4, 0  ;;  %v223_v7 = vsel %vm220_vm0, %v197_v5, 0  ;;  %v198_v8 = vld.sshfl [vmem:[#allocation1 + $0x10] sm:$0xff pattern:$0x73625140] }
  0x2f   :  { %260 = vmatpush.bf16.msra.mxu3 %v221_v6  ;;  %273 = vmatpush.bf16.msra.mxu1 %v223_v7  ;;  %v225_v10 = vsel %vm220_vm0, %v198_v8, 0  ;;  %v199_v11 = vld.sshfl [vmem:[#allocation1 + $0x18] sm:$0xff pattern:$0x73625140] }
  0x30   :  { %286 = vmatpush.bf16.msra.mxu2 %v225_v10  ;;  %205 = vst [vmem:[#allocation1] ss:$4 sm:$0xff] %v153_v3  ;;  %v227_v12 = vsel %vm220_vm0, %v199_v11, 0  ;;  %v202_v13 = vld.sshfl [vmem:[#allocation1 + $0x30] sm:$0xff pattern:$0x73625140] }
  0x31   :  { %v233_v14 = vsel %vm220_vm0, %v202_v13, 0  ;;  %v201_v15 = vld.sshfl [vmem:[#allocation1 + $0x28] sm:$0xff pattern:$0x73625140]  ;;  %v10974_v45 = vld [vmem:[#allocation7 + $0x5c0] sm:$0xf] }
  0x32   :  { %10220 = vmatmul.msk.bf16.vlgmr.msra.gmra.mxu3 %vm216_vm1, %v16784_v9  ;;  %10221 = vmatmul.msk.bf16.vlgmr.msra.gmra.mxu1 %vm216_vm1, %v16784_v9  ;;  %v231_v17 = vsel %vm220_vm0, %v201_v15, 0  ;;  %v200_v18 = vld.sshfl [vmem:[#allocation1 + $0x20] sm:$0xff pattern:$0x73625140]  ;;  %v15384_v46 = vld [vmem:[#allocation7 + $0x5dc] sm:$0xf0] }
  0x33   :  { %299 = vmatpush.bf16.msrb.mxu3 %v227_v12  ;;  %10222 = vmatmul.msk.bf16.vlgmr.msra.gmra.mxu2 %vm216_vm1, %v16784_v9  ;;  %v229_v19 = vsel %vm220_vm0, %v200_v18, 0  ;;  %v203_v20 = vld.sshfl [vmem:[#allocation1 + $0x38] sm:$0xff pattern:$0x73625140]  ;;  %v10975_v49 = vor.u32 %v15384_v46, %v10974_v45 }
  0x34   :  { %325 = vmatpush.bf16.msrb.mxu1 %v231_v17  ;;  %338 = vmatpush.bf16.msrb.mxu2 %v233_v14  ;;  %207 = vst [vmem:[#allocation1 + $0x20] ss:$4 sm:$0xff] %v154_v16  ;;  %v235_v21 = vsel %vm220_vm0, %v203_v20, 0  ;;  %v10654_v50 = vld [vmem:[#allocation7 + $0x340] sm:$0xf] }
  0x35   :  { %312 = vmatpush.bf16.msra.mxu0 %v229_v19  ;;  %v15304_v51 = vld [vmem:[#allocation7 + $0x35c] sm:$0xf0] }
  0x36   :  { %v10430_v52 = vld [vmem:[#allocation7 + $0x180] sm:$0xf]  ;;  %v10655_v62 = vor.u32 %v15304_v51, %v10654_v50 }
  0x37   :  { %351 = vmatpush.bf16.msra.mxu3 %v235_v21  ;;  %v210_v22 = vld.sshfl [vmem:[#allocation1 + $0x10] sm:$0xff pattern:$0x73625140]  ;;  %v208_v23 = vld.sshfl [vmem:[#allocation1] sm:$0xff pattern:$0x73625140] }
  0x38   :  { %10224 = vmatmul.msk.bf16.vlgmr.msra.gmra.mxu0 %vm216_vm1, %v16784_v9  ;;  %v241_v24 = vsel %vm220_vm0, %v210_v22, 0  ;;  %v237_v25 = vsel %vm220_vm0, %v208_v23, 0  ;;  %v209_v26 = vld.sshfl [vmem:[#allocation1 + $0x8] sm:$0xff pattern:$0x73625140] }
  0x39   :  { %390 = vmatpush.bf16.msra.mxu2 %v241_v24  ;;  %364 = vmatpush.bf16.msrb.mxu0 %v237_v25  ;;  %v239_v27 = vsel %vm220_vm0, %v209_v26, 0  ;;  %v211_v28 = vld.sshfl [vmem:[#allocation1 + $0x18] sm:$0xff pattern:$0x73625140] }
  0x3a   :  { %377 = vmatpush.bf16.msra.mxu1 %v239_v27  ;;  %v243_v29 = vsel %vm220_vm0, %v211_v28, 0  ;;  %v15248_v53 = vld [vmem:[#allocation7 + $0x19c] sm:$0xf0] }
  0x3b   :  { %v214_v30 = vld.sshfl [vmem:[#allocation1 + $0x30] sm:$0xff pattern:$0x73625140]  ;;  %v212_v32 = vld.sshfl [vmem:[#allocation1 + $0x20] sm:$0xff pattern:$0x73625140]  ;;  %v10431_v56 = vor.u32 %v15248_v53, %v10430_v52 }
  0x3c   :  { %v249_v31 = vsel %vm220_vm0, %v214_v30, 0  ;;  %v245_v33 = vsel %vm220_vm0, %v212_v32, 0  ;;  %v213_v34 = vld.sshfl [vmem:[#allocation1 + $0x28] sm:$0xff pattern:$0x73625140] }
  0x3d   :  { %416 = vmatpush.bf16.msra.mxu0 %v245_v33  ;;  %v247_v35 = vsel %vm220_vm0, %v213_v34, 0  ;;  %v215_v37 = vld.sshfl [vmem:[#allocation1 + $0x38] sm:$0xff pattern:$0x73625140] }
  0x3e   :  { %v251_v39 = vsel %vm220_vm0, %v215_v37, 0  ;;  %v10942_v54 = vld [vmem:[#allocation7 + $0x580] sm:$0xf] }
  0x3f   :  { %v15376_v55 = vld [vmem:[#allocation7 + $0x59c] sm:$0xf0] }
  0x40   :  { %v10943_v57 = vor.u32 %v15376_v55, %v10942_v54  ;;  %v10398_v58 = vld [vmem:[#allocation7 + $0x140] sm:$0xf] }
  0x41   :  { %v15240_v59 = vld [vmem:[#allocation7 + $0x15c] sm:$0xf0] }
  0x42   :  { %10223 = vmatmul.msk.bf16.vlgmr.msrb.gmra.mxu3 %vm216_vm1, %v16784_v9  ;;  %10225 = vmatmul.msk.bf16.vlgmr.msrb.gmra.mxu1 %vm216_vm1, %v16784_v9  ;;  %v10910_v60 = vld [vmem:[#allocation7 + $0x540] sm:$0xf]  ;;  %v10399_v1 = vor.u32 %v15240_v59, %v10398_v58 }
  0x43   :  { %10226 = vmatmul.msk.bf16.vlgmr.msrb.gmra.mxu2 %vm216_vm1, %v16784_v9  ;;  %403 = vmatpush.bf16.msrb.mxu3 %v243_v29  ;;  %v15368_v61 = vld [vmem:[#allocation7 + $0x55c] sm:$0xf0] }
  0x44   :  { %442 = vmatpush.bf16.msrb.mxu2 %v249_v31  ;;  %429 = vmatpush.bf16.msrb.mxu1 %v247_v35  ;;  %v10622_v63 = vld [vmem:[#allocation7 + $0x300] sm:$0xf]  ;;  %v10911_v2 = vor.u32 %v15368_v61, %v10910_v60 }
  0x45   :  { %v15296_v0 = vld [vmem:[#allocation7 + $0x31c] sm:$0xf0] }
  0x46   :  { %v10623_v3 = vor.u32 %v15296_v0, %v10622_v63  ;;  %v10590_v4 = vld [vmem:[#allocation7 + $0x2c0] sm:$0xf] }
  0x47   :  { %v10366_v5 = vld [vmem:[#allocation7 + $0x100] sm:$0xf] }
  0x48   :  { %10228 = vmatmul.msk.bf16.vlgmr.msrb.gmra.mxu0 %vm216_vm1, %v16784_v9  ;;  %v15232_v6 = vld [vmem:[#allocation7 + $0x11c] sm:$0xf0] }
  0x49   :  { %6655 = vmatpush.bf16.msrb.mxu0 %v10463_v48  ;;  %v15288_v7 = vld [vmem:[#allocation7 + $0x2dc] sm:$0xf0]  ;;  %v10367_v13 = vor.u32 %v15232_v6, %v10366_v5 }
  0x4a   :  { %v10878_v8 = vld [vmem:[#allocation7 + $0x500] sm:$0xf]  ;;  %v10591_v14 = vor.u32 %v15288_v7, %v10590_v4 }
  0x4b   :  { %v15360_v10 = vld [vmem:[#allocation7 + $0x51c] sm:$0xf0] }
  0x4c   :  { %v11230_v11 = vld [vmem:[#allocation7 + $0x7c0] sm:$0xf]  ;;  %v10879_v15 = vor.u32 %v15360_v10, %v10878_v8 }
  0x4d   :  { %6656 = vmatpush.bf16.msrb.mxu0 %v10431_v56  ;;  %v15448_v12 = vld [vmem:[#allocation7 + $0x7dc] sm:$0xf0] }
  0x4e   :  { %v10558_v16 = vld [vmem:[#allocation7 + $0x280] sm:$0xf]  ;;  %v11231_v22 = vor.u32 %v15448_v12, %v11230_v11 }
  0x4f   :  { %v10334_v17 = vld [vmem:[#allocation7 + $0xc0] sm:$0xf] }
  0x50   :  { %v15224_v18 = vld [vmem:[#allocation7 + $0xdc] sm:$0xf0] }
  0x51   :  { %6657 = vmatpush.bf16.msrb.mxu0 %v10399_v1  ;;  %v15280_v19 = vld [vmem:[#allocation7 + $0x29c] sm:$0xf0]  ;;  %v10335_v25 = vor.u32 %v15224_v18, %v10334_v17 }
  0x52   :  { %10227 = vmatmul.msk.bf16.vlgmr.msra.gmra.mxu3 %vm216_vm1, %v16784_v9  ;;  %10229 = vmatmul.msk.bf16.vlgmr.msra.gmra.mxu1 %vm216_vm1, %v16784_v9  ;;  %v10846_v20 = vld [vmem:[#allocation7 + $0x4c0] sm:$0xf]  ;;  %v10559_v26 = vor.u32 %v15280_v19, %v10558_v16 }
  0x53   :  { %10230 = vmatmul.msk.bf16.vlgmr.msra.gmra.mxu2 %vm216_vm1, %v16784_v9  ;;  %455 = vmatpush.bf16.msra.mxu3 %v251_v39  ;;  %v15352_v21 = vld [vmem:[#allocation7 + $0x4dc] sm:$0xf0] }
  0x54   :  { %6668 = vmatpush.bf16.msra.mxu1 %v10719_v40  ;;  %6681 = vmatpush.bf16.msra.mxu2 %v10975_v49  ;;  %v11198_v23 = vld [vmem:[#allocation7 + $0x780] sm:$0xf]  ;;  %v10847_v27 = vor.u32 %v15352_v21, %v10846_v20 }
  0x55   :  { %v15440_v24 = vld [vmem:[#allocation7 + $0x79c] sm:$0xf0]  ;;  %6658 = vmatpush.bf16.msrb.mxu0 %v10367_v13 }
  0x56   :  { %v10526_v28 = vld [vmem:[#allocation7 + $0x240] sm:$0xf]  ;;  %v11199_v34 = vor.u32 %v15440_v24, %v11198_v23 }
  0x57   :  { %v10302_v29 = vld [vmem:[#allocation7 + $0x80] sm:$0xf] }
  0x58   :  { %10232 = vmatmul.msk.bf16.vlgmr.msra.gmra.mxu0 %vm216_vm1, %v16784_v9  ;;  %6669 = vmatpush.bf16.msra.mxu1 %v10687_v47  ;;  %v15216_v30 = vld [vmem:[#allocation7 + $0x9c] sm:$0xf0] }
  0x59   :  { %6682 = vmatpush.bf16.msra.mxu2 %v10943_v57  ;;  %v15272_v31 = vld [vmem:[#allocation7 + $0x25c] sm:$0xf0]  ;;  %6659 = vmatpush.bf16.msrb.mxu0 %v10335_v25  ;;  %v10303_v37 = vor.u32 %v15216_v30, %v10302_v29 }
  0x5a   :  { %v10814_v32 = vld [vmem:[#allocation7 + $0x480] sm:$0xf]  ;;  %v10527_v39 = vor.u32 %v15272_v31, %v10526_v28 }
  0x5b   :  { %v15344_v33 = vld [vmem:[#allocation7 + $0x49c] sm:$0xf0] }
  0x5c   :  { %6670 = vmatpush.bf16.msra.mxu1 %v10655_v62  ;;  %v11166_v35 = vld [vmem:[#allocation7 + $0x740] sm:$0xf]  ;;  %v10815_v40 = vor.u32 %v15344_v33, %v10814_v32 }
  0x5d   :  { %6683 = vmatpush.bf16.msra.mxu2 %v10911_v2  ;;  %v15432_v36 = vld [vmem:[#allocation7 + $0x75c] sm:$0xf0]  ;;  %6660 = vmatpush.bf16.msrb.mxu0 %v10303_v37 }
  0x5e   :  { %v10494_v38 = vld [vmem:[#allocation7 + $0x200] sm:$0xf]  ;;  %v11167_v47 = vor.u32 %v15432_v36, %v11166_v35 }
  0x5f   :  { %v15264_v41 = vld [vmem:[#allocation7 + $0x21c] sm:$0xf0] }
  0x60   :  { %6671 = vmatpush.bf16.msra.mxu1 %v10623_v3  ;;  %v10270_v42 = vld [vmem:[#allocation7 + $0x40] sm:$0xf]  ;;  %v10495_v52 = vor.u32 %v15264_v41, %v10494_v38 }
  0x61   :  { %6684 = vmatpush.bf16.msra.mxu2 %v10879_v15  ;;  %v15208_v43 = vld [vmem:[#allocation7 + $0x5c] sm:$0xf0] }
  0x62   :  { %10231 = vmatmul.msk.bf16.vlgmr.msrb.gmra.mxu3 %vm216_vm1, %v16784_v9  ;;  %10233 = vmatmul.msk.bf16.vlgmr.msrb.gmra.mxu1 %vm216_vm1, %v16784_v9  ;;  %v11742_v44 = vld [vmem:[#allocation7 + $0xbc0] sm:$0xf]  ;;  %v10271_v51 = vor.u32 %v15208_v43, %v10270_v42 }
  0x63   :  { %10234 = vmatmul.msk.bf16.vlgmr.msrb.gmra.mxu2 %vm216_vm1, %v16784_v9  ;;  %6694 = vmatpush.bf16.msrb.mxu3 %v11231_v22  ;;  %v10782_v45 = vld [vmem:[#allocation7 + $0x440] sm:$0xf] }
  0x64   :  { %6672 = vmatpush.bf16.msra.mxu1 %v10591_v14  ;;  %v15336_v46 = vld [vmem:[#allocation7 + $0x45c] sm:$0xf0]  ;;  %6661 = vmatpush.bf16.msrb.mxu0 %v10271_v51 }
  0x65   :  { %6685 = vmatpush.bf16.msra.mxu2 %v10847_v27  ;;  %v15576_v48 = vld [vmem:[#allocation7 + $0xbdc] sm:$0xf0]  ;;  %v10783_v53 = vor.u32 %v15336_v46, %v10782_v45 }
  0x66   :  { %v11134_v49 = vld [vmem:[#allocation7 + $0x700] sm:$0xf]  ;;  %v11743_v58 = vor.u32 %v15576_v48, %v11742_v44 }
  0x67   :  { %6695 = vmatpush.bf16.msrb.mxu3 %v11199_v34  ;;  %v15424_v50 = vld [vmem:[#allocation7 + $0x71c] sm:$0xf0] }
  0x68   :  { %6673 = vmatpush.bf16.msra.mxu1 %v10559_v26  ;;  %v11710_v54 = vld [vmem:[#allocation7 + $0xb80] sm:$0xf]  ;;  %v11135_v60 = vor.u32 %v15424_v50, %v11134_v49 }
  0x69   :  { %6686 = vmatpush.bf16.msra.mxu2 %v10815_v40  ;;  %v10238_v55 = vld [vmem:[#allocation7] sm:$0xf] }
  0x6a   :  { %v15200_v56 = vld [vmem:[#allocation7 + $0x1c] sm:$0xf0] }
  0x6b   :  { %v10750_v57 = vld [vmem:[#allocation7 + $0x400] sm:$0xf]  ;;  %6696 = vmatpush.bf16.msrb.mxu3 %v11167_v47  ;;  %v10239_v2 = vor.u32 %v15200_v56, %v10238_v55 }
  0x6c   :  { %6674 = vmatpush.bf16.msra.mxu1 %v10527_v39  ;;  %v15328_v59 = vld [vmem:[#allocation7 + $0x41c] sm:$0xf0] }
  0x6d   :  { %v11486_v61 = vld [vmem:[#allocation7 + $0x9c0] sm:$0xf]  ;;  %6687 = vmatpush.bf16.msra.mxu2 %v10783_v53  ;;  %v10751_v5 = vor.u32 %v15328_v59, %v10750_v57  ;;  %6662 = vmatpush.bf16.msrb.mxu0 %v10239_v2 }
  0x6e   :  { %v15512_v62 = vld [vmem:[#allocation7 + $0x9dc] sm:$0xf0] }
  0x6f   :  { %v15568_v63 = vld [vmem:[#allocation7 + $0xb9c] sm:$0xf0]  ;;  %v11487_v6 = vor.u32 %v15512_v62, %v11486_v61  ;;  %6697 = vmatpush.bf16.msrb.mxu3 %v11135_v60 }
  0x70   :  { %v11998_v0 = vld [vmem:[#allocation7 + $0xdc0] sm:$0xf]  ;;  %6675 = vmatpush.bf16.msra.mxu1 %v10495_v52  ;;  %v11711_v7 = vor.u32 %v15568_v63, %v11710_v54 }
  0x71   :  { %v15640_v1 = vld [vmem:[#allocation7 + $0xddc] sm:$0xf0]  ;;  %6688 = vmatpush.bf16.msra.mxu2 %v10751_v5  ;;  %6707 = vmatpush.bf16.msra.mxu0 %v11487_v6 }
  0x72   :  { %v11102_v3 = vld [vmem:[#allocation7 + $0x6c0] sm:$0xf]  ;;  %v11999_v8 = vor.u32 %v15640_v1, %v11998_v0  ;;  %10235 = vmatmul.msk.bf16.vlgmr.msra.gmra.mxu3 %vm216_vm1, %v16784_v9 }
  0x73   :  { %v15416_v4 = vld [vmem:[#allocation7 + $0x6dc] sm:$0xf0] }
  0x74   :  { %6720 = vmatpush.bf16.msrb.mxu1 %v11743_v58  ;;  %v11678_v10 = vld [vmem:[#allocation7 + $0xb40] sm:$0xf]  ;;  %v11103_v14 = vor.u32 %v15416_v4, %v11102_v3 }
  0x75   :  { %v11454_v11 = vld [vmem:[#allocation7 + $0x980] sm:$0xf]  ;;  %6733 = vmatpush.bf16.msrb.mxu2 %v11999_v8 }
  0x76   :  { %v15504_v12 = vld [vmem:[#allocation7 + $0x99c] sm:$0xf0]  ;;  %6698 = vmatpush.bf16.msrb.mxu3 %v11103_v14 }
  0x77   :  { %v15560_v13 = vld [vmem:[#allocation7 + $0xb5c] sm:$0xf0]  ;;  %v11455_v19 = vor.u32 %v15504_v12, %v11454_v11 }
  0x78   :  { %v11966_v15 = vld [vmem:[#allocation7 + $0xd80] sm:$0xf]  ;;  %6721 = vmatpush.bf16.msrb.mxu1 %v11711_v7  ;;  %v11679_v20 = vor.u32 %v15560_v13, %v11678_v10 }
  0x79   :  { %v15632_v16 = vld [vmem:[#allocation7 + $0xd9c] sm:$0xf0]  ;;  %6708 = vmatpush.bf16.msra.mxu0 %v11455_v19 }
  0x7a   :  { %v11070_v17 = vld [vmem:[#allocation7 + $0x680] sm:$0xf]  ;;  %v11967_v21 = vor.u32 %v15632_v16, %v11966_v15 }
  0x7b   :  { %v15408_v18 = vld [vmem:[#allocation7 + $0x69c] sm:$0xf0] }
  0x7c   :  { %v11646_v22 = vld [vmem:[#allocation7 + $0xb00] sm:$0xf]  ;;  %v11071_v9 = vor.u32 %v15408_v18, %v11070_v17  ;;  %6722 = vmatpush.bf16.msrb.mxu1 %v11679_v20  ;;  %6734 = vmatpush.bf16.msrb.mxu2 %v11967_v21 }
  0x7d   :  { %v11422_v23 = vld [vmem:[#allocation7 + $0x940] sm:$0xf] }
  0x7e   :  { %v15496_v24 = vld [vmem:[#allocation7 + $0x95c] sm:$0xf0]  ;;  %6699 = vmatpush.bf16.msrb.mxu3 %v11071_v9 }
  0x7f   :  { %v15552_v25 = vld [vmem:[#allocation7 + $0xb1c] sm:$0xf0]  ;;  %v11423_v30 = vor.u32 %v15496_v24, %v11422_v23 }
  0x80   :  { %v11934_v26 = vld [vmem:[#allocation7 + $0xd40] sm:$0xf]  ;;  %v11647_v31 = vor.u32 %v15552_v25, %v11646_v22 }
  0x81   :  { %v15624_v27 = vld [vmem:[#allocation7 + $0xd5c] sm:$0xf0]  ;;  %6709 = vmatpush.bf16.msra.mxu0 %v11423_v30 }
  0x82   :  { %v11038_v28 = vld [vmem:[#allocation7 + $0x640] sm:$0xf]  ;;  %v11935_v32 = vor.u32 %v15624_v27, %v11934_v26  ;;  %6723 = vmatpush.bf16.msrb.mxu1 %v11647_v31 }
  0x83   :  { %v15400_v29 = vld [vmem:[#allocation7 + $0x65c] sm:$0xf0] }
  0x84   :  { %v11614_v33 = vld [vmem:[#allocation7 + $0xac0] sm:$0xf]  ;;  %v11039_v37 = vor.u32 %v15400_v29, %v11038_v28  ;;  %6735 = vmatpush.bf16.msrb.mxu2 %v11935_v32 }
  0x85   :  { %v11390_v34 = vld [vmem:[#allocation7 + $0x900] sm:$0xf] }
  0x86   :  { %v15488_v35 = vld [vmem:[#allocation7 + $0x91c] sm:$0xf0]  ;;  %6700 = vmatpush.bf16.msrb.mxu3 %v11039_v37 }
  0x87   :  { %v15544_v36 = vld [vmem:[#allocation7 + $0xadc] sm:$0xf0]  ;;  %v11391_v42 = vor.u32 %v15488_v35, %v11390_v34 }
  0x88   :  { %v11902_v38 = vld [vmem:[#allocation7 + $0xd00] sm:$0xf]  ;;  %v11615_v43 = vor.u32 %v15544_v36, %v11614_v33  ;;  %v16832_v36 = vld [vmem:[#allocation5] sm:$0xff] }
  0x89   :  { %v15616_v39 = vld [vmem:[#allocation7 + $0xd1c] sm:$0xf0]  ;;  %6710 = vmatpush.bf16.msra.mxu0 %v11391_v42 }
  0x8a   :  { %v11006_v40 = vld [vmem:[#allocation7 + $0x600] sm:$0xf]  ;;  %v11903_v44 = vor.u32 %v15616_v39, %v11902_v38  ;;  %6724 = vmatpush.bf16.msrb.mxu1 %v11615_v43 }
  0x8b   :  { %v15392_v41 = vld [vmem:[#allocation7 + $0x61c] sm:$0xf0] }
  0x8c   :  { %v11582_v45 = vld [vmem:[#allocation7 + $0xa80] sm:$0xf]  ;;  %v11007_v47 = vor.u32 %v15392_v41, %v11006_v40  ;;  %6736 = vmatpush.bf16.msrb.mxu2 %v11903_v44  ;;  %v160_v40 = vperm.slane %v16832_v36, 1 }
  0x8d   :  { %v15536_v46 = vld [vmem:[#allocation7 + $0xa9c] sm:$0xf0] }
  0x8e   :  { %v11583_v48 = vor.u32 %v15536_v46, %v11582_v45  ;;  %6701 = vmatpush.bf16.msrb.mxu3 %v11007_v47  ;;  %v11358_v49 = vld [vmem:[#allocation7 + $0x8c0] sm:$0xf]  ;;  %v159_v46 = vperm.slane %v16832_v36, 0  ;;  %v161_v47 = vperm.slane %v16832_v36, 2 }
  0x8f   :  { %v15480_v50 = vld [vmem:[#allocation7 + $0x8dc] sm:$0xf0] }
  0x90   :  { %6725 = vmatpush.bf16.msrb.mxu1 %v11583_v48  ;;  %v11870_v51 = vld [vmem:[#allocation7 + $0xcc0] sm:$0xf]  ;;  %v11359_v52 = vor.u32 %v15480_v50, %v11358_v49 }
  0x91   :  { %v15608_v53 = vld [vmem:[#allocation7 + $0xcdc] sm:$0xf0] }
  0x92   :  { %v12254_v54 = vld [vmem:[#allocation7 + $0xfc0] sm:$0xf]  ;;  %v11871_v56 = vor.u32 %v15608_v53, %v11870_v51  ;;  %6711 = vmatpush.bf16.msra.mxu0 %v11359_v52 }
  0x93   :  { %v15704_v55 = vld [vmem:[#allocation7 + $0xfdc] sm:$0xf0] }
  0x94   :  { %v12255_v57 = vor.u32 %v15704_v55, %v12254_v54  ;;  %v11550_v58 = vld [vmem:[#allocation7 + $0xa40] sm:$0xf]  ;;  %6737 = vmatpush.bf16.msrb.mxu2 %v11871_v56 }
  0x95   :  { %v15528_v59 = vld [vmem:[#allocation7 + $0xa5c] sm:$0xf0] }
  0x96   :  { %v11551_v60 = vor.u32 %v15528_v59, %v11550_v58  ;;  %6746 = vmatpush.bf16.msra.mxu3 %v12255_v57  ;;  %v11326_v61 = vld [vmem:[#allocation7 + $0x880] sm:$0xf] }
  0x97   :  { %v15472_v62 = vld [vmem:[#allocation7 + $0x89c] sm:$0xf0] }
  0x98   :  { %v11838_v63 = vld [vmem:[#allocation7 + $0xc80] sm:$0xf]  ;;  %6726 = vmatpush.bf16.msrb.mxu1 %v11551_v60  ;;  %v11327_v0 = vor.u32 %v15472_v62, %v11326_v61 }
  0x99   :  { %v15600_v1 = vld [vmem:[#allocation7 + $0xc9c] sm:$0xf0] }
  0x9a   :  { %v12222_v2 = vld [vmem:[#allocation7 + $0xf80] sm:$0xf]  ;;  %v11839_v4 = vor.u32 %v15600_v1, %v11838_v63  ;;  %6712 = vmatpush.bf16.msra.mxu0 %v11327_v0 }
  0x9b   :  { %v15696_v3 = vld [vmem:[#allocation7 + $0xf9c] sm:$0xf0] }
  0x9c   :  { %v12223_v5 = vor.u32 %v15696_v3, %v12222_v2  ;;  %v11518_v6 = vld [vmem:[#allocation7 + $0xa00] sm:$0xf]  ;;  %6738 = vmatpush.bf16.msrb.mxu2 %v11839_v4 }
  0x9d   :  { %v15520_v7 = vld [vmem:[#allocation7 + $0xa1c] sm:$0xf0] }
  0x9e   :  { %v11519_v8 = vor.u32 %v15520_v7, %v11518_v6  ;;  %6747 = vmatpush.bf16.msra.mxu3 %v12223_v5  ;;  %v11294_v10 = vld [vmem:[#allocation7 + $0x840] sm:$0xf] }
  0x9f   :  { %v15464_v11 = vld [vmem:[#allocation7 + $0x85c] sm:$0xf0] }
  0xa0   :  { %6727 = vmatpush.bf16.msrb.mxu1 %v11519_v8  ;;  %v11295_v12 = vor.u32 %v15464_v11, %v11294_v10  ;;  %v11806_v13 = vld [vmem:[#allocation7 + $0xc40] sm:$0xf] }
  0xa1   :  { %v15592_v14 = vld [vmem:[#allocation7 + $0xc5c] sm:$0xf0] }
  0xa2   :  { %v12190_v15 = vld [vmem:[#allocation7 + $0xf40] sm:$0xf]  ;;  %v11807_v16 = vor.u32 %v15592_v14, %v11806_v13  ;;  %6713 = vmatpush.bf16.msra.mxu0 %v11295_v12 }
  0xa3   :  { %v15688_v17 = vld [vmem:[#allocation7 + $0xf5c] sm:$0xf0] }
  0xa4   :  { %v12191_v18 = vor.u32 %v15688_v17, %v12190_v15  ;;  %6739 = vmatpush.bf16.msrb.mxu2 %v11807_v16  ;;  %v11262_v19 = vld [vmem:[#allocation7 + $0x800] sm:$0xf]  ;;  %v164_v15 = vperm.slane %v16832_v36, 5  ;;  %v163_v16 = vperm.slane %v16832_v36, 4 }
  0xa5   :  { %v15456_v20 = vld [vmem:[#allocation7 + $0x81c] sm:$0xf0] }
  0xa6   :  { %v11774_v21 = vld [vmem:[#allocation7 + $0xc00] sm:$0xf]  ;;  %6748 = vmatpush.bf16.msra.mxu3 %v12191_v18  ;;  %v11263_v22 = vor.u32 %v15456_v20, %v11262_v19 }
  0xa7   :  { %v15584_v23 = vld [vmem:[#allocation7 + $0xc1c] sm:$0xf0] }
  0xa8   :  { %v12158_v24 = vld [vmem:[#allocation7 + $0xf00] sm:$0xf]  ;;  %v11775_v9 = vor.u32 %v15584_v23, %v11774_v21  ;;  %6714 = vmatpush.bf16.msra.mxu0 %v11263_v22 }
  0xa9   :  { %v15680_v25 = vld [vmem:[#allocation7 + $0xf1c] sm:$0xf0] }
  0xaa   :  { %v12159_v26 = vor.u32 %v15680_v25, %v12158_v24  ;;  %6740 = vmatpush.bf16.msrb.mxu2 %v11775_v9  ;;  %v12126_v27 = vld [vmem:[#allocation7 + $0xec0] sm:$0xf] }
  0xab   :  { %v15672_v28 = vld [vmem:[#allocation7 + $0xedc] sm:$0xf0] }
  0xac   :  { %6749 = vmatpush.bf16.msra.mxu3 %v12159_v26  ;;  %v12127_v29 = vor.u32 %v15672_v28, %v12126_v27  ;;  %v12094_v30 = vld [vmem:[#allocation7 + $0xe80] sm:$0xf] }
  0xad   :  { %v15664_v31 = vld [vmem:[#allocation7 + $0xe9c] sm:$0xf0] }
  0xae   :  { %v12095_v32 = vor.u32 %v15664_v31, %v12094_v30  ;;  %v12062_v33 = vld [vmem:[#allocation7 + $0xe40] sm:$0xf] }
  0xaf   :  { %v15656_v34 = vld [vmem:[#allocation7 + $0xe5c] sm:$0xf0]  ;;  %v275_v41 = vpop.f32.mrf.mxu1 }
  0xb0   :  { %6750 = vmatpush.bf16.msra.mxu3 %v12127_v29  ;;  %v12063_v35 = vor.u32 %v15656_v34, %v12062_v33  ;;  %v12030_v37 = vld [vmem:[#allocation7 + $0xe00] sm:$0xf]  ;;  %v276_v42 = vadd.f32 %v275_v41, %v160_v40  ;;  %v162_v33 = vperm.slane %v16832_v36, 3  ;;  %v165_v41 = vperm.slane %v16832_v36, 6 }
  0xb1   :  { %v15648_v38 = vld [vmem:[#allocation7 + $0xe1c] sm:$0xf0] }
  0xb2   :  { %v12031_v39 = vor.u32 %v15648_v38, %v12030_v37  ;;  %v12766_v43 = vld [vmem:[#allocation7 + $0x13c0] sm:$0xf]  ;;  %v462_v45 = vmax.f32 %v276_v42, 0.0 }
  0xb3   :  { %v15832_v44 = vld [vmem:[#allocation7 + $0x13dc] sm:$0xf0] }
  0xb4   :  { %6751 = vmatpush.bf16.msra.mxu3 %v12095_v32  ;;  %v12767_v48 = vor.u32 %v15832_v44, %v12766_v43  ;;  %v16837_v49 = vpack.c.bf16 %v462_v45, %v462_v45  ;;  %v12734_v50 = vld [vmem:[#allocation7 + $0x1380] sm:$0xf] }
  0xb5   :  { %v15824_v51 = vld [vmem:[#allocation7 + $0x139c] sm:$0xf0]  ;;  %v314_v52 = vpop.f32.mrf.mxu0  ;;  %v262_v53 = vpop.f32.mrf.mxu3 }
  0xb6   :  { %v263_v54 = vadd.f32 %v262_v53, %v159_v46  ;;  %v288_v55 = vpop.f32.mrf.mxu2  ;;  %6676 = vmatmul.bf16.vlgmr.msra.gmra.mxu1 %v16837_v49  ;;  %v12510_v56 = vld [vmem:[#allocation7 + $0x11c0] sm:$0xf]  ;;  %v12735_v59 = vor.u32 %v15824_v51, %v12734_v50  ;;  %v315_v30 = vadd.f32 %v314_v52, %v163_v16 }
  0xb7   :  { %v15768_v57 = vld [vmem:[#allocation7 + $0x11dc] sm:$0xf0]  ;;  %v289_v58 = vadd.f32 %v288_v55, %v161_v47  ;;  %6772 = vmatpush.bf16.msra.mxu1 %v12767_v48  ;;  %v277_v62 = vpop.f32.mrf.mxu1 }
  0xb8   :  { %6752 = vmatpush.bf16.msra.mxu3 %v12063_v35  ;;  %v13022_v60 = vld [vmem:[#allocation7 + $0x15c0] sm:$0xf]  ;;  %v461_v63 = vmax.f32 %v263_v54, 0.0  ;;  %v12511_v3 = vor.u32 %v15768_v57, %v12510_v56  ;;  %v465_v45 = vmax.f32 %v315_v30, 0.0 }
  0xb9   :  { %v15896_v61 = vld [vmem:[#allocation7 + $0x15dc] sm:$0xf0]  ;;  %v463_v2 = vmax.f32 %v289_v58, 0.0 }
  0xba   :  { %v12702_v0 = vld [vmem:[#allocation7 + $0x1340] sm:$0xf]  ;;  %v16840_v4 = vpack.c.bf16 %v461_v63, %v461_v63  ;;  %v13023_v5 = vor.u32 %v15896_v61, %v13022_v60  ;;  %v16855_v63 = vpack.c.bf16 %v465_v45, %v465_v45 }
  0xbb   :  { %v15816_v1 = vld [vmem:[#allocation7 + $0x135c] sm:$0xf0]  ;;  %v16842_v8 = vpack.c.bf16 %v463_v2, %v463_v2  ;;  %6773 = vmatpush.bf16.msra.mxu1 %v12735_v59 }
  0xbc   :  { %6753 = vmatpush.bf16.msra.mxu3 %v12031_v39  ;;  %v12478_v6 = vld [vmem:[#allocation7 + $0x1180] sm:$0xf]  ;;  %v12703_v10 = vor.u32 %v15816_v1, %v12702_v0  ;;  %6663 = vmatmul.bf16.vlgmr.msrb.gmra.mxu0 %v16840_v4 }
  0xbd   :  { %v15760_v7 = vld [vmem:[#allocation7 + $0x119c] sm:$0xf0]  ;;  %v316_v17 = vpop.f32.mrf.mxu0  ;;  %6689 = vmatmul.bf16.vlgmr.msra.gmra.mxu2 %v16842_v8  ;;  %6759 = vmatpush.bf16.msrb.mxu0 %v12511_v3  ;;  %v264_v18 = vpop.f32.mrf.mxu3 }
  0xbe   :  { %v12990_v11 = vld [vmem:[#allocation7 + $0x1580] sm:$0xf]  ;;  %v12479_v19 = vor.u32 %v15760_v7, %v12478_v6  ;;  %6785 = vmatpush.bf16.msra.mxu2 %v13023_v5  ;;  %v290_v21 = vpop.f32.mrf.mxu2 }
  0xbf   :  { %v15888_v12 = vld [vmem:[#allocation7 + $0x159c] sm:$0xf0]  ;;  %6774 = vmatpush.bf16.msra.mxu1 %v12703_v10  ;;  %v327_v26 = vpop.f32.mrf.mxu1 }
  0xc0   :  { %v12670_v13 = vld [vmem:[#allocation7 + $0x1300] sm:$0xf]  ;;  %v12991_v20 = vor.u32 %v15888_v12, %v12990_v11  ;;  %v328_v29 = vadd.f32 %v327_v26, %v164_v15 }
  0xc1   :  { %v15808_v14 = vld [vmem:[#allocation7 + $0x131c] sm:$0xf0]  ;;  %6760 = vmatpush.bf16.msrb.mxu0 %v12479_v19  ;;  %v16861_v19 = vld [vmem:[#allocation5 + $0x8] sm:$0xff] }
  0xc2   :  { %v12446_v22 = vld [vmem:[#allocation7 + $0x1140] sm:$0xf]  ;;  %v12671_v24 = vor.u32 %v15808_v14, %v12670_v13  ;;  %6786 = vmatpush.bf16.msra.mxu2 %v12991_v20  ;;  %v466_v37 = vmax.f32 %v328_v29, 0.0 }
  0xc3   :  { %v15752_v23 = vld [vmem:[#allocation7 + $0x115c] sm:$0xf0] }
  0xc4   :  { %v12958_v25 = vld [vmem:[#allocation7 + $0x1540] sm:$0xf]  ;;  %v12447_v31 = vor.u32 %v15752_v23, %v12446_v22  ;;  %6775 = vmatpush.bf16.msra.mxu1 %v12671_v24  ;;  %v16850_v44 = vpack.c.bf16 %v466_v37, %v466_v37  ;;  %v168_v22 = vperm.slane %v16861_v19, 1 }
  0xc5   :  { %v15880_v9 = vld [vmem:[#allocation7 + $0x155c] sm:$0xf0]  ;;  %v16852_v46 = vpop.f32.mrf.mxu0  ;;  %v301_v47 = vpop.f32.mrf.mxu3 }
  0xc6   :  { %v12638_v27 = vld [vmem:[#allocation7 + $0x12c0] sm:$0xf]  ;;  %v12959_v32 = vor.u32 %v15880_v9, %v12958_v25  ;;  %6761 = vmatpush.bf16.msrb.mxu0 %v12447_v31  ;;  %v302_v51 = vadd.f32 %v301_v47, %v162_v33  ;;  %v340_v53 = vpop.f32.mrf.mxu2  ;;  %6728 = vmatmul.bf16.vlgmr.msrb.gmra.mxu1 %v16850_v44 }
  0xc7   :  { %v15800_v28 = vld [vmem:[#allocation7 + $0x12dc] sm:$0xf0]  ;;  %v341_v58 = vadd.f32 %v340_v53, %v165_v41  ;;  %v329_v61 = vpop.f32.mrf.mxu1 }
  0xc8   :  { %v12414_v34 = vld [vmem:[#allocation7 + $0x1100] sm:$0xf]  ;;  %v12639_v38 = vor.u32 %v15800_v28, %v12638_v27  ;;  %6787 = vmatpush.bf16.msra.mxu2 %v12959_v32  ;;  %v464_v62 = vmax.f32 %v302_v51, 0.0  ;;  %v167_v28 = vperm.slane %v16861_v19, 0 }
  0xc9   :  { %v15744_v35 = vld [vmem:[#allocation7 + $0x111c] sm:$0xf0]  ;;  %v467_v2 = vmax.f32 %v341_v58, 0.0 }
  0xca   :  { %v12926_v39 = vld [vmem:[#allocation7 + $0x1500] sm:$0xf]  ;;  %v12415_v48 = vor.u32 %v15744_v35, %v12414_v34  ;;  %6776 = vmatpush.bf16.msra.mxu1 %v12639_v38  ;;  %v16857_v10 = vpack.c.bf16 %v464_v62, %v464_v62 }
  0xcb   :  { %v15872_v40 = vld [vmem:[#allocation7 + $0x151c] sm:$0xf0]  ;;  %v16859_v15 = vpack.c.bf16 %v467_v2, %v467_v2 }
  0xcc   :  { %v12606_v42 = vld [vmem:[#allocation7 + $0x1280] sm:$0xf]  ;;  %v12927_v52 = vor.u32 %v15872_v40, %v12926_v39  ;;  %6762 = vmatpush.bf16.msrb.mxu0 %v12415_v48  ;;  %6702 = vmatmul.bf16.vlgmr.msrb.gmra.mxu3 %v16857_v10 }
  0xcd   :  { %v15792_v43 = vld [vmem:[#allocation7 + $0x129c] sm:$0xf0]  ;;  %6715 = vmatmul.bf16.vlgmr.msra.gmra.mxu0 %v16855_v63  ;;  %v368_v23 = vpop.f32.mrf.mxu0  ;;  %v303_v24 = vpop.f32.mrf.mxu3  ;;  %6741 = vmatmul.bf16.vlgmr.msrb.gmra.mxu2 %v16859_v15 }
  0xce   :  { %v12382_v50 = vld [vmem:[#allocation7 + $0x10c0] sm:$0xf]  ;;  %v12607_v57 = vor.u32 %v15792_v43, %v12606_v42  ;;  %6788 = vmatpush.bf16.msra.mxu2 %v12927_v52  ;;  %v342_v30 = vpop.f32.mrf.mxu2  ;;  %v367_v52 = vadd.f32 %v16852_v46, %v167_v28 }
  0xcf   :  { %v15736_v54 = vld [vmem:[#allocation7 + $0x10dc] sm:$0xf0]  ;;  %v379_v38 = vpop.f32.mrf.mxu1 }
  0xd0   :  { %v13278_v55 = vld [vmem:[#allocation7 + $0x17c0] sm:$0xf]  ;;  %v12383_v3 = vor.u32 %v15736_v54, %v12382_v50  ;;  %6777 = vmatpush.bf16.msra.mxu1 %v12607_v57  ;;  %v380_v43 = vadd.f32 %v379_v38, %v168_v22  ;;  %v166_v54 = vperm.slane %v16832_v36, 7 }
  0xd1   :  { %v15960_v56 = vld [vmem:[#allocation7 + $0x17dc] sm:$0xf0] }
  0xd2   :  { %v12894_v59 = vld [vmem:[#allocation7 + $0x14c0] sm:$0xf]  ;;  %v13279_v5 = vor.u32 %v15960_v56, %v13278_v55  ;;  %6763 = vmatpush.bf16.msrb.mxu0 %v12383_v3  ;;  %v470_v57 = vmax.f32 %v380_v43, 0.0 }
  0xd3   :  { %v15864_v60 = vld [vmem:[#allocation7 + $0x14dc] sm:$0xf0] }
  0xd4   :  { %v12574_v0 = vld [vmem:[#allocation7 + $0x1240] sm:$0xf]  ;;  %v12895_v11 = vor.u32 %v15864_v60, %v12894_v59  ;;  %6798 = vmatpush.bf16.msrb.mxu3 %v13279_v5  ;;  %v169_v60 = vperm.slane %v16861_v19, 2 }
  0xd5   :  { %v15784_v1 = vld [vmem:[#allocation7 + $0x125c] sm:$0xf0]  ;;  %v16873_v2 = vpop.f32.mrf.mxu0  ;;  %v353_v46 = vpop.f32.mrf.mxu3 }
  0xd6   :  { %v12350_v6 = vld [vmem:[#allocation7 + $0x1080] sm:$0xf]  ;;  %v12575_v16 = vor.u32 %v15784_v1, %v12574_v0  ;;  %6789 = vmatpush.bf16.msra.mxu2 %v12895_v11  ;;  %v16871_v1 = vpack.c.bf16 %v470_v57, %v470_v57  ;;  %v354_v11 = vadd.f32 %v353_v46, %v166_v54 }
  0xd7   :  { %v15728_v7 = vld [vmem:[#allocation7 + $0x109c] sm:$0xf0]  ;;  %v381_v23 = vpop.f32.mrf.mxu1 }
  0xd8   :  { %v12862_v12 = vld [vmem:[#allocation7 + $0x1480] sm:$0xf]  ;;  %v12351_v25 = vor.u32 %v15728_v7, %v12350_v6  ;;  %6778 = vmatpush.bf16.msra.mxu1 %v12575_v16  ;;  %v469_v7 = vmax.f32 %v367_v52, 0.0  ;;  %v468_v24 = vmax.f32 %v354_v11, 0.0 }
  0xd9   :  { %v13246_v13 = vld [vmem:[#allocation7 + $0x1780] sm:$0xf] }
  0xda   :  { %v15952_v14 = vld [vmem:[#allocation7 + $0x179c] sm:$0xf0]  ;;  %6764 = vmatpush.bf16.msrb.mxu0 %v12351_v25 }
  0xdb   :  { %v15856_v17 = vld [vmem:[#allocation7 + $0x149c] sm:$0xf0]  ;;  %v13247_v9 = vor.u32 %v15952_v14, %v13246_v13  ;;  %v392_v14 = vpop.f32.mrf.mxu2 }
  0xdc   :  { %v12542_v18 = vld [vmem:[#allocation7 + $0x1200] sm:$0xf]  ;;  %v12863_v29 = vor.u32 %v15856_v17, %v12862_v12 }
  0xdd   :  { %v15776_v20 = vld [vmem:[#allocation7 + $0x121c] sm:$0xf0]  ;;  %6799 = vmatpush.bf16.msrb.mxu3 %v13247_v9 }
  0xde   :  { %v13790_v21 = vld [vmem:[#allocation7 + $0x1bc0] sm:$0xf]  ;;  %v12543_v34 = vor.u32 %v15776_v20, %v12542_v18  ;;  %6790 = vmatpush.bf16.msra.mxu2 %v12863_v29  ;;  %v393_v20 = vadd.f32 %v392_v14, %v169_v60  ;;  %v16876_v29 = vpack.c.bf16 %v469_v7, %v469_v7 }
  0xdf   :  { %v16088_v26 = vld [vmem:[#allocation7 + $0x1bdc] sm:$0xf0] }
  0xe0   :  { %v12318_v27 = vld [vmem:[#allocation7 + $0x1040] sm:$0xf]  ;;  %v13791_v39 = vor.u32 %v16088_v26, %v13790_v21  ;;  %6779 = vmatpush.bf16.msra.mxu1 %v12543_v34 }
  0xe1   :  { %v15720_v31 = vld [vmem:[#allocation7 + $0x105c] sm:$0xf0] }
  0xe2   :  { %v13214_v32 = vld [vmem:[#allocation7 + $0x1740] sm:$0xf]  ;;  %v12319_v45 = vor.u32 %v15720_v31, %v12318_v27  ;;  %v471_v27 = vmax.f32 %v393_v20, 0.0 }
  0xe3   :  { %v15944_v33 = vld [vmem:[#allocation7 + $0x175c] sm:$0xf0]  ;;  %6780 = vmatmul.bf16.vlgmr.msra.gmra.mxu1 %v16871_v1 }
  0xe4   :  { %v12830_v35 = vld [vmem:[#allocation7 + $0x1440] sm:$0xf]  ;;  %v13215_v47 = vor.u32 %v15944_v33, %v13214_v32  ;;  %6824 = vmatpush.bf16.msrb.mxu1 %v13791_v39  ;;  %6765 = vmatpush.bf16.msrb.mxu0 %v12319_v45  ;;  %v16878_v32 = vpack.c.bf16 %v468_v24, %v468_v24  ;;  %v420_v45 = vpop.f32.mrf.mxu0 }
  0xe5   :  { %v15848_v37 = vld [vmem:[#allocation7 + $0x145c] sm:$0xf0] }
  0xe6   :  { %v13758_v40 = vld [vmem:[#allocation7 + $0x1b80] sm:$0xf]  ;;  %v12831_v53 = vor.u32 %v15848_v37, %v12830_v35  ;;  %6800 = vmatpush.bf16.msrb.mxu3 %v13215_v47  ;;  %v355_v47 = vpop.f32.mrf.mxu3 }
  0xe7   :  { %v16080_v41 = vld [vmem:[#allocation7 + $0x1b9c] sm:$0xf0]  ;;  %6754 = vmatmul.bf16.vlgmr.msra.gmra.mxu3 %v16878_v32 }
  0xe8   :  { %v12286_v42 = vld [vmem:[#allocation7 + $0x1000] sm:$0xf]  ;;  %v13759_v61 = vor.u32 %v16080_v41, %v13758_v40  ;;  %6791 = vmatpush.bf16.msra.mxu2 %v12831_v53  ;;  %v16880_v40 = vpack.c.bf16 %v471_v27, %v471_v27 }
  0xe9   :  { %v15712_v48 = vld [vmem:[#allocation7 + $0x101c] sm:$0xf0] }
  0xea   :  { %v12798_v50 = vld [vmem:[#allocation7 + $0x1400] sm:$0xf]  ;;  %v12287_v36 = vor.u32 %v15712_v48, %v12286_v42  ;;  %6825 = vmatpush.bf16.msrb.mxu1 %v13759_v61  ;;  %v170_v61 = vperm.slane %v16861_v19, 3 }
  0xeb   :  { %v15840_v51 = vld [vmem:[#allocation7 + $0x141c] sm:$0xf0] }
  0xec   :  { %v13182_v55 = vld [vmem:[#allocation7 + $0x1700] sm:$0xf]  ;;  %v12799_v12 = vor.u32 %v15840_v51, %v12798_v50  ;;  %6766 = vmatpush.bf16.msrb.mxu0 %v12287_v36 }
  0xed   :  { %v15936_v56 = vld [vmem:[#allocation7 + $0x171c] sm:$0xf0] }
  0xee   :  { %v13534_v58 = vld [vmem:[#allocation7 + $0x19c0] sm:$0xf]  ;;  %v13183_v3 = vor.u32 %v15936_v56, %v13182_v55  ;;  %6792 = vmatpush.bf16.msra.mxu2 %v12799_v12  ;;  %v394_v55 = vpop.f32.mrf.mxu2 }
  0xef   :  { %v16024_v59 = vld [vmem:[#allocation7 + $0x19dc] sm:$0xf0]  ;;  %6767 = vmatmul.bf16.vlgmr.msrb.gmra.mxu0 %v16876_v29  ;;  %v173_v55 = vperm.slane %v16861_v19, 6 }
  0xf0   :  { %v14046_v62 = vld [vmem:[#allocation7 + $0x1dc0] sm:$0xf]  ;;  %v13535_v13 = vor.u32 %v16024_v59, %v13534_v58  ;;  %6801 = vmatpush.bf16.msrb.mxu3 %v13183_v3  ;;  %v431_v59 = vpop.f32.mrf.mxu1 }
  0xf1   :  { %v16152_v0 = vld [vmem:[#allocation7 + $0x1ddc] sm:$0xf0]  ;;  %6793 = vmatmul.bf16.vlgmr.msra.gmra.mxu2 %v16880_v40 }
  0xf2   :  { %v13726_v5 = vld [vmem:[#allocation7 + $0x1b40] sm:$0xf]  ;;  %v14047_v18 = vor.u32 %v16152_v0, %v14046_v62  ;;  %6811 = vmatpush.bf16.msra.mxu0 %v13535_v13 }
  0xf3   :  { %v16072_v6 = vld [vmem:[#allocation7 + $0x1b5c] sm:$0xf0] }
  0xf4   :  { %v13150_v16 = vld [vmem:[#allocation7 + $0x16c0] sm:$0xf]  ;;  %v13727_v25 = vor.u32 %v16072_v6, %v13726_v5  ;;  %6837 = vmatpush.bf16.msrb.mxu2 %v14047_v18 }
  0xf5   :  { %v15928_v17 = vld [vmem:[#allocation7 + $0x16dc] sm:$0xf0] }
  0xf6   :  { %v13502_v21 = vld [vmem:[#allocation7 + $0x1980] sm:$0xf]  ;;  %v13151_v28 = vor.u32 %v15928_v17, %v13150_v16  ;;  %6826 = vmatpush.bf16.msrb.mxu1 %v13727_v25  ;;  %v172_v17 = vperm.slane %v16861_v19, 5 }
  0xf7   :  { %v16016_v22 = vld [vmem:[#allocation7 + $0x199c] sm:$0xf0] }
  0xf8   :  { %v14014_v9 = vld [vmem:[#allocation7 + $0x1d80] sm:$0xf]  ;;  %v13503_v33 = vor.u32 %v16016_v22, %v13502_v21  ;;  %6802 = vmatpush.bf16.msrb.mxu3 %v13151_v28  ;;  %v405_v22 = vpop.f32.mrf.mxu3 }
  0xf9   :  { %v16144_v26 = vld [vmem:[#allocation7 + $0x1d9c] sm:$0xf0] }
  0xfa   :  { %v13694_v30 = vld [vmem:[#allocation7 + $0x1b00] sm:$0xf]  ;;  %v14015_v37 = vor.u32 %v16144_v26, %v14014_v9  ;;  %6812 = vmatpush.bf16.msra.mxu0 %v13503_v33  ;;  %v406_v9 = vadd.f32 %v405_v22, %v170_v61  ;;  %v444_v33 = vpop.f32.mrf.mxu2 }
  0xfb   :  { %v16064_v31 = vld [vmem:[#allocation7 + $0x1b1c] sm:$0xf0] }
  0xfc   :  { %v13118_v34 = vld [vmem:[#allocation7 + $0x1680] sm:$0xf]  ;;  %v13695_v41 = vor.u32 %v16064_v31, %v13694_v30  ;;  %6838 = vmatpush.bf16.msrb.mxu2 %v14015_v37 }
  0xfd   :  { %v15920_v35 = vld [vmem:[#allocation7 + $0x169c] sm:$0xf0] }
  0xfe   :  { %v13470_v38 = vld [vmem:[#allocation7 + $0x1940] sm:$0xf]  ;;  %v13119_v48 = vor.u32 %v15920_v35, %v13118_v34  ;;  %6827 = vmatpush.bf16.msrb.mxu1 %v13695_v41  ;;  %v433_v41 = vpop.f32.mrf.mxu1 }
  0xff   :  { %v16008_v39 = vld [vmem:[#allocation7 + $0x195c] sm:$0xf0] }
 0x100   :  { %v13982_v42 = vld [vmem:[#allocation7 + $0x1d40] sm:$0xf]  ;;  %v13471_v52 = vor.u32 %v16008_v39, %v13470_v38  ;;  %6803 = vmatpush.bf16.msrb.mxu3 %v13119_v48  ;;  %v432_v39 = vadd.f32 %v431_v59, %v172_v17  ;;  %v15316_v48 = vld [vmem:[#allocation7 + $0x3c4] sm:$0xf] }
 0x101   :  { %v16136_v43 = vld [vmem:[#allocation7 + $0x1d5c] sm:$0xf0] }
 0x102   :  { %v13662_v50 = vld [vmem:[#allocation7 + $0x1ac0] sm:$0xf]  ;;  %v13983_v56 = vor.u32 %v16136_v43, %v13982_v42  ;;  %6813 = vmatpush.bf16.msra.mxu0 %v13471_v52  ;;  %v472_v42 = vmax.f32 %v406_v9, 0.0  ;;  %v474_v61 = vmax.f32 %v432_v39, 0.0  ;;  %v446_v17 = vpop.f32.mrf.mxu2 }
 0x103   :  { %v16056_v51 = vld [vmem:[#allocation7 + $0x1adc] sm:$0xf0]  ;;  %v15228_v17 = vld [vmem:[#allocation7 + $0x104] sm:$0xf] }
 0x104   :  { %v13086_v53 = vld [vmem:[#allocation7 + $0x1640] sm:$0xf]  ;;  %v13663_v60 = vor.u32 %v16056_v51, %v13662_v50  ;;  %6839 = vmatpush.bf16.msrb.mxu2 %v13983_v56  ;;  %v10720_v50 = vld [vmem:[#allocation7 + $0x3e0] sm:$0xf0]  ;;  %v171_v51 = vperm.slane %v16861_v19, 4  ;;  %v16888_v52 = vpack.c.bf16 %v472_v42, %v472_v42 }
 0x105   :  { %v15912_v54 = vld [vmem:[#allocation7 + $0x165c] sm:$0xf0] }
 0x106   :  { %v13438_v57 = vld [vmem:[#allocation7 + $0x1900] sm:$0xf]  ;;  %v13087_v46 = vor.u32 %v15912_v54, %v13086_v53  ;;  %6828 = vmatpush.bf16.msrb.mxu1 %v13663_v60 }
 0x107   :  { %v16000_v58 = vld [vmem:[#allocation7 + $0x191c] sm:$0xf0] }
 0x108   :  { %v13950_v62 = vld [vmem:[#allocation7 + $0x1d00] sm:$0xf]  ;;  %v13439_v6 = vor.u32 %v16000_v58, %v13438_v57  ;;  %6804 = vmatpush.bf16.msrb.mxu3 %v13087_v46 }
 0x109   :  { %v16128_v0 = vld [vmem:[#allocation7 + $0x1d1c] sm:$0xf0] }
 0x10a   :  { %v13630_v36 = vld [vmem:[#allocation7 + $0x1a80] sm:$0xf]  ;;  %v13951_v13 = vor.u32 %v16128_v0, %v13950_v62  ;;  %6814 = vmatpush.bf16.msra.mxu0 %v13439_v6  ;;  %v407_v6 = vpop.f32.mrf.mxu3 }
 0x10b   :  { %v16048_v3 = vld [vmem:[#allocation7 + $0x1a9c] sm:$0xf0] }
 0x10c   :  { %v13054_v5 = vld [vmem:[#allocation7 + $0x1600] sm:$0xf]  ;;  %v13631_v18 = vor.u32 %v16048_v3, %v13630_v36  ;;  %6840 = vmatpush.bf16.msrb.mxu2 %v13951_v13  ;;  %v10723_v36 = vor.u32 %v15316_v48, %v10720_v50  ;;  %v419_v3 = vadd.f32 %v16873_v2, %v171_v51  ;;  %v10688_v13 = vld [vmem:[#allocation7 + $0x3a0] sm:$0xf0] }
 0x10d   :  { %v15904_v7 = vld [vmem:[#allocation7 + $0x161c] sm:$0xf0]  ;;  %v15372_v50 = vld [vmem:[#allocation7 + $0x584] sm:$0xf] }
 0x10e   :  { %v13406_v11 = vld [vmem:[#allocation7 + $0x18c0] sm:$0xf]  ;;  %v13055_v23 = vor.u32 %v15904_v7, %v13054_v5  ;;  %6829 = vmatpush.bf16.msrb.mxu1 %v13631_v18  ;;  %v15308_v5 = vld [vmem:[#allocation7 + $0x384] sm:$0xf]  ;;  %v445_v7 = vadd.f32 %v444_v33, %v173_v55  ;;  %v473_v9 = vmax.f32 %v419_v3, 0.0 }
 0x10f   :  { %v15992_v12 = vld [vmem:[#allocation7 + $0x18dc] sm:$0xf0]  ;;  %v10944_v51 = vld [vmem:[#allocation7 + $0x5a0] sm:$0xf0] }
 0x110   :  { %v14302_v14 = vld [vmem:[#allocation7 + $0x1fc0] sm:$0xf]  ;;  %v13407_v26 = vor.u32 %v15992_v12, %v13406_v11  ;;  %6805 = vmatpush.bf16.msrb.mxu3 %v13055_v23  ;;  %v10912_v3 = vld [vmem:[#allocation7 + $0x560] sm:$0xf0] }
 0x111   :  { %v16216_v16 = vld [vmem:[#allocation7 + $0x1fdc] sm:$0xf0] }
 0x112   :  { %v13918_v20 = vld [vmem:[#allocation7 + $0x1cc0] sm:$0xf]  ;;  %v14303_v27 = vor.u32 %v16216_v16, %v14302_v14  ;;  %6815 = vmatpush.bf16.msra.mxu0 %v13407_v26  ;;  %v10691_v26 = vor.u32 %v15308_v5, %v10688_v13  ;;  %v174_v5 = vperm.slane %v16861_v19, 7 }
 0x113   :  { %v16120_v21 = vld [vmem:[#allocation7 + $0x1cdc] sm:$0xf0]  ;;  %6806 = vmatmul.bf16.vlgmr.msrb.gmra.mxu3 %v16888_v52 }
 0x114   :  { %v13598_v24 = vld [vmem:[#allocation7 + $0x1a40] sm:$0xf]  ;;  %v13919_v34 = vor.u32 %v16120_v21, %v13918_v20  ;;  %6850 = vmatpush.bf16.msra.mxu3 %v14303_v27  ;;  %v16893_v20 = vpack.c.bf16 %v474_v61, %v474_v61  ;;  %v15380_v27 = vld [vmem:[#allocation7 + $0x5c4] sm:$0xf]  ;;  %v10947_v61 = vor.u32 %v15372_v50, %v10944_v51 }
 0x115   :  { %v16040_v25 = vld [vmem:[#allocation7 + $0x1a5c] sm:$0xf0]  ;;  %v15212_v51 = vld [vmem:[#allocation7 + $0x84] sm:$0xf] }
 0x116   :  { %v13374_v28 = vld [vmem:[#allocation7 + $0x1880] sm:$0xf]  ;;  %v13599_v43 = vor.u32 %v16040_v25, %v13598_v24  ;;  %6841 = vmatpush.bf16.msrb.mxu2 %v13919_v34  ;;  %v15252_v24 = vld [vmem:[#allocation7 + $0x1c4] sm:$0xf] }
 0x117   :  { %v15984_v30 = vld [vmem:[#allocation7 + $0x189c] sm:$0xf0]  ;;  %v10464_v25 = vld [vmem:[#allocation7 + $0x1e0] sm:$0xf0] }
 0x118   :  { %v13886_v31 = vld [vmem:[#allocation7 + $0x1c80] sm:$0xf]  ;;  %v13375_v53 = vor.u32 %v15984_v30, %v13374_v28  ;;  %6830 = vmatpush.bf16.msrb.mxu1 %v13599_v43  ;;  %v10976_v28 = vld [vmem:[#allocation7 + $0x5e0] sm:$0xf0]  ;;  %v475_v30 = vmax.f32 %v445_v7, 0.0 }
 0x119   :  { %v16112_v35 = vld [vmem:[#allocation7 + $0x1c9c] sm:$0xf0]  ;;  %v15300_v34 = vld [vmem:[#allocation7 + $0x344] sm:$0xf]  ;;  %v10979_v42 = vor.u32 %v15380_v27, %v10976_v28 }
 0x11a   :  { %v14270_v37 = vld [vmem:[#allocation7 + $0x1f80] sm:$0xf]  ;;  %v13887_v58 = vor.u32 %v16112_v35, %v13886_v31  ;;  %6816 = vmatpush.bf16.msra.mxu0 %v13375_v53  ;;  %v10656_v35 = vld [vmem:[#allocation7 + $0x360] sm:$0xf0]  ;;  %v457_v53 = vpop.f32.mrf.mxu3 }
 0x11b   :  { %v16208_v38 = vld [vmem:[#allocation7 + $0x1f9c] sm:$0xf0]  ;;  %v15244_v43 = vld [vmem:[#allocation7 + $0x184] sm:$0xf]  ;;  %v10659_v48 = vor.u32 %v15300_v34, %v10656_v35 }
 0x11c   :  { %v13566_v45 = vld [vmem:[#allocation7 + $0x1a00] sm:$0xf]  ;;  %v14271_v54 = vor.u32 %v16208_v38, %v14270_v37  ;;  %6842 = vmatpush.bf16.msrb.mxu2 %v13887_v58  ;;  %v10467_v38 = vor.u32 %v15252_v24, %v10464_v25  ;;  %v15284_v7 = vld [vmem:[#allocation7 + $0x2c4] sm:$0xf] }
 0x11d   :  { %v16032_v47 = vld [vmem:[#allocation7 + $0x1a1c] sm:$0xf0]  ;;  %v15276_v25 = vld [vmem:[#allocation7 + $0x284] sm:$0xf] }
 0x11e   :  { %v13342_v56 = vld [vmem:[#allocation7 + $0x1840] sm:$0xf]  ;;  %v13567_v62 = vor.u32 %v16032_v47, %v13566_v45  ;;  %6851 = vmatpush.bf16.msra.mxu3 %v14271_v54  ;;  %v10432_v45 = vld [vmem:[#allocation7 + $0x1a0] sm:$0xf0]  ;;  %v16896_v47 = vpack.c.bf16 %v473_v9, %v473_v9  ;;  %v16898_v54 = vpack.c.bf16 %v475_v30, %v475_v30 }
 0x11f   :  { %v15976_v57 = vld [vmem:[#allocation7 + $0x185c] sm:$0xf0]  ;;  %v10435_v58 = vor.u32 %v15244_v43, %v10432_v45  ;;  %v10560_v9 = vld [vmem:[#allocation7 + $0x2a0] sm:$0xf0] }
 0x120   :  { %v14238_v59 = vld [vmem:[#allocation7 + $0x1f40] sm:$0xf]  ;;  %v13343_v11 = vor.u32 %v15976_v57, %v13342_v56  ;;  %6831 = vmatpush.bf16.msrb.mxu1 %v13567_v62  ;;  %v15292_v56 = vld [vmem:[#allocation7 + $0x304] sm:$0xf] }
 0x121   :  { %v16200_v60 = vld [vmem:[#allocation7 + $0x1f5c] sm:$0xf0]  ;;  %v10624_v57 = vld [vmem:[#allocation7 + $0x320] sm:$0xf0] }
 0x122   :  { %v13854_v0 = vld [vmem:[#allocation7 + $0x1c40] sm:$0xf]  ;;  %v14239_v12 = vor.u32 %v16200_v60, %v14238_v59  ;;  %6817 = vmatpush.bf16.msra.mxu0 %v13343_v11  ;;  %v15236_v62 = vld [vmem:[#allocation7 + $0x144] sm:$0xf]  ;;  %v459_v19 = vpop.f32.mrf.mxu3 }
 0x123   :  { %v16104_v46 = vld [vmem:[#allocation7 + $0x1c5c] sm:$0xf0]  ;;  %6832 = vmatmul.bf16.vlgmr.msrb.gmra.mxu1 %v16893_v20  ;;  %v10592_v11 = vld [vmem:[#allocation7 + $0x2e0] sm:$0xf0] }
 0x124   :  { %v13310_v14 = vld [vmem:[#allocation7 + $0x1800] sm:$0xf]  ;;  %v13855_v18 = vor.u32 %v16104_v46, %v13854_v0  ;;  %6876 = vmatpush.bf16.msra.mxu1 %v10723_v36  ;;  %6852 = vmatpush.bf16.msra.mxu3 %v14239_v12  ;;  %v10400_v0 = vld [vmem:[#allocation7 + $0x160] sm:$0xf0]  ;;  %v10627_v46 = vor.u32 %v15292_v56, %v10624_v57 }
 0x125   :  { %v15968_v16 = vld [vmem:[#allocation7 + $0x181c] sm:$0xf0]  ;;  %v15364_v36 = vld [vmem:[#allocation7 + $0x544] sm:$0xf]  ;;  %v10403_v12 = vor.u32 %v15236_v62, %v10400_v0 }
 0x126   :  { %v13822_v21 = vld [vmem:[#allocation7 + $0x1c00] sm:$0xf]  ;;  %v13311_v31 = vor.u32 %v15968_v16, %v13310_v14  ;;  %6843 = vmatpush.bf16.msrb.mxu2 %v13855_v18  ;;  %v10915_v16 = vor.u32 %v15364_v36, %v10912_v3  ;;  %v10368_v18 = vld [vmem:[#allocation7 + $0x120] sm:$0xf0] }
 0x127   :  { %v14206_v22 = vld [vmem:[#allocation7 + $0x1f00] sm:$0xf]  ;;  %v15220_v30 = vld [vmem:[#allocation7 + $0xc4] sm:$0xf] }
 0x128   :  { %v16192_v23 = vld [vmem:[#allocation7 + $0x1f1c] sm:$0xf0]  ;;  %6877 = vmatpush.bf16.msra.mxu1 %v10691_v26  ;;  %6818 = vmatpush.bf16.msra.mxu0 %v13311_v31  ;;  %v10371_v26 = vor.u32 %v15228_v17, %v10368_v18  ;;  %v15444_v34 = vld [vmem:[#allocation7 + $0x7c4] sm:$0xf] }
 0x129   :  { %v16096_v2 = vld [vmem:[#allocation7 + $0x1c1c] sm:$0xf0]  ;;  %v14207_v33 = vor.u32 %v16192_v23, %v14206_v22  ;;  %v458_v22 = vadd.f32 %v457_v53, %v174_v5  ;;  %v15356_v23 = vld [vmem:[#allocation7 + $0x504] sm:$0xf] }
 0x12a   :  { %v13823_v37 = vor.u32 %v16096_v2, %v13822_v21  ;;  %v14174_v39 = vld [vmem:[#allocation7 + $0x1ec0] sm:$0xf]  ;;  %v10595_v21 = vor.u32 %v15284_v7, %v10592_v11  ;;  %v10880_v2 = vld [vmem:[#allocation7 + $0x520] sm:$0xf0] }
 0x12b   :  { %v16184_v41 = vld [vmem:[#allocation7 + $0x1edc] sm:$0xf0]  ;;  %6853 = vmatpush.bf16.msra.mxu3 %v14207_v33  ;;  %6819 = vmatmul.bf16.vlgmr.msra.gmra.mxu0 %v16896_v47  ;;  %v10883_v31 = vor.u32 %v15356_v23, %v10880_v2  ;;  %v10336_v33 = vld [vmem:[#allocation7 + $0xe0] sm:$0xf0] }
 0x12c   :  { %v14175_v55 = vor.u32 %v16184_v41, %v14174_v39  ;;  %6844 = vmatpush.bf16.msrb.mxu2 %v13823_v37  ;;  %6863 = vmatpush.bf16.msrb.mxu0 %v10467_v38  ;;  %v14142_v59 = vld [vmem:[#allocation7 + $0x1e80] sm:$0xf]  ;;  %v11232_v35 = vld [vmem:[#allocation7 + $0x7e0] sm:$0xf0]  ;;  %v476_v37 = vmax.f32 %v458_v22, 0.0  ;;  %v10563_v38 = vor.u32 %v15276_v25, %v10560_v9 }
 0x12d   :  { %v16176_v60 = vld [vmem:[#allocation7 + $0x1e9c] sm:$0xf0]  ;;  %6878 = vmatpush.bf16.msra.mxu1 %v10659_v48  ;;  %v15348_v39 = vld [vmem:[#allocation7 + $0x4c4] sm:$0xf]  ;;  %v10339_v48 = vor.u32 %v15220_v30, %v10336_v33  ;;  %v11235_v50 = vor.u32 %v15444_v34, %v11232_v35 }
 0x12e   :  { %v14143_v6 = vor.u32 %v16176_v60, %v14142_v59  ;;  %v14110_v13 = vld [vmem:[#allocation7 + $0x1e40] sm:$0xf]  ;;  %v10848_v41 = vld [vmem:[#allocation7 + $0x4e0] sm:$0xf0] }
 0x12f   :  { %6845 = vmatmul.bf16.vlgmr.msrb.gmra.mxu2 %v16898_v54  ;;  %6854 = vmatpush.bf16.msra.mxu3 %v14175_v55  ;;  %v16168_v14 = vld [vmem:[#allocation7 + $0x1e5c] sm:$0xf0]  ;;  %v15268_v43 = vld [vmem:[#allocation7 + $0x244] sm:$0xf]  ;;  %v10851_v53 = vor.u32 %v15348_v39, %v10848_v41 }
 0x130   :  { %6889 = vmatpush.bf16.msra.mxu2 %v10979_v42  ;;  %6864 = vmatpush.bf16.msrb.mxu0 %v10435_v58  ;;  %v14111_v24 = vor.u32 %v16168_v14, %v14110_v13  ;;  %v14078_v27 = vld [vmem:[#allocation7 + $0x1e00] sm:$0xf]  ;;  %v10528_v45 = vld [vmem:[#allocation7 + $0x260] sm:$0xf0]  ;;  %v16903_v58 = vpack.c.bf16 %v476_v37, %v476_v37 }
 0x131   :  { %6879 = vmatpush.bf16.msra.mxu1 %v10627_v46  ;;  %v16160_v28 = vld [vmem:[#allocation7 + $0x1e1c] sm:$0xf0]  ;;  %v10304_v55 = vld [vmem:[#allocation7 + $0xa0] sm:$0xf0]  ;;  %v10531_v59 = vor.u32 %v15268_v43, %v10528_v45 }
 0x132   :  { %v14079_v42 = vor.u32 %v16160_v28, %v14078_v27  ;;  %v15436_v56 = vld [vmem:[#allocation7 + $0x784] sm:$0xf]  ;;  %v10307_v46 = vor.u32 %v15212_v51, %v10304_v55 }
 0x133   :  { %6855 = vmatpush.bf16.msra.mxu3 %v14143_v6  ;;  %v11200_v57 = vld [vmem:[#allocation7 + $0x7a0] sm:$0xf0] }
 0x134   :  { %6890 = vmatpush.bf16.msra.mxu2 %v10947_v61  ;;  %6865 = vmatpush.bf16.msrb.mxu0 %v10403_v12  ;;  %v15340_v60 = vld [vmem:[#allocation7 + $0x484] sm:$0xf]  ;;  %v11203_v36 = vor.u32 %v15436_v56, %v11200_v57 }
 0x135   :  { %6880 = vmatpush.bf16.msra.mxu1 %v10595_v21  ;;  %v10816_v61 = vld [vmem:[#allocation7 + $0x4a0] sm:$0xf0] }
 0x136   :  { %v15260_v62 = vld [vmem:[#allocation7 + $0x204] sm:$0xf]  ;;  %v10819_v7 = vor.u32 %v15340_v60, %v10816_v61 }
 0x137   :  { %6856 = vmatpush.bf16.msra.mxu3 %v14111_v24  ;;  %v10496_v0 = vld [vmem:[#allocation7 + $0x220] sm:$0xf0] }
 0x138   :  { %6891 = vmatpush.bf16.msra.mxu2 %v10915_v16  ;;  %6866 = vmatpush.bf16.msrb.mxu0 %v10371_v26  ;;  %v15572_v3 = vld [vmem:[#allocation7 + $0xbc4] sm:$0xf]  ;;  %v10499_v14 = vor.u32 %v15260_v62, %v10496_v0 }
 0x139   :  { %6881 = vmatpush.bf16.msra.mxu1 %v10563_v38  ;;  %v11744_v5 = vld [vmem:[#allocation7 + $0xbe0] sm:$0xf0] }
 0x13a   :  { %v15204_v6 = vld [vmem:[#allocation7 + $0x44] sm:$0xf]  ;;  %v11747_v18 = vor.u32 %v15572_v3, %v11744_v5 }
 0x13b   :  { %6857 = vmatpush.bf16.msra.mxu3 %v14079_v42  ;;  %v10272_v11 = vld [vmem:[#allocation7 + $0x60] sm:$0xf0] }
 0x13c   :  { %6892 = vmatpush.bf16.msra.mxu2 %v10883_v31  ;;  %6867 = vmatpush.bf16.msrb.mxu0 %v10339_v48  ;;  %v15428_v12 = vld [vmem:[#allocation7 + $0x744] sm:$0xf]  ;;  %v10275_v22 = vor.u32 %v15204_v6, %v10272_v11 }
 0x13d   :  { %v11168_v13 = vld [vmem:[#allocation7 + $0x760] sm:$0xf0]  ;;  %6882 = vmatpush.bf16.msra.mxu1 %v10531_v59 }
 0x13e   :  { %6858 = vmatmul.bf16.vlgmr.msra.gmra.mxu3 %v16903_v58  ;;  %v15332_v16 = vld [vmem:[#allocation7 + $0x444] sm:$0xf]  ;;  %v11171_v23 = vor.u32 %v15428_v12, %v11168_v13 }
 0x13f   :  { %6902 = vmatpush.bf16.msrb.mxu3 %v11235_v50  ;;  %v10784_v17 = vld [vmem:[#allocation7 + $0x460] sm:$0xf0] }
 0x140   :  { %6893 = vmatpush.bf16.msra.mxu2 %v10851_v53  ;;  %v15564_v21 = vld [vmem:[#allocation7 + $0xb84] sm:$0xf]  ;;  %6868 = vmatpush.bf16.msrb.mxu0 %v10307_v46  ;;  %v10787_v25 = vor.u32 %v15332_v16, %v10784_v17 }
 0x141   :  { %v11712_v2 = vld [vmem:[#allocation7 + $0xba0] sm:$0xf0]  ;;  %6883 = vmatpush.bf16.msra.mxu1 %v10499_v14 }
 0x142   :  { %v15196_v19 = vld [vmem:[#allocation7 + $0x4] sm:$0xf]  ;;  %v11715_v33 = vor.u32 %v15564_v21, %v11712_v2 }
 0x143   :  { %6903 = vmatpush.bf16.msrb.mxu3 %v11203_v36  ;;  %v10240_v24 = vld [vmem:[#allocation7 + $0x20] sm:$0xf0] }
 0x144   :  { %6894 = vmatpush.bf16.msra.mxu2 %v10819_v7  ;;  %v15324_v9 = vld [vmem:[#allocation7 + $0x404] sm:$0xf]  ;;  %6869 = vmatpush.bf16.msrb.mxu0 %v10275_v22  ;;  %v10243_v37 = vor.u32 %v15196_v19, %v10240_v24 }
 0x145   :  { %v15420_v26 = vld [vmem:[#allocation7 + $0x704] sm:$0xf]  ;;  %6928 = vmatpush.bf16.msrb.mxu1 %v11747_v18 }
 0x146   :  { %v11136_v27 = vld [vmem:[#allocation7 + $0x720] sm:$0xf0]  ;;  %6884 = vmatmul.bf16.vlgmr.msra.gmra.mxu1 %v16837_v49 }
 0x147   :  { %v10752_v28 = vld [vmem:[#allocation7 + $0x420] sm:$0xf0]  ;;  %6904 = vmatpush.bf16.msrb.mxu3 %v11171_v23  ;;  %v11139_v38 = vor.u32 %v15420_v26, %v11136_v27 }
 0x148   :  { %v15508_v30 = vld [vmem:[#allocation7 + $0x9c4] sm:$0xf]  ;;  %6895 = vmatpush.bf16.msra.mxu2 %v10787_v25  ;;  %v10755_v42 = vor.u32 %v15324_v9, %v10752_v28  ;;  %6870 = vmatpush.bf16.msrb.mxu0 %v10243_v37 }
 0x149   :  { %v11488_v31 = vld [vmem:[#allocation7 + $0x9e0] sm:$0xf0]  ;;  %6929 = vmatpush.bf16.msrb.mxu1 %v11715_v33 }
 0x14a   :  { %v15636_v34 = vld [vmem:[#allocation7 + $0xdc4] sm:$0xf]  ;;  %v11491_v43 = vor.u32 %v15508_v30, %v11488_v31 }
 0x14b   :  { %v12000_v35 = vld [vmem:[#allocation7 + $0xde0] sm:$0xf0]  ;;  %6905 = vmatpush.bf16.msrb.mxu3 %v11139_v38  ;;  %6871 = vmatmul.bf16.vlgmr.msrb.gmra.mxu0 %v16840_v4 }
 0x14c   :  { %v15556_v39 = vld [vmem:[#allocation7 + $0xb44] sm:$0xf]  ;;  %v12003_v50 = vor.u32 %v15636_v34, %v12000_v35  ;;  %6896 = vmatpush.bf16.msra.mxu2 %v10755_v42  ;;  %6915 = vmatpush.bf16.msra.mxu0 %v11491_v43 }
 0x14d   :  { %v11680_v41 = vld [vmem:[#allocation7 + $0xb60] sm:$0xf0] }
 0x14e   :  { %v15412_v45 = vld [vmem:[#allocation7 + $0x6c4] sm:$0xf]  ;;  %v11683_v55 = vor.u32 %v15556_v39, %v11680_v41 }
 0x14f   :  { %v11104_v48 = vld [vmem:[#allocation7 + $0x6e0] sm:$0xf0]  ;;  %6897 = vmatmul.bf16.vlgmr.msra.gmra.mxu2 %v16842_v8 }
 0x150   :  { %v15500_v51 = vld [vmem:[#allocation7 + $0x984] sm:$0xf]  ;;  %v11107_v59 = vor.u32 %v15412_v45, %v11104_v48  ;;  %6941 = vmatpush.bf16.msrb.mxu2 %v12003_v50  ;;  %6930 = vmatpush.bf16.msrb.mxu1 %v11683_v55 }
 0x151   :  { %v11456_v53 = vld [vmem:[#allocation7 + $0x9a0] sm:$0xf0] }
 0x152   :  { %v15628_v56 = vld [vmem:[#allocation7 + $0xd84] sm:$0xf]  ;;  %v11459_v62 = vor.u32 %v15500_v51, %v11456_v53  ;;  %6906 = vmatpush.bf16.msrb.mxu3 %v11107_v59 }
 0x153   :  { %v11968_v57 = vld [vmem:[#allocation7 + $0xda0] sm:$0xf0] }
 0x154   :  { %v15548_v60 = vld [vmem:[#allocation7 + $0xb04] sm:$0xf]  ;;  %v11971_v36 = vor.u32 %v15628_v56, %v11968_v57  ;;  %6916 = vmatpush.bf16.msra.mxu0 %v11459_v62 }
 0x155   :  { %v11648_v61 = vld [vmem:[#allocation7 + $0xb20] sm:$0xf0] }
 0x156   :  { %v15404_v0 = vld [vmem:[#allocation7 + $0x684] sm:$0xf]  ;;  %v11651_v6 = vor.u32 %v15548_v60, %v11648_v61  ;;  %6942 = vmatpush.bf16.msrb.mxu2 %v11971_v36 }
 0x157   :  { %v11072_v46 = vld [vmem:[#allocation7 + $0x6a0] sm:$0xf0] }
 0x158   :  { %v15492_v3 = vld [vmem:[#allocation7 + $0x944] sm:$0xf]  ;;  %v11075_v12 = vor.u32 %v15404_v0, %v11072_v46  ;;  %6931 = vmatpush.bf16.msrb.mxu1 %v11651_v6 }
 0x159   :  { %v11424_v5 = vld [vmem:[#allocation7 + $0x960] sm:$0xf0] }
 0x15a   :  { %v15620_v7 = vld [vmem:[#allocation7 + $0xd44] sm:$0xf]  ;;  %v11427_v16 = vor.u32 %v15492_v3, %v11424_v5  ;;  %6907 = vmatpush.bf16.msrb.mxu3 %v11075_v12 }
 0x15b   :  { %v11936_v11 = vld [vmem:[#allocation7 + $0xd60] sm:$0xf0] }
 0x15c   :  { %v15540_v13 = vld [vmem:[#allocation7 + $0xac4] sm:$0xf]  ;;  %v11939_v21 = vor.u32 %v15620_v7, %v11936_v11  ;;  %6917 = vmatpush.bf16.msra.mxu0 %v11427_v16 }
 0x15d   :  { %v11616_v14 = vld [vmem:[#allocation7 + $0xae0] sm:$0xf0] }
 0x15e   :  { %v15396_v17 = vld [vmem:[#allocation7 + $0x644] sm:$0xf]  ;;  %v11619_v2 = vor.u32 %v15540_v13, %v11616_v14  ;;  %6943 = vmatpush.bf16.msrb.mxu2 %v11939_v21 }
 0x15f   :  { %v11040_v18 = vld [vmem:[#allocation7 + $0x660] sm:$0xf0] }
 0x160   :  { %v15484_v22 = vld [vmem:[#allocation7 + $0x904] sm:$0xf]  ;;  %v11043_v25 = vor.u32 %v15396_v17, %v11040_v18  ;;  %6932 = vmatpush.bf16.msrb.mxu1 %v11619_v2 }
 0x161   :  { %v11392_v23 = vld [vmem:[#allocation7 + $0x920] sm:$0xf0] }
 0x162   :  { %v15612_v19 = vld [vmem:[#allocation7 + $0xd04] sm:$0xf]  ;;  %v11395_v27 = vor.u32 %v15484_v22, %v11392_v23  ;;  %6908 = vmatpush.bf16.msrb.mxu3 %v11043_v25 }
 0x163   :  { %v11904_v24 = vld [vmem:[#allocation7 + $0xd20] sm:$0xf0] }
 0x164   :  { %v15532_v9 = vld [vmem:[#allocation7 + $0xa84] sm:$0xf]  ;;  %v11907_v33 = vor.u32 %v15612_v19, %v11904_v24  ;;  %6918 = vmatpush.bf16.msra.mxu0 %v11395_v27 }
 0x165   :  { %v11584_v26 = vld [vmem:[#allocation7 + $0xaa0] sm:$0xf0] }
 0x166   :  { %v15388_v28 = vld [vmem:[#allocation7 + $0x604] sm:$0xf]  ;;  %v11587_v38 = vor.u32 %v15532_v9, %v11584_v26  ;;  %6944 = vmatpush.bf16.msrb.mxu2 %v11907_v33 }
 0x167   :  { %v11008_v30 = vld [vmem:[#allocation7 + $0x620] sm:$0xf0] }
 0x168   :  { %v15476_v31 = vld [vmem:[#allocation7 + $0x8c4] sm:$0xf]  ;;  %v11011_v42 = vor.u32 %v15388_v28, %v11008_v30  ;;  %6933 = vmatpush.bf16.msrb.mxu1 %v11587_v38 }
 0x169   :  { %v11360_v34 = vld [vmem:[#allocation7 + $0x8e0] sm:$0xf0] }
 0x16a   :  { %v15700_v35 = vld [vmem:[#allocation7 + $0xfc4] sm:$0xf]  ;;  %v11363_v48 = vor.u32 %v15476_v31, %v11360_v34  ;;  %6909 = vmatpush.bf16.msrb.mxu3 %v11011_v42 }
 0x16b   :  { %v12256_v37 = vld [vmem:[#allocation7 + $0xfe0] sm:$0xf0] }
 0x16c   :  { %v15604_v39 = vld [vmem:[#allocation7 + $0xcc4] sm:$0xf]  ;;  %v12259_v50 = vor.u32 %v15700_v35, %v12256_v37  ;;  %6919 = vmatpush.bf16.msra.mxu0 %v11363_v48 }
 0x16d   :  { %v11872_v41 = vld [vmem:[#allocation7 + $0xce0] sm:$0xf0]  ;;  %6910 = vmatmul.bf16.vlgmr.msrb.gmra.mxu3 %v16857_v10 }
 0x16e   :  { %v15524_v43 = vld [vmem:[#allocation7 + $0xa44] sm:$0xf]  ;;  %v11875_v53 = vor.u32 %v15604_v39, %v11872_v41  ;;  %6954 = vmatpush.bf16.msra.mxu3 %v12259_v50 }
 0x16f   :  { %v11552_v45 = vld [vmem:[#allocation7 + $0xa60] sm:$0xf0] }
 0x170   :  { %v15468_v51 = vld [vmem:[#allocation7 + $0x884] sm:$0xf]  ;;  %v11555_v59 = vor.u32 %v15524_v43, %v11552_v45  ;;  %6945 = vmatpush.bf16.msrb.mxu2 %v11875_v53 }
 0x171   :  { %v11328_v55 = vld [vmem:[#allocation7 + $0x8a0] sm:$0xf0] }
 0x172   :  { %v15692_v56 = vld [vmem:[#allocation7 + $0xf84] sm:$0xf]  ;;  %v11331_v46 = vor.u32 %v15468_v51, %v11328_v55  ;;  %6934 = vmatpush.bf16.msrb.mxu1 %v11555_v59 }
 0x173   :  { %v12224_v57 = vld [vmem:[#allocation7 + $0xfa0] sm:$0xf0] }
 0x174   :  { %v15596_v60 = vld [vmem:[#allocation7 + $0xc84] sm:$0xf]  ;;  %v12227_v36 = vor.u32 %v15692_v56, %v12224_v57  ;;  %6920 = vmatpush.bf16.msra.mxu0 %v11331_v46 }
 0x175   :  { %v11840_v61 = vld [vmem:[#allocation7 + $0xca0] sm:$0xf0] }
 0x176   :  { %v15516_v62 = vld [vmem:[#allocation7 + $0xa04] sm:$0xf]  ;;  %v11843_v7 = vor.u32 %v15596_v60, %v11840_v61  ;;  %6955 = vmatpush.bf16.msra.mxu3 %v12227_v36 }
 0x177   :  { %v11520_v0 = vld [vmem:[#allocation7 + $0xa20] sm:$0xf0] }
 0x178   :  { %v15828_v3 = vld [vmem:[#allocation7 + $0x13c4] sm:$0xf]  ;;  %v11523_v14 = vor.u32 %v15516_v62, %v11520_v0  ;;  %6946 = vmatpush.bf16.msrb.mxu2 %v11843_v7 }
 0x179   :  { %v12768_v5 = vld [vmem:[#allocation7 + $0x13e0] sm:$0xf0] }
 0x17a   :  { %v15460_v6 = vld [vmem:[#allocation7 + $0x844] sm:$0xf]  ;;  %v12771_v18 = vor.u32 %v15828_v3, %v12768_v5  ;;  %6935 = vmatpush.bf16.msrb.mxu1 %v11523_v14 }
 0x17b   :  { %v11296_v11 = vld [vmem:[#allocation7 + $0x860] sm:$0xf0] }
 0x17c   :  { %v15684_v12 = vld [vmem:[#allocation7 + $0xf44] sm:$0xf]  ;;  %v11299_v22 = vor.u32 %v15460_v6, %v11296_v11 }
 0x17d   :  { %v12192_v13 = vld [vmem:[#allocation7 + $0xf60] sm:$0xf0]  ;;  %6936 = vmatmul.bf16.vlgmr.msrb.gmra.mxu1 %v16850_v44 }
 0x17e   :  { %v15588_v16 = vld [vmem:[#allocation7 + $0xc44] sm:$0xf]  ;;  %v12195_v23 = vor.u32 %v15684_v12, %v12192_v13  ;;  %6980 = vmatpush.bf16.msra.mxu1 %v12771_v18  ;;  %6921 = vmatpush.bf16.msra.mxu0 %v11299_v22  ;;  %v6677_v13 = vpop.f32.mrf.mxu1 }
 0x17f   :  { %v11808_v17 = vld [vmem:[#allocation7 + $0xc60] sm:$0xf0] }
 0x180   :  { %v15820_v21 = vld [vmem:[#allocation7 + $0x1384] sm:$0xf]  ;;  %v11811_v25 = vor.u32 %v15588_v16, %v11808_v17  ;;  %6956 = vmatpush.bf16.msra.mxu3 %v12195_v23 }
 0x181   :  { %v12736_v2 = vld [vmem:[#allocation7 + $0x13a0] sm:$0xf0] }
 0x182   :  { %v15452_v19 = vld [vmem:[#allocation7 + $0x804] sm:$0xf]  ;;  %v12739_v33 = vor.u32 %v15820_v21, %v12736_v2  ;;  %6947 = vmatpush.bf16.msrb.mxu2 %v11811_v25 }
 0x183   :  { %v11264_v24 = vld [vmem:[#allocation7 + $0x820] sm:$0xf0] }
 0x184   :  { %v15580_v9 = vld [vmem:[#allocation7 + $0xc04] sm:$0xf]  ;;  %v11267_v37 = vor.u32 %v15452_v19, %v11264_v24  ;;  %6981 = vmatpush.bf16.msra.mxu1 %v12739_v33 }
 0x185   :  { %v15676_v26 = vld [vmem:[#allocation7 + $0xf04] sm:$0xf] }
 0x186   :  { %v12160_v27 = vld [vmem:[#allocation7 + $0xf20] sm:$0xf0]  ;;  %6922 = vmatpush.bf16.msra.mxu0 %v11267_v37 }
 0x187   :  { %v11776_v28 = vld [vmem:[#allocation7 + $0xc20] sm:$0xf0]  ;;  %v12163_v38 = vor.u32 %v15676_v26, %v12160_v27 }
 0x188   :  { %v15764_v30 = vld [vmem:[#allocation7 + $0x11c4] sm:$0xf]  ;;  %v11779_v42 = vor.u32 %v15580_v9, %v11776_v28 }
 0x189   :  { %v12512_v31 = vld [vmem:[#allocation7 + $0x11e0] sm:$0xf0]  ;;  %6957 = vmatpush.bf16.msra.mxu3 %v12163_v38  ;;  %6923 = vmatmul.bf16.vlgmr.msra.gmra.mxu0 %v16855_v63 }
 0x18a   :  { %v15892_v34 = vld [vmem:[#allocation7 + $0x15c4] sm:$0xf]  ;;  %v12515_v43 = vor.u32 %v15764_v30, %v12512_v31  ;;  %6948 = vmatpush.bf16.msrb.mxu2 %v11779_v42  ;;  %v6664_v31 = vpop.f32.mrf.mxu0 }
 0x18b   :  { %v13024_v35 = vld [vmem:[#allocation7 + $0x15e0] sm:$0xf0] }
 0x18c   :  { %v15812_v39 = vld [vmem:[#allocation7 + $0x1344] sm:$0xf]  ;;  %v13027_v50 = vor.u32 %v15892_v34, %v13024_v35  ;;  %6967 = vmatpush.bf16.msrb.mxu0 %v12515_v43 }
 0x18d   :  { %v12704_v41 = vld [vmem:[#allocation7 + $0x1360] sm:$0xf0]  ;;  %6949 = vmatmul.bf16.vlgmr.msrb.gmra.mxu2 %v16859_v15 }
 0x18e   :  { %v15668_v45 = vld [vmem:[#allocation7 + $0xec4] sm:$0xf]  ;;  %v12707_v55 = vor.u32 %v15812_v39, %v12704_v41  ;;  %6993 = vmatpush.bf16.msra.mxu2 %v13027_v50 }
 0x18f   :  { %v12128_v48 = vld [vmem:[#allocation7 + $0xee0] sm:$0xf0] }
 0x190   :  { %v15756_v51 = vld [vmem:[#allocation7 + $0x1184] sm:$0xf]  ;;  %v12131_v59 = vor.u32 %v15668_v45, %v12128_v48  ;;  %6982 = vmatpush.bf16.msra.mxu1 %v12707_v55 }
 0x191   :  { %v12480_v53 = vld [vmem:[#allocation7 + $0x11a0] sm:$0xf0] }
 0x192   :  { %v15884_v56 = vld [vmem:[#allocation7 + $0x1584] sm:$0xf]  ;;  %v12483_v62 = vor.u32 %v15756_v51, %v12480_v53  ;;  %6958 = vmatpush.bf16.msra.mxu3 %v12131_v59  ;;  %v6679_v51 = vpop.f32.mrf.mxu1 }
 0x193   :  { %v12992_v57 = vld [vmem:[#allocation7 + $0x15a0] sm:$0xf0] }
 0x194   :  { %v15804_v60 = vld [vmem:[#allocation7 + $0x1304] sm:$0xf]  ;;  %v12995_v36 = vor.u32 %v15884_v56, %v12992_v57  ;;  %6968 = vmatpush.bf16.msrb.mxu0 %v12483_v62 }
 0x195   :  { %v12672_v61 = vld [vmem:[#allocation7 + $0x1320] sm:$0xf0] }
 0x196   :  { %v15660_v0 = vld [vmem:[#allocation7 + $0xe84] sm:$0xf]  ;;  %v12675_v6 = vor.u32 %v15804_v60, %v12672_v61  ;;  %6994 = vmatpush.bf16.msra.mxu2 %v12995_v36 }
 0x197   :  { %v12096_v46 = vld [vmem:[#allocation7 + $0xea0] sm:$0xf0] }
 0x198   :  { %v15748_v3 = vld [vmem:[#allocation7 + $0x1144] sm:$0xf]  ;;  %v12099_v14 = vor.u32 %v15660_v0, %v12096_v46  ;;  %6983 = vmatpush.bf16.msra.mxu1 %v12675_v6 }
 0x199   :  { %v12448_v5 = vld [vmem:[#allocation7 + $0x1160] sm:$0xf0] }
 0x19a   :  { %v15876_v7 = vld [vmem:[#allocation7 + $0x1544] sm:$0xf]  ;;  %v12451_v18 = vor.u32 %v15748_v3, %v12448_v5  ;;  %6959 = vmatpush.bf16.msra.mxu3 %v12099_v14 }
 0x19b   :  { %v12960_v11 = vld [vmem:[#allocation7 + $0x1560] sm:$0xf0] }
 0x19c   :  { %v16912_v12 = vld [vmem:[#allocation8] sm:$0xff]  ;;  %v12963_v23 = vor.u32 %v15876_v7, %v12960_v11  ;;  %6969 = vmatpush.bf16.msrb.mxu0 %v12451_v18  ;;  %v6690_v7 = vpop.f32.mrf.mxu2 }
 0x19d   :  { %v15796_v16 = vld [vmem:[#allocation7 + $0x12c4] sm:$0xf]  ;;  %v1519_v2 = vperm.slane %v16912_v12, 0 }
 0x19e   :  { %v12640_v17 = vld [vmem:[#allocation7 + $0x12e0] sm:$0xf0]  ;;  %6995 = vmatpush.bf16.msra.mxu2 %v12963_v23 }
 0x19f   :  { %v15652_v21 = vld [vmem:[#allocation7 + $0xe44] sm:$0xf]  ;;  %v12643_v25 = vor.u32 %v15796_v16, %v12640_v17  ;;  %v6665_v38 = vadd.f32 %v6664_v31, %v1519_v2  ;;  %v6666_v16 = vpop.f32.mrf.mxu0 }
 0x1a0   :  { %v12064_v22 = vld [vmem:[#allocation7 + $0xe60] sm:$0xf0] }
 0x1a1   :  { %v15740_v19 = vld [vmem:[#allocation7 + $0x1104] sm:$0xf]  ;;  %v12067_v27 = vor.u32 %v15652_v21, %v12064_v22  ;;  %6984 = vmatpush.bf16.msra.mxu1 %v12643_v25  ;;  %v6678_v53 = vadd.f32 %v6677_v13, %v6665_v38 }
 0x1a2   :  { %v12416_v24 = vld [vmem:[#allocation7 + $0x1120] sm:$0xf0] }
 0x1a3   :  { %v15868_v9 = vld [vmem:[#allocation7 + $0x1504] sm:$0xf]  ;;  %v12419_v33 = vor.u32 %v15740_v19, %v12416_v24  ;;  %6960 = vmatpush.bf16.msra.mxu3 %v12067_v27  ;;  %v16916_v14 = vadd.f32 %v6690_v7, %v6678_v53 }
 0x1a4   :  { %v12928_v26 = vld [vmem:[#allocation7 + $0x1520] sm:$0xf0]  ;;  %v6692_v53 = vpop.f32.mrf.mxu2 }
 0x1a5   :  { %v15788_v28 = vld [vmem:[#allocation7 + $0x1284] sm:$0xf]  ;;  %v12931_v39 = vor.u32 %v15868_v9, %v12928_v26  ;;  %6970 = vmatpush.bf16.msrb.mxu0 %v12419_v33 }
 0x1a6   :  { %v12608_v30 = vld [vmem:[#allocation7 + $0x12a0] sm:$0xf0] }
 0x1a7   :  { %v15644_v34 = vld [vmem:[#allocation7 + $0xe04] sm:$0xf]  ;;  %v12611_v45 = vor.u32 %v15788_v28, %v12608_v30  ;;  %6996 = vmatpush.bf16.msra.mxu2 %v12931_v39  ;;  %v16919_v28 = vpop.f32.mrf.mxu1 }
 0x1a8   :  { %v12032_v35 = vld [vmem:[#allocation7 + $0xe20] sm:$0xf0] }
 0x1a9   :  { %v15732_v37 = vld [vmem:[#allocation7 + $0x10c4] sm:$0xf]  ;;  %v12035_v55 = vor.u32 %v15644_v34, %v12032_v35  ;;  %6985 = vmatpush.bf16.msra.mxu1 %v12611_v45 }
 0x1aa   :  { %v12384_v41 = vld [vmem:[#allocation7 + $0x10e0] sm:$0xf0] }
 0x1ab   :  { %v15956_v42 = vld [vmem:[#allocation7 + $0x17c4] sm:$0xf]  ;;  %v12387_v59 = vor.u32 %v15732_v37, %v12384_v41  ;;  %6961 = vmatpush.bf16.msra.mxu3 %v12035_v55 }
 0x1ac   :  { %v13280_v43 = vld [vmem:[#allocation7 + $0x17e0] sm:$0xf0] }
 0x1ad   :  { %v15860_v48 = vld [vmem:[#allocation7 + $0x14c4] sm:$0xf]  ;;  %v13283_v60 = vor.u32 %v15956_v42, %v13280_v43  ;;  %6971 = vmatpush.bf16.msrb.mxu0 %v12387_v59 }
 0x1ae   :  { %v12896_v50 = vld [vmem:[#allocation7 + $0x14e0] sm:$0xf0]  ;;  %6962 = vmatmul.bf16.vlgmr.msra.gmra.mxu3 %v16878_v32 }
 0x1af   :  { %v15780_v56 = vld [vmem:[#allocation7 + $0x1244] sm:$0xf]  ;;  %v12899_v62 = vor.u32 %v15860_v48, %v12896_v50  ;;  %7006 = vmatpush.bf16.msrb.mxu3 %v13283_v60 }
 0x1b0   :  { %v12576_v57 = vld [vmem:[#allocation7 + $0x1260] sm:$0xf0] }
 0x1b1   :  { %v15724_v61 = vld [vmem:[#allocation7 + $0x1084] sm:$0xf]  ;;  %v12579_v3 = vor.u32 %v15780_v56, %v12576_v57  ;;  %6997 = vmatpush.bf16.msra.mxu2 %v12899_v62  ;;  %v6716_v62 = vpop.f32.mrf.mxu0 }
 0x1b2   :  { %v12352_v0 = vld [vmem:[#allocation7 + $0x10a0] sm:$0xf0] }
 0x1b3   :  { %v15948_v46 = vld [vmem:[#allocation7 + $0x1784] sm:$0xf]  ;;  %v12355_v17 = vor.u32 %v15724_v61, %v12352_v0  ;;  %6986 = vmatpush.bf16.msra.mxu1 %v12579_v3 }
 0x1b4   :  { %v13248_v36 = vld [vmem:[#allocation7 + $0x17a0] sm:$0xf0] }
 0x1b5   :  { %v15852_v5 = vld [vmem:[#allocation7 + $0x1484] sm:$0xf]  ;;  %v13251_v18 = vor.u32 %v15948_v46, %v13248_v36  ;;  %6972 = vmatpush.bf16.msrb.mxu0 %v12355_v17 }
 0x1b6   :  { %v12864_v6 = vld [vmem:[#allocation7 + $0x14a0] sm:$0xf0] }
 0x1b7   :  { %v15772_v11 = vld [vmem:[#allocation7 + $0x1204] sm:$0xf]  ;;  %v12867_v2 = vor.u32 %v15852_v5, %v12864_v6  ;;  %7007 = vmatpush.bf16.msrb.mxu3 %v13251_v18 }
 0x1b8   :  { %v12544_v13 = vld [vmem:[#allocation7 + $0x1220] sm:$0xf0] }
 0x1b9   :  { %v16084_v21 = vld [vmem:[#allocation7 + $0x1bc4] sm:$0xf]  ;;  %v12547_v9 = vor.u32 %v15772_v11, %v12544_v13  ;;  %6998 = vmatpush.bf16.msra.mxu2 %v12867_v2  ;;  %v6731_v11 = vpop.f32.mrf.mxu1 }
 0x1ba   :  { %v13792_v22 = vld [vmem:[#allocation7 + $0x1be0] sm:$0xf0] }
 0x1bb   :  { %v15716_v23 = vld [vmem:[#allocation7 + $0x1044] sm:$0xf]  ;;  %v13795_v30 = vor.u32 %v16084_v21, %v13792_v22  ;;  %6987 = vmatpush.bf16.msra.mxu1 %v12547_v9 }
 0x1bc   :  { %v12320_v19 = vld [vmem:[#allocation7 + $0x1060] sm:$0xf0] }
 0x1bd   :  { %v15940_v24 = vld [vmem:[#allocation7 + $0x1744] sm:$0xf]  ;;  %v12323_v33 = vor.u32 %v15716_v23, %v12320_v19 }
 0x1be   :  { %v13216_v25 = vld [vmem:[#allocation7 + $0x1760] sm:$0xf0]  ;;  %6988 = vmatmul.bf16.vlgmr.msra.gmra.mxu1 %v16871_v1 }
 0x1bf   :  { %v15844_v26 = vld [vmem:[#allocation7 + $0x1444] sm:$0xf]  ;;  %v13219_v34 = vor.u32 %v15940_v24, %v13216_v25  ;;  %7032 = vmatpush.bf16.msrb.mxu1 %v13795_v30  ;;  %6973 = vmatpush.bf16.msrb.mxu0 %v12323_v33  ;;  %v6703_v24 = vpop.f32.mrf.mxu3 }
 0x1c0   :  { %v12832_v27 = vld [vmem:[#allocation7 + $0x1460] sm:$0xf0] }
 0x1c1   :  { %v16076_v31 = vld [vmem:[#allocation7 + $0x1b84] sm:$0xf]  ;;  %v12835_v39 = vor.u32 %v15844_v26, %v12832_v27  ;;  %7008 = vmatpush.bf16.msrb.mxu3 %v13219_v34  ;;  %v6704_v27 = vadd.f32 %v6703_v24, %v16916_v14 }
 0x1c2   :  { %v13760_v35 = vld [vmem:[#allocation7 + $0x1ba0] sm:$0xf0] }
 0x1c3   :  { %v15708_v37 = vld [vmem:[#allocation7 + $0x1004] sm:$0xf]  ;;  %v13763_v51 = vor.u32 %v16076_v31, %v13760_v35  ;;  %6999 = vmatpush.bf16.msra.mxu2 %v12835_v39  ;;  %v6717_v39 = vadd.f32 %v6716_v62, %v6704_v27 }
 0x1c4   :  { %v12288_v38 = vld [vmem:[#allocation7 + $0x1020] sm:$0xf0] }
 0x1c5   :  { %v15836_v41 = vld [vmem:[#allocation7 + $0x1404] sm:$0xf]  ;;  %v12291_v57 = vor.u32 %v15708_v37, %v12288_v38  ;;  %7033 = vmatpush.bf16.msrb.mxu1 %v13763_v51  ;;  %v6718_v38 = vpop.f32.mrf.mxu0  ;;  %v16925_v51 = vpop.f32.mrf.mxu1  ;;  %v6730_v53 = vadd.f32 %v16919_v28, %v6717_v39 }
 0x1c6   :  { %v15932_v42 = vld [vmem:[#allocation7 + $0x1704] sm:$0xf] }
 0x1c7   :  { %v13184_v43 = vld [vmem:[#allocation7 + $0x1720] sm:$0xf0]  ;;  %6974 = vmatpush.bf16.msrb.mxu0 %v12291_v57 }
 0x1c8   :  { %v12800_v45 = vld [vmem:[#allocation7 + $0x1420] sm:$0xf0]  ;;  %v13187_v59 = vor.u32 %v15932_v42, %v13184_v43 }
 0x1c9   :  { %v16020_v48 = vld [vmem:[#allocation7 + $0x19c4] sm:$0xf]  ;;  %v12803_v0 = vor.u32 %v15836_v41, %v12800_v45  ;;  %v6742_v41 = vpop.f32.mrf.mxu2 }
 0x1ca   :  { %v13536_v50 = vld [vmem:[#allocation7 + $0x19e0] sm:$0xf0]  ;;  %7009 = vmatpush.bf16.msrb.mxu3 %v13187_v59  ;;  %6975 = vmatmul.bf16.vlgmr.msrb.gmra.mxu0 %v16876_v29  ;;  %v6743_v62 = vadd.f32 %v6742_v41, %v6730_v53 }
 0x1cb   :  { %v16148_v55 = vld [vmem:[#allocation7 + $0x1dc4] sm:$0xf]  ;;  %v13539_v46 = vor.u32 %v16020_v48, %v13536_v50  ;;  %7000 = vmatpush.bf16.msra.mxu2 %v12803_v0 }
 0x1cc   :  { %v14048_v56 = vld [vmem:[#allocation7 + $0x1de0] sm:$0xf0] }
 0x1cd   :  { %v16068_v60 = vld [vmem:[#allocation7 + $0x1b44] sm:$0xf]  ;;  %v14051_v5 = vor.u32 %v16148_v55, %v14048_v56  ;;  %7019 = vmatpush.bf16.msra.mxu0 %v13539_v46  ;;  %v6768_v24 = vpop.f32.mrf.mxu0 }
 0x1ce   :  { %v13728_v61 = vld [vmem:[#allocation7 + $0x1b60] sm:$0xf0]  ;;  %7001 = vmatmul.bf16.vlgmr.msra.gmra.mxu2 %v16880_v40 }
 0x1cf   :  { %v15924_v36 = vld [vmem:[#allocation7 + $0x16c4] sm:$0xf]  ;;  %v13731_v13 = vor.u32 %v16068_v60, %v13728_v61  ;;  %7045 = vmatpush.bf16.msrb.mxu2 %v14051_v5  ;;  %v6705_v5 = vpop.f32.mrf.mxu3 }
 0x1d0   :  { %v13152_v3 = vld [vmem:[#allocation7 + $0x16e0] sm:$0xf0]  ;;  %v15313_v5 = vld [vmem:[#allocation7 + $0x3a4] sm:$0xf0] }
 0x1d1   :  { %v16012_v6 = vld [vmem:[#allocation7 + $0x1984] sm:$0xf]  ;;  %v13155_v18 = vor.u32 %v15924_v36, %v13152_v3  ;;  %7034 = vmatpush.bf16.msrb.mxu1 %v13731_v13 }
 0x1d2   :  { %v13504_v7 = vld [vmem:[#allocation7 + $0x19a0] sm:$0xf0] }
 0x1d3   :  { %v16140_v16 = vld [vmem:[#allocation7 + $0x1d84] sm:$0xf]  ;;  %v13507_v23 = vor.u32 %v16012_v6, %v13504_v7  ;;  %7010 = vmatpush.bf16.msrb.mxu3 %v13155_v18 }
 0x1d4   :  { %v14016_v17 = vld [vmem:[#allocation7 + $0x1da0] sm:$0xf0] }
 0x1d5   :  { %v16060_v21 = vld [vmem:[#allocation7 + $0x1b04] sm:$0xf]  ;;  %v14019_v25 = vor.u32 %v16140_v16, %v14016_v17  ;;  %7020 = vmatpush.bf16.msra.mxu0 %v13507_v23  ;;  %v6744_v23 = vpop.f32.mrf.mxu2 }
 0x1d6   :  { %v13696_v22 = vld [vmem:[#allocation7 + $0x1b20] sm:$0xf0]  ;;  %v15257_v23 = vld [vmem:[#allocation7 + $0x1e4] sm:$0xf0] }
 0x1d7   :  { %v15916_v2 = vld [vmem:[#allocation7 + $0x1684] sm:$0xf]  ;;  %v13699_v30 = vor.u32 %v16060_v21, %v13696_v22  ;;  %7046 = vmatpush.bf16.msrb.mxu2 %v14019_v25 }
 0x1d8   :  { %v13120_v19 = vld [vmem:[#allocation7 + $0x16a0] sm:$0xf0] }
 0x1d9   :  { %v16004_v9 = vld [vmem:[#allocation7 + $0x1944] sm:$0xf]  ;;  %v13123_v34 = vor.u32 %v15916_v2, %v13120_v19  ;;  %7035 = vmatpush.bf16.msrb.mxu1 %v13699_v30 }
 0x1da   :  { %v13472_v26 = vld [vmem:[#allocation7 + $0x1960] sm:$0xf0] }
 0x1db   :  { %v16132_v31 = vld [vmem:[#allocation7 + $0x1d44] sm:$0xf]  ;;  %v13475_v42 = vor.u32 %v16004_v9, %v13472_v26  ;;  %7011 = vmatpush.bf16.msrb.mxu3 %v13123_v34 }
 0x1dc   :  { %v13984_v33 = vld [vmem:[#allocation7 + $0x1d60] sm:$0xf0] }
 0x1dd   :  { %v16052_v35 = vld [vmem:[#allocation7 + $0x1ac4] sm:$0xf]  ;;  %v13987_v14 = vor.u32 %v16132_v31, %v13984_v33  ;;  %7021 = vmatpush.bf16.msra.mxu0 %v13475_v42  ;;  %v6783_v31 = vpop.f32.mrf.mxu1  ;;  %v10726_v42 = vld [vmem:[#allocation7 + $0x3c8] sm:$0xf] }
 0x1de   :  { %v13664_v37 = vld [vmem:[#allocation7 + $0x1ae0] sm:$0xf0] }
 0x1df   :  { %v15908_v43 = vld [vmem:[#allocation7 + $0x1644] sm:$0xf]  ;;  %v13667_v55 = vor.u32 %v16052_v35, %v13664_v37  ;;  %7047 = vmatpush.bf16.msrb.mxu2 %v13987_v14  ;;  %v6755_v14 = vpop.f32.mrf.mxu3 }
 0x1e0   :  { %v13088_v45 = vld [vmem:[#allocation7 + $0x1660] sm:$0xf0] }
 0x1e1   :  { %v15996_v48 = vld [vmem:[#allocation7 + $0x1904] sm:$0xf]  ;;  %v13091_v59 = vor.u32 %v15908_v43, %v13088_v45  ;;  %7036 = vmatpush.bf16.msrb.mxu1 %v13667_v55  ;;  %v15321_v43 = vld [vmem:[#allocation7 + $0x3e4] sm:$0xf0] }
 0x1e2   :  { %v13440_v50 = vld [vmem:[#allocation7 + $0x1920] sm:$0xf0] }
 0x1e3   :  { %v16124_v56 = vld [vmem:[#allocation7 + $0x1d04] sm:$0xf]  ;;  %v13443_v0 = vor.u32 %v15996_v48, %v13440_v50  ;;  %7012 = vmatpush.bf16.msrb.mxu3 %v13091_v59 }
 0x1e4   :  { %v13952_v57 = vld [vmem:[#allocation7 + $0x1d20] sm:$0xf0] }
 0x1e5   :  { %v16044_v60 = vld [vmem:[#allocation7 + $0x1a84] sm:$0xf]  ;;  %v13955_v6 = vor.u32 %v16124_v56, %v13952_v57  ;;  %7022 = vmatpush.bf16.msra.mxu0 %v13443_v0  ;;  %v6756_v56 = vadd.f32 %v6755_v14, %v6743_v62  ;;  %v10694_v0 = vld [vmem:[#allocation7 + $0x388] sm:$0xf] }
 0x1e6   :  { %v13632_v61 = vld [vmem:[#allocation7 + $0x1aa0] sm:$0xf0]  ;;  %v10630_v14 = vld [vmem:[#allocation7 + $0x308] sm:$0xf] }
 0x1e7   :  { %v15900_v46 = vld [vmem:[#allocation7 + $0x1604] sm:$0xf]  ;;  %v13635_v13 = vor.u32 %v16044_v60, %v13632_v61  ;;  %7048 = vmatpush.bf16.msrb.mxu2 %v13955_v6  ;;  %v10727_v61 = vor.u32 %v15321_v43, %v10726_v42  ;;  %v6757_v31 = vpop.f32.mrf.mxu3  ;;  %v10950_v42 = vld [vmem:[#allocation7 + $0x588] sm:$0xf] }
 0x1e8   :  { %v13056_v36 = vld [vmem:[#allocation7 + $0x1620] sm:$0xf0]  ;;  %v15377_v43 = vld [vmem:[#allocation7 + $0x5a4] sm:$0xf0] }
 0x1e9   :  { %v15988_v3 = vld [vmem:[#allocation7 + $0x18c4] sm:$0xf]  ;;  %v13059_v18 = vor.u32 %v15900_v46, %v13056_v36  ;;  %7037 = vmatpush.bf16.msrb.mxu1 %v13635_v13  ;;  %v6769_v46 = vadd.f32 %v6768_v24, %v6756_v56  ;;  %v15385_v24 = vld [vmem:[#allocation7 + $0x5e4] sm:$0xf0] }
 0x1ea   :  { %v13408_v7 = vld [vmem:[#allocation7 + $0x18e0] sm:$0xf0] }
 0x1eb   :  { %v16212_v11 = vld [vmem:[#allocation7 + $0x1fc4] sm:$0xf]  ;;  %v13411_v2 = vor.u32 %v15988_v3, %v13408_v7  ;;  %7013 = vmatpush.bf16.msrb.mxu3 %v13059_v18  ;;  %v6782_v18 = vadd.f32 %v16925_v51, %v6769_v46  ;;  %v15369_v46 = vld [vmem:[#allocation7 + $0x564] sm:$0xf0] }
 0x1ec   :  { %v14304_v28 = vld [vmem:[#allocation7 + $0x1fe0] sm:$0xf0] }
 0x1ed   :  { %v16116_v16 = vld [vmem:[#allocation7 + $0x1cc4] sm:$0xf]  ;;  %v14307_v19 = vor.u32 %v16212_v11, %v14304_v28  ;;  %7023 = vmatpush.bf16.msra.mxu0 %v13411_v2  ;;  %v6770_v11 = vpop.f32.mrf.mxu0  ;;  %v6794_v28 = vpop.f32.mrf.mxu2  ;;  %v10695_v2 = vor.u32 %v15313_v5, %v10694_v0  ;;  %v10918_v0 = vld [vmem:[#allocation7 + $0x548] sm:$0xf] }
 0x1ee   :  { %v13920_v17 = vld [vmem:[#allocation7 + $0x1ce0] sm:$0xf0]  ;;  %7014 = vmatmul.bf16.vlgmr.msrb.gmra.mxu3 %v16888_v52  ;;  %v15289_v5 = vld [vmem:[#allocation7 + $0x2e4] sm:$0xf0] }
 0x1ef   :  { %v16036_v21 = vld [vmem:[#allocation7 + $0x1a44] sm:$0xf]  ;;  %v13923_v9 = vor.u32 %v16116_v16, %v13920_v17  ;;  %7058 = vmatpush.bf16.msra.mxu3 %v14307_v19  ;;  %v10982_v19 = vld [vmem:[#allocation7 + $0x5c8] sm:$0xf] }
 0x1f0   :  { %v13600_v22 = vld [vmem:[#allocation7 + $0x1a60] sm:$0xf0] }
 0x1f1   :  { %v15980_v25 = vld [vmem:[#allocation7 + $0x1884] sm:$0xf]  ;;  %v13603_v33 = vor.u32 %v16036_v21, %v13600_v22  ;;  %7049 = vmatpush.bf16.msrb.mxu2 %v13923_v9  ;;  %v10470_v22 = vld [vmem:[#allocation7 + $0x1c8] sm:$0xf] }
 0x1f2   :  { %v13376_v26 = vld [vmem:[#allocation7 + $0x18a0] sm:$0xf0] }
 0x1f3   :  { %v16204_v27 = vld [vmem:[#allocation7 + $0x1f84] sm:$0xf]  ;;  %v13379_v39 = vor.u32 %v15980_v25, %v13376_v26  ;;  %7038 = vmatpush.bf16.msrb.mxu1 %v13603_v33  ;;  %v6795_v25 = vadd.f32 %v6794_v28, %v6782_v18  ;;  %v10471_v33 = vor.u32 %v15257_v23, %v10470_v22  ;;  %v6833_v18 = vpop.f32.mrf.mxu1  ;;  %v10886_v22 = vld [vmem:[#allocation7 + $0x508] sm:$0xf] }
 0x1f4   :  { %v14272_v30 = vld [vmem:[#allocation7 + $0x1fa0] sm:$0xf0]  ;;  %v15361_v23 = vld [vmem:[#allocation7 + $0x524] sm:$0xf0] }
 0x1f5   :  { %v16108_v34 = vld [vmem:[#allocation7 + $0x1c84] sm:$0xf]  ;;  %v14275_v41 = vor.u32 %v16204_v27, %v14272_v30  ;;  %7024 = vmatpush.bf16.msra.mxu0 %v13379_v39  ;;  %v10662_v27 = vld [vmem:[#allocation7 + $0x348] sm:$0xf]  ;;  %v6796_v56 = vpop.f32.mrf.mxu2  ;;  %v10887_v31 = vor.u32 %v15361_v23, %v10886_v22 }
 0x1f6   :  { %v13888_v35 = vld [vmem:[#allocation7 + $0x1ca0] sm:$0xf0]  ;;  %v15305_v30 = vld [vmem:[#allocation7 + $0x364] sm:$0xf0] }
 0x1f7   :  { %v16028_v37 = vld [vmem:[#allocation7 + $0x1a04] sm:$0xf]  ;;  %v13891_v48 = vor.u32 %v16108_v34, %v13888_v35  ;;  %7059 = vmatpush.bf16.msra.mxu3 %v14275_v41  ;;  %v15249_v39 = vld [vmem:[#allocation7 + $0x1a4] sm:$0xf0]  ;;  %v10663_v41 = vor.u32 %v15305_v30, %v10662_v27 }
 0x1f8   :  { %v13568_v38 = vld [vmem:[#allocation7 + $0x1a20] sm:$0xf0]  ;;  %v10342_v30 = vld [vmem:[#allocation7 + $0xc8] sm:$0xf] }
 0x1f9   :  { %v15972_v45 = vld [vmem:[#allocation7 + $0x1844] sm:$0xf]  ;;  %v13571_v57 = vor.u32 %v16028_v37, %v13568_v38  ;;  %7050 = vmatpush.bf16.msrb.mxu2 %v13891_v48  ;;  %v10983_v37 = vor.u32 %v15385_v24, %v10982_v19  ;;  %v10438_v38 = vld [vmem:[#allocation7 + $0x188] sm:$0xf] }
 0x1fa   :  { %v13344_v50 = vld [vmem:[#allocation7 + $0x1860] sm:$0xf0]  ;;  %v15297_v48 = vld [vmem:[#allocation7 + $0x324] sm:$0xf0] }
 0x1fb   :  { %v16196_v53 = vld [vmem:[#allocation7 + $0x1f44] sm:$0xf]  ;;  %v13347_v36 = vor.u32 %v15972_v45, %v13344_v50  ;;  %7039 = vmatpush.bf16.msrb.mxu1 %v13571_v57  ;;  %v10439_v50 = vor.u32 %v15249_v39, %v10438_v38  ;;  %v10951_v57 = vor.u32 %v15377_v43, %v10950_v42  ;;  %v10566_v19 = vld [vmem:[#allocation7 + $0x288] sm:$0xf]  ;;  %v6820_v38 = vpop.f32.mrf.mxu0 }
 0x1fc   :  { %v14240_v55 = vld [vmem:[#allocation7 + $0x1f60] sm:$0xf0]  ;;  %v15281_v24 = vld [vmem:[#allocation7 + $0x2a4] sm:$0xf0] }
 0x1fd   :  { %v16100_v59 = vld [vmem:[#allocation7 + $0x1c44] sm:$0xf]  ;;  %v14243_v3 = vor.u32 %v16196_v53, %v14240_v55  ;;  %7025 = vmatpush.bf16.msra.mxu0 %v13347_v36  ;;  %v15273_v42 = vld [vmem:[#allocation7 + $0x264] sm:$0xf0] }
 0x1fe   :  { %v13856_v60 = vld [vmem:[#allocation7 + $0x1c60] sm:$0xf0]  ;;  %7040 = vmatmul.bf16.vlgmr.msrb.gmra.mxu1 %v16893_v20  ;;  %v11206_v56 = vld [vmem:[#allocation7 + $0x788] sm:$0xf] }
 0x1ff   :  { %v15964_v6 = vld [vmem:[#allocation7 + $0x1804] sm:$0xf]  ;;  %v13859_v62 = vor.u32 %v16100_v59, %v13856_v60  ;;  %7084 = vmatpush.bf16.msra.mxu1 %v10727_v61  ;;  %7060 = vmatpush.bf16.msra.mxu3 %v14243_v3  ;;  %v10406_v59 = vld [vmem:[#allocation7 + $0x148] sm:$0xf]  ;;  %v10631_v61 = vor.u32 %v15297_v48, %v10630_v14 }
 0x200   :  { %v13312_v7 = vld [vmem:[#allocation7 + $0x1820] sm:$0xf0]  ;;  %v15241_v60 = vld [vmem:[#allocation7 + $0x164] sm:$0xf0] }
 0x201   :  { %v16092_v13 = vld [vmem:[#allocation7 + $0x1c04] sm:$0xf]  ;;  %v13315_v9 = vor.u32 %v15964_v6, %v13312_v7  ;;  %7051 = vmatpush.bf16.msrb.mxu2 %v13859_v62  ;;  %v10598_v3 = vld [vmem:[#allocation7 + $0x2c8] sm:$0xf]  ;;  %v6807_v6 = vpop.f32.mrf.mxu3  ;;  %v10407_v7 = vor.u32 %v15241_v60, %v10406_v59  ;;  %v6835_v59 = vpop.f32.mrf.mxu1 }
 0x202   :  { %v16188_v16 = vld [vmem:[#allocation7 + $0x1f04] sm:$0xf]  ;;  %v6808_v62 = vadd.f32 %v6807_v6, %v6795_v25  ;;  %v15225_v25 = vld [vmem:[#allocation7 + $0xe4] sm:$0xf0] }
 0x203   :  { %v14208_v17 = vld [vmem:[#allocation7 + $0x1f20] sm:$0xf0]  ;;  %7085 = vmatpush.bf16.msra.mxu1 %v10695_v2  ;;  %7026 = vmatpush.bf16.msra.mxu0 %v13315_v9  ;;  %v10310_v48 = vld [vmem:[#allocation7 + $0x88] sm:$0xf] }
 0x204   :  { %v13824_v21 = vld [vmem:[#allocation7 + $0x1c20] sm:$0xf0]  ;;  %v14211_v26 = vor.u32 %v16188_v16, %v14208_v17  ;;  %v10374_v16 = vld [vmem:[#allocation7 + $0x108] sm:$0xf]  ;;  %v6821_v43 = vadd.f32 %v6820_v38, %v6808_v62 }
 0x205   :  { %v13827_v51 = vor.u32 %v16092_v13, %v13824_v21  ;;  %v16180_v34 = vld [vmem:[#allocation7 + $0x1ec4] sm:$0xf]  ;;  %v10919_v13 = vor.u32 %v15369_v46, %v10918_v0  ;;  %v15233_v17 = vld [vmem:[#allocation7 + $0x124] sm:$0xf0]  ;;  %v10599_v21 = vor.u32 %v15289_v5, %v10598_v3 }
 0x206   :  { %v14176_v35 = vld [vmem:[#allocation7 + $0x1ee0] sm:$0xf0]  ;;  %7061 = vmatpush.bf16.msra.mxu3 %v14211_v26  ;;  %7027 = vmatmul.bf16.vlgmr.msra.gmra.mxu0 %v16896_v47  ;;  %v10375_v9 = vor.u32 %v15233_v17, %v10374_v16  ;;  %v6834_v60 = vadd.f32 %v6833_v18, %v6821_v43  ;;  %v10822_v0 = vld [vmem:[#allocation7 + $0x488] sm:$0xf]  ;;  %v6846_v18 = vpop.f32.mrf.mxu2 }
 0x207   :  { %v14179_v45 = vor.u32 %v16180_v34, %v14176_v35  ;;  %7052 = vmatpush.bf16.msrb.mxu2 %v13827_v51  ;;  %7071 = vmatpush.bf16.msrb.mxu0 %v10471_v33  ;;  %v16172_v53 = vld [vmem:[#allocation7 + $0x1e84] sm:$0xf]  ;;  %v11238_v51 = vld [vmem:[#allocation7 + $0x7c8] sm:$0xf]  ;;  %v10567_v34 = vor.u32 %v15281_v24, %v10566_v19 }
 0x208   :  { %v14144_v55 = vld [vmem:[#allocation7 + $0x1ea0] sm:$0xf0]  ;;  %7086 = vmatpush.bf16.msra.mxu1 %v10663_v41  ;;  %v15449_v33 = vld [vmem:[#allocation7 + $0x7e4] sm:$0xf0] }
 0x209   :  { %v14147_v36 = vor.u32 %v16172_v53, %v14144_v55  ;;  %v16164_v11 = vld [vmem:[#allocation7 + $0x1e44] sm:$0xf]  ;;  %v10854_v35 = vld [vmem:[#allocation7 + $0x4c8] sm:$0xf]  ;;  %v11239_v14 = vor.u32 %v15449_v33, %v11238_v51 }
 0x20a   :  { %7053 = vmatmul.bf16.vlgmr.msrb.gmra.mxu2 %v16898_v54  ;;  %7062 = vmatpush.bf16.msra.mxu3 %v14179_v45  ;;  %v14112_v28 = vld [vmem:[#allocation7 + $0x1e60] sm:$0xf0]  ;;  %v10534_v41 = vld [vmem:[#allocation7 + $0x248] sm:$0xf]  ;;  %v10343_v45 = vor.u32 %v15225_v25, %v10342_v30 }
 0x20b   :  { %7097 = vmatpush.bf16.msra.mxu2 %v10983_v37  ;;  %7072 = vmatpush.bf16.msrb.mxu0 %v10439_v50  ;;  %v14115_v2 = vor.u32 %v16164_v11, %v14112_v28  ;;  %v16156_v26 = vld [vmem:[#allocation7 + $0x1e04] sm:$0xf]  ;;  %v15353_v37 = vld [vmem:[#allocation7 + $0x4e4] sm:$0xf0]  ;;  %v6809_v50 = vpop.f32.mrf.mxu3 }
 0x20c   :  { %7087 = vmatpush.bf16.msra.mxu1 %v10631_v61  ;;  %v14080_v27 = vld [vmem:[#allocation7 + $0x1e20] sm:$0xf0]  ;;  %v10855_v53 = vor.u32 %v15353_v37, %v10854_v35  ;;  %v15217_v55 = vld [vmem:[#allocation7 + $0xa4] sm:$0xf0]  ;;  %v10535_v61 = vor.u32 %v15273_v42, %v10534_v41 }
 0x20d   :  { %v14083_v39 = vor.u32 %v16156_v26, %v14080_v27  ;;  %v15345_v46 = vld [vmem:[#allocation7 + $0x4a4] sm:$0xf0]  ;;  %v10311_v5 = vor.u32 %v15217_v55, %v10310_v48 }
 0x20e   :  { %7063 = vmatpush.bf16.msra.mxu3 %v14147_v36  ;;  %v10502_v36 = vld [vmem:[#allocation7 + $0x208] sm:$0xf]  ;;  %v10823_v62 = vor.u32 %v15345_v46, %v10822_v0  ;;  %v6848_v0 = vpop.f32.mrf.mxu2 }
 0x20f   :  { %7098 = vmatpush.bf16.msra.mxu2 %v10951_v57  ;;  %7073 = vmatpush.bf16.msrb.mxu0 %v10407_v7  ;;  %v15441_v57 = vld [vmem:[#allocation7 + $0x7a4] sm:$0xf0] }
 0x210   :  { %7088 = vmatpush.bf16.msra.mxu1 %v10599_v21  ;;  %v15265_v3 = vld [vmem:[#allocation7 + $0x224] sm:$0xf0]  ;;  %v11207_v6 = vor.u32 %v15441_v57, %v11206_v56 }
 0x211   :  { %v11750_v7 = vld [vmem:[#allocation7 + $0xbc8] sm:$0xf]  ;;  %v10503_v21 = vor.u32 %v15265_v3, %v10502_v36 }
 0x212   :  { %7064 = vmatpush.bf16.msra.mxu3 %v14115_v2  ;;  %v15577_v11 = vld [vmem:[#allocation7 + $0xbe4] sm:$0xf0]  ;;  %v16934_v2 = vadd.f32 %v6846_v18, %v6834_v60 }
 0x213   :  { %7099 = vmatpush.bf16.msra.mxu2 %v10919_v13  ;;  %7074 = vmatpush.bf16.msrb.mxu0 %v10375_v9  ;;  %v10278_v28 = vld [vmem:[#allocation7 + $0x48] sm:$0xf]  ;;  %v11751_v19 = vor.u32 %v15577_v11, %v11750_v7  ;;  %v6822_v9 = vpop.f32.mrf.mxu0 }
 0x214   :  { %7089 = vmatpush.bf16.msra.mxu1 %v10567_v34  ;;  %v15209_v13 = vld [vmem:[#allocation7 + $0x64] sm:$0xf0]  ;;  %v6859_v9 = vpop.f32.mrf.mxu3 }
 0x215   :  { %v11174_v16 = vld [vmem:[#allocation7 + $0x748] sm:$0xf]  ;;  %v10279_v26 = vor.u32 %v15209_v13, %v10278_v28 }
 0x216   :  { %7065 = vmatpush.bf16.msra.mxu3 %v14083_v39  ;;  %v15433_v17 = vld [vmem:[#allocation7 + $0x764] sm:$0xf0] }
 0x217   :  { %7100 = vmatpush.bf16.msra.mxu2 %v10887_v31  ;;  %7075 = vmatpush.bf16.msrb.mxu0 %v10343_v45  ;;  %v10790_v22 = vld [vmem:[#allocation7 + $0x448] sm:$0xf]  ;;  %v11175_v27 = vor.u32 %v15433_v17, %v11174_v16 }
 0x218   :  { %7090 = vmatpush.bf16.msra.mxu1 %v10535_v61  ;;  %v15337_v23 = vld [vmem:[#allocation7 + $0x464] sm:$0xf0] }
 0x219   :  { %7066 = vmatmul.bf16.vlgmr.msra.gmra.mxu3 %v16903_v58  ;;  %v11718_v24 = vld [vmem:[#allocation7 + $0xb88] sm:$0xf]  ;;  %v10791_v51 = vor.u32 %v15337_v23, %v10790_v22 }
 0x21a   :  { %7110 = vmatpush.bf16.msrb.mxu3 %v11239_v14  ;;  %v15569_v30 = vld [vmem:[#allocation7 + $0xba4] sm:$0xf0] }
 0x21b   :  { %7101 = vmatpush.bf16.msra.mxu2 %v10855_v53  ;;  %7076 = vmatpush.bf16.msrb.mxu0 %v10311_v5  ;;  %v10246_v31 = vld [vmem:[#allocation7 + $0x8] sm:$0xf]  ;;  %v11719_v41 = vor.u32 %v15569_v30, %v11718_v24 }
 0x21c   :  { %v15201_v25 = vld [vmem:[#allocation7 + $0x24] sm:$0xf0]  ;;  %7091 = vmatpush.bf16.msra.mxu1 %v10503_v21 }
 0x21d   :  { %v10758_v33 = vld [vmem:[#allocation7 + $0x408] sm:$0xf]  ;;  %v10247_v45 = vor.u32 %v15201_v25, %v10246_v31  ;;  %v16940_v31 = vadd.f32 %v6859_v9, %v16934_v2  ;;  %v6885_v25 = vpop.f32.mrf.mxu1 }
 0x21e   :  { %7111 = vmatpush.bf16.msrb.mxu3 %v11207_v6  ;;  %v11142_v34 = vld [vmem:[#allocation7 + $0x708] sm:$0xf] }
 0x21f   :  { %7102 = vmatpush.bf16.msra.mxu2 %v10823_v62  ;;  %v15425_v35 = vld [vmem:[#allocation7 + $0x724] sm:$0xf0]  ;;  %7077 = vmatpush.bf16.msrb.mxu0 %v10279_v26 }
 0x220   :  { %v15329_v37 = vld [vmem:[#allocation7 + $0x424] sm:$0xf0]  ;;  %7136 = vmatpush.bf16.msrb.mxu1 %v11751_v19  ;;  %v11143_v14 = vor.u32 %v15425_v35, %v11142_v34 }
 0x221   :  { %v11494_v38 = vld [vmem:[#allocation7 + $0x9c8] sm:$0xf]  ;;  %7092 = vmatmul.bf16.vlgmr.msra.gmra.mxu1 %v16837_v49  ;;  %v10759_v53 = vor.u32 %v15329_v37, %v10758_v33 }
 0x222   :  { %v15513_v39 = vld [vmem:[#allocation7 + $0x9e4] sm:$0xf0]  ;;  %7112 = vmatpush.bf16.msrb.mxu3 %v11175_v27 }
 0x223   :  { %v12006_v42 = vld [vmem:[#allocation7 + $0xdc8] sm:$0xf]  ;;  %7103 = vmatpush.bf16.msra.mxu2 %v10791_v51  ;;  %v11495_v55 = vor.u32 %v15513_v39, %v11494_v38  ;;  %7078 = vmatpush.bf16.msrb.mxu0 %v10247_v45  ;;  %v1520_v39 = vperm.slane %v16912_v12, 1 }
 0x224   :  { %v15641_v43 = vld [vmem:[#allocation7 + $0xde4] sm:$0xf0]  ;;  %7137 = vmatpush.bf16.msrb.mxu1 %v11719_v41 }
 0x225   :  { %v11686_v48 = vld [vmem:[#allocation7 + $0xb48] sm:$0xf]  ;;  %v12007_v59 = vor.u32 %v15641_v43, %v12006_v42 }
 0x226   :  { %v15561_v50 = vld [vmem:[#allocation7 + $0xb64] sm:$0xf0]  ;;  %7113 = vmatpush.bf16.msrb.mxu3 %v11143_v14  ;;  %7079 = vmatmul.bf16.vlgmr.msrb.gmra.mxu0 %v16840_v4 }
 0x227   :  { %v11110_v56 = vld [vmem:[#allocation7 + $0x6c8] sm:$0xf]  ;;  %v11687_v46 = vor.u32 %v15561_v50, %v11686_v48  ;;  %7104 = vmatpush.bf16.msra.mxu2 %v10759_v53  ;;  %7123 = vmatpush.bf16.msra.mxu0 %v11495_v55 }
 0x228   :  { %v15417_v57 = vld [vmem:[#allocation7 + $0x6e4] sm:$0xf0] }
 0x229   :  { %v11462_v60 = vld [vmem:[#allocation7 + $0x988] sm:$0xf]  ;;  %v11111_v5 = vor.u32 %v15417_v57, %v11110_v56  ;;  %7138 = vmatpush.bf16.msrb.mxu1 %v11687_v46 }
 0x22a   :  { %v15505_v61 = vld [vmem:[#allocation7 + $0x9a4] sm:$0xf0]  ;;  %7105 = vmatmul.bf16.vlgmr.msra.gmra.mxu2 %v16842_v8 }
 0x22b   :  { %v11974_v36 = vld [vmem:[#allocation7 + $0xd88] sm:$0xf]  ;;  %v11463_v11 = vor.u32 %v15505_v61, %v11462_v60  ;;  %7149 = vmatpush.bf16.msrb.mxu2 %v12007_v59  ;;  %7114 = vmatpush.bf16.msrb.mxu3 %v11111_v5  ;;  %v6872_v61 = vpop.f32.mrf.mxu0 }
 0x22c   :  { %v15633_v3 = vld [vmem:[#allocation7 + $0xda4] sm:$0xf0] }
 0x22d   :  { %v11654_v6 = vld [vmem:[#allocation7 + $0xb08] sm:$0xf]  ;;  %v11975_v13 = vor.u32 %v15633_v3, %v11974_v36  ;;  %7124 = vmatpush.bf16.msra.mxu0 %v11463_v11  ;;  %v6873_v36 = vadd.f32 %v6872_v61, %v1520_v39  ;;  %v6887_v11 = vpop.f32.mrf.mxu1 }
 0x22e   :  { %v15553_v7 = vld [vmem:[#allocation7 + $0xb24] sm:$0xf0] }
 0x22f   :  { %v11078_v28 = vld [vmem:[#allocation7 + $0x688] sm:$0xf]  ;;  %v11655_v18 = vor.u32 %v15553_v7, %v11654_v6  ;;  %7150 = vmatpush.bf16.msrb.mxu2 %v11975_v13  ;;  %v6861_v7 = vpop.f32.mrf.mxu3 }
 0x230   :  { %v15409_v62 = vld [vmem:[#allocation7 + $0x6a4] sm:$0xf0] }
 0x231   :  { %v11430_v16 = vld [vmem:[#allocation7 + $0x948] sm:$0xf]  ;;  %v11079_v23 = vor.u32 %v15409_v62, %v11078_v28  ;;  %7139 = vmatpush.bf16.msrb.mxu1 %v11655_v18 }
 0x232   :  { %v15497_v17 = vld [vmem:[#allocation7 + $0x964] sm:$0xf0] }
 0x233   :  { %v11942_v21 = vld [vmem:[#allocation7 + $0xd48] sm:$0xf]  ;;  %v11431_v26 = vor.u32 %v15497_v17, %v11430_v16  ;;  %7115 = vmatpush.bf16.msrb.mxu3 %v11079_v23  ;;  %v6886_v17 = vadd.f32 %v6885_v25, %v6873_v36 }
 0x234   :  { %v15625_v22 = vld [vmem:[#allocation7 + $0xd64] sm:$0xf0] }
 0x235   :  { %v11622_v19 = vld [vmem:[#allocation7 + $0xac8] sm:$0xf]  ;;  %v11943_v51 = vor.u32 %v15625_v22, %v11942_v21  ;;  %7125 = vmatpush.bf16.msra.mxu0 %v11431_v26 }
 0x236   :  { %v15545_v24 = vld [vmem:[#allocation7 + $0xae4] sm:$0xf0] }
 0x237   :  { %v11046_v27 = vld [vmem:[#allocation7 + $0x648] sm:$0xf]  ;;  %v11623_v35 = vor.u32 %v15545_v24, %v11622_v19  ;;  %7151 = vmatpush.bf16.msrb.mxu2 %v11943_v51 }
 0x238   :  { %v15401_v30 = vld [vmem:[#allocation7 + $0x664] sm:$0xf0] }
 0x239   :  { %v11398_v33 = vld [vmem:[#allocation7 + $0x908] sm:$0xf]  ;;  %v11047_v41 = vor.u32 %v15401_v30, %v11046_v27  ;;  %7140 = vmatpush.bf16.msrb.mxu1 %v11623_v35 }
 0x23a   :  { %v15489_v34 = vld [vmem:[#allocation7 + $0x924] sm:$0xf0] }
 0x23b   :  { %v11910_v37 = vld [vmem:[#allocation7 + $0xd08] sm:$0xf]  ;;  %v11399_v45 = vor.u32 %v15489_v34, %v11398_v33  ;;  %7116 = vmatpush.bf16.msrb.mxu3 %v11047_v41 }
 0x23c   :  { %v15617_v38 = vld [vmem:[#allocation7 + $0xd24] sm:$0xf0] }
 0x23d   :  { %v11590_v42 = vld [vmem:[#allocation7 + $0xa88] sm:$0xf]  ;;  %v11911_v50 = vor.u32 %v15617_v38, %v11910_v37  ;;  %7126 = vmatpush.bf16.msra.mxu0 %v11399_v45  ;;  %v6898_v37 = vpop.f32.mrf.mxu2 }
 0x23e   :  { %v15537_v43 = vld [vmem:[#allocation7 + $0xaa4] sm:$0xf0]  ;;  %v16944_v41 = vadd.f32 %v6898_v37, %v6886_v17 }
 0x23f   :  { %v11014_v14 = vld [vmem:[#allocation7 + $0x608] sm:$0xf]  ;;  %v11591_v57 = vor.u32 %v15537_v43, %v11590_v42  ;;  %7152 = vmatpush.bf16.msrb.mxu2 %v11911_v50  ;;  %v6874_v42 = vpop.f32.mrf.mxu0 }
 0x240   :  { %v15393_v2 = vld [vmem:[#allocation7 + $0x624] sm:$0xf0] }
 0x241   :  { %v11366_v48 = vld [vmem:[#allocation7 + $0x8c8] sm:$0xf]  ;;  %v11015_v12 = vor.u32 %v15393_v2, %v11014_v14  ;;  %7141 = vmatpush.bf16.msrb.mxu1 %v11591_v57 }
 0x242   :  { %v15481_v53 = vld [vmem:[#allocation7 + $0x8e4] sm:$0xf0] }
 0x243   :  { %v12262_v55 = vld [vmem:[#allocation7 + $0xfc8] sm:$0xf]  ;;  %v11367_v3 = vor.u32 %v15481_v53, %v11366_v48  ;;  %7117 = vmatpush.bf16.msrb.mxu3 %v11015_v12 }
 0x244   :  { %v15705_v56 = vld [vmem:[#allocation7 + $0xfe4] sm:$0xf0] }
 0x245   :  { %v11878_v59 = vld [vmem:[#allocation7 + $0xcc8] sm:$0xf]  ;;  %v12263_v5 = vor.u32 %v15705_v56, %v12262_v55  ;;  %7127 = vmatpush.bf16.msra.mxu0 %v11367_v3 }
 0x246   :  { %v15609_v60 = vld [vmem:[#allocation7 + $0xce4] sm:$0xf0]  ;;  %7118 = vmatmul.bf16.vlgmr.msrb.gmra.mxu3 %v16857_v10 }
 0x247   :  { %v11558_v0 = vld [vmem:[#allocation7 + $0xa48] sm:$0xf]  ;;  %v11879_v28 = vor.u32 %v15609_v60, %v11878_v59  ;;  %7162 = vmatpush.bf16.msra.mxu3 %v12263_v5 }
 0x248   :  { %v15529_v46 = vld [vmem:[#allocation7 + $0xa64] sm:$0xf0] }
 0x249   :  { %v11334_v6 = vld [vmem:[#allocation7 + $0x888] sm:$0xf]  ;;  %v11559_v18 = vor.u32 %v15529_v46, %v11558_v0  ;;  %7153 = vmatpush.bf16.msrb.mxu2 %v11879_v28 }
 0x24a   :  { %v15473_v62 = vld [vmem:[#allocation7 + $0x8a4] sm:$0xf0] }
 0x24b   :  { %v12230_v13 = vld [vmem:[#allocation7 + $0xf88] sm:$0xf]  ;;  %v11335_v24 = vor.u32 %v15473_v62, %v11334_v6  ;;  %7142 = vmatpush.bf16.msrb.mxu1 %v11559_v18 }
 0x24c   :  { %v15697_v16 = vld [vmem:[#allocation7 + $0xfa4] sm:$0xf0] }
 0x24d   :  { %v11846_v21 = vld [vmem:[#allocation7 + $0xc88] sm:$0xf]  ;;  %v12231_v9 = vor.u32 %v15697_v16, %v12230_v13  ;;  %7128 = vmatpush.bf16.msra.mxu0 %v11335_v24  ;;  %v6900_v16 = vpop.f32.mrf.mxu2 }
 0x24e   :  { %v15601_v22 = vld [vmem:[#allocation7 + $0xca4] sm:$0xf0] }
 0x24f   :  { %v11526_v23 = vld [vmem:[#allocation7 + $0xa08] sm:$0xf]  ;;  %v11847_v51 = vor.u32 %v15601_v22, %v11846_v21  ;;  %7163 = vmatpush.bf16.msra.mxu3 %v12231_v9 }
 0x250   :  { %v15521_v19 = vld [vmem:[#allocation7 + $0xa24] sm:$0xf0] }
 0x251   :  { %v12774_v26 = vld [vmem:[#allocation7 + $0x13c8] sm:$0xf]  ;;  %v11527_v25 = vor.u32 %v15521_v19, %v11526_v23  ;;  %7154 = vmatpush.bf16.msrb.mxu2 %v11847_v51 }
 0x252   :  { %v15833_v27 = vld [vmem:[#allocation7 + $0x13e4] sm:$0xf0] }
 0x253   :  { %v11302_v30 = vld [vmem:[#allocation7 + $0x848] sm:$0xf]  ;;  %v12775_v43 = vor.u32 %v15833_v27, %v12774_v26  ;;  %7143 = vmatpush.bf16.msrb.mxu1 %v11527_v25 }
 0x254   :  { %v15465_v33 = vld [vmem:[#allocation7 + $0x864] sm:$0xf0] }
 0x255   :  { %v12198_v34 = vld [vmem:[#allocation7 + $0xf48] sm:$0xf]  ;;  %v11303_v14 = vor.u32 %v15465_v33, %v11302_v30 }
 0x256   :  { %v15689_v35 = vld [vmem:[#allocation7 + $0xf64] sm:$0xf0]  ;;  %7144 = vmatmul.bf16.vlgmr.msrb.gmra.mxu1 %v16850_v44 }
 0x257   :  { %v11814_v38 = vld [vmem:[#allocation7 + $0xc48] sm:$0xf]  ;;  %v12199_v2 = vor.u32 %v15689_v35, %v12198_v34  ;;  %7188 = vmatpush.bf16.msra.mxu1 %v12775_v43  ;;  %7129 = vmatpush.bf16.msra.mxu0 %v11303_v14 }
 0x258   :  { %v15593_v39 = vld [vmem:[#allocation7 + $0xc64] sm:$0xf0] }
 0x259   :  { %v12742_v45 = vld [vmem:[#allocation7 + $0x1388] sm:$0xf]  ;;  %v11815_v55 = vor.u32 %v15593_v39, %v11814_v38  ;;  %7164 = vmatpush.bf16.msra.mxu3 %v12199_v2 }
 0x25a   :  { %v15825_v48 = vld [vmem:[#allocation7 + $0x13a4] sm:$0xf0] }
 0x25b   :  { %v11270_v50 = vld [vmem:[#allocation7 + $0x808] sm:$0xf]  ;;  %v12743_v0 = vor.u32 %v15825_v48, %v12742_v45  ;;  %7155 = vmatpush.bf16.msrb.mxu2 %v11815_v55  ;;  %v6911_v45 = vpop.f32.mrf.mxu3 }
 0x25c   :  { %v15457_v53 = vld [vmem:[#allocation7 + $0x824] sm:$0xf0] }
 0x25d   :  { %v11782_v56 = vld [vmem:[#allocation7 + $0xc08] sm:$0xf]  ;;  %v11271_v3 = vor.u32 %v15457_v53, %v11270_v50  ;;  %7189 = vmatpush.bf16.msra.mxu1 %v12743_v0  ;;  %v6912_v50 = vadd.f32 %v6911_v45, %v16944_v41  ;;  %v6937_v53 = vpop.f32.mrf.mxu1 }
 0x25e   :  { %v12166_v57 = vld [vmem:[#allocation7 + $0xf08] sm:$0xf] }
 0x25f   :  { %v15681_v59 = vld [vmem:[#allocation7 + $0xf24] sm:$0xf0]  ;;  %7130 = vmatpush.bf16.msra.mxu0 %v11271_v3 }
 0x260   :  { %v15585_v60 = vld [vmem:[#allocation7 + $0xc24] sm:$0xf0]  ;;  %v12167_v5 = vor.u32 %v15681_v59, %v12166_v57 }
 0x261   :  { %v12518_v61 = vld [vmem:[#allocation7 + $0x11c8] sm:$0xf]  ;;  %v11783_v11 = vor.u32 %v15585_v60, %v11782_v56 }
 0x262   :  { %v15769_v12 = vld [vmem:[#allocation7 + $0x11e4] sm:$0xf0]  ;;  %7165 = vmatpush.bf16.msra.mxu3 %v12167_v5  ;;  %7131 = vmatmul.bf16.vlgmr.msra.gmra.mxu0 %v16855_v63 }
 0x263   :  { %v13030_v46 = vld [vmem:[#allocation7 + $0x15c8] sm:$0xf]  ;;  %v12519_v28 = vor.u32 %v15769_v12, %v12518_v61  ;;  %7156 = vmatpush.bf16.msrb.mxu2 %v11783_v11 }
 0x264   :  { %v15897_v36 = vld [vmem:[#allocation7 + $0x15e4] sm:$0xf0] }
 0x265   :  { %v12710_v6 = vld [vmem:[#allocation7 + $0x1348] sm:$0xf]  ;;  %v13031_v17 = vor.u32 %v15897_v36, %v13030_v46  ;;  %7175 = vmatpush.bf16.msrb.mxu0 %v12519_v28 }
 0x266   :  { %v15817_v7 = vld [vmem:[#allocation7 + $0x1364] sm:$0xf0]  ;;  %7157 = vmatmul.bf16.vlgmr.msrb.gmra.mxu2 %v16859_v15 }
 0x267   :  { %v12134_v62 = vld [vmem:[#allocation7 + $0xec8] sm:$0xf]  ;;  %v12711_v22 = vor.u32 %v15817_v7, %v12710_v6  ;;  %7201 = vmatpush.bf16.msra.mxu2 %v13031_v17  ;;  %v6924_v17 = vpop.f32.mrf.mxu0 }
 0x268   :  { %v15673_v13 = vld [vmem:[#allocation7 + $0xee4] sm:$0xf0] }
 0x269   :  { %v12486_v18 = vld [vmem:[#allocation7 + $0x1188] sm:$0xf]  ;;  %v12135_v24 = vor.u32 %v15673_v13, %v12134_v62  ;;  %7190 = vmatpush.bf16.msra.mxu1 %v12711_v22 }
 0x26a   :  { %v15761_v21 = vld [vmem:[#allocation7 + $0x11a4] sm:$0xf0] }
 0x26b   :  { %v12998_v23 = vld [vmem:[#allocation7 + $0x1588] sm:$0xf]  ;;  %v12487_v27 = vor.u32 %v15761_v21, %v12486_v18  ;;  %7166 = vmatpush.bf16.msra.mxu3 %v12135_v24 }
 0x26c   :  { %v15889_v19 = vld [vmem:[#allocation7 + $0x15a4] sm:$0xf0] }
 0x26d   :  { %v12678_v9 = vld [vmem:[#allocation7 + $0x1308] sm:$0xf]  ;;  %v12999_v33 = vor.u32 %v15889_v19, %v12998_v23  ;;  %7176 = vmatpush.bf16.msrb.mxu0 %v12487_v27  ;;  %v6925_v23 = vadd.f32 %v6924_v17, %v6912_v50  ;;  %v6913_v19 = vpop.f32.mrf.mxu3  ;;  %v6939_v27 = vpop.f32.mrf.mxu1 }
 0x26e   :  { %v15809_v26 = vld [vmem:[#allocation7 + $0x1324] sm:$0xf0] }
 0x26f   :  { %v12102_v30 = vld [vmem:[#allocation7 + $0xe88] sm:$0xf]  ;;  %v12679_v37 = vor.u32 %v15809_v26, %v12678_v9  ;;  %7202 = vmatpush.bf16.msra.mxu2 %v12999_v33 }
 0x270   :  { %v15665_v51 = vld [vmem:[#allocation7 + $0xea4] sm:$0xf0] }
 0x271   :  { %v12454_v34 = vld [vmem:[#allocation7 + $0x1148] sm:$0xf]  ;;  %v12103_v39 = vor.u32 %v15665_v51, %v12102_v30  ;;  %7191 = vmatpush.bf16.msra.mxu1 %v12679_v37 }
 0x272   :  { %v15753_v35 = vld [vmem:[#allocation7 + $0x1164] sm:$0xf0] }
 0x273   :  { %v12966_v25 = vld [vmem:[#allocation7 + $0x1548] sm:$0xf]  ;;  %v12455_v14 = vor.u32 %v15753_v35, %v12454_v34  ;;  %7167 = vmatpush.bf16.msra.mxu3 %v12103_v39  ;;  %v6938_v35 = vadd.f32 %v6937_v53, %v6925_v23 }
 0x274   :  { %v15881_v38 = vld [vmem:[#allocation7 + $0x1564] sm:$0xf0] }
 0x275   :  { %v12646_v42 = vld [vmem:[#allocation7 + $0x12c8] sm:$0xf]  ;;  %v12967_v55 = vor.u32 %v15881_v38, %v12966_v25  ;;  %7177 = vmatpush.bf16.msrb.mxu0 %v12455_v14 }
 0x276   :  { %v15801_v43 = vld [vmem:[#allocation7 + $0x12e4] sm:$0xf0] }
 0x277   :  { %v12070_v2 = vld [vmem:[#allocation7 + $0xe48] sm:$0xf]  ;;  %v12647_v59 = vor.u32 %v15801_v43, %v12646_v42  ;;  %7203 = vmatpush.bf16.msra.mxu2 %v12967_v55 }
 0x278   :  { %v15657_v48 = vld [vmem:[#allocation7 + $0xe64] sm:$0xf0] }
 0x279   :  { %v12422_v56 = vld [vmem:[#allocation7 + $0x1108] sm:$0xf]  ;;  %v12071_v12 = vor.u32 %v15657_v48, %v12070_v2  ;;  %7192 = vmatpush.bf16.msra.mxu1 %v12647_v59  ;;  %v6950_v59 = vpop.f32.mrf.mxu2 }
 0x27a   :  { %v15745_v57 = vld [vmem:[#allocation7 + $0x1124] sm:$0xf0] }
 0x27b   :  { %v12934_v60 = vld [vmem:[#allocation7 + $0x1508] sm:$0xf]  ;;  %v12423_v36 = vor.u32 %v15745_v57, %v12422_v56  ;;  %7168 = vmatpush.bf16.msra.mxu3 %v12071_v12  ;;  %v16951_v12 = vadd.f32 %v6950_v59, %v6938_v35 }
 0x27c   :  { %v15873_v61 = vld [vmem:[#allocation7 + $0x1524] sm:$0xf0] }
 0x27d   :  { %v12614_v0 = vld [vmem:[#allocation7 + $0x1288] sm:$0xf]  ;;  %v12935_v41 = vor.u32 %v15873_v61, %v12934_v60  ;;  %7178 = vmatpush.bf16.msrb.mxu0 %v12423_v36 }
 0x27e   :  { %v15793_v46 = vld [vmem:[#allocation7 + $0x12a4] sm:$0xf0] }
 0x27f   :  { %v12038_v3 = vld [vmem:[#allocation7 + $0xe08] sm:$0xf]  ;;  %v12615_v62 = vor.u32 %v15793_v46, %v12614_v0  ;;  %7204 = vmatpush.bf16.msra.mxu2 %v12935_v41  ;;  %v6926_v0 = vpop.f32.mrf.mxu0 }
 0x280   :  { %v15649_v5 = vld [vmem:[#allocation7 + $0xe24] sm:$0xf0] }
 0x281   :  { %v12390_v6 = vld [vmem:[#allocation7 + $0x10c8] sm:$0xf]  ;;  %v12039_v18 = vor.u32 %v15649_v5, %v12038_v3  ;;  %7193 = vmatpush.bf16.msra.mxu1 %v12615_v62 }
 0x282   :  { %v15737_v7 = vld [vmem:[#allocation7 + $0x10e4] sm:$0xf0] }
 0x283   :  { %v13286_v11 = vld [vmem:[#allocation7 + $0x17c8] sm:$0xf]  ;;  %v12391_v24 = vor.u32 %v15737_v7, %v12390_v6  ;;  %7169 = vmatpush.bf16.msra.mxu3 %v12039_v18 }
 0x284   :  { %v15961_v28 = vld [vmem:[#allocation7 + $0x17e4] sm:$0xf0] }
 0x285   :  { %v12902_v13 = vld [vmem:[#allocation7 + $0x14c8] sm:$0xf]  ;;  %v13287_v9 = vor.u32 %v15961_v28, %v13286_v11  ;;  %7179 = vmatpush.bf16.msrb.mxu0 %v12391_v24 }
 0x286   :  { %v15865_v16 = vld [vmem:[#allocation7 + $0x14e4] sm:$0xf0]  ;;  %7170 = vmatmul.bf16.vlgmr.msra.gmra.mxu3 %v16878_v32 }
 0x287   :  { %v12582_v21 = vld [vmem:[#allocation7 + $0x1248] sm:$0xf]  ;;  %v12903_v30 = vor.u32 %v15865_v16, %v12902_v13  ;;  %7214 = vmatpush.bf16.msrb.mxu3 %v13287_v9 }
 0x288   :  { %v15785_v22 = vld [vmem:[#allocation7 + $0x1264] sm:$0xf0] }
 0x289   :  { %v12358_v26 = vld [vmem:[#allocation7 + $0x1088] sm:$0xf]  ;;  %v12583_v37 = vor.u32 %v15785_v22, %v12582_v21  ;;  %7205 = vmatpush.bf16.msra.mxu2 %v12903_v30 }
 0x28a   :  { %v15729_v51 = vld [vmem:[#allocation7 + $0x10a4] sm:$0xf0] }
 0x28b   :  { %v13254_v33 = vld [vmem:[#allocation7 + $0x1788] sm:$0xf]  ;;  %v12359_v43 = vor.u32 %v15729_v51, %v12358_v26  ;;  %7194 = vmatpush.bf16.msra.mxu1 %v12583_v37 }
 0x28c   :  { %v15953_v34 = vld [vmem:[#allocation7 + $0x17a4] sm:$0xf0] }
 0x28d   :  { %v12870_v25 = vld [vmem:[#allocation7 + $0x1488] sm:$0xf]  ;;  %v13255_v45 = vor.u32 %v15953_v34, %v13254_v33  ;;  %7180 = vmatpush.bf16.msrb.mxu0 %v12359_v43  ;;  %v6952_v34 = vpop.f32.mrf.mxu2 }
 0x28e   :  { %v15857_v38 = vld [vmem:[#allocation7 + $0x14a4] sm:$0xf0] }
 0x28f   :  { %v12550_v39 = vld [vmem:[#allocation7 + $0x1208] sm:$0xf]  ;;  %v12871_v50 = vor.u32 %v15857_v38, %v12870_v25  ;;  %7215 = vmatpush.bf16.msrb.mxu3 %v13255_v45 }
 0x290   :  { %v15777_v42 = vld [vmem:[#allocation7 + $0x1224] sm:$0xf0] }
 0x291   :  { %v13798_v14 = vld [vmem:[#allocation7 + $0x1bc8] sm:$0xf]  ;;  %v12551_v53 = vor.u32 %v15777_v42, %v12550_v39  ;;  %7206 = vmatpush.bf16.msra.mxu2 %v12871_v50 }
 0x292   :  { %v16089_v2 = vld [vmem:[#allocation7 + $0x1be4] sm:$0xf0] }
 0x293   :  { %v12326_v48 = vld [vmem:[#allocation7 + $0x1048] sm:$0xf]  ;;  %v13799_v46 = vor.u32 %v16089_v2, %v13798_v14  ;;  %7195 = vmatpush.bf16.msra.mxu1 %v12551_v53 }
 0x294   :  { %v15721_v55 = vld [vmem:[#allocation7 + $0x1064] sm:$0xf0] }
 0x295   :  { %v13222_v56 = vld [vmem:[#allocation7 + $0x1748] sm:$0xf]  ;;  %v12327_v3 = vor.u32 %v15721_v55, %v12326_v48 }
 0x296   :  { %v15945_v57 = vld [vmem:[#allocation7 + $0x1764] sm:$0xf0]  ;;  %7196 = vmatmul.bf16.vlgmr.msra.gmra.mxu1 %v16871_v1 }
 0x297   :  { %v12838_v60 = vld [vmem:[#allocation7 + $0x1448] sm:$0xf]  ;;  %v13223_v5 = vor.u32 %v15945_v57, %v13222_v56  ;;  %7240 = vmatpush.bf16.msrb.mxu1 %v13799_v46  ;;  %7181 = vmatpush.bf16.msrb.mxu0 %v12327_v3 }
 0x298   :  { %v15849_v61 = vld [vmem:[#allocation7 + $0x1464] sm:$0xf0] }
 0x299   :  { %v13766_v36 = vld [vmem:[#allocation7 + $0x1b88] sm:$0xf]  ;;  %v12839_v11 = vor.u32 %v15849_v61, %v12838_v60  ;;  %7216 = vmatpush.bf16.msrb.mxu3 %v13223_v5 }
 0x29a   :  { %v16081_v6 = vld [vmem:[#allocation7 + $0x1ba4] sm:$0xf0] }
 0x29b   :  { %v12294_v41 = vld [vmem:[#allocation7 + $0x1008] sm:$0xf]  ;;  %v13767_v21 = vor.u32 %v16081_v6, %v13766_v36  ;;  %7207 = vmatpush.bf16.msra.mxu2 %v12839_v11  ;;  %v6963_v36 = vpop.f32.mrf.mxu3 }
 0x29c   :  { %v15713_v7 = vld [vmem:[#allocation7 + $0x1024] sm:$0xf0] }
 0x29d   :  { %v12806_v28 = vld [vmem:[#allocation7 + $0x1408] sm:$0xf]  ;;  %v12295_v19 = vor.u32 %v15713_v7, %v12294_v41  ;;  %7241 = vmatpush.bf16.msrb.mxu1 %v13767_v21  ;;  %v6964_v41 = vadd.f32 %v6963_v36, %v16951_v12  ;;  %v6989_v7 = vpop.f32.mrf.mxu1 }
 0x29e   :  { %v13190_v62 = vld [vmem:[#allocation7 + $0x1708] sm:$0xf] }
 0x29f   :  { %v15937_v13 = vld [vmem:[#allocation7 + $0x1724] sm:$0xf0]  ;;  %7182 = vmatpush.bf16.msrb.mxu0 %v12295_v19 }
 0x2a0   :  { %v15841_v16 = vld [vmem:[#allocation7 + $0x1424] sm:$0xf0]  ;;  %v13191_v24 = vor.u32 %v15937_v13, %v13190_v62 }
 0x2a1   :  { %v13542_v17 = vld [vmem:[#allocation7 + $0x19c8] sm:$0xf]  ;;  %v12807_v27 = vor.u32 %v15841_v16, %v12806_v28 }
 0x2a2   :  { %v16025_v18 = vld [vmem:[#allocation7 + $0x19e4] sm:$0xf0]  ;;  %7217 = vmatpush.bf16.msrb.mxu3 %v13191_v24  ;;  %7183 = vmatmul.bf16.vlgmr.msrb.gmra.mxu0 %v16876_v29 }
 0x2a3   :  { %v14054_v22 = vld [vmem:[#allocation7 + $0x1dc8] sm:$0xf]  ;;  %v13543_v30 = vor.u32 %v16025_v18, %v13542_v17  ;;  %7208 = vmatpush.bf16.msra.mxu2 %v12807_v27 }
 0x2a4   :  { %v16153_v23 = vld [vmem:[#allocation7 + $0x1de4] sm:$0xf0] }
 0x2a5   :  { %v13734_v9 = vld [vmem:[#allocation7 + $0x1b48] sm:$0xf]  ;;  %v14055_v35 = vor.u32 %v16153_v23, %v14054_v22  ;;  %7227 = vmatpush.bf16.msra.mxu0 %v13543_v30 }
 0x2a6   :  { %v16073_v26 = vld [vmem:[#allocation7 + $0x1b64] sm:$0xf0]  ;;  %7209 = vmatmul.bf16.vlgmr.msra.gmra.mxu2 %v16880_v40 }
 0x2a7   :  { %v13158_v51 = vld [vmem:[#allocation7 + $0x16c8] sm:$0xf]  ;;  %v13735_v38 = vor.u32 %v16073_v26, %v13734_v9  ;;  %7253 = vmatpush.bf16.msrb.mxu2 %v14055_v35  ;;  %v6976_v35 = vpop.f32.mrf.mxu0 }
 0x2a8   :  { %v15929_v33 = vld [vmem:[#allocation7 + $0x16e4] sm:$0xf0] }
 0x2a9   :  { %v13510_v37 = vld [vmem:[#allocation7 + $0x1988] sm:$0xf]  ;;  %v13159_v43 = vor.u32 %v15929_v33, %v13158_v51  ;;  %7242 = vmatpush.bf16.msrb.mxu1 %v13735_v38 }
 0x2aa   :  { %v16017_v25 = vld [vmem:[#allocation7 + $0x19a4] sm:$0xf0] }
 0x2ab   :  { %v14022_v39 = vld [vmem:[#allocation7 + $0x1d88] sm:$0xf]  ;;  %v13511_v2 = vor.u32 %v16017_v25, %v13510_v37  ;;  %7218 = vmatpush.bf16.msrb.mxu3 %v13159_v43 }
 0x2ac   :  { %v16145_v42 = vld [vmem:[#allocation7 + $0x1da4] sm:$0xf0] }
 0x2ad   :  { %v13702_v45 = vld [vmem:[#allocation7 + $0x1b08] sm:$0xf]  ;;  %v14023_v55 = vor.u32 %v16145_v42, %v14022_v39  ;;  %7228 = vmatpush.bf16.msra.mxu0 %v13511_v2  ;;  %v6977_v39 = vadd.f32 %v6976_v35, %v6964_v41  ;;  %v6965_v42 = vpop.f32.mrf.mxu3  ;;  %v6991_v2 = vpop.f32.mrf.mxu1  ;;  %v15253_v35 = vld [vmem:[#allocation7 + $0x1cc] sm:$0xf] }
 0x2ae   :  { %v16065_v14 = vld [vmem:[#allocation7 + $0x1b24] sm:$0xf0] }
 0x2af   :  { %v13126_v48 = vld [vmem:[#allocation7 + $0x1688] sm:$0xf]  ;;  %v13703_v59 = vor.u32 %v16065_v14, %v13702_v45  ;;  %7254 = vmatpush.bf16.msrb.mxu2 %v14023_v55 }
 0x2b0   :  { %v15921_v50 = vld [vmem:[#allocation7 + $0x16a4] sm:$0xf0] }
 0x2b1   :  { %v13478_v56 = vld [vmem:[#allocation7 + $0x1948] sm:$0xf]  ;;  %v13127_v61 = vor.u32 %v15921_v50, %v13126_v48  ;;  %7243 = vmatpush.bf16.msrb.mxu1 %v13703_v59 }
 0x2b2   :  { %v16009_v57 = vld [vmem:[#allocation7 + $0x1964] sm:$0xf0] }
 0x2b3   :  { %v13990_v53 = vld [vmem:[#allocation7 + $0x1d48] sm:$0xf]  ;;  %v13479_v3 = vor.u32 %v16009_v57, %v13478_v56  ;;  %7219 = vmatpush.bf16.msrb.mxu3 %v13127_v61  ;;  %v6990_v57 = vadd.f32 %v6989_v7, %v6977_v39  ;;  %v10984_v39 = vld [vmem:[#allocation7 + $0x5e8] sm:$0xf0] }
 0x2b4   :  { %v16137_v60 = vld [vmem:[#allocation7 + $0x1d64] sm:$0xf0] }
 0x2b5   :  { %v13670_v0 = vld [vmem:[#allocation7 + $0x1ac8] sm:$0xf]  ;;  %v13991_v11 = vor.u32 %v16137_v60, %v13990_v53  ;;  %7229 = vmatpush.bf16.msra.mxu0 %v13479_v3  ;;  %v15317_v3 = vld [vmem:[#allocation7 + $0x3cc] sm:$0xf] }
 0x2b6   :  { %v16057_v46 = vld [vmem:[#allocation7 + $0x1ae4] sm:$0xf0] }
 0x2b7   :  { %v13094_v5 = vld [vmem:[#allocation7 + $0x1648] sm:$0xf]  ;;  %v13671_v13 = vor.u32 %v16057_v46, %v13670_v0  ;;  %7255 = vmatpush.bf16.msrb.mxu2 %v13991_v11 }
 0x2b8   :  { %v15913_v6 = vld [vmem:[#allocation7 + $0x1664] sm:$0xf0] }
 0x2b9   :  { %v13446_v28 = vld [vmem:[#allocation7 + $0x1908] sm:$0xf]  ;;  %v13095_v18 = vor.u32 %v15913_v6, %v13094_v5  ;;  %7244 = vmatpush.bf16.msrb.mxu1 %v13671_v13  ;;  %v10728_v5 = vld [vmem:[#allocation7 + $0x3e8] sm:$0xf0]  ;;  %v7002_v13 = vpop.f32.mrf.mxu2 }
 0x2ba   :  { %v16001_v62 = vld [vmem:[#allocation7 + $0x1924] sm:$0xf0] }
 0x2bb   :  { %v13958_v16 = vld [vmem:[#allocation7 + $0x1d08] sm:$0xf]  ;;  %v13447_v23 = vor.u32 %v16001_v62, %v13446_v28  ;;  %7220 = vmatpush.bf16.msrb.mxu3 %v13095_v18  ;;  %v16958_v18 = vadd.f32 %v7002_v13, %v6990_v57 }
 0x2bc   :  { %v16129_v17 = vld [vmem:[#allocation7 + $0x1d24] sm:$0xf0] }
 0x2bd   :  { %v13638_v21 = vld [vmem:[#allocation7 + $0x1a88] sm:$0xf]  ;;  %v13959_v12 = vor.u32 %v16129_v17, %v13958_v16  ;;  %7230 = vmatpush.bf16.msra.mxu0 %v13447_v23  ;;  %v15309_v23 = vld [vmem:[#allocation7 + $0x38c] sm:$0xf] }
 0x2be   :  { %v16049_v22 = vld [vmem:[#allocation7 + $0x1aa4] sm:$0xf0] }
 0x2bf   :  { %v13062_v19 = vld [vmem:[#allocation7 + $0x1608] sm:$0xf]  ;;  %v13639_v51 = vor.u32 %v16049_v22, %v13638_v21  ;;  %7256 = vmatpush.bf16.msrb.mxu2 %v13959_v12  ;;  %v6978_v21 = vpop.f32.mrf.mxu0  ;;  %v10731_v22 = vor.u32 %v15317_v3, %v10728_v5  ;;  %v10632_v3 = vld [vmem:[#allocation7 + $0x328] sm:$0xf0] }
 0x2c0   :  { %v15905_v24 = vld [vmem:[#allocation7 + $0x1624] sm:$0xf0]  ;;  %v15285_v21 = vld [vmem:[#allocation7 + $0x2cc] sm:$0xf] }
 0x2c1   :  { %v13414_v9 = vld [vmem:[#allocation7 + $0x18c8] sm:$0xf]  ;;  %v13063_v37 = vor.u32 %v15905_v24, %v13062_v19  ;;  %7245 = vmatpush.bf16.msrb.mxu1 %v13639_v51 }
 0x2c2   :  { %v15993_v26 = vld [vmem:[#allocation7 + $0x18e4] sm:$0xf0] }
 0x2c3   :  { %v14310_v27 = vld [vmem:[#allocation7 + $0x1fc8] sm:$0xf]  ;;  %v13415_v43 = vor.u32 %v15993_v26, %v13414_v9  ;;  %7221 = vmatpush.bf16.msrb.mxu3 %v13063_v37  ;;  %v10696_v9 = vld [vmem:[#allocation7 + $0x3a8] sm:$0xf0] }
 0x2c4   :  { %v16217_v30 = vld [vmem:[#allocation7 + $0x1fe4] sm:$0xf0]  ;;  %v10472_v37 = vld [vmem:[#allocation7 + $0x1e8] sm:$0xf0] }
 0x2c5   :  { %v13926_v33 = vld [vmem:[#allocation7 + $0x1cc8] sm:$0xf]  ;;  %v14311_v45 = vor.u32 %v16217_v30, %v14310_v27  ;;  %7231 = vmatpush.bf16.msra.mxu0 %v13415_v43 }
 0x2c6   :  { %v16121_v34 = vld [vmem:[#allocation7 + $0x1ce4] sm:$0xf0]  ;;  %7222 = vmatmul.bf16.vlgmr.msrb.gmra.mxu3 %v16888_v52 }
 0x2c7   :  { %v13606_v25 = vld [vmem:[#allocation7 + $0x1a48] sm:$0xf]  ;;  %v13927_v48 = vor.u32 %v16121_v34, %v13926_v33  ;;  %7266 = vmatpush.bf16.msra.mxu3 %v14311_v45  ;;  %v15301_v45 = vld [vmem:[#allocation7 + $0x34c] sm:$0xf] }
 0x2c8   :  { %v16041_v38 = vld [vmem:[#allocation7 + $0x1a64] sm:$0xf0] }
 0x2c9   :  { %v13382_v14 = vld [vmem:[#allocation7 + $0x1888] sm:$0xf]  ;;  %v13607_v59 = vor.u32 %v16041_v38, %v13606_v25  ;;  %7257 = vmatpush.bf16.msrb.mxu2 %v13927_v48  ;;  %v10699_v25 = vor.u32 %v15309_v23, %v10696_v9  ;;  %v15381_v38 = vld [vmem:[#allocation7 + $0x5cc] sm:$0xf]  ;;  %v10475_v48 = vor.u32 %v15253_v35, %v10472_v37  ;;  %v7015_v23 = vpop.f32.mrf.mxu3 }
 0x2ca   :  { %v15985_v50 = vld [vmem:[#allocation7 + $0x18a4] sm:$0xf0]  ;;  %v10987_v57 = vor.u32 %v15381_v38, %v10984_v39  ;;  %v10888_v35 = vld [vmem:[#allocation7 + $0x528] sm:$0xf0] }
 0x2cb   :  { %v14278_v55 = vld [vmem:[#allocation7 + $0x1f88] sm:$0xf]  ;;  %v13383_v46 = vor.u32 %v15985_v50, %v13382_v14  ;;  %7246 = vmatpush.bf16.msrb.mxu1 %v13607_v59  ;;  %v10664_v14 = vld [vmem:[#allocation7 + $0x368] sm:$0xf0] }
 0x2cc   :  { %v16209_v56 = vld [vmem:[#allocation7 + $0x1fa4] sm:$0xf0]  ;;  %v15245_v59 = vld [vmem:[#allocation7 + $0x18c] sm:$0xf] }
 0x2cd   :  { %v13894_v53 = vld [vmem:[#allocation7 + $0x1c88] sm:$0xf]  ;;  %v14279_v36 = vor.u32 %v16209_v56, %v14278_v55  ;;  %7232 = vmatpush.bf16.msra.mxu0 %v13383_v46  ;;  %v7004_v56 = vpop.f32.mrf.mxu2  ;;  %v10568_v38 = vld [vmem:[#allocation7 + $0x2a8] sm:$0xf0] }
 0x2ce   :  { %v16113_v60 = vld [vmem:[#allocation7 + $0x1ca4] sm:$0xf0]  ;;  %v10856_v56 = vld [vmem:[#allocation7 + $0x4e8] sm:$0xf0] }
 0x2cf   :  { %v13574_v61 = vld [vmem:[#allocation7 + $0x1a08] sm:$0xf]  ;;  %v13895_v41 = vor.u32 %v16113_v60, %v13894_v53  ;;  %7267 = vmatpush.bf16.msra.mxu3 %v14279_v36  ;;  %v10440_v53 = vld [vmem:[#allocation7 + $0x1a8] sm:$0xf0]  ;;  %v10667_v60 = vor.u32 %v15301_v45, %v10664_v14 }
 0x2d0   :  { %v16033_v0 = vld [vmem:[#allocation7 + $0x1a24] sm:$0xf0]  ;;  %v15293_v36 = vld [vmem:[#allocation7 + $0x30c] sm:$0xf]  ;;  %v10443_v5 = vor.u32 %v15245_v59, %v10440_v53 }
 0x2d1   :  { %v13350_v6 = vld [vmem:[#allocation7 + $0x1848] sm:$0xf]  ;;  %v13575_v7 = vor.u32 %v16033_v0, %v13574_v61  ;;  %7258 = vmatpush.bf16.msrb.mxu2 %v13895_v41  ;;  %v15373_v61 = vld [vmem:[#allocation7 + $0x58c] sm:$0xf]  ;;  %v10635_v13 = vor.u32 %v15293_v36, %v10632_v3 }
 0x2d2   :  { %v15977_v11 = vld [vmem:[#allocation7 + $0x1864] sm:$0xf0]  ;;  %v10952_v0 = vld [vmem:[#allocation7 + $0x5a8] sm:$0xf0] }
 0x2d3   :  { %v14246_v28 = vld [vmem:[#allocation7 + $0x1f48] sm:$0xf]  ;;  %v13351_v19 = vor.u32 %v15977_v11, %v13350_v6  ;;  %7247 = vmatpush.bf16.msrb.mxu1 %v13575_v7  ;;  %v10955_v11 = vor.u32 %v15373_v61, %v10952_v0  ;;  %v15365_v7 = vld [vmem:[#allocation7 + $0x54c] sm:$0xf]  ;;  %v7017_v0 = vpop.f32.mrf.mxu3 }
 0x2d4   :  { %v16201_v62 = vld [vmem:[#allocation7 + $0x1f64] sm:$0xf0]  ;;  %v15221_v45 = vld [vmem:[#allocation7 + $0xcc] sm:$0xf] }
 0x2d5   :  { %v13862_v16 = vld [vmem:[#allocation7 + $0x1c48] sm:$0xf]  ;;  %v14247_v24 = vor.u32 %v16201_v62, %v14246_v28  ;;  %7233 = vmatpush.bf16.msra.mxu0 %v13351_v19  ;;  %v15237_v28 = vld [vmem:[#allocation7 + $0x14c] sm:$0xf] }
 0x2d6   :  { %v16105_v17 = vld [vmem:[#allocation7 + $0x1c64] sm:$0xf0]  ;;  %7248 = vmatmul.bf16.vlgmr.msrb.gmra.mxu1 %v16893_v20  ;;  %v10408_v62 = vld [vmem:[#allocation7 + $0x168] sm:$0xf0] }
 0x2d7   :  { %v13318_v12 = vld [vmem:[#allocation7 + $0x1808] sm:$0xf]  ;;  %v13863_v27 = vor.u32 %v16105_v17, %v13862_v16  ;;  %7292 = vmatpush.bf16.msra.mxu1 %v10731_v22  ;;  %7268 = vmatpush.bf16.msra.mxu3 %v14247_v24  ;;  %v10920_v16 = vld [vmem:[#allocation7 + $0x568] sm:$0xf0]  ;;  %v10411_v19 = vor.u32 %v15237_v28, %v10408_v62 }
 0x2d8   :  { %v15969_v26 = vld [vmem:[#allocation7 + $0x1824] sm:$0xf0]  ;;  %v10600_v22 = vld [vmem:[#allocation7 + $0x2e8] sm:$0xf0] }
 0x2d9   :  { %v13830_v30 = vld [vmem:[#allocation7 + $0x1c08] sm:$0xf]  ;;  %v13319_v42 = vor.u32 %v15969_v26, %v13318_v12  ;;  %7259 = vmatpush.bf16.msrb.mxu2 %v13863_v27  ;;  %v7016_v12 = vadd.f32 %v7015_v23, %v16958_v18  ;;  %v7041_v26 = vpop.f32.mrf.mxu1  ;;  %v10923_v27 = vor.u32 %v15365_v7, %v10920_v16  ;;  %v10344_v14 = vld [vmem:[#allocation7 + $0xe8] sm:$0xf0] }
 0x2da   :  { %v14214_v51 = vld [vmem:[#allocation7 + $0x1f08] sm:$0xf]  ;;  %v15269_v53 = vld [vmem:[#allocation7 + $0x24c] sm:$0xf] }
 0x2db   :  { %v16193_v33 = vld [vmem:[#allocation7 + $0x1f24] sm:$0xf0]  ;;  %7293 = vmatpush.bf16.msra.mxu1 %v10699_v25  ;;  %7234 = vmatpush.bf16.msra.mxu0 %v13319_v42  ;;  %v15277_v25 = vld [vmem:[#allocation7 + $0x28c] sm:$0xf] }
 0x2dc   :  { %v16097_v34 = vld [vmem:[#allocation7 + $0x1c24] sm:$0xf0]  ;;  %v14215_v43 = vor.u32 %v16193_v33, %v14214_v51  ;;  %v10376_v51 = vld [vmem:[#allocation7 + $0x128] sm:$0xf0]  ;;  %v10603_v33 = vor.u32 %v15285_v21, %v10600_v22 }
 0x2dd   :  { %v13831_v2 = vor.u32 %v16097_v34, %v13830_v30  ;;  %v14182_v50 = vld [vmem:[#allocation7 + $0x1ec8] sm:$0xf]  ;;  %v15229_v30 = vld [vmem:[#allocation7 + $0x10c] sm:$0xf] }
 0x2de   :  { %v16185_v55 = vld [vmem:[#allocation7 + $0x1ee4] sm:$0xf0]  ;;  %7269 = vmatpush.bf16.msra.mxu3 %v14215_v43  ;;  %7235 = vmatmul.bf16.vlgmr.msra.gmra.mxu0 %v16896_v47  ;;  %v15357_v34 = vld [vmem:[#allocation7 + $0x50c] sm:$0xf]  ;;  %v10379_v39 = vor.u32 %v15229_v30, %v10376_v51 }
 0x2df   :  { %v14183_v46 = vor.u32 %v16185_v55, %v14182_v50  ;;  %7260 = vmatpush.bf16.msrb.mxu2 %v13831_v2  ;;  %7279 = vmatpush.bf16.msrb.mxu0 %v10475_v48  ;;  %v14150_v6 = vld [vmem:[#allocation7 + $0x1e88] sm:$0xf]  ;;  %v10891_v18 = vor.u32 %v15357_v34, %v10888_v35  ;;  %v15445_v2 = vld [vmem:[#allocation7 + $0x7cc] sm:$0xf]  ;;  %v10571_v50 = vor.u32 %v15277_v25, %v10568_v38 }
 0x2e0   :  { %v16177_v41 = vld [vmem:[#allocation7 + $0x1ea4] sm:$0xf0]  ;;  %7294 = vmatpush.bf16.msra.mxu1 %v10667_v60  ;;  %v11240_v48 = vld [vmem:[#allocation7 + $0x7e8] sm:$0xf0] }
 0x2e1   :  { %v14151_v17 = vor.u32 %v16177_v41, %v14150_v6  ;;  %v14118_v24 = vld [vmem:[#allocation7 + $0x1e48] sm:$0xf]  ;;  %v15349_v55 = vld [vmem:[#allocation7 + $0x4cc] sm:$0xf]  ;;  %v11243_v36 = vor.u32 %v15445_v2, %v11240_v48 }
 0x2e2   :  { %7261 = vmatmul.bf16.vlgmr.msrb.gmra.mxu2 %v16898_v54  ;;  %7270 = vmatpush.bf16.msra.mxu3 %v14183_v46  ;;  %v16169_v9 = vld [vmem:[#allocation7 + $0x1e64] sm:$0xf0]  ;;  %v10536_v60 = vld [vmem:[#allocation7 + $0x268] sm:$0xf0]  ;;  %v10347_v46 = vor.u32 %v15221_v45, %v10344_v14  ;;  %v10859_v6 = vor.u32 %v15349_v55, %v10856_v56 }
 0x2e3   :  { %7305 = vmatpush.bf16.msra.mxu2 %v10987_v57  ;;  %7280 = vmatpush.bf16.msrb.mxu0 %v10443_v5  ;;  %v14119_v37 = vor.u32 %v16169_v9, %v14118_v24  ;;  %v14086_v42 = vld [vmem:[#allocation7 + $0x1e08] sm:$0xf]  ;;  %v7028_v57 = vpop.f32.mrf.mxu0  ;;  %v15213_v3 = vld [vmem:[#allocation7 + $0x8c] sm:$0xf]  ;;  %v7043_v5 = vpop.f32.mrf.mxu1 }
 0x2e4   :  { %7295 = vmatpush.bf16.msra.mxu1 %v10635_v13  ;;  %v16161_v43 = vld [vmem:[#allocation7 + $0x1e24] sm:$0xf0]  ;;  %v7029_v61 = vadd.f32 %v7028_v57, %v7016_v12  ;;  %v10312_v41 = vld [vmem:[#allocation7 + $0xa8] sm:$0xf0]  ;;  %v10539_v13 = vor.u32 %v15269_v53, %v10536_v60 }
 0x2e5   :  { %v14087_v59 = vor.u32 %v16161_v43, %v14086_v42  ;;  %v11208_v28 = vld [vmem:[#allocation7 + $0x7a8] sm:$0xf0]  ;;  %v10315_v22 = vor.u32 %v15213_v3, %v10312_v41 }
 0x2e6   :  { %7271 = vmatpush.bf16.msra.mxu3 %v14151_v17  ;;  %v7042_v62 = vadd.f32 %v7041_v26, %v7029_v61  ;;  %v15341_v7 = vld [vmem:[#allocation7 + $0x48c] sm:$0xf] }
 0x2e7   :  { %7306 = vmatpush.bf16.msra.mxu2 %v10955_v11  ;;  %7281 = vmatpush.bf16.msrb.mxu0 %v10411_v19  ;;  %v15437_v11 = vld [vmem:[#allocation7 + $0x78c] sm:$0xf] }
 0x2e8   :  { %7296 = vmatpush.bf16.msra.mxu1 %v10603_v33  ;;  %v10824_v16 = vld [vmem:[#allocation7 + $0x4a8] sm:$0xf0]  ;;  %v11211_v23 = vor.u32 %v15437_v11, %v11208_v28  ;;  %v7054_v33 = vpop.f32.mrf.mxu2 }
 0x2e9   :  { %v15261_v17 = vld [vmem:[#allocation7 + $0x20c] sm:$0xf]  ;;  %v10827_v12 = vor.u32 %v15341_v7, %v10824_v16 }
 0x2ea   :  { %7272 = vmatpush.bf16.msra.mxu3 %v14119_v37  ;;  %v10504_v21 = vld [vmem:[#allocation7 + $0x228] sm:$0xf0]  ;;  %v16965_v37 = vadd.f32 %v7054_v33, %v7042_v62 }
 0x2eb   :  { %7307 = vmatpush.bf16.msra.mxu2 %v10923_v27  ;;  %7282 = vmatpush.bf16.msrb.mxu0 %v10379_v39  ;;  %v15573_v19 = vld [vmem:[#allocation7 + $0xbcc] sm:$0xf]  ;;  %v10507_v26 = vor.u32 %v15261_v17, %v10504_v21  ;;  %v7030_v25 = vpop.f32.mrf.mxu0 }
 0x2ec   :  { %7297 = vmatpush.bf16.msra.mxu1 %v10571_v50  ;;  %v11752_v24 = vld [vmem:[#allocation7 + $0xbe8] sm:$0xf0] }
 0x2ed   :  { %v15205_v9 = vld [vmem:[#allocation7 + $0x4c] sm:$0xf]  ;;  %v11755_v38 = vor.u32 %v15573_v19, %v11752_v24 }
 0x2ee   :  { %7273 = vmatpush.bf16.msra.mxu3 %v14087_v59  ;;  %v10280_v27 = vld [vmem:[#allocation7 + $0x68] sm:$0xf0] }
 0x2ef   :  { %7308 = vmatpush.bf16.msra.mxu2 %v10891_v18  ;;  %7283 = vmatpush.bf16.msrb.mxu0 %v10347_v46  ;;  %v15429_v30 = vld [vmem:[#allocation7 + $0x74c] sm:$0xf]  ;;  %v10283_v42 = vor.u32 %v15205_v9, %v10280_v27 }
 0x2f0   :  { %v11176_v51 = vld [vmem:[#allocation7 + $0x768] sm:$0xf0]  ;;  %7298 = vmatpush.bf16.msra.mxu1 %v10539_v13  ;;  %v7056_v28 = vpop.f32.mrf.mxu2 }
 0x2f1   :  { %7274 = vmatmul.bf16.vlgmr.msra.gmra.mxu3 %v16903_v58  ;;  %v15333_v34 = vld [vmem:[#allocation7 + $0x44c] sm:$0xf]  ;;  %v11179_v43 = vor.u32 %v15429_v30, %v11176_v51 }
 0x2f2   :  { %7318 = vmatpush.bf16.msrb.mxu3 %v11243_v36  ;;  %v10792_v35 = vld [vmem:[#allocation7 + $0x468] sm:$0xf0] }
 0x2f3   :  { %7309 = vmatpush.bf16.msra.mxu2 %v10859_v6  ;;  %v15565_v39 = vld [vmem:[#allocation7 + $0xb8c] sm:$0xf]  ;;  %7284 = vmatpush.bf16.msrb.mxu0 %v10315_v22  ;;  %v10795_v2 = vor.u32 %v15333_v34, %v10792_v35 }
 0x2f4   :  { %v11720_v45 = vld [vmem:[#allocation7 + $0xba8] sm:$0xf0]  ;;  %7299 = vmatpush.bf16.msra.mxu1 %v10507_v26 }
 0x2f5   :  { %v15197_v18 = vld [vmem:[#allocation7 + $0xc] sm:$0xf]  ;;  %v11723_v53 = vor.u32 %v15565_v39, %v11720_v45  ;;  %v7067_v39 = vpop.f32.mrf.mxu3 }
 0x2f6   :  { %7319 = vmatpush.bf16.msrb.mxu3 %v11211_v23  ;;  %v10248_v14 = vld [vmem:[#allocation7 + $0x28] sm:$0xf0] }
 0x2f7   :  { %7310 = vmatpush.bf16.msra.mxu2 %v10827_v12  ;;  %v15325_v48 = vld [vmem:[#allocation7 + $0x40c] sm:$0xf]  ;;  %7285 = vmatpush.bf16.msrb.mxu0 %v10283_v42  ;;  %v10251_v0 = vor.u32 %v15197_v18, %v10248_v14  ;;  %v16971_v18 = vadd.f32 %v7067_v39, %v16965_v37  ;;  %v7093_v14 = vpop.f32.mrf.mxu1 }
 0x2f8   :  { %v15421_v50 = vld [vmem:[#allocation7 + $0x70c] sm:$0xf]  ;;  %7344 = vmatpush.bf16.msrb.mxu1 %v11755_v38 }
 0x2f9   :  { %v11144_v55 = vld [vmem:[#allocation7 + $0x728] sm:$0xf0]  ;;  %7300 = vmatmul.bf16.vlgmr.msra.gmra.mxu1 %v16837_v49 }
 0x2fa   :  { %v10760_v56 = vld [vmem:[#allocation7 + $0x428] sm:$0xf0]  ;;  %7320 = vmatpush.bf16.msrb.mxu3 %v11179_v43  ;;  %v11147_v46 = vor.u32 %v15421_v50, %v11144_v55 }
 0x2fb   :  { %v15509_v57 = vld [vmem:[#allocation7 + $0x9cc] sm:$0xf]  ;;  %7311 = vmatpush.bf16.msra.mxu2 %v10795_v2  ;;  %v10763_v5 = vor.u32 %v15325_v48, %v10760_v56  ;;  %7286 = vmatpush.bf16.msrb.mxu0 %v10251_v0 }
 0x2fc   :  { %v11496_v59 = vld [vmem:[#allocation7 + $0x9e8] sm:$0xf0]  ;;  %7345 = vmatpush.bf16.msrb.mxu1 %v11723_v53 }
 0x2fd   :  { %v15637_v60 = vld [vmem:[#allocation7 + $0xdcc] sm:$0xf]  ;;  %v11499_v6 = vor.u32 %v15509_v57, %v11496_v59  ;;  %v16456_v59 = vld [vmem:[#allocation8] sm:$0xff] }
 0x2fe   :  { %v12008_v61 = vld [vmem:[#allocation7 + $0xde8] sm:$0xf0]  ;;  %7321 = vmatpush.bf16.msrb.mxu3 %v11147_v46  ;;  %7287 = vmatmul.bf16.vlgmr.msrb.gmra.mxu0 %v16840_v4  ;;  %v1521_v53 = vperm.slane %v16456_v59, 2  ;;  %v7106_v59 = vpop.f32.mrf.mxu2 }
 0x2ff   :  { %v15557_v36 = vld [vmem:[#allocation7 + $0xb4c] sm:$0xf]  ;;  %v12011_v62 = vor.u32 %v15637_v60, %v12008_v61  ;;  %7312 = vmatpush.bf16.msra.mxu2 %v10763_v5  ;;  %7331 = vmatpush.bf16.msra.mxu0 %v11499_v6 }
 0x300   :  { %v11688_v3 = vld [vmem:[#allocation7 + $0xb68] sm:$0xf0] }
 0x301   :  { %v15413_v41 = vld [vmem:[#allocation7 + $0x6cc] sm:$0xf]  ;;  %v11691_v16 = vor.u32 %v15557_v36, %v11688_v3 }
 0x302   :  { %v11112_v11 = vld [vmem:[#allocation7 + $0x6e8] sm:$0xf0]  ;;  %7313 = vmatmul.bf16.vlgmr.msra.gmra.mxu2 %v16842_v8 }
 0x303   :  { %v15501_v13 = vld [vmem:[#allocation7 + $0x98c] sm:$0xf]  ;;  %v11115_v22 = vor.u32 %v15413_v41, %v11112_v11  ;;  %7357 = vmatpush.bf16.msrb.mxu2 %v12011_v62  ;;  %7346 = vmatpush.bf16.msrb.mxu1 %v11691_v16 }
 0x304   :  { %v11464_v7 = vld [vmem:[#allocation7 + $0x9a8] sm:$0xf0] }
 0x305   :  { %v15629_v17 = vld [vmem:[#allocation7 + $0xd8c] sm:$0xf]  ;;  %v11467_v24 = vor.u32 %v15501_v13, %v11464_v7  ;;  %7322 = vmatpush.bf16.msrb.mxu3 %v11115_v22  ;;  %v7080_v7 = vpop.f32.mrf.mxu0 }
 0x306   :  { %v11976_v21 = vld [vmem:[#allocation7 + $0xda8] sm:$0xf0]  ;;  %v7081_v22 = vadd.f32 %v7080_v7, %v1521_v53 }
 0x307   :  { %v15549_v23 = vld [vmem:[#allocation7 + $0xb0c] sm:$0xf]  ;;  %v11979_v27 = vor.u32 %v15629_v17, %v11976_v21  ;;  %7332 = vmatpush.bf16.msra.mxu0 %v11467_v24 }
 0x308   :  { %v11656_v19 = vld [vmem:[#allocation7 + $0xb28] sm:$0xf0] }
 0x309   :  { %v15405_v9 = vld [vmem:[#allocation7 + $0x68c] sm:$0xf]  ;;  %v11659_v33 = vor.u32 %v15549_v23, %v11656_v19  ;;  %7358 = vmatpush.bf16.msrb.mxu2 %v11979_v27  ;;  %v7069_v23 = vpop.f32.mrf.mxu3 }
 0x30a   :  { %v11080_v12 = vld [vmem:[#allocation7 + $0x6a8] sm:$0xf0] }
 0x30b   :  { %v15493_v30 = vld [vmem:[#allocation7 + $0x94c] sm:$0xf]  ;;  %v11083_v35 = vor.u32 %v15405_v9, %v11080_v12  ;;  %7347 = vmatpush.bf16.msrb.mxu1 %v11659_v33  ;;  %v7095_v12 = vpop.f32.mrf.mxu1 }
 0x30c   :  { %v11432_v51 = vld [vmem:[#allocation7 + $0x968] sm:$0xf0] }
 0x30d   :  { %v15621_v26 = vld [vmem:[#allocation7 + $0xd4c] sm:$0xf]  ;;  %v11435_v42 = vor.u32 %v15493_v30, %v11432_v51  ;;  %7323 = vmatpush.bf16.msrb.mxu3 %v11083_v35 }
 0x30e   :  { %v11944_v34 = vld [vmem:[#allocation7 + $0xd68] sm:$0xf0] }
 0x30f   :  { %v15541_v25 = vld [vmem:[#allocation7 + $0xacc] sm:$0xf]  ;;  %v11947_v2 = vor.u32 %v15621_v26, %v11944_v34  ;;  %7333 = vmatpush.bf16.msra.mxu0 %v11435_v42  ;;  %v7094_v26 = vadd.f32 %v7093_v14, %v7081_v22 }
 0x310   :  { %v11624_v38 = vld [vmem:[#allocation7 + $0xae8] sm:$0xf0] }
 0x311   :  { %v15397_v43 = vld [vmem:[#allocation7 + $0x64c] sm:$0xf]  ;;  %v11627_v55 = vor.u32 %v15541_v25, %v11624_v38  ;;  %7359 = vmatpush.bf16.msrb.mxu2 %v11947_v2 }
 0x312   :  { %v11048_v45 = vld [vmem:[#allocation7 + $0x668] sm:$0xf0] }
 0x313   :  { %v15485_v48 = vld [vmem:[#allocation7 + $0x90c] sm:$0xf]  ;;  %v11051_v60 = vor.u32 %v15397_v43, %v11048_v45  ;;  %7348 = vmatpush.bf16.msrb.mxu1 %v11627_v55 }
 0x314   :  { %v11400_v50 = vld [vmem:[#allocation7 + $0x928] sm:$0xf0] }
 0x315   :  { %v15613_v56 = vld [vmem:[#allocation7 + $0xd0c] sm:$0xf]  ;;  %v11403_v46 = vor.u32 %v15485_v48, %v11400_v50  ;;  %7324 = vmatpush.bf16.msrb.mxu3 %v11051_v60 }
 0x316   :  { %v11912_v57 = vld [vmem:[#allocation7 + $0xd28] sm:$0xf0] }
 0x317   :  { %v15533_v61 = vld [vmem:[#allocation7 + $0xa8c] sm:$0xf]  ;;  %v11915_v5 = vor.u32 %v15613_v56, %v11912_v57  ;;  %7334 = vmatpush.bf16.msra.mxu0 %v11403_v46 }
 0x318   :  { %v11592_v0 = vld [vmem:[#allocation7 + $0xaa8] sm:$0xf0] }
 0x319   :  { %v15389_v36 = vld [vmem:[#allocation7 + $0x60c] sm:$0xf]  ;;  %v11595_v28 = vor.u32 %v15533_v61, %v11592_v0  ;;  %7360 = vmatpush.bf16.msrb.mxu2 %v11915_v5  ;;  %v16974_v61 = vadd.f32 %v7106_v59, %v7094_v26  ;;  %v7082_v0 = vpop.f32.mrf.mxu0  ;;  %v7108_v26 = vpop.f32.mrf.mxu2 }
 0x31a   :  { %v11016_v37 = vld [vmem:[#allocation7 + $0x628] sm:$0xf0] }
 0x31b   :  { %v15477_v3 = vld [vmem:[#allocation7 + $0x8cc] sm:$0xf]  ;;  %v11019_v16 = vor.u32 %v15389_v36, %v11016_v37  ;;  %7349 = vmatpush.bf16.msrb.mxu1 %v11595_v28 }
 0x31c   :  { %v11368_v6 = vld [vmem:[#allocation7 + $0x8e8] sm:$0xf0] }
 0x31d   :  { %v15701_v41 = vld [vmem:[#allocation7 + $0xfcc] sm:$0xf]  ;;  %v11371_v19 = vor.u32 %v15477_v3, %v11368_v6  ;;  %7325 = vmatpush.bf16.msrb.mxu3 %v11019_v16 }
 0x31e   :  { %v12264_v11 = vld [vmem:[#allocation7 + $0xfe8] sm:$0xf0] }
 0x31f   :  { %v15605_v62 = vld [vmem:[#allocation7 + $0xccc] sm:$0xf]  ;;  %v12267_v24 = vor.u32 %v15701_v41, %v12264_v11  ;;  %7335 = vmatpush.bf16.msra.mxu0 %v11371_v19 }
 0x320   :  { %v11880_v13 = vld [vmem:[#allocation7 + $0xce8] sm:$0xf0]  ;;  %7326 = vmatmul.bf16.vlgmr.msrb.gmra.mxu3 %v16857_v10 }
 0x321   :  { %v15525_v17 = vld [vmem:[#allocation7 + $0xa4c] sm:$0xf]  ;;  %v11883_v27 = vor.u32 %v15605_v62, %v11880_v13  ;;  %7370 = vmatpush.bf16.msra.mxu3 %v12267_v24 }
 0x322   :  { %v11560_v21 = vld [vmem:[#allocation7 + $0xa68] sm:$0xf0] }
 0x323   :  { %v15469_v9 = vld [vmem:[#allocation7 + $0x88c] sm:$0xf]  ;;  %v11563_v34 = vor.u32 %v15525_v17, %v11560_v21  ;;  %7361 = vmatpush.bf16.msrb.mxu2 %v11883_v27 }
 0x324   :  { %v11336_v30 = vld [vmem:[#allocation7 + $0x8a8] sm:$0xf0] }
 0x325   :  { %v15693_v51 = vld [vmem:[#allocation7 + $0xf8c] sm:$0xf]  ;;  %v11339_v42 = vor.u32 %v15469_v9, %v11336_v30  ;;  %7350 = vmatpush.bf16.msrb.mxu1 %v11563_v34 }
 0x326   :  { %v12232_v33 = vld [vmem:[#allocation7 + $0xfa8] sm:$0xf0] }
 0x327   :  { %v15597_v35 = vld [vmem:[#allocation7 + $0xc8c] sm:$0xf]  ;;  %v12235_v43 = vor.u32 %v15693_v51, %v12232_v33  ;;  %7336 = vmatpush.bf16.msra.mxu0 %v11339_v42 }
 0x328   :  { %v11848_v25 = vld [vmem:[#allocation7 + $0xca8] sm:$0xf0] }
 0x329   :  { %v15517_v38 = vld [vmem:[#allocation7 + $0xa0c] sm:$0xf]  ;;  %v11851_v50 = vor.u32 %v15597_v35, %v11848_v25  ;;  %7371 = vmatpush.bf16.msra.mxu3 %v12235_v43 }
 0x32a   :  { %v11528_v39 = vld [vmem:[#allocation7 + $0xa28] sm:$0xf0] }
 0x32b   :  { %v15829_v45 = vld [vmem:[#allocation7 + $0x13cc] sm:$0xf]  ;;  %v11531_v14 = vor.u32 %v15517_v38, %v11528_v39  ;;  %7362 = vmatpush.bf16.msrb.mxu2 %v11851_v50 }
 0x32c   :  { %v12776_v2 = vld [vmem:[#allocation7 + $0x13e8] sm:$0xf0] }
 0x32d   :  { %v15461_v48 = vld [vmem:[#allocation7 + $0x84c] sm:$0xf]  ;;  %v12779_v46 = vor.u32 %v15829_v45, %v12776_v2  ;;  %7351 = vmatpush.bf16.msrb.mxu1 %v11531_v14 }
 0x32e   :  { %v11304_v55 = vld [vmem:[#allocation7 + $0x868] sm:$0xf0] }
 0x32f   :  { %v15685_v56 = vld [vmem:[#allocation7 + $0xf4c] sm:$0xf]  ;;  %v11307_v37 = vor.u32 %v15461_v48, %v11304_v55 }
 0x330   :  { %v12200_v57 = vld [vmem:[#allocation7 + $0xf68] sm:$0xf0]  ;;  %7352 = vmatmul.bf16.vlgmr.msrb.gmra.mxu1 %v16850_v44 }
 0x331   :  { %v15589_v53 = vld [vmem:[#allocation7 + $0xc4c] sm:$0xf]  ;;  %v12203_v3 = vor.u32 %v15685_v56, %v12200_v57  ;;  %7396 = vmatpush.bf16.msra.mxu1 %v12779_v46  ;;  %7337 = vmatpush.bf16.msra.mxu0 %v11307_v37  ;;  %v7119_v37 = vpop.f32.mrf.mxu3 }
 0x332   :  { %v11816_v60 = vld [vmem:[#allocation7 + $0xc68] sm:$0xf0] }
 0x333   :  { %v15821_v36 = vld [vmem:[#allocation7 + $0x138c] sm:$0xf]  ;;  %v11819_v11 = vor.u32 %v15589_v53, %v11816_v60  ;;  %7372 = vmatpush.bf16.msra.mxu3 %v12203_v3 }
 0x334   :  { %v12744_v5 = vld [vmem:[#allocation7 + $0x13a8] sm:$0xf0] }
 0x335   :  { %v15453_v6 = vld [vmem:[#allocation7 + $0x80c] sm:$0xf]  ;;  %v12747_v21 = vor.u32 %v15821_v36, %v12744_v5  ;;  %7363 = vmatpush.bf16.msrb.mxu2 %v11819_v11  ;;  %v7145_v11 = vpop.f32.mrf.mxu1 }
 0x336   :  { %v11272_v41 = vld [vmem:[#allocation7 + $0x828] sm:$0xf0] }
 0x337   :  { %v15581_v28 = vld [vmem:[#allocation7 + $0xc0c] sm:$0xf]  ;;  %v11275_v19 = vor.u32 %v15453_v6, %v11272_v41  ;;  %7397 = vmatpush.bf16.msra.mxu1 %v12747_v21  ;;  %v7120_v41 = vadd.f32 %v7119_v37, %v16974_v61 }
 0x338   :  { %v15677_v62 = vld [vmem:[#allocation7 + $0xf0c] sm:$0xf] }
 0x339   :  { %v12168_v13 = vld [vmem:[#allocation7 + $0xf28] sm:$0xf0]  ;;  %7338 = vmatpush.bf16.msra.mxu0 %v11275_v19 }
 0x33a   :  { %v11784_v7 = vld [vmem:[#allocation7 + $0xc28] sm:$0xf0]  ;;  %v12171_v24 = vor.u32 %v15677_v62, %v12168_v13 }
 0x33b   :  { %v15765_v16 = vld [vmem:[#allocation7 + $0x11cc] sm:$0xf]  ;;  %v11787_v27 = vor.u32 %v15581_v28, %v11784_v7 }
 0x33c   :  { %v12520_v17 = vld [vmem:[#allocation7 + $0x11e8] sm:$0xf0]  ;;  %7373 = vmatpush.bf16.msra.mxu3 %v12171_v24  ;;  %7339 = vmatmul.bf16.vlgmr.msra.gmra.mxu0 %v16855_v63 }
 0x33d   :  { %v15893_v22 = vld [vmem:[#allocation7 + $0x15cc] sm:$0xf]  ;;  %v12523_v30 = vor.u32 %v15765_v16, %v12520_v17  ;;  %7364 = vmatpush.bf16.msrb.mxu2 %v11787_v27 }
 0x33e   :  { %v13032_v23 = vld [vmem:[#allocation7 + $0x15e8] sm:$0xf0] }
 0x33f   :  { %v15813_v9 = vld [vmem:[#allocation7 + $0x134c] sm:$0xf]  ;;  %v13035_v34 = vor.u32 %v15893_v22, %v13032_v23  ;;  %7383 = vmatpush.bf16.msrb.mxu0 %v12523_v30 }
 0x340   :  { %v12712_v12 = vld [vmem:[#allocation7 + $0x1368] sm:$0xf0]  ;;  %7365 = vmatmul.bf16.vlgmr.msrb.gmra.mxu2 %v16859_v15 }
 0x341   :  { %v15669_v51 = vld [vmem:[#allocation7 + $0xecc] sm:$0xf]  ;;  %v12715_v38 = vor.u32 %v15813_v9, %v12712_v12  ;;  %7409 = vmatpush.bf16.msra.mxu2 %v13035_v34 }
 0x342   :  { %v12136_v33 = vld [vmem:[#allocation7 + $0xee8] sm:$0xf0] }
 0x343   :  { %v15757_v35 = vld [vmem:[#allocation7 + $0x118c] sm:$0xf]  ;;  %v12139_v43 = vor.u32 %v15669_v51, %v12136_v33  ;;  %7398 = vmatpush.bf16.msra.mxu1 %v12715_v38 }
 0x344   :  { %v12488_v25 = vld [vmem:[#allocation7 + $0x11a8] sm:$0xf0] }
 0x345   :  { %v15885_v39 = vld [vmem:[#allocation7 + $0x158c] sm:$0xf]  ;;  %v12491_v48 = vor.u32 %v15757_v35, %v12488_v25  ;;  %7374 = vmatpush.bf16.msra.mxu3 %v12139_v43  ;;  %v7132_v35 = vpop.f32.mrf.mxu0  ;;  %v7121_v43 = vpop.f32.mrf.mxu3 }
 0x346   :  { %v13000_v42 = vld [vmem:[#allocation7 + $0x15a8] sm:$0xf0] }
 0x347   :  { %v15805_v45 = vld [vmem:[#allocation7 + $0x130c] sm:$0xf]  ;;  %v13003_v56 = vor.u32 %v15885_v39, %v13000_v42  ;;  %7384 = vmatpush.bf16.msrb.mxu0 %v12491_v48  ;;  %v7133_v42 = vadd.f32 %v7132_v35, %v7120_v41 }
 0x348   :  { %v12680_v2 = vld [vmem:[#allocation7 + $0x1328] sm:$0xf0] }
 0x349   :  { %v15661_v50 = vld [vmem:[#allocation7 + $0xe8c] sm:$0xf]  ;;  %v12683_v14 = vor.u32 %v15805_v45, %v12680_v2  ;;  %7410 = vmatpush.bf16.msra.mxu2 %v13003_v56 }
 0x34a   :  { %v12104_v55 = vld [vmem:[#allocation7 + $0xea8] sm:$0xf0] }
 0x34b   :  { %v15749_v57 = vld [vmem:[#allocation7 + $0x114c] sm:$0xf]  ;;  %v12107_v0 = vor.u32 %v15661_v50, %v12104_v55  ;;  %7399 = vmatpush.bf16.msra.mxu1 %v12683_v14  ;;  %v7147_v50 = vpop.f32.mrf.mxu1  ;;  %v7146_v14 = vadd.f32 %v7145_v11, %v7133_v42 }
 0x34c   :  { %v12456_v59 = vld [vmem:[#allocation7 + $0x1168] sm:$0xf0] }
 0x34d   :  { %v15877_v53 = vld [vmem:[#allocation7 + $0x154c] sm:$0xf]  ;;  %v12459_v3 = vor.u32 %v15749_v57, %v12456_v59  ;;  %7375 = vmatpush.bf16.msra.mxu3 %v12107_v0 }
 0x34e   :  { %v12968_v60 = vld [vmem:[#allocation7 + $0x1568] sm:$0xf0] }
 0x34f   :  { %v15797_v46 = vld [vmem:[#allocation7 + $0x12cc] sm:$0xf]  ;;  %v12971_v28 = vor.u32 %v15877_v53, %v12968_v60  ;;  %7385 = vmatpush.bf16.msrb.mxu0 %v12459_v3 }
 0x350   :  { %v12648_v36 = vld [vmem:[#allocation7 + $0x12e8] sm:$0xf0] }
 0x351   :  { %v15653_v5 = vld [vmem:[#allocation7 + $0xe4c] sm:$0xf]  ;;  %v12651_v7 = vor.u32 %v15797_v46, %v12648_v36  ;;  %7411 = vmatpush.bf16.msra.mxu2 %v12971_v28 }
 0x352   :  { %v12072_v6 = vld [vmem:[#allocation7 + $0xe68] sm:$0xf0] }
 0x353   :  { %v15741_v62 = vld [vmem:[#allocation7 + $0x110c] sm:$0xf]  ;;  %v12075_v21 = vor.u32 %v15653_v5, %v12072_v6  ;;  %7400 = vmatpush.bf16.msra.mxu1 %v12651_v7 }
 0x354   :  { %v12424_v13 = vld [vmem:[#allocation7 + $0x1128] sm:$0xf0] }
 0x355   :  { %v15869_v16 = vld [vmem:[#allocation7 + $0x150c] sm:$0xf]  ;;  %v12427_v19 = vor.u32 %v15741_v62, %v12424_v13  ;;  %7376 = vmatpush.bf16.msra.mxu3 %v12075_v21 }
 0x356   :  { %v12936_v17 = vld [vmem:[#allocation7 + $0x1528] sm:$0xf0] }
 0x357   :  { %v15789_v22 = vld [vmem:[#allocation7 + $0x128c] sm:$0xf]  ;;  %v12939_v61 = vor.u32 %v15869_v16, %v12936_v17  ;;  %7386 = vmatpush.bf16.msrb.mxu0 %v12427_v19  ;;  %v7158_v16 = vpop.f32.mrf.mxu2 }
 0x358   :  { %v12616_v23 = vld [vmem:[#allocation7 + $0x12a8] sm:$0xf0] }
 0x359   :  { %v15645_v24 = vld [vmem:[#allocation7 + $0xe0c] sm:$0xf]  ;;  %v12619_v33 = vor.u32 %v15789_v22, %v12616_v23  ;;  %7412 = vmatpush.bf16.msra.mxu2 %v12939_v61  ;;  %v16981_v22 = vadd.f32 %v7158_v16, %v7146_v14  ;;  %v7134_v23 = vpop.f32.mrf.mxu0 }
 0x35a   :  { %v12040_v9 = vld [vmem:[#allocation7 + $0xe28] sm:$0xf0] }
 0x35b   :  { %v15733_v12 = vld [vmem:[#allocation7 + $0x10cc] sm:$0xf]  ;;  %v12043_v25 = vor.u32 %v15645_v24, %v12040_v9  ;;  %7401 = vmatpush.bf16.msra.mxu1 %v12619_v33 }
 0x35c   :  { %v12392_v27 = vld [vmem:[#allocation7 + $0x10e8] sm:$0xf0] }
 0x35d   :  { %v15957_v30 = vld [vmem:[#allocation7 + $0x17cc] sm:$0xf]  ;;  %v12395_v45 = vor.u32 %v15733_v12, %v12392_v27  ;;  %7377 = vmatpush.bf16.msra.mxu3 %v12043_v25 }
 0x35e   :  { %v13288_v51 = vld [vmem:[#allocation7 + $0x17e8] sm:$0xf0] }
 0x35f   :  { %v15861_v26 = vld [vmem:[#allocation7 + $0x14cc] sm:$0xf]  ;;  %v13291_v2 = vor.u32 %v15957_v30, %v13288_v51  ;;  %7387 = vmatpush.bf16.msrb.mxu0 %v12395_v45  ;;  %v7160_v14 = vpop.f32.mrf.mxu2 }
 0x360   :  { %v12904_v34 = vld [vmem:[#allocation7 + $0x14e8] sm:$0xf0]  ;;  %7378 = vmatmul.bf16.vlgmr.msra.gmra.mxu3 %v16878_v32 }
 0x361   :  { %v15781_v38 = vld [vmem:[#allocation7 + $0x124c] sm:$0xf]  ;;  %v12907_v55 = vor.u32 %v15861_v26, %v12904_v34  ;;  %7422 = vmatpush.bf16.msrb.mxu3 %v13291_v2 }
 0x362   :  { %v12584_v39 = vld [vmem:[#allocation7 + $0x1268] sm:$0xf0] }
 0x363   :  { %v15725_v48 = vld [vmem:[#allocation7 + $0x108c] sm:$0xf]  ;;  %v12587_v53 = vor.u32 %v15781_v38, %v12584_v39  ;;  %7413 = vmatpush.bf16.msra.mxu2 %v12907_v55 }
 0x364   :  { %v12360_v56 = vld [vmem:[#allocation7 + $0x10a8] sm:$0xf0] }
 0x365   :  { %v15949_v57 = vld [vmem:[#allocation7 + $0x178c] sm:$0xf]  ;;  %v12363_v37 = vor.u32 %v15725_v48, %v12360_v56  ;;  %7402 = vmatpush.bf16.msra.mxu1 %v12587_v53 }
 0x366   :  { %v13256_v59 = vld [vmem:[#allocation7 + $0x17a8] sm:$0xf0] }
 0x367   :  { %v15853_v60 = vld [vmem:[#allocation7 + $0x148c] sm:$0xf]  ;;  %v13259_v3 = vor.u32 %v15949_v57, %v13256_v59  ;;  %7388 = vmatpush.bf16.msrb.mxu0 %v12363_v37 }
 0x368   :  { %v12872_v0 = vld [vmem:[#allocation7 + $0x14a8] sm:$0xf0] }
 0x369   :  { %v15773_v46 = vld [vmem:[#allocation7 + $0x120c] sm:$0xf]  ;;  %v12875_v28 = vor.u32 %v15853_v60, %v12872_v0  ;;  %7423 = vmatpush.bf16.msrb.mxu3 %v13259_v3 }
 0x36a   :  { %v12552_v36 = vld [vmem:[#allocation7 + $0x1228] sm:$0xf0] }
 0x36b   :  { %v16085_v5 = vld [vmem:[#allocation7 + $0x1bcc] sm:$0xf]  ;;  %v12555_v11 = vor.u32 %v15773_v46, %v12552_v36  ;;  %7414 = vmatpush.bf16.msra.mxu2 %v12875_v28 }
 0x36c   :  { %v13800_v6 = vld [vmem:[#allocation7 + $0x1be8] sm:$0xf0] }
 0x36d   :  { %v15717_v41 = vld [vmem:[#allocation7 + $0x104c] sm:$0xf]  ;;  %v13803_v19 = vor.u32 %v16085_v5, %v13800_v6  ;;  %7403 = vmatpush.bf16.msra.mxu1 %v12555_v11 }
 0x36e   :  { %v12328_v62 = vld [vmem:[#allocation7 + $0x1068] sm:$0xf0] }
 0x36f   :  { %v15941_v13 = vld [vmem:[#allocation7 + $0x174c] sm:$0xf]  ;;  %v12331_v9 = vor.u32 %v15717_v41, %v12328_v62 }
 0x370   :  { %v13224_v7 = vld [vmem:[#allocation7 + $0x1768] sm:$0xf0]  ;;  %7404 = vmatmul.bf16.vlgmr.msra.gmra.mxu1 %v16871_v1 }
 0x371   :  { %v15845_v17 = vld [vmem:[#allocation7 + $0x144c] sm:$0xf]  ;;  %v13227_v12 = vor.u32 %v15941_v13, %v13224_v7  ;;  %7448 = vmatpush.bf16.msrb.mxu1 %v13803_v19  ;;  %7389 = vmatpush.bf16.msrb.mxu0 %v12331_v9  ;;  %v7171_v9 = vpop.f32.mrf.mxu3 }
 0x372   :  { %v12840_v21 = vld [vmem:[#allocation7 + $0x1468] sm:$0xf0] }
 0x373   :  { %v16077_v24 = vld [vmem:[#allocation7 + $0x1b8c] sm:$0xf]  ;;  %v12843_v51 = vor.u32 %v15845_v17, %v12840_v21  ;;  %7424 = vmatpush.bf16.msrb.mxu3 %v13227_v12 }
 0x374   :  { %v13768_v61 = vld [vmem:[#allocation7 + $0x1ba8] sm:$0xf0] }
 0x375   :  { %v15709_v27 = vld [vmem:[#allocation7 + $0x100c] sm:$0xf]  ;;  %v13771_v39 = vor.u32 %v16077_v24, %v13768_v61  ;;  %7415 = vmatpush.bf16.msra.mxu2 %v12843_v51  ;;  %v7197_v51 = vpop.f32.mrf.mxu1 }
 0x376   :  { %v12296_v30 = vld [vmem:[#allocation7 + $0x1028] sm:$0xf0] }
 0x377   :  { %v15837_v33 = vld [vmem:[#allocation7 + $0x140c] sm:$0xf]  ;;  %v12299_v45 = vor.u32 %v15709_v27, %v12296_v30  ;;  %7449 = vmatpush.bf16.msrb.mxu1 %v13771_v39  ;;  %v7172_v30 = vadd.f32 %v7171_v9, %v16981_v22 }
 0x378   :  { %v15933_v26 = vld [vmem:[#allocation7 + $0x170c] sm:$0xf] }
 0x379   :  { %v13192_v34 = vld [vmem:[#allocation7 + $0x1728] sm:$0xf0]  ;;  %7390 = vmatpush.bf16.msrb.mxu0 %v12299_v45 }
 0x37a   :  { %v12808_v35 = vld [vmem:[#allocation7 + $0x1428] sm:$0xf0]  ;;  %v13195_v2 = vor.u32 %v15933_v26, %v13192_v34 }
 0x37b   :  { %v16021_v25 = vld [vmem:[#allocation7 + $0x19cc] sm:$0xf]  ;;  %v12811_v55 = vor.u32 %v15837_v33, %v12808_v35 }
 0x37c   :  { %v13544_v38 = vld [vmem:[#allocation7 + $0x19e8] sm:$0xf0]  ;;  %7425 = vmatpush.bf16.msrb.mxu3 %v13195_v2  ;;  %7391 = vmatmul.bf16.vlgmr.msrb.gmra.mxu0 %v16876_v29 }
 0x37d   :  { %v16149_v42 = vld [vmem:[#allocation7 + $0x1dcc] sm:$0xf]  ;;  %v13547_v56 = vor.u32 %v16021_v25, %v13544_v38  ;;  %7416 = vmatpush.bf16.msra.mxu2 %v12811_v55 }
 0x37e   :  { %v14056_v43 = vld [vmem:[#allocation7 + $0x1de8] sm:$0xf0] }
 0x37f   :  { %v16069_v48 = vld [vmem:[#allocation7 + $0x1b4c] sm:$0xf]  ;;  %v14059_v53 = vor.u32 %v16149_v42, %v14056_v43  ;;  %7435 = vmatpush.bf16.msra.mxu0 %v13547_v56 }
 0x380   :  { %v13736_v50 = vld [vmem:[#allocation7 + $0x1b68] sm:$0xf0]  ;;  %7417 = vmatmul.bf16.vlgmr.msra.gmra.mxu2 %v16880_v40 }
 0x381   :  { %v15925_v57 = vld [vmem:[#allocation7 + $0x16cc] sm:$0xf]  ;;  %v13739_v46 = vor.u32 %v16069_v48, %v13736_v50  ;;  %7461 = vmatpush.bf16.msrb.mxu2 %v14059_v53 }
 0x382   :  { %v13160_v59 = vld [vmem:[#allocation7 + $0x16e8] sm:$0xf0] }
 0x383   :  { %v16013_v60 = vld [vmem:[#allocation7 + $0x198c] sm:$0xf]  ;;  %v13163_v3 = vor.u32 %v15925_v57, %v13160_v59  ;;  %7450 = vmatpush.bf16.msrb.mxu1 %v13739_v46 }
 0x384   :  { %v13512_v0 = vld [vmem:[#allocation7 + $0x19a8] sm:$0xf0] }
 0x385   :  { %v16141_v36 = vld [vmem:[#allocation7 + $0x1d8c] sm:$0xf]  ;;  %v13515_v41 = vor.u32 %v16013_v60, %v13512_v0  ;;  %7426 = vmatpush.bf16.msrb.mxu3 %v13163_v3  ;;  %v7184_v60 = vpop.f32.mrf.mxu0  ;;  %v7173_v3 = vpop.f32.mrf.mxu3 }
 0x386   :  { %v14024_v37 = vld [vmem:[#allocation7 + $0x1da8] sm:$0xf0]  ;;  %v15386_v3 = vld [vmem:[#allocation7 + $0x5ec] sm:$0xf0] }
 0x387   :  { %v16061_v5 = vld [vmem:[#allocation7 + $0x1b0c] sm:$0xf]  ;;  %v14027_v13 = vor.u32 %v16141_v36, %v14024_v37  ;;  %7436 = vmatpush.bf16.msra.mxu0 %v13515_v41  ;;  %v7185_v37 = vadd.f32 %v7184_v60, %v7172_v30 }
 0x388   :  { %v13704_v6 = vld [vmem:[#allocation7 + $0x1b28] sm:$0xf0] }
 0x389   :  { %v15917_v28 = vld [vmem:[#allocation7 + $0x168c] sm:$0xf]  ;;  %v13707_v11 = vor.u32 %v16061_v5, %v13704_v6  ;;  %7462 = vmatpush.bf16.msrb.mxu2 %v14027_v13 }
 0x38a   :  { %v13128_v62 = vld [vmem:[#allocation7 + $0x16a8] sm:$0xf0] }
 0x38b   :  { %v16005_v7 = vld [vmem:[#allocation7 + $0x194c] sm:$0xf]  ;;  %v13131_v23 = vor.u32 %v15917_v28, %v13128_v62  ;;  %7451 = vmatpush.bf16.msrb.mxu1 %v13707_v11  ;;  %v7199_v28 = vpop.f32.mrf.mxu1  ;;  %v7198_v11 = vadd.f32 %v7197_v51, %v7185_v37  ;;  %v10990_v37 = vld [vmem:[#allocation7 + $0x5d0] sm:$0xf] }
 0x38c   :  { %v13480_v16 = vld [vmem:[#allocation7 + $0x1968] sm:$0xf0]  ;;  %v15306_v28 = vld [vmem:[#allocation7 + $0x36c] sm:$0xf0] }
 0x38d   :  { %v16133_v17 = vld [vmem:[#allocation7 + $0x1d4c] sm:$0xf]  ;;  %v13483_v12 = vor.u32 %v16005_v7, %v13480_v16  ;;  %7427 = vmatpush.bf16.msrb.mxu3 %v13131_v23 }
 0x38e   :  { %v13992_v21 = vld [vmem:[#allocation7 + $0x1d68] sm:$0xf0] }
 0x38f   :  { %v16053_v19 = vld [vmem:[#allocation7 + $0x1acc] sm:$0xf]  ;;  %v13995_v33 = vor.u32 %v16133_v17, %v13992_v21  ;;  %7437 = vmatpush.bf16.msra.mxu0 %v13483_v12 }
 0x390   :  { %v13672_v24 = vld [vmem:[#allocation7 + $0x1ae8] sm:$0xf0] }
 0x391   :  { %v15909_v61 = vld [vmem:[#allocation7 + $0x164c] sm:$0xf]  ;;  %v13675_v35 = vor.u32 %v16053_v19, %v13672_v24  ;;  %7463 = vmatpush.bf16.msrb.mxu2 %v13995_v33 }
 0x392   :  { %v13096_v27 = vld [vmem:[#allocation7 + $0x1668] sm:$0xf0] }
 0x393   :  { %v15997_v26 = vld [vmem:[#allocation7 + $0x190c] sm:$0xf]  ;;  %v13099_v39 = vor.u32 %v15909_v61, %v13096_v27  ;;  %7452 = vmatpush.bf16.msrb.mxu1 %v13675_v35  ;;  %v10734_v61 = vld [vmem:[#allocation7 + $0x3d0] sm:$0xf] }
 0x394   :  { %v13448_v34 = vld [vmem:[#allocation7 + $0x1928] sm:$0xf0]  ;;  %v15322_v27 = vld [vmem:[#allocation7 + $0x3ec] sm:$0xf0] }
 0x395   :  { %v16125_v25 = vld [vmem:[#allocation7 + $0x1d0c] sm:$0xf]  ;;  %v13451_v45 = vor.u32 %v15997_v26, %v13448_v34  ;;  %7428 = vmatpush.bf16.msrb.mxu3 %v13099_v39 }
 0x396   :  { %v13960_v38 = vld [vmem:[#allocation7 + $0x1d28] sm:$0xf0] }
 0x397   :  { %v16045_v42 = vld [vmem:[#allocation7 + $0x1a8c] sm:$0xf]  ;;  %v13963_v22 = vor.u32 %v16125_v25, %v13960_v38  ;;  %7438 = vmatpush.bf16.msra.mxu0 %v13451_v45  ;;  %v7210_v25 = vpop.f32.mrf.mxu2  ;;  %v10735_v45 = vor.u32 %v15322_v27, %v10734_v61  ;;  %v10638_v61 = vld [vmem:[#allocation7 + $0x310] sm:$0xf] }
 0x398   :  { %v13640_v43 = vld [vmem:[#allocation7 + $0x1aa8] sm:$0xf0]  ;;  %v15298_v27 = vld [vmem:[#allocation7 + $0x32c] sm:$0xf0] }
 0x399   :  { %v15901_v2 = vld [vmem:[#allocation7 + $0x160c] sm:$0xf]  ;;  %v13643_v59 = vor.u32 %v16045_v42, %v13640_v43  ;;  %7464 = vmatpush.bf16.msrb.mxu2 %v13963_v22  ;;  %v16988_v42 = vadd.f32 %v7210_v25, %v7198_v11  ;;  %v7186_v43 = vpop.f32.mrf.mxu0  ;;  %v15314_v22 = vld [vmem:[#allocation7 + $0x3ac] sm:$0xf0] }
 0x39a   :  { %v13064_v48 = vld [vmem:[#allocation7 + $0x1628] sm:$0xf0]  ;;  %v15242_v25 = vld [vmem:[#allocation7 + $0x16c] sm:$0xf0] }
 0x39b   :  { %v15989_v50 = vld [vmem:[#allocation7 + $0x18cc] sm:$0xf]  ;;  %v13067_v0 = vor.u32 %v15901_v2, %v13064_v48  ;;  %7453 = vmatpush.bf16.msrb.mxu1 %v13643_v59  ;;  %v10702_v2 = vld [vmem:[#allocation7 + $0x390] sm:$0xf] }
 0x39c   :  { %v13416_v55 = vld [vmem:[#allocation7 + $0x18e8] sm:$0xf0] }
 0x39d   :  { %v16213_v56 = vld [vmem:[#allocation7 + $0x1fcc] sm:$0xf]  ;;  %v13419_v5 = vor.u32 %v15989_v50, %v13416_v55  ;;  %7429 = vmatpush.bf16.msrb.mxu3 %v13067_v0  ;;  %v10478_v0 = vld [vmem:[#allocation7 + $0x1d0] sm:$0xf] }
 0x39e   :  { %v14312_v57 = vld [vmem:[#allocation7 + $0x1fe8] sm:$0xf0] }
 0x39f   :  { %v16117_v14 = vld [vmem:[#allocation7 + $0x1ccc] sm:$0xf]  ;;  %v14315_v6 = vor.u32 %v16213_v56, %v14312_v57  ;;  %7439 = vmatpush.bf16.msra.mxu0 %v13419_v5  ;;  %v7212_v11 = vpop.f32.mrf.mxu2 }
 0x3a0   :  { %v13928_v53 = vld [vmem:[#allocation7 + $0x1ce8] sm:$0xf0]  ;;  %7430 = vmatmul.bf16.vlgmr.msrb.gmra.mxu3 %v16888_v52  ;;  %v10862_v11 = vld [vmem:[#allocation7 + $0x4d0] sm:$0xf] }
 0x3a1   :  { %v16037_v46 = vld [vmem:[#allocation7 + $0x1a4c] sm:$0xf]  ;;  %v13931_v62 = vor.u32 %v16117_v14, %v13928_v53  ;;  %7474 = vmatpush.bf16.msra.mxu3 %v14315_v6 }
 0x3a2   :  { %v13608_v36 = vld [vmem:[#allocation7 + $0x1a68] sm:$0xf0] }
 0x3a3   :  { %v15981_v41 = vld [vmem:[#allocation7 + $0x188c] sm:$0xf]  ;;  %v13611_v17 = vor.u32 %v16037_v46, %v13608_v36  ;;  %7465 = vmatpush.bf16.msrb.mxu2 %v13931_v62  ;;  %v15258_v46 = vld [vmem:[#allocation7 + $0x1ec] sm:$0xf0]  ;;  %v10703_v36 = vor.u32 %v15314_v22, %v10702_v2 }
 0x3a4   :  { %v13384_v13 = vld [vmem:[#allocation7 + $0x18a8] sm:$0xf0]  ;;  %v15290_v2 = vld [vmem:[#allocation7 + $0x2ec] sm:$0xf0] }
 0x3a5   :  { %v16205_v7 = vld [vmem:[#allocation7 + $0x1f8c] sm:$0xf]  ;;  %v13387_v9 = vor.u32 %v15981_v41, %v13384_v13  ;;  %7454 = vmatpush.bf16.msrb.mxu1 %v13611_v17  ;;  %v10670_v41 = vld [vmem:[#allocation7 + $0x350] sm:$0xf]  ;;  %v10479_v13 = vor.u32 %v15258_v46, %v10478_v0  ;;  %v10991_v17 = vor.u32 %v15386_v3, %v10990_v37 }
 0x3a6   :  { %v14280_v16 = vld [vmem:[#allocation7 + $0x1fa8] sm:$0xf0]  ;;  %v10894_v0 = vld [vmem:[#allocation7 + $0x510] sm:$0xf] }
 0x3a7   :  { %v16109_v21 = vld [vmem:[#allocation7 + $0x1c8c] sm:$0xf]  ;;  %v14283_v12 = vor.u32 %v16205_v7, %v14280_v16  ;;  %7440 = vmatpush.bf16.msra.mxu0 %v13387_v9  ;;  %v15378_v9 = vld [vmem:[#allocation7 + $0x5ac] sm:$0xf0] }
 0x3a8   :  { %v13896_v23 = vld [vmem:[#allocation7 + $0x1ca8] sm:$0xf0]  ;;  %v15362_v46 = vld [vmem:[#allocation7 + $0x52c] sm:$0xf0] }
 0x3a9   :  { %v16029_v19 = vld [vmem:[#allocation7 + $0x1a0c] sm:$0xf]  ;;  %v13899_v33 = vor.u32 %v16109_v21, %v13896_v23  ;;  %7475 = vmatpush.bf16.msra.mxu3 %v14283_v12  ;;  %v10446_v21 = vld [vmem:[#allocation7 + $0x190] sm:$0xf] }
 0x3aa   :  { %v13576_v24 = vld [vmem:[#allocation7 + $0x1a28] sm:$0xf0]  ;;  %v15250_v23 = vld [vmem:[#allocation7 + $0x1ac] sm:$0xf0] }
 0x3ab   :  { %v15973_v30 = vld [vmem:[#allocation7 + $0x184c] sm:$0xf]  ;;  %v13579_v51 = vor.u32 %v16029_v19, %v13576_v24  ;;  %7466 = vmatpush.bf16.msrb.mxu2 %v13899_v33  ;;  %v10671_v19 = vor.u32 %v15306_v28, %v10670_v41  ;;  %v10958_v24 = vld [vmem:[#allocation7 + $0x590] sm:$0xf] }
 0x3ac   :  { %v13352_v26 = vld [vmem:[#allocation7 + $0x1868] sm:$0xf0]  ;;  %v10574_v37 = vld [vmem:[#allocation7 + $0x290] sm:$0xf] }
 0x3ad   :  { %v16197_v34 = vld [vmem:[#allocation7 + $0x1f4c] sm:$0xf]  ;;  %v13355_v48 = vor.u32 %v15973_v30, %v13352_v26  ;;  %7455 = vmatpush.bf16.msrb.mxu1 %v13579_v51  ;;  %v10447_v30 = vor.u32 %v15250_v23, %v10446_v21  ;;  %v10639_v51 = vor.u32 %v15298_v27, %v10638_v61  ;;  %v15282_v3 = vld [vmem:[#allocation7 + $0x2ac] sm:$0xf0]  ;;  %v7236_v21 = vpop.f32.mrf.mxu0 }
 0x3ae   :  { %v14248_v35 = vld [vmem:[#allocation7 + $0x1f68] sm:$0xf0]  ;;  %v10350_v28 = vld [vmem:[#allocation7 + $0xd0] sm:$0xf] }
 0x3af   :  { %v16101_v38 = vld [vmem:[#allocation7 + $0x1c4c] sm:$0xf]  ;;  %v14251_v50 = vor.u32 %v16197_v34, %v14248_v35  ;;  %7441 = vmatpush.bf16.msra.mxu0 %v13355_v48  ;;  %v10959_v34 = vor.u32 %v15378_v9, %v10958_v24  ;;  %v10414_v35 = vld [vmem:[#allocation7 + $0x150] sm:$0xf]  ;;  %v7223_v48 = vpop.f32.mrf.mxu3 }
 0x3b0   :  { %v13864_v39 = vld [vmem:[#allocation7 + $0x1c68] sm:$0xf0]  ;;  %7456 = vmatmul.bf16.vlgmr.msrb.gmra.mxu1 %v16893_v20  ;;  %v15274_v24 = vld [vmem:[#allocation7 + $0x26c] sm:$0xf0] }
 0x3b1   :  { %v15965_v55 = vld [vmem:[#allocation7 + $0x180c] sm:$0xf]  ;;  %v13867_v57 = vor.u32 %v16101_v38, %v13864_v39  ;;  %7500 = vmatpush.bf16.msra.mxu1 %v10735_v45  ;;  %7476 = vmatpush.bf16.msra.mxu3 %v14251_v50  ;;  %v10926_v38 = vld [vmem:[#allocation7 + $0x550] sm:$0xf]  ;;  %v10415_v50 = vor.u32 %v15242_v25, %v10414_v35 }
 0x3b2   :  { %v13320_v56 = vld [vmem:[#allocation7 + $0x1828] sm:$0xf0]  ;;  %v15370_v39 = vld [vmem:[#allocation7 + $0x56c] sm:$0xf0] }
 0x3b3   :  { %v16093_v59 = vld [vmem:[#allocation7 + $0x1c0c] sm:$0xf]  ;;  %v13323_v5 = vor.u32 %v15965_v55, %v13320_v56  ;;  %7467 = vmatpush.bf16.msrb.mxu2 %v13867_v57  ;;  %v10606_v45 = vld [vmem:[#allocation7 + $0x2d0] sm:$0xf]  ;;  %v7224_v56 = vadd.f32 %v7223_v48, %v16988_v42  ;;  %v7249_v57 = vpop.f32.mrf.mxu1  ;;  %v10895_v42 = vor.u32 %v15362_v46, %v10894_v0  ;;  %v7262_v0 = vpop.f32.mrf.mxu2 }
 0x3b4   :  { %v16189_v14 = vld [vmem:[#allocation7 + $0x1f0c] sm:$0xf]  ;;  %v11214_v35 = vld [vmem:[#allocation7 + $0x790] sm:$0xf] }
 0x3b5   :  { %v14216_v53 = vld [vmem:[#allocation7 + $0x1f28] sm:$0xf0]  ;;  %7501 = vmatpush.bf16.msra.mxu1 %v10703_v36  ;;  %7442 = vmatpush.bf16.msra.mxu0 %v13323_v5  ;;  %v7237_v9 = vadd.f32 %v7236_v21, %v7224_v56  ;;  %v15442_v25 = vld [vmem:[#allocation7 + $0x7ac] sm:$0xf0] }
 0x3b6   :  { %v13832_v60 = vld [vmem:[#allocation7 + $0x1c28] sm:$0xf0]  ;;  %v14219_v6 = vor.u32 %v16189_v14, %v14216_v53  ;;  %v10382_v14 = vld [vmem:[#allocation7 + $0x110] sm:$0xf] }
 0x3b7   :  { %v13835_v62 = vor.u32 %v16093_v59, %v13832_v60  ;;  %v16181_v7 = vld [vmem:[#allocation7 + $0x1ecc] sm:$0xf]  ;;  %v10927_v59 = vor.u32 %v15370_v39, %v10926_v38  ;;  %v15234_v53 = vld [vmem:[#allocation7 + $0x12c] sm:$0xf0]  ;;  %v10607_v60 = vor.u32 %v15290_v2, %v10606_v45 }
 0x3b8   :  { %v14184_v16 = vld [vmem:[#allocation7 + $0x1ee8] sm:$0xf0]  ;;  %7477 = vmatpush.bf16.msra.mxu3 %v14219_v6  ;;  %7443 = vmatmul.bf16.vlgmr.msra.gmra.mxu0 %v16896_v47  ;;  %v10383_v5 = vor.u32 %v15234_v53, %v10382_v14  ;;  %v10830_v39 = vld [vmem:[#allocation7 + $0x490] sm:$0xf] }
 0x3b9   :  { %v14187_v12 = vor.u32 %v16181_v7, %v14184_v16  ;;  %7468 = vmatpush.bf16.msrb.mxu2 %v13835_v62  ;;  %7487 = vmatpush.bf16.msrb.mxu0 %v10479_v13  ;;  %v16173_v33 = vld [vmem:[#allocation7 + $0x1e8c] sm:$0xf]  ;;  %v15226_v62 = vld [vmem:[#allocation7 + $0xec] sm:$0xf0]  ;;  %v10575_v16 = vor.u32 %v15282_v3, %v10574_v37  ;;  %v7238_v3 = vpop.f32.mrf.mxu0 }
 0x3ba   :  { %v14152_v26 = vld [vmem:[#allocation7 + $0x1ea8] sm:$0xf0]  ;;  %7502 = vmatpush.bf16.msra.mxu1 %v10671_v19  ;;  %v11246_v13 = vld [vmem:[#allocation7 + $0x7d0] sm:$0xf]  ;;  %v10351_v61 = vor.u32 %v15226_v62, %v10350_v28 }
 0x3bb   :  { %v14155_v43 = vor.u32 %v16173_v33, %v14152_v26  ;;  %v16165_v22 = vld [vmem:[#allocation7 + $0x1e4c] sm:$0xf]  ;;  %v15450_v7 = vld [vmem:[#allocation7 + $0x7ec] sm:$0xf0]  ;;  %v7251_v33 = vpop.f32.mrf.mxu1 }
 0x3bc   :  { %7469 = vmatmul.bf16.vlgmr.msrb.gmra.mxu2 %v16898_v54  ;;  %7478 = vmatpush.bf16.msra.mxu3 %v14187_v12  ;;  %v14120_v55 = vld [vmem:[#allocation7 + $0x1e68] sm:$0xf0]  ;;  %v10542_v19 = vld [vmem:[#allocation7 + $0x250] sm:$0xf]  ;;  %v7225_v12 = vpop.f32.mrf.mxu3  ;;  %v11247_v27 = vor.u32 %v15450_v7, %v11246_v13 }
 0x3bd   :  { %7513 = vmatpush.bf16.msra.mxu2 %v10991_v17  ;;  %7488 = vmatpush.bf16.msrb.mxu0 %v10447_v30  ;;  %v14123_v36 = vor.u32 %v16165_v22, %v14120_v55  ;;  %v16157_v6 = vld [vmem:[#allocation7 + $0x1e0c] sm:$0xf]  ;;  %v15354_v17 = vld [vmem:[#allocation7 + $0x4ec] sm:$0xf0]  ;;  %v10543_v38 = vor.u32 %v15274_v24, %v10542_v19 }
 0x3be   :  { %7503 = vmatpush.bf16.msra.mxu1 %v10639_v51  ;;  %v14088_v41 = vld [vmem:[#allocation7 + $0x1e28] sm:$0xf0]  ;;  %v10318_v30 = vld [vmem:[#allocation7 + $0x90] sm:$0xf]  ;;  %v10863_v26 = vor.u32 %v15354_v17, %v10862_v11  ;;  %v7250_v51 = vadd.f32 %v7249_v57, %v7237_v9 }
 0x3bf   :  { %v14091_v23 = vor.u32 %v16157_v6, %v14088_v41  ;;  %v10510_v45 = vld [vmem:[#allocation7 + $0x210] sm:$0xf] }
 0x3c0   :  { %7479 = vmatpush.bf16.msra.mxu3 %v14155_v43  ;;  %v15346_v43 = vld [vmem:[#allocation7 + $0x4ac] sm:$0xf0]  ;;  %v16995_v37 = vadd.f32 %v7262_v0, %v7250_v51  ;;  %v7264_v51 = vpop.f32.mrf.mxu2 }
 0x3c1   :  { %7514 = vmatpush.bf16.msra.mxu2 %v10959_v34  ;;  %7489 = vmatpush.bf16.msrb.mxu0 %v10415_v50  ;;  %v15218_v34 = vld [vmem:[#allocation7 + $0xac] sm:$0xf0]  ;;  %v11215_v50 = vor.u32 %v15442_v25, %v11214_v35 }
 0x3c2   :  { %7504 = vmatpush.bf16.msra.mxu1 %v10607_v60  ;;  %v15266_v2 = vld [vmem:[#allocation7 + $0x22c] sm:$0xf0]  ;;  %v10319_v48 = vor.u32 %v15218_v34, %v10318_v30 }
 0x3c3   :  { %v11758_v22 = vld [vmem:[#allocation7 + $0xbd0] sm:$0xf]  ;;  %v10511_v57 = vor.u32 %v15266_v2, %v10510_v45 }
 0x3c4   :  { %7480 = vmatpush.bf16.msra.mxu3 %v14123_v36  ;;  %v15578_v55 = vld [vmem:[#allocation7 + $0xbec] sm:$0xf0] }
 0x3c5   :  { %7515 = vmatpush.bf16.msra.mxu2 %v10927_v59  ;;  %7490 = vmatpush.bf16.msrb.mxu0 %v10383_v5  ;;  %v10286_v56 = vld [vmem:[#allocation7 + $0x50] sm:$0xf]  ;;  %v10831_v59 = vor.u32 %v15346_v43, %v10830_v39  ;;  %v11759_v5 = vor.u32 %v15578_v55, %v11758_v22 }
 0x3c6   :  { %7505 = vmatpush.bf16.msra.mxu1 %v10575_v16  ;;  %v15210_v14 = vld [vmem:[#allocation7 + $0x6c] sm:$0xf0] }
 0x3c7   :  { %v11182_v53 = vld [vmem:[#allocation7 + $0x750] sm:$0xf]  ;;  %v10287_v41 = vor.u32 %v15210_v14, %v10286_v56 }
 0x3c8   :  { %7481 = vmatpush.bf16.msra.mxu3 %v14091_v23  ;;  %v15434_v60 = vld [vmem:[#allocation7 + $0x76c] sm:$0xf0] }
 0x3c9   :  { %7516 = vmatpush.bf16.msra.mxu2 %v10895_v42  ;;  %7491 = vmatpush.bf16.msrb.mxu0 %v10351_v61  ;;  %v10798_v46 = vld [vmem:[#allocation7 + $0x450] sm:$0xf]  ;;  %v11183_v28 = vor.u32 %v15434_v60, %v11182_v53 }
 0x3ca   :  { %7506 = vmatpush.bf16.msra.mxu1 %v10543_v38  ;;  %v15338_v36 = vld [vmem:[#allocation7 + $0x46c] sm:$0xf0] }
 0x3cb   :  { %7482 = vmatmul.bf16.vlgmr.msra.gmra.mxu3 %v16903_v58  ;;  %v11726_v6 = vld [vmem:[#allocation7 + $0xb90] sm:$0xf]  ;;  %v10799_v7 = vor.u32 %v15338_v36, %v10798_v46 }
 0x3cc   :  { %7526 = vmatpush.bf16.msrb.mxu3 %v11247_v27  ;;  %v15570_v42 = vld [vmem:[#allocation7 + $0xbac] sm:$0xf0] }
 0x3cd   :  { %7517 = vmatpush.bf16.msra.mxu2 %v10863_v26  ;;  %7492 = vmatpush.bf16.msrb.mxu0 %v10319_v48  ;;  %v10254_v62 = vld [vmem:[#allocation7 + $0x10] sm:$0xf]  ;;  %v11727_v24 = vor.u32 %v15570_v42, %v11726_v6 }
 0x3ce   :  { %v15202_v13 = vld [vmem:[#allocation7 + $0x2c] sm:$0xf0]  ;;  %7507 = vmatpush.bf16.msra.mxu1 %v10511_v57 }
 0x3cf   :  { %v10766_v16 = vld [vmem:[#allocation7 + $0x410] sm:$0xf]  ;;  %v10255_v61 = vor.u32 %v15202_v13, %v10254_v62 }
 0x3d0   :  { %7527 = vmatpush.bf16.msrb.mxu3 %v11215_v50  ;;  %v11150_v11 = vld [vmem:[#allocation7 + $0x710] sm:$0xf] }
 0x3d1   :  { %7518 = vmatpush.bf16.msra.mxu2 %v10831_v59  ;;  %v15426_v17 = vld [vmem:[#allocation7 + $0x72c] sm:$0xf0]  ;;  %7493 = vmatpush.bf16.msrb.mxu0 %v10287_v41  ;;  %v7275_v41 = vpop.f32.mrf.mxu3 }
 0x3d2   :  { %v15330_v21 = vld [vmem:[#allocation7 + $0x42c] sm:$0xf0]  ;;  %7552 = vmatpush.bf16.msrb.mxu1 %v11759_v5  ;;  %v11151_v27 = vor.u32 %v15426_v17, %v11150_v11  ;;  %v17001_v13 = vadd.f32 %v7275_v41, %v16995_v37 }
 0x3d3   :  { %v11502_v23 = vld [vmem:[#allocation7 + $0x9d0] sm:$0xf]  ;;  %7508 = vmatmul.bf16.vlgmr.msra.gmra.mxu1 %v16837_v49  ;;  %v10767_v26 = vor.u32 %v15330_v21, %v10766_v16 }
 0x3d4   :  { %v15514_v19 = vld [vmem:[#allocation7 + $0x9ec] sm:$0xf0]  ;;  %7528 = vmatpush.bf16.msrb.mxu3 %v11183_v28 }
 0x3d5   :  { %v12014_v9 = vld [vmem:[#allocation7 + $0xdd0] sm:$0xf]  ;;  %7519 = vmatpush.bf16.msra.mxu2 %v10799_v7  ;;  %v11503_v34 = vor.u32 %v15514_v19, %v11502_v23  ;;  %7494 = vmatpush.bf16.msrb.mxu0 %v10255_v61  ;;  %v7301_v7 = vpop.f32.mrf.mxu1 }
 0x3d6   :  { %v15642_v12 = vld [vmem:[#allocation7 + $0xdec] sm:$0xf0]  ;;  %7553 = vmatpush.bf16.msrb.mxu1 %v11727_v24  ;;  %v16457_v24 = vld [vmem:[#allocation8] sm:$0xff] }
 0x3d7   :  { %v11694_v30 = vld [vmem:[#allocation7 + $0xb50] sm:$0xf]  ;;  %v12015_v38 = vor.u32 %v15642_v12, %v12014_v9  ;;  %v1522_v9 = vperm.slane %v16457_v24, 3 }
 0x3d8   :  { %v15562_v33 = vld [vmem:[#allocation7 + $0xb6c] sm:$0xf0]  ;;  %7529 = vmatpush.bf16.msrb.mxu3 %v11151_v27  ;;  %7495 = vmatmul.bf16.vlgmr.msrb.gmra.mxu0 %v16840_v4 }
 0x3d9   :  { %v11118_v35 = vld [vmem:[#allocation7 + $0x6d0] sm:$0xf]  ;;  %v11695_v45 = vor.u32 %v15562_v33, %v11694_v30  ;;  %7520 = vmatpush.bf16.msra.mxu2 %v10767_v26  ;;  %7539 = vmatpush.bf16.msra.mxu0 %v11503_v34 }
 0x3da   :  { %v15418_v25 = vld [vmem:[#allocation7 + $0x6ec] sm:$0xf0] }
 0x3db   :  { %v11470_v39 = vld [vmem:[#allocation7 + $0x990] sm:$0xf]  ;;  %v11119_v50 = vor.u32 %v15418_v25, %v11118_v35  ;;  %7554 = vmatpush.bf16.msrb.mxu1 %v11695_v45  ;;  %v7288_v45 = vpop.f32.mrf.mxu0 }
 0x3dc   :  { %v15506_v43 = vld [vmem:[#allocation7 + $0x9ac] sm:$0xf0]  ;;  %7521 = vmatmul.bf16.vlgmr.msra.gmra.mxu2 %v16842_v8 }
 0x3dd   :  { %v11982_v2 = vld [vmem:[#allocation7 + $0xd90] sm:$0xf]  ;;  %v11471_v56 = vor.u32 %v15506_v43, %v11470_v39  ;;  %7565 = vmatpush.bf16.msrb.mxu2 %v12015_v38  ;;  %7530 = vmatpush.bf16.msrb.mxu3 %v11119_v50 }
 0x3de   :  { %v15634_v48 = vld [vmem:[#allocation7 + $0xdac] sm:$0xf0] }
 0x3df   :  { %v11662_v22 = vld [vmem:[#allocation7 + $0xb10] sm:$0xf]  ;;  %v11983_v53 = vor.u32 %v15634_v48, %v11982_v2  ;;  %7540 = vmatpush.bf16.msra.mxu0 %v11471_v56 }
 0x3e0   :  { %v15554_v55 = vld [vmem:[#allocation7 + $0xb2c] sm:$0xf0] }
 0x3e1   :  { %v11086_v59 = vld [vmem:[#allocation7 + $0x690] sm:$0xf]  ;;  %v11663_v57 = vor.u32 %v15554_v55, %v11662_v22  ;;  %7566 = vmatpush.bf16.msrb.mxu2 %v11983_v53  ;;  %v7289_v22 = vadd.f32 %v7288_v45, %v1522_v9  ;;  %v7277_v55 = vpop.f32.mrf.mxu3  ;;  %v7303_v53 = vpop.f32.mrf.mxu1 }
 0x3e2   :  { %v15410_v14 = vld [vmem:[#allocation7 + $0x6ac] sm:$0xf0]  ;;  %v7314_v9 = vpop.f32.mrf.mxu2 }
 0x3e3   :  { %v11438_v60 = vld [vmem:[#allocation7 + $0x950] sm:$0xf]  ;;  %v11087_v3 = vor.u32 %v15410_v14, %v11086_v59  ;;  %7555 = vmatpush.bf16.msrb.mxu1 %v11663_v57 }
 0x3e4   :  { %v15498_v0 = vld [vmem:[#allocation7 + $0x96c] sm:$0xf0] }
 0x3e5   :  { %v11950_v46 = vld [vmem:[#allocation7 + $0xd50] sm:$0xf]  ;;  %v11439_v28 = vor.u32 %v15498_v0, %v11438_v60  ;;  %7531 = vmatpush.bf16.msrb.mxu3 %v11087_v3 }
 0x3e6   :  { %v15626_v36 = vld [vmem:[#allocation7 + $0xd6c] sm:$0xf0] }
 0x3e7   :  { %v11630_v5 = vld [vmem:[#allocation7 + $0xad0] sm:$0xf]  ;;  %v11951_v16 = vor.u32 %v15626_v36, %v11950_v46  ;;  %7541 = vmatpush.bf16.msra.mxu0 %v11439_v28  ;;  %v7302_v36 = vadd.f32 %v7301_v7, %v7289_v22 }
 0x3e8   :  { %v15546_v6 = vld [vmem:[#allocation7 + $0xaec] sm:$0xf0] }
 0x3e9   :  { %v11054_v42 = vld [vmem:[#allocation7 + $0x650] sm:$0xf]  ;;  %v11631_v21 = vor.u32 %v15546_v6, %v11630_v5  ;;  %7567 = vmatpush.bf16.msrb.mxu2 %v11951_v16 }
 0x3ea   :  { %v15402_v62 = vld [vmem:[#allocation7 + $0x66c] sm:$0xf0] }
 0x3eb   :  { %v11406_v11 = vld [vmem:[#allocation7 + $0x910] sm:$0xf]  ;;  %v11055_v12 = vor.u32 %v15402_v62, %v11054_v42  ;;  %7556 = vmatpush.bf16.msrb.mxu1 %v11631_v21 }
 0x3ec   :  { %v15490_v17 = vld [vmem:[#allocation7 + $0x92c] sm:$0xf0] }
 0x3ed   :  { %v11918_v23 = vld [vmem:[#allocation7 + $0xd10] sm:$0xf]  ;;  %v11407_v30 = vor.u32 %v15490_v17, %v11406_v11  ;;  %7532 = vmatpush.bf16.msrb.mxu3 %v11055_v12 }
 0x3ee   :  { %v15618_v19 = vld [vmem:[#allocation7 + $0xd2c] sm:$0xf0] }
 0x3ef   :  { %v11598_v61 = vld [vmem:[#allocation7 + $0xa90] sm:$0xf]  ;;  %v11919_v34 = vor.u32 %v15618_v19, %v11918_v23  ;;  %7542 = vmatpush.bf16.msra.mxu0 %v11407_v30  ;;  %v7290_v30 = vpop.f32.mrf.mxu0 }
 0x3f0   :  { %v15538_v27 = vld [vmem:[#allocation7 + $0xaac] sm:$0xf0] }
 0x3f1   :  { %v11022_v33 = vld [vmem:[#allocation7 + $0x610] sm:$0xf]  ;;  %v11599_v38 = vor.u32 %v15538_v27, %v11598_v61  ;;  %7568 = vmatpush.bf16.msrb.mxu2 %v11919_v34  ;;  %v17004_v27 = vadd.f32 %v7314_v9, %v7302_v36 }
 0x3f2   :  { %v15394_v37 = vld [vmem:[#allocation7 + $0x62c] sm:$0xf0] }
 0x3f3   :  { %v11374_v26 = vld [vmem:[#allocation7 + $0x8d0] sm:$0xf]  ;;  %v11023_v2 = vor.u32 %v15394_v37, %v11022_v33  ;;  %7557 = vmatpush.bf16.msrb.mxu1 %v11599_v38 }
 0x3f4   :  { %v15482_v35 = vld [vmem:[#allocation7 + $0x8ec] sm:$0xf0] }
 0x3f5   :  { %v12270_v25 = vld [vmem:[#allocation7 + $0xfd0] sm:$0xf]  ;;  %v11375_v56 = vor.u32 %v15482_v35, %v11374_v26  ;;  %7533 = vmatpush.bf16.msrb.mxu3 %v11023_v2 }
 0x3f6   :  { %v15706_v51 = vld [vmem:[#allocation7 + $0xfec] sm:$0xf0] }
 0x3f7   :  { %v11886_v39 = vld [vmem:[#allocation7 + $0xcd0] sm:$0xf]  ;;  %v12271_v59 = vor.u32 %v15706_v51, %v12270_v25  ;;  %7543 = vmatpush.bf16.msra.mxu0 %v11375_v56 }
 0x3f8   :  { %v15610_v43 = vld [vmem:[#allocation7 + $0xcec] sm:$0xf0]  ;;  %7534 = vmatmul.bf16.vlgmr.msrb.gmra.mxu3 %v16857_v10 }
 0x3f9   :  { %v11566_v48 = vld [vmem:[#allocation7 + $0xa50] sm:$0xf]  ;;  %v11887_v60 = vor.u32 %v15610_v43, %v11886_v39  ;;  %7578 = vmatpush.bf16.msra.mxu3 %v12271_v59 }
 0x3fa   :  { %v15530_v50 = vld [vmem:[#allocation7 + $0xa6c] sm:$0xf0] }
 0x3fb   :  { %v11342_v14 = vld [vmem:[#allocation7 + $0x890] sm:$0xf]  ;;  %v11567_v3 = vor.u32 %v15530_v50, %v11566_v48  ;;  %7569 = vmatpush.bf16.msrb.mxu2 %v11887_v60 }
 0x3fc   :  { %v15474_v0 = vld [vmem:[#allocation7 + $0x8ac] sm:$0xf0] }
 0x3fd   :  { %v12238_v57 = vld [vmem:[#allocation7 + $0xf90] sm:$0xf]  ;;  %v11343_v42 = vor.u32 %v15474_v0, %v11342_v14  ;;  %7558 = vmatpush.bf16.msrb.mxu1 %v11567_v3  ;;  %v7316_v3 = vpop.f32.mrf.mxu2 }
 0x3fe   :  { %v15698_v46 = vld [vmem:[#allocation7 + $0xfac] sm:$0xf0] }
 0x3ff   :  { %v11854_v5 = vld [vmem:[#allocation7 + $0xc90] sm:$0xf]  ;;  %v12239_v62 = vor.u32 %v15698_v46, %v12238_v57  ;;  %7544 = vmatpush.bf16.msra.mxu0 %v11343_v42 }
 0x400   :  { %v15602_v6 = vld [vmem:[#allocation7 + $0xcac] sm:$0xf0] }
 0x401   :  { %v11534_v41 = vld [vmem:[#allocation7 + $0xa10] sm:$0xf]  ;;  %v11855_v21 = vor.u32 %v15602_v6, %v11854_v5  ;;  %7579 = vmatpush.bf16.msra.mxu3 %v12239_v62 }
 0x402   :  { %v15522_v28 = vld [vmem:[#allocation7 + $0xa2c] sm:$0xf0] }
 0x403   :  { %v12782_v16 = vld [vmem:[#allocation7 + $0x13d0] sm:$0xf]  ;;  %v11535_v7 = vor.u32 %v15522_v28, %v11534_v41  ;;  %7570 = vmatpush.bf16.msrb.mxu2 %v11855_v21 }
 0x404   :  { %v15834_v11 = vld [vmem:[#allocation7 + $0x13ec] sm:$0xf0] }
 0x405   :  { %v11310_v17 = vld [vmem:[#allocation7 + $0x850] sm:$0xf]  ;;  %v12783_v33 = vor.u32 %v15834_v11, %v12782_v16  ;;  %7559 = vmatpush.bf16.msrb.mxu1 %v11535_v7 }
 0x406   :  { %v15466_v23 = vld [vmem:[#allocation7 + $0x86c] sm:$0xf0] }
 0x407   :  { %v12206_v19 = vld [vmem:[#allocation7 + $0xf50] sm:$0xf]  ;;  %v11311_v26 = vor.u32 %v15466_v23, %v11310_v17 }
 0x408   :  { %v15690_v24 = vld [vmem:[#allocation7 + $0xf6c] sm:$0xf0]  ;;  %7560 = vmatmul.bf16.vlgmr.msrb.gmra.mxu1 %v16850_v44 }
 0x409   :  { %v11822_v12 = vld [vmem:[#allocation7 + $0xc50] sm:$0xf]  ;;  %v12207_v34 = vor.u32 %v15690_v24, %v12206_v19  ;;  %7604 = vmatpush.bf16.msra.mxu1 %v12783_v33  ;;  %7545 = vmatpush.bf16.msra.mxu0 %v11311_v26 }
 0x40a   :  { %v15594_v61 = vld [vmem:[#allocation7 + $0xc6c] sm:$0xf0] }
 0x40b   :  { %v12750_v37 = vld [vmem:[#allocation7 + $0x1390] sm:$0xf]  ;;  %v11823_v38 = vor.u32 %v15594_v61, %v11822_v12  ;;  %7580 = vmatpush.bf16.msra.mxu3 %v12207_v34  ;;  %v7327_v34 = vpop.f32.mrf.mxu3 }
 0x40c   :  { %v15826_v35 = vld [vmem:[#allocation7 + $0x13ac] sm:$0xf0] }
 0x40d   :  { %v11278_v25 = vld [vmem:[#allocation7 + $0x810] sm:$0xf]  ;;  %v12751_v22 = vor.u32 %v15826_v35, %v12750_v37  ;;  %7571 = vmatpush.bf16.msrb.mxu2 %v11823_v38  ;;  %v7328_v38 = vadd.f32 %v7327_v34, %v17004_v27 }
 0x40e   :  { %v15458_v51 = vld [vmem:[#allocation7 + $0x82c] sm:$0xf0] }
 0x40f   :  { %v11790_v39 = vld [vmem:[#allocation7 + $0xc10] sm:$0xf]  ;;  %v11279_v59 = vor.u32 %v15458_v51, %v11278_v25  ;;  %7605 = vmatpush.bf16.msra.mxu1 %v12751_v22 }
 0x410   :  { %v12174_v43 = vld [vmem:[#allocation7 + $0xf10] sm:$0xf] }
 0x411   :  { %v15682_v45 = vld [vmem:[#allocation7 + $0xf2c] sm:$0xf0]  ;;  %7546 = vmatpush.bf16.msra.mxu0 %v11279_v59 }
 0x412   :  { %v15586_v2 = vld [vmem:[#allocation7 + $0xc2c] sm:$0xf0]  ;;  %v12175_v14 = vor.u32 %v15682_v45, %v12174_v43 }
 0x413   :  { %v12526_v48 = vld [vmem:[#allocation7 + $0x11d0] sm:$0xf]  ;;  %v11791_v0 = vor.u32 %v15586_v2, %v11790_v39  ;;  %v7353_v39 = vpop.f32.mrf.mxu1 }
 0x414   :  { %v15770_v50 = vld [vmem:[#allocation7 + $0x11ec] sm:$0xf0]  ;;  %7581 = vmatpush.bf16.msra.mxu3 %v12175_v14  ;;  %7547 = vmatmul.bf16.vlgmr.msra.gmra.mxu0 %v16855_v63 }
 0x415   :  { %v13038_v55 = vld [vmem:[#allocation7 + $0x15d0] sm:$0xf]  ;;  %v12527_v57 = vor.u32 %v15770_v50, %v12526_v48  ;;  %7572 = vmatpush.bf16.msrb.mxu2 %v11791_v0 }
 0x416   :  { %v15898_v56 = vld [vmem:[#allocation7 + $0x15ec] sm:$0xf0] }
 0x417   :  { %v12718_v53 = vld [vmem:[#allocation7 + $0x1350] sm:$0xf]  ;;  %v13039_v5 = vor.u32 %v15898_v56, %v13038_v55  ;;  %7591 = vmatpush.bf16.msrb.mxu0 %v12527_v57 }
 0x418   :  { %v15818_v60 = vld [vmem:[#allocation7 + $0x136c] sm:$0xf0]  ;;  %7573 = vmatmul.bf16.vlgmr.msrb.gmra.mxu2 %v16859_v15 }
 0x419   :  { %v12142_v46 = vld [vmem:[#allocation7 + $0xed0] sm:$0xf]  ;;  %v12719_v28 = vor.u32 %v15818_v60, %v12718_v53  ;;  %7617 = vmatpush.bf16.msra.mxu2 %v13039_v5 }
 0x41a   :  { %v15674_v36 = vld [vmem:[#allocation7 + $0xeec] sm:$0xf0] }
 0x41b   :  { %v12494_v6 = vld [vmem:[#allocation7 + $0x1190] sm:$0xf]  ;;  %v12143_v16 = vor.u32 %v15674_v36, %v12142_v46  ;;  %7606 = vmatpush.bf16.msra.mxu1 %v12719_v28 }
 0x41c   :  { %v15762_v41 = vld [vmem:[#allocation7 + $0x11ac] sm:$0xf0] }
 0x41d   :  { %v13006_v42 = vld [vmem:[#allocation7 + $0x1590] sm:$0xf]  ;;  %v12495_v21 = vor.u32 %v15762_v41, %v12494_v6  ;;  %7582 = vmatpush.bf16.msra.mxu3 %v12143_v16  ;;  %v7340_v41 = vpop.f32.mrf.mxu0 }
 0x41e   :  { %v15890_v62 = vld [vmem:[#allocation7 + $0x15ac] sm:$0xf0]  ;;  %v7341_v16 = vadd.f32 %v7340_v41, %v7328_v38 }
 0x41f   :  { %v12686_v11 = vld [vmem:[#allocation7 + $0x1310] sm:$0xf]  ;;  %v13007_v24 = vor.u32 %v15890_v62, %v13006_v42  ;;  %7592 = vmatpush.bf16.msrb.mxu0 %v12495_v21 }
 0x420   :  { %v15810_v17 = vld [vmem:[#allocation7 + $0x132c] sm:$0xf0] }
 0x421   :  { %v12110_v23 = vld [vmem:[#allocation7 + $0xe90] sm:$0xf]  ;;  %v12687_v12 = vor.u32 %v15810_v17, %v12686_v11  ;;  %7618 = vmatpush.bf16.msra.mxu2 %v13007_v24  ;;  %v7329_v11 = vpop.f32.mrf.mxu3 }
 0x422   :  { %v15666_v19 = vld [vmem:[#allocation7 + $0xeac] sm:$0xf0] }
 0x423   :  { %v12462_v9 = vld [vmem:[#allocation7 + $0x1150] sm:$0xf]  ;;  %v12111_v33 = vor.u32 %v15666_v19, %v12110_v23  ;;  %7607 = vmatpush.bf16.msra.mxu1 %v12687_v12  ;;  %v7355_v19 = vpop.f32.mrf.mxu1 }
 0x424   :  { %v15754_v7 = vld [vmem:[#allocation7 + $0x116c] sm:$0xf0] }
 0x425   :  { %v12974_v61 = vld [vmem:[#allocation7 + $0x1550] sm:$0xf]  ;;  %v12463_v35 = vor.u32 %v15754_v7, %v12462_v9  ;;  %7583 = vmatpush.bf16.msra.mxu3 %v12111_v33 }
 0x426   :  { %v15882_v30 = vld [vmem:[#allocation7 + $0x156c] sm:$0xf0] }
 0x427   :  { %v12654_v37 = vld [vmem:[#allocation7 + $0x12d0] sm:$0xf]  ;;  %v12975_v43 = vor.u32 %v15882_v30, %v12974_v61  ;;  %7593 = vmatpush.bf16.msrb.mxu0 %v12463_v35  ;;  %v7354_v61 = vadd.f32 %v7353_v39, %v7341_v16 }
 0x428   :  { %v15802_v26 = vld [vmem:[#allocation7 + $0x12ec] sm:$0xf0] }
 0x429   :  { %v12078_v25 = vld [vmem:[#allocation7 + $0xe50] sm:$0xf]  ;;  %v12655_v48 = vor.u32 %v15802_v26, %v12654_v37  ;;  %7619 = vmatpush.bf16.msra.mxu2 %v12975_v43 }
 0x42a   :  { %v15658_v51 = vld [vmem:[#allocation7 + $0xe6c] sm:$0xf0] }
 0x42b   :  { %v12430_v45 = vld [vmem:[#allocation7 + $0x1110] sm:$0xf]  ;;  %v12079_v55 = vor.u32 %v15658_v51, %v12078_v25  ;;  %7608 = vmatpush.bf16.msra.mxu1 %v12655_v48 }
 0x42c   :  { %v15746_v2 = vld [vmem:[#allocation7 + $0x112c] sm:$0xf0] }
 0x42d   :  { %v12942_v50 = vld [vmem:[#allocation7 + $0x1510] sm:$0xf]  ;;  %v12431_v14 = vor.u32 %v15746_v2, %v12430_v45  ;;  %7584 = vmatpush.bf16.msra.mxu3 %v12079_v55 }
 0x42e   :  { %v15874_v22 = vld [vmem:[#allocation7 + $0x152c] sm:$0xf0] }
 0x42f   :  { %v12622_v56 = vld [vmem:[#allocation7 + $0x1290] sm:$0xf]  ;;  %v12943_v27 = vor.u32 %v15874_v22, %v12942_v50  ;;  %7594 = vmatpush.bf16.msrb.mxu0 %v12431_v14  ;;  %v7366_v22 = vpop.f32.mrf.mxu2  ;;  %v7342_v14 = vpop.f32.mrf.mxu0 }
 0x430   :  { %v15794_v59 = vld [vmem:[#allocation7 + $0x12ac] sm:$0xf0] }
 0x431   :  { %v12046_v53 = vld [vmem:[#allocation7 + $0xe10] sm:$0xf]  ;;  %v12623_v3 = vor.u32 %v15794_v59, %v12622_v56  ;;  %7620 = vmatpush.bf16.msra.mxu2 %v12943_v27  ;;  %v17011_v59 = vadd.f32 %v7366_v22, %v7354_v61 }
 0x432   :  { %v15650_v60 = vld [vmem:[#allocation7 + $0xe2c] sm:$0xf0] }
 0x433   :  { %v12398_v0 = vld [vmem:[#allocation7 + $0x10d0] sm:$0xf]  ;;  %v12047_v28 = vor.u32 %v15650_v60, %v12046_v53  ;;  %7609 = vmatpush.bf16.msra.mxu1 %v12623_v3 }
 0x434   :  { %v15738_v57 = vld [vmem:[#allocation7 + $0x10ec] sm:$0xf0] }
 0x435   :  { %v13294_v46 = vld [vmem:[#allocation7 + $0x17d0] sm:$0xf]  ;;  %v12399_v17 = vor.u32 %v15738_v57, %v12398_v0  ;;  %7585 = vmatpush.bf16.msra.mxu3 %v12047_v28 }
 0x436   :  { %v15962_v36 = vld [vmem:[#allocation7 + $0x17ec] sm:$0xf0] }
 0x437   :  { %v12910_v5 = vld [vmem:[#allocation7 + $0x14d0] sm:$0xf]  ;;  %v13295_v21 = vor.u32 %v15962_v36, %v13294_v46  ;;  %7595 = vmatpush.bf16.msrb.mxu0 %v12399_v17 }
 0x438   :  { %v15866_v6 = vld [vmem:[#allocation7 + $0x14ec] sm:$0xf0]  ;;  %7586 = vmatmul.bf16.vlgmr.msra.gmra.mxu3 %v16878_v32 }
 0x439   :  { %v12590_v42 = vld [vmem:[#allocation7 + $0x1250] sm:$0xf]  ;;  %v12911_v24 = vor.u32 %v15866_v6, %v12910_v5  ;;  %7630 = vmatpush.bf16.msrb.mxu3 %v13295_v21 }
 0x43a   :  { %v15786_v62 = vld [vmem:[#allocation7 + $0x126c] sm:$0xf0] }
 0x43b   :  { %v12366_v23 = vld [vmem:[#allocation7 + $0x1090] sm:$0xf]  ;;  %v12591_v30 = vor.u32 %v15786_v62, %v12590_v42  ;;  %7621 = vmatpush.bf16.msra.mxu2 %v12911_v24 }
 0x43c   :  { %v15730_v9 = vld [vmem:[#allocation7 + $0x10ac] sm:$0xf0] }
 0x43d   :  { %v13262_v7 = vld [vmem:[#allocation7 + $0x1790] sm:$0xf]  ;;  %v12367_v35 = vor.u32 %v15730_v9, %v12366_v23  ;;  %7610 = vmatpush.bf16.msra.mxu1 %v12591_v30  ;;  %v7368_v30 = vpop.f32.mrf.mxu2 }
 0x43e   :  { %v15954_v12 = vld [vmem:[#allocation7 + $0x17ac] sm:$0xf0] }
 0x43f   :  { %v12878_v33 = vld [vmem:[#allocation7 + $0x1490] sm:$0xf]  ;;  %v13263_v25 = vor.u32 %v15954_v12, %v13262_v7  ;;  %7596 = vmatpush.bf16.msrb.mxu0 %v12367_v35 }
 0x440   :  { %v15858_v37 = vld [vmem:[#allocation7 + $0x14ac] sm:$0xf0] }
 0x441   :  { %v12558_v26 = vld [vmem:[#allocation7 + $0x1210] sm:$0xf]  ;;  %v12879_v45 = vor.u32 %v15858_v37, %v12878_v33  ;;  %7631 = vmatpush.bf16.msrb.mxu3 %v13263_v25 }
 0x442   :  { %v15778_v34 = vld [vmem:[#allocation7 + $0x122c] sm:$0xf0] }
 0x443   :  { %v13806_v51 = vld [vmem:[#allocation7 + $0x1bd0] sm:$0xf]  ;;  %v12559_v39 = vor.u32 %v15778_v34, %v12558_v26  ;;  %7622 = vmatpush.bf16.msra.mxu2 %v12879_v45 }
 0x444   :  { %v16090_v38 = vld [vmem:[#allocation7 + $0x1bec] sm:$0xf0] }
 0x445   :  { %v12334_v43 = vld [vmem:[#allocation7 + $0x1050] sm:$0xf]  ;;  %v13807_v53 = vor.u32 %v16090_v38, %v13806_v51  ;;  %7611 = vmatpush.bf16.msra.mxu1 %v12559_v39 }
 0x446   :  { %v15722_v2 = vld [vmem:[#allocation7 + $0x106c] sm:$0xf0] }
 0x447   :  { %v13230_v48 = vld [vmem:[#allocation7 + $0x1750] sm:$0xf]  ;;  %v12335_v0 = vor.u32 %v15722_v2, %v12334_v43 }
 0x448   :  { %v15946_v50 = vld [vmem:[#allocation7 + $0x176c] sm:$0xf0]  ;;  %7612 = vmatmul.bf16.vlgmr.msra.gmra.mxu1 %v16871_v1 }
 0x449   :  { %v12846_v55 = vld [vmem:[#allocation7 + $0x1450] sm:$0xf]  ;;  %v13231_v27 = vor.u32 %v15946_v50, %v13230_v48  ;;  %7656 = vmatpush.bf16.msrb.mxu1 %v13807_v53  ;;  %7597 = vmatpush.bf16.msrb.mxu0 %v12335_v0 }
 0x44a   :  { %v15850_v56 = vld [vmem:[#allocation7 + $0x146c] sm:$0xf0] }
 0x44b   :  { %v13774_v60 = vld [vmem:[#allocation7 + $0x1b90] sm:$0xf]  ;;  %v12847_v3 = vor.u32 %v15850_v56, %v12846_v55  ;;  %7632 = vmatpush.bf16.msrb.mxu3 %v13231_v27  ;;  %v7379_v27 = vpop.f32.mrf.mxu3 }
 0x44c   :  { %v16082_v57 = vld [vmem:[#allocation7 + $0x1bac] sm:$0xf0] }
 0x44d   :  { %v12302_v46 = vld [vmem:[#allocation7 + $0x1010] sm:$0xf]  ;;  %v13775_v16 = vor.u32 %v16082_v57, %v13774_v60  ;;  %7623 = vmatpush.bf16.msra.mxu2 %v12847_v3  ;;  %v7380_v3 = vadd.f32 %v7379_v27, %v17011_v59 }
 0x44e   :  { %v15714_v36 = vld [vmem:[#allocation7 + $0x102c] sm:$0xf0] }
 0x44f   :  { %v12814_v5 = vld [vmem:[#allocation7 + $0x1410] sm:$0xf]  ;;  %v12303_v21 = vor.u32 %v15714_v36, %v12302_v46  ;;  %7657 = vmatpush.bf16.msrb.mxu1 %v13775_v16 }
 0x450   :  { %v13198_v6 = vld [vmem:[#allocation7 + $0x1710] sm:$0xf] }
 0x451   :  { %v15938_v41 = vld [vmem:[#allocation7 + $0x172c] sm:$0xf0]  ;;  %7598 = vmatpush.bf16.msrb.mxu0 %v12303_v21 }
 0x452   :  { %v15842_v28 = vld [vmem:[#allocation7 + $0x142c] sm:$0xf0]  ;;  %v13199_v23 = vor.u32 %v15938_v41, %v13198_v6 }
 0x453   :  { %v13550_v42 = vld [vmem:[#allocation7 + $0x19d0] sm:$0xf]  ;;  %v12815_v9 = vor.u32 %v15842_v28, %v12814_v5  ;;  %v7405_v5 = vpop.f32.mrf.mxu1 }
 0x454   :  { %v16026_v62 = vld [vmem:[#allocation7 + $0x19ec] sm:$0xf0]  ;;  %7633 = vmatpush.bf16.msrb.mxu3 %v13199_v23  ;;  %7599 = vmatmul.bf16.vlgmr.msrb.gmra.mxu0 %v16876_v29 }
 0x455   :  { %v14062_v11 = vld [vmem:[#allocation7 + $0x1dd0] sm:$0xf]  ;;  %v13551_v7 = vor.u32 %v16026_v62, %v13550_v42  ;;  %7624 = vmatpush.bf16.msra.mxu2 %v12815_v9 }
 0x456   :  { %v16154_v17 = vld [vmem:[#allocation7 + $0x1dec] sm:$0xf0] }
 0x457   :  { %v13742_v19 = vld [vmem:[#allocation7 + $0x1b50] sm:$0xf]  ;;  %v14063_v33 = vor.u32 %v16154_v17, %v14062_v11  ;;  %7643 = vmatpush.bf16.msra.mxu0 %v13551_v7 }
 0x458   :  { %v16074_v24 = vld [vmem:[#allocation7 + $0x1b6c] sm:$0xf0]  ;;  %7625 = vmatmul.bf16.vlgmr.msra.gmra.mxu2 %v16880_v40 }
 0x459   :  { %v13166_v12 = vld [vmem:[#allocation7 + $0x16d0] sm:$0xf]  ;;  %v13743_v34 = vor.u32 %v16074_v24, %v13742_v19  ;;  %7669 = vmatpush.bf16.msrb.mxu2 %v14063_v33 }
 0x45a   :  { %v15930_v61 = vld [vmem:[#allocation7 + $0x16ec] sm:$0xf0] }
 0x45b   :  { %v13518_v37 = vld [vmem:[#allocation7 + $0x1990] sm:$0xf]  ;;  %v13167_v51 = vor.u32 %v15930_v61, %v13166_v12  ;;  %7658 = vmatpush.bf16.msrb.mxu1 %v13743_v34 }
 0x45c   :  { %v16018_v26 = vld [vmem:[#allocation7 + $0x19ac] sm:$0xf0] }
 0x45d   :  { %v14030_v35 = vld [vmem:[#allocation7 + $0x1d90] sm:$0xf]  ;;  %v13519_v45 = vor.u32 %v16018_v26, %v13518_v37  ;;  %7634 = vmatpush.bf16.msrb.mxu3 %v13167_v51  ;;  %v7392_v26 = vpop.f32.mrf.mxu0 }
 0x45e   :  { %v16146_v25 = vld [vmem:[#allocation7 + $0x1dac] sm:$0xf0]  ;;  %v7393_v51 = vadd.f32 %v7392_v26, %v7380_v3  ;;  %v10736_v3 = vld [vmem:[#allocation7 + $0x3f0] sm:$0xf0] }
 0x45f   :  { %v13710_v38 = vld [vmem:[#allocation7 + $0x1b10] sm:$0xf]  ;;  %v14031_v50 = vor.u32 %v16146_v25, %v14030_v35  ;;  %7644 = vmatpush.bf16.msra.mxu0 %v13519_v45 }
 0x460   :  { %v16066_v43 = vld [vmem:[#allocation7 + $0x1b2c] sm:$0xf0] }
 0x461   :  { %v13134_v2 = vld [vmem:[#allocation7 + $0x1690] sm:$0xf]  ;;  %v13711_v55 = vor.u32 %v16066_v43, %v13710_v38  ;;  %7670 = vmatpush.bf16.msrb.mxu2 %v14031_v50  ;;  %v7381_v38 = vpop.f32.mrf.mxu3 }
 0x462   :  { %v15922_v48 = vld [vmem:[#allocation7 + $0x16ac] sm:$0xf0]  ;;  %v15382_v38 = vld [vmem:[#allocation7 + $0x5d4] sm:$0xf] }
 0x463   :  { %v13486_v22 = vld [vmem:[#allocation7 + $0x1950] sm:$0xf]  ;;  %v13135_v53 = vor.u32 %v15922_v48, %v13134_v2  ;;  %7659 = vmatpush.bf16.msrb.mxu1 %v13711_v55  ;;  %v7407_v48 = vpop.f32.mrf.mxu1 }
 0x464   :  { %v16010_v39 = vld [vmem:[#allocation7 + $0x196c] sm:$0xf0]  ;;  %v15302_v48 = vld [vmem:[#allocation7 + $0x354] sm:$0xf] }
 0x465   :  { %v13998_v56 = vld [vmem:[#allocation7 + $0x1d50] sm:$0xf]  ;;  %v13487_v57 = vor.u32 %v16010_v39, %v13486_v22  ;;  %7635 = vmatpush.bf16.msrb.mxu3 %v13135_v53 }
 0x466   :  { %v16138_v14 = vld [vmem:[#allocation7 + $0x1d6c] sm:$0xf0] }
 0x467   :  { %v13678_v60 = vld [vmem:[#allocation7 + $0x1ad0] sm:$0xf]  ;;  %v13999_v6 = vor.u32 %v16138_v14, %v13998_v56  ;;  %7645 = vmatpush.bf16.msra.mxu0 %v13487_v57  ;;  %v7406_v56 = vadd.f32 %v7405_v5, %v7393_v51 }
 0x468   :  { %v16058_v0 = vld [vmem:[#allocation7 + $0x1aec] sm:$0xf0] }
 0x469   :  { %v13102_v46 = vld [vmem:[#allocation7 + $0x1650] sm:$0xf]  ;;  %v13679_v42 = vor.u32 %v16058_v0, %v13678_v60  ;;  %7671 = vmatpush.bf16.msrb.mxu2 %v13999_v6 }
 0x46a   :  { %v15914_v36 = vld [vmem:[#allocation7 + $0x166c] sm:$0xf0] }
 0x46b   :  { %v13454_v41 = vld [vmem:[#allocation7 + $0x1910] sm:$0xf]  ;;  %v13103_v11 = vor.u32 %v15914_v36, %v13102_v46  ;;  %7660 = vmatpush.bf16.msrb.mxu1 %v13679_v42  ;;  %v15318_v36 = vld [vmem:[#allocation7 + $0x3d4] sm:$0xf] }
 0x46c   :  { %v16002_v28 = vld [vmem:[#allocation7 + $0x192c] sm:$0xf0] }
 0x46d   :  { %v13966_v62 = vld [vmem:[#allocation7 + $0x1d10] sm:$0xf]  ;;  %v13455_v23 = vor.u32 %v16002_v28, %v13454_v41  ;;  %7636 = vmatpush.bf16.msrb.mxu3 %v13103_v11 }
 0x46e   :  { %v16130_v16 = vld [vmem:[#allocation7 + $0x1d2c] sm:$0xf0] }
 0x46f   :  { %v13646_v17 = vld [vmem:[#allocation7 + $0x1a90] sm:$0xf]  ;;  %v13967_v59 = vor.u32 %v16130_v16, %v13966_v62  ;;  %7646 = vmatpush.bf16.msra.mxu0 %v13455_v23  ;;  %v7418_v16 = vpop.f32.mrf.mxu2  ;;  %v7394_v23 = vpop.f32.mrf.mxu0 }
 0x470   :  { %v16050_v21 = vld [vmem:[#allocation7 + $0x1aac] sm:$0xf0]  ;;  %v10928_v23 = vld [vmem:[#allocation7 + $0x570] sm:$0xf0] }
 0x471   :  { %v13070_v19 = vld [vmem:[#allocation7 + $0x1610] sm:$0xf]  ;;  %v13647_v30 = vor.u32 %v16050_v21, %v13646_v17  ;;  %7672 = vmatpush.bf16.msrb.mxu2 %v13967_v59  ;;  %v17018_v21 = vadd.f32 %v7418_v16, %v7406_v56  ;;  %v15238_v16 = vld [vmem:[#allocation7 + $0x154] sm:$0xf] }
 0x472   :  { %v15906_v24 = vld [vmem:[#allocation7 + $0x162c] sm:$0xf0] }
 0x473   :  { %v13422_v9 = vld [vmem:[#allocation7 + $0x18d0] sm:$0xf]  ;;  %v13071_v34 = vor.u32 %v15906_v24, %v13070_v19  ;;  %7661 = vmatpush.bf16.msrb.mxu1 %v13647_v30  ;;  %v10739_v19 = vor.u32 %v15318_v36, %v10736_v3  ;;  %v15310_v24 = vld [vmem:[#allocation7 + $0x394] sm:$0xf] }
 0x474   :  { %v15994_v7 = vld [vmem:[#allocation7 + $0x18ec] sm:$0xf0]  ;;  %v15294_v3 = vld [vmem:[#allocation7 + $0x314] sm:$0xf] }
 0x475   :  { %v14318_v12 = vld [vmem:[#allocation7 + $0x1fd0] sm:$0xf]  ;;  %v13423_v43 = vor.u32 %v15994_v7, %v13422_v9  ;;  %7637 = vmatpush.bf16.msrb.mxu3 %v13071_v34  ;;  %v10704_v7 = vld [vmem:[#allocation7 + $0x3b0] sm:$0xf0] }
 0x476   :  { %v16218_v61 = vld [vmem:[#allocation7 + $0x1fec] sm:$0xf0]  ;;  %v10707_v51 = vor.u32 %v15310_v24, %v10704_v7  ;;  %v15286_v24 = vld [vmem:[#allocation7 + $0x2d4] sm:$0xf] }
 0x477   :  { %v13934_v33 = vld [vmem:[#allocation7 + $0x1cd0] sm:$0xf]  ;;  %v14319_v45 = vor.u32 %v16218_v61, %v14318_v12  ;;  %7647 = vmatpush.bf16.msra.mxu0 %v13423_v43  ;;  %v10992_v43 = vld [vmem:[#allocation7 + $0x5f0] sm:$0xf0] }
 0x478   :  { %v16122_v37 = vld [vmem:[#allocation7 + $0x1cec] sm:$0xf0]  ;;  %7638 = vmatmul.bf16.vlgmr.msrb.gmra.mxu3 %v16888_v52 }
 0x479   :  { %v13614_v35 = vld [vmem:[#allocation7 + $0x1a50] sm:$0xf]  ;;  %v13935_v50 = vor.u32 %v16122_v37, %v13934_v33  ;;  %7682 = vmatpush.bf16.msra.mxu3 %v14319_v45 }
 0x47a   :  { %v16042_v25 = vld [vmem:[#allocation7 + $0x1a6c] sm:$0xf0] }
 0x47b   :  { %v13390_v2 = vld [vmem:[#allocation7 + $0x1890] sm:$0xf]  ;;  %v13615_v14 = vor.u32 %v16042_v25, %v13614_v35  ;;  %7673 = vmatpush.bf16.msrb.mxu2 %v13935_v50  ;;  %v15254_v35 = vld [vmem:[#allocation7 + $0x1d4] sm:$0xf] }
 0x47c   :  { %v15986_v22 = vld [vmem:[#allocation7 + $0x18ac] sm:$0xf0]  ;;  %v10480_v25 = vld [vmem:[#allocation7 + $0x1f0] sm:$0xf0] }
 0x47d   :  { %v14286_v39 = vld [vmem:[#allocation7 + $0x1f90] sm:$0xf]  ;;  %v13391_v57 = vor.u32 %v15986_v22, %v13390_v2  ;;  %7662 = vmatpush.bf16.msrb.mxu1 %v13615_v14  ;;  %v10672_v50 = vld [vmem:[#allocation7 + $0x370] sm:$0xf0]  ;;  %v7420_v14 = vpop.f32.mrf.mxu2 }
 0x47e   :  { %v16210_v55 = vld [vmem:[#allocation7 + $0x1fac] sm:$0xf0] }
 0x47f   :  { %v13902_v53 = vld [vmem:[#allocation7 + $0x1c90] sm:$0xf]  ;;  %v14287_v46 = vor.u32 %v16210_v55, %v14286_v39  ;;  %7648 = vmatpush.bf16.msra.mxu0 %v13391_v57  ;;  %v10483_v39 = vor.u32 %v15254_v35, %v10480_v25  ;;  %v15374_v57 = vld [vmem:[#allocation7 + $0x594] sm:$0xf] }
 0x480   :  { %v16114_v60 = vld [vmem:[#allocation7 + $0x1cac] sm:$0xf0]  ;;  %v15358_v25 = vld [vmem:[#allocation7 + $0x514] sm:$0xf] }
 0x481   :  { %v13582_v0 = vld [vmem:[#allocation7 + $0x1a10] sm:$0xf]  ;;  %v13903_v41 = vor.u32 %v16114_v60, %v13902_v53  ;;  %7683 = vmatpush.bf16.msra.mxu3 %v14287_v46  ;;  %v10995_v53 = vor.u32 %v15382_v38, %v10992_v43  ;;  %v15246_v60 = vld [vmem:[#allocation7 + $0x194] sm:$0xf] }
 0x482   :  { %v16034_v27 = vld [vmem:[#allocation7 + $0x1a2c] sm:$0xf0]  ;;  %v10960_v46 = vld [vmem:[#allocation7 + $0x5b0] sm:$0xf0] }
 0x483   :  { %v13358_v6 = vld [vmem:[#allocation7 + $0x1850] sm:$0xf]  ;;  %v13583_v5 = vor.u32 %v16034_v27, %v13582_v0  ;;  %7674 = vmatpush.bf16.msrb.mxu2 %v13903_v41  ;;  %v10448_v0 = vld [vmem:[#allocation7 + $0x1b0] sm:$0xf0]  ;;  %v10675_v27 = vor.u32 %v15302_v48, %v10672_v50 }
 0x484   :  { %v15978_v28 = vld [vmem:[#allocation7 + $0x186c] sm:$0xf0]  ;;  %v10451_v41 = vor.u32 %v15246_v60, %v10448_v0  ;;  %v15278_v43 = vld [vmem:[#allocation7 + $0x294] sm:$0xf]  ;;  %v7444_v0 = vpop.f32.mrf.mxu0 }
 0x485   :  { %v14254_v42 = vld [vmem:[#allocation7 + $0x1f50] sm:$0xf]  ;;  %v13359_v9 = vor.u32 %v15978_v28, %v13358_v6  ;;  %7663 = vmatpush.bf16.msrb.mxu1 %v13583_v5  ;;  %v10640_v6 = vld [vmem:[#allocation7 + $0x330] sm:$0xf0] }
 0x486   :  { %v16202_v62 = vld [vmem:[#allocation7 + $0x1f6c] sm:$0xf0]  ;;  %v10416_v5 = vld [vmem:[#allocation7 + $0x170] sm:$0xf0] }
 0x487   :  { %v13870_v11 = vld [vmem:[#allocation7 + $0x1c50] sm:$0xf]  ;;  %v14255_v59 = vor.u32 %v16202_v62, %v14254_v42  ;;  %7649 = vmatpush.bf16.msra.mxu0 %v13359_v9  ;;  %v10963_v62 = vor.u32 %v15374_v57, %v10960_v46  ;;  %v10608_v9 = vld [vmem:[#allocation7 + $0x2f0] sm:$0xf0]  ;;  %v10419_v7 = vor.u32 %v15238_v16, %v10416_v5 }
 0x488   :  { %v16106_v17 = vld [vmem:[#allocation7 + $0x1c6c] sm:$0xf0]  ;;  %7664 = vmatmul.bf16.vlgmr.msrb.gmra.mxu1 %v16893_v20  ;;  %v10611_v35 = vor.u32 %v15286_v24, %v10608_v9  ;;  %v10864_v60 = vld [vmem:[#allocation7 + $0x4f0] sm:$0xf0] }
 0x489   :  { %v13326_v12 = vld [vmem:[#allocation7 + $0x1810] sm:$0xf]  ;;  %v13871_v30 = vor.u32 %v16106_v17, %v13870_v11  ;;  %7708 = vmatpush.bf16.msra.mxu1 %v10739_v19  ;;  %7684 = vmatpush.bf16.msra.mxu3 %v14255_v59  ;;  %v10643_v11 = vor.u32 %v15294_v3, %v10640_v6  ;;  %v15366_v17 = vld [vmem:[#allocation7 + $0x554] sm:$0xf]  ;;  %v7431_v59 = vpop.f32.mrf.mxu3 }
 0x48a   :  { %v15970_v61 = vld [vmem:[#allocation7 + $0x182c] sm:$0xf0]  ;;  %v15270_v57 = vld [vmem:[#allocation7 + $0x254] sm:$0xf] }
 0x48b   :  { %v13838_v33 = vld [vmem:[#allocation7 + $0x1c10] sm:$0xf]  ;;  %v13327_v45 = vor.u32 %v15970_v61, %v13326_v12  ;;  %7675 = vmatpush.bf16.msrb.mxu2 %v13871_v30  ;;  %v7432_v30 = vadd.f32 %v7431_v59, %v17018_v21  ;;  %v10544_v46 = vld [vmem:[#allocation7 + $0x270] sm:$0xf0] }
 0x48c   :  { %v14222_v37 = vld [vmem:[#allocation7 + $0x1f10] sm:$0xf]  ;;  %v10320_v16 = vld [vmem:[#allocation7 + $0xb0] sm:$0xf0] }
 0x48d   :  { %v16194_v26 = vld [vmem:[#allocation7 + $0x1f2c] sm:$0xf0]  ;;  %7709 = vmatpush.bf16.msra.mxu1 %v10707_v51  ;;  %7650 = vmatpush.bf16.msra.mxu0 %v13327_v45  ;;  %v10896_v51 = vld [vmem:[#allocation7 + $0x530] sm:$0xf0] }
 0x48e   :  { %v16098_v34 = vld [vmem:[#allocation7 + $0x1c2c] sm:$0xf0]  ;;  %v14223_v2 = vor.u32 %v16194_v26, %v14222_v37  ;;  %v10931_v37 = vor.u32 %v15366_v17, %v10928_v23  ;;  %v15230_v26 = vld [vmem:[#allocation7 + $0x114] sm:$0xf]  ;;  %v10899_v21 = vor.u32 %v15358_v25, %v10896_v51  ;;  %v10547_v23 = vor.u32 %v15270_v57, %v10544_v46  ;;  %v7470_v51 = vpop.f32.mrf.mxu2 }
 0x48f   :  { %v13839_v22 = vor.u32 %v16098_v34, %v13838_v33  ;;  %v14190_v55 = vld [vmem:[#allocation7 + $0x1ed0] sm:$0xf]  ;;  %v7457_v33 = vpop.f32.mrf.mxu1  ;;  %v10384_v34 = vld [vmem:[#allocation7 + $0x130] sm:$0xf0] }
 0x490   :  { %v16186_v56 = vld [vmem:[#allocation7 + $0x1eec] sm:$0xf0]  ;;  %7685 = vmatpush.bf16.msra.mxu3 %v14223_v2  ;;  %7651 = vmatmul.bf16.vlgmr.msra.gmra.mxu0 %v16896_v47  ;;  %v10576_v45 = vld [vmem:[#allocation7 + $0x2b0] sm:$0xf0]  ;;  %v10387_v2 = vor.u32 %v15230_v26, %v10384_v34 }
 0x491   :  { %v14191_v36 = vor.u32 %v16186_v56, %v14190_v55  ;;  %7676 = vmatpush.bf16.msrb.mxu2 %v13839_v22  ;;  %7695 = vmatpush.bf16.msrb.mxu0 %v10483_v39  ;;  %v14158_v28 = vld [vmem:[#allocation7 + $0x1e90] sm:$0xf]  ;;  %v15222_v22 = vld [vmem:[#allocation7 + $0xd4] sm:$0xf]  ;;  %v10579_v14 = vor.u32 %v15278_v43, %v10576_v45  ;;  %v7433_v3 = vpop.f32.mrf.mxu3 }
 0x492   :  { %v16178_v42 = vld [vmem:[#allocation7 + $0x1eac] sm:$0xf0]  ;;  %7710 = vmatpush.bf16.msra.mxu1 %v10675_v27  ;;  %v10352_v39 = vld [vmem:[#allocation7 + $0xf0] sm:$0xf0] }
 0x493   :  { %v14159_v19 = vor.u32 %v16178_v42, %v14158_v28  ;;  %v14126_v12 = vld [vmem:[#allocation7 + $0x1e50] sm:$0xf]  ;;  %v15446_v55 = vld [vmem:[#allocation7 + $0x7d4] sm:$0xf]  ;;  %v10355_v6 = vor.u32 %v15222_v22, %v10352_v39 }
 0x494   :  { %7677 = vmatmul.bf16.vlgmr.msrb.gmra.mxu2 %v16898_v54  ;;  %7686 = vmatpush.bf16.msra.mxu3 %v14191_v36  ;;  %v16170_v61 = vld [vmem:[#allocation7 + $0x1e6c] sm:$0xf0]  ;;  %v11248_v56 = vld [vmem:[#allocation7 + $0x7f0] sm:$0xf0]  ;;  %v7445_v36 = vadd.f32 %v7444_v0, %v7432_v30 }
 0x495   :  { %7721 = vmatpush.bf16.msra.mxu2 %v10995_v53  ;;  %7696 = vmatpush.bf16.msrb.mxu0 %v10451_v41  ;;  %v14127_v38 = vor.u32 %v16170_v61, %v14126_v12  ;;  %v14094_v48 = vld [vmem:[#allocation7 + $0x1e10] sm:$0xf]  ;;  %v15350_v53 = vld [vmem:[#allocation7 + $0x4d4] sm:$0xf]  ;;  %v11251_v41 = vor.u32 %v15446_v55, %v11248_v56 }
 0x496   :  { %7711 = vmatpush.bf16.msra.mxu1 %v10643_v11  ;;  %v16162_v50 = vld [vmem:[#allocation7 + $0x1e2c] sm:$0xf0]  ;;  %v15214_v28 = vld [vmem:[#allocation7 + $0x94] sm:$0xf]  ;;  %v7458_v17 = vadd.f32 %v7457_v33, %v7445_v36 }
 0x497   :  { %v14095_v27 = vor.u32 %v16162_v50, %v14094_v48  ;;  %v7459_v42 = vpop.f32.mrf.mxu1  ;;  %v15438_v5 = vld [vmem:[#allocation7 + $0x794] sm:$0xf] }
 0x498   :  { %7687 = vmatpush.bf16.msra.mxu3 %v14159_v19  ;;  %v11216_v11 = vld [vmem:[#allocation7 + $0x7b0] sm:$0xf0]  ;;  %v17025_v45 = vadd.f32 %v7470_v51, %v7458_v17 }
 0x499   :  { %7722 = vmatpush.bf16.msra.mxu2 %v10963_v62  ;;  %7697 = vmatpush.bf16.msrb.mxu0 %v10419_v7  ;;  %v10867_v62 = vor.u32 %v15350_v53, %v10864_v60  ;;  %v15342_v19 = vld [vmem:[#allocation7 + $0x494] sm:$0xf]  ;;  %v10323_v7 = vor.u32 %v15214_v28, %v10320_v16  ;;  %v11219_v12 = vor.u32 %v15438_v5, %v11216_v11 }
 0x49a   :  { %7712 = vmatpush.bf16.msra.mxu1 %v10611_v35  ;;  %v10832_v24 = vld [vmem:[#allocation7 + $0x4b0] sm:$0xf0] }
 0x49b   :  { %v15262_v9 = vld [vmem:[#allocation7 + $0x214] sm:$0xf]  ;;  %v10835_v26 = vor.u32 %v15342_v19, %v10832_v24 }
 0x49c   :  { %7688 = vmatpush.bf16.msra.mxu3 %v14127_v38  ;;  %v10512_v59 = vld [vmem:[#allocation7 + $0x230] sm:$0xf0] }
 0x49d   :  { %7723 = vmatpush.bf16.msra.mxu2 %v10931_v37  ;;  %7698 = vmatpush.bf16.msrb.mxu0 %v10387_v2  ;;  %v15574_v61 = vld [vmem:[#allocation7 + $0xbd4] sm:$0xf]  ;;  %v10515_v33 = vor.u32 %v15262_v9, %v10512_v59  ;;  %v7446_v2 = vpop.f32.mrf.mxu0 }
 0x49e   :  { %7713 = vmatpush.bf16.msra.mxu1 %v10579_v14  ;;  %v11760_v30 = vld [vmem:[#allocation7 + $0xbf0] sm:$0xf0] }
 0x49f   :  { %v15206_v37 = vld [vmem:[#allocation7 + $0x54] sm:$0xf]  ;;  %v11763_v48 = vor.u32 %v15574_v61, %v11760_v30 }
 0x4a0   :  { %7689 = vmatpush.bf16.msra.mxu3 %v14095_v27  ;;  %v10288_v34 = vld [vmem:[#allocation7 + $0x70] sm:$0xf0] }
 0x4a1   :  { %7724 = vmatpush.bf16.msra.mxu2 %v10899_v21  ;;  %7699 = vmatpush.bf16.msrb.mxu0 %v10355_v6  ;;  %v15430_v35 = vld [vmem:[#allocation7 + $0x754] sm:$0xf]  ;;  %v10291_v22 = vor.u32 %v15206_v37, %v10288_v34 }
 0x4a2   :  { %v11184_v25 = vld [vmem:[#allocation7 + $0x770] sm:$0xf0]  ;;  %7714 = vmatpush.bf16.msra.mxu1 %v10547_v23  ;;  %v7472_v23 = vpop.f32.mrf.mxu2 }
 0x4a3   :  { %7690 = vmatmul.bf16.vlgmr.msra.gmra.mxu3 %v16903_v58  ;;  %v15334_v38 = vld [vmem:[#allocation7 + $0x454] sm:$0xf]  ;;  %v11187_v21 = vor.u32 %v15430_v35, %v11184_v25 }
 0x4a4   :  { %7734 = vmatpush.bf16.msrb.mxu3 %v11251_v41  ;;  %v10800_v43 = vld [vmem:[#allocation7 + $0x470] sm:$0xf0] }
 0x4a5   :  { %7725 = vmatpush.bf16.msra.mxu2 %v10867_v62  ;;  %v15566_v50 = vld [vmem:[#allocation7 + $0xb94] sm:$0xf]  ;;  %7700 = vmatpush.bf16.msrb.mxu0 %v10323_v7  ;;  %v10803_v14 = vor.u32 %v15334_v38, %v10800_v43 }
 0x4a6   :  { %v11728_v39 = vld [vmem:[#allocation7 + $0xbb0] sm:$0xf0]  ;;  %7715 = vmatpush.bf16.msra.mxu1 %v10515_v33 }
 0x4a7   :  { %v15198_v55 = vld [vmem:[#allocation7 + $0x14] sm:$0xf]  ;;  %v11731_v36 = vor.u32 %v15566_v50, %v11728_v39 }
 0x4a8   :  { %7735 = vmatpush.bf16.msrb.mxu3 %v11219_v12  ;;  %v10256_v56 = vld [vmem:[#allocation7 + $0x30] sm:$0xf0] }
 0x4a9   :  { %7726 = vmatpush.bf16.msra.mxu2 %v10835_v26  ;;  %v15326_v53 = vld [vmem:[#allocation7 + $0x414] sm:$0xf]  ;;  %7701 = vmatpush.bf16.msrb.mxu0 %v10291_v22  ;;  %v10259_v41 = vor.u32 %v15198_v55, %v10256_v56 }
 0x4aa   :  { %v15422_v60 = vld [vmem:[#allocation7 + $0x714] sm:$0xf]  ;;  %7760 = vmatpush.bf16.msrb.mxu1 %v11763_v48 }
 0x4ab   :  { %v11152_v0 = vld [vmem:[#allocation7 + $0x730] sm:$0xf0]  ;;  %7716 = vmatmul.bf16.vlgmr.msra.gmra.mxu1 %v16837_v49 }
 0x4ac   :  { %v10768_v27 = vld [vmem:[#allocation7 + $0x430] sm:$0xf0]  ;;  %7736 = vmatpush.bf16.msrb.mxu3 %v11187_v21  ;;  %v11155_v28 = vor.u32 %v15422_v60, %v11152_v0  ;;  %v7483_v21 = vpop.f32.mrf.mxu3 }
 0x4ad   :  { %v15510_v57 = vld [vmem:[#allocation7 + $0x9d4] sm:$0xf]  ;;  %7727 = vmatpush.bf16.msra.mxu2 %v10803_v14  ;;  %v10771_v16 = vor.u32 %v15326_v53, %v10768_v27  ;;  %7702 = vmatpush.bf16.msrb.mxu0 %v10259_v41  ;;  %v17031_v14 = vadd.f32 %v7483_v21, %v17025_v45  ;;  %v7509_v53 = vpop.f32.mrf.mxu1 }
 0x4ae   :  { %v11504_v46 = vld [vmem:[#allocation7 + $0x9f0] sm:$0xf0]  ;;  %7761 = vmatpush.bf16.msrb.mxu1 %v11731_v36 }
 0x4af   :  { %v15638_v3 = vld [vmem:[#allocation7 + $0xdd4] sm:$0xf]  ;;  %v11507_v5 = vor.u32 %v15510_v57, %v11504_v46 }
 0x4b0   :  { %v12016_v6 = vld [vmem:[#allocation7 + $0xdf0] sm:$0xf0]  ;;  %7737 = vmatpush.bf16.msrb.mxu3 %v11155_v28  ;;  %7703 = vmatmul.bf16.vlgmr.msrb.gmra.mxu0 %v16840_v4 }
 0x4b1   :  { %v15558_v42 = vld [vmem:[#allocation7 + $0xb54] sm:$0xf]  ;;  %v12019_v19 = vor.u32 %v15638_v3, %v12016_v6  ;;  %7728 = vmatpush.bf16.msra.mxu2 %v10771_v16  ;;  %7747 = vmatpush.bf16.msra.mxu0 %v11507_v5  ;;  %v16458_v3 = vld [vmem:[#allocation8] sm:$0xff] }
 0x4b2   :  { %v11696_v62 = vld [vmem:[#allocation7 + $0xb70] sm:$0xf0]  ;;  %v1523_v6 = vperm.slane %v16458_v3, 4 }
 0x4b3   :  { %v15414_v11 = vld [vmem:[#allocation7 + $0x6d4] sm:$0xf]  ;;  %v11699_v59 = vor.u32 %v15558_v42, %v11696_v62 }
 0x4b4   :  { %v11120_v17 = vld [vmem:[#allocation7 + $0x6f0] sm:$0xf0]  ;;  %7729 = vmatmul.bf16.vlgmr.msra.gmra.mxu2 %v16842_v8 }
 0x4b5   :  { %v15502_v24 = vld [vmem:[#allocation7 + $0x994] sm:$0xf]  ;;  %v11123_v61 = vor.u32 %v15414_v11, %v11120_v17  ;;  %7773 = vmatpush.bf16.msrb.mxu2 %v12019_v19  ;;  %7762 = vmatpush.bf16.msrb.mxu1 %v11699_v59 }
 0x4b6   :  { %v11472_v9 = vld [vmem:[#allocation7 + $0x9b0] sm:$0xf0] }
 0x4b7   :  { %v15630_v7 = vld [vmem:[#allocation7 + $0xd94] sm:$0xf]  ;;  %v11475_v26 = vor.u32 %v15502_v24, %v11472_v9  ;;  %7738 = vmatpush.bf16.msrb.mxu3 %v11123_v61 }
 0x4b8   :  { %v11984_v12 = vld [vmem:[#allocation7 + $0xdb0] sm:$0xf0] }
 0x4b9   :  { %v15550_v30 = vld [vmem:[#allocation7 + $0xb14] sm:$0xf]  ;;  %v11987_v25 = vor.u32 %v15630_v7, %v11984_v12  ;;  %7748 = vmatpush.bf16.msra.mxu0 %v11475_v26  ;;  %v7496_v7 = vpop.f32.mrf.mxu0  ;;  %v7485_v26 = vpop.f32.mrf.mxu3 }
 0x4ba   :  { %v11664_v37 = vld [vmem:[#allocation7 + $0xb30] sm:$0xf0] }
 0x4bb   :  { %v15406_v34 = vld [vmem:[#allocation7 + $0x694] sm:$0xf]  ;;  %v11667_v38 = vor.u32 %v15550_v30, %v11664_v37  ;;  %7774 = vmatpush.bf16.msrb.mxu2 %v11987_v25  ;;  %v7497_v37 = vadd.f32 %v7496_v7, %v1523_v6 }
 0x4bc   :  { %v11088_v35 = vld [vmem:[#allocation7 + $0x6b0] sm:$0xf0] }
 0x4bd   :  { %v15494_v51 = vld [vmem:[#allocation7 + $0x954] sm:$0xf]  ;;  %v11091_v48 = vor.u32 %v15406_v34, %v11088_v35  ;;  %7763 = vmatpush.bf16.msrb.mxu1 %v11667_v38 }
 0x4be   :  { %v11440_v33 = vld [vmem:[#allocation7 + $0x970] sm:$0xf0] }
 0x4bf   :  { %v15622_v43 = vld [vmem:[#allocation7 + $0xd54] sm:$0xf]  ;;  %v11443_v39 = vor.u32 %v15494_v51, %v11440_v33  ;;  %7739 = vmatpush.bf16.msrb.mxu3 %v11091_v48  ;;  %v7511_v51 = vpop.f32.mrf.mxu1  ;;  %v7510_v48 = vadd.f32 %v7509_v53, %v7497_v37 }
 0x4c0   :  { %v11952_v2 = vld [vmem:[#allocation7 + $0xd70] sm:$0xf0] }
 0x4c1   :  { %v15542_v50 = vld [vmem:[#allocation7 + $0xad4] sm:$0xf]  ;;  %v11955_v60 = vor.u32 %v15622_v43, %v11952_v2  ;;  %7749 = vmatpush.bf16.msra.mxu0 %v11443_v39 }
 0x4c2   :  { %v11632_v22 = vld [vmem:[#allocation7 + $0xaf0] sm:$0xf0] }
 0x4c3   :  { %v15398_v55 = vld [vmem:[#allocation7 + $0x654] sm:$0xf]  ;;  %v11635_v57 = vor.u32 %v15542_v50, %v11632_v22  ;;  %7775 = vmatpush.bf16.msrb.mxu2 %v11955_v60 }
 0x4c4   :  { %v11056_v56 = vld [vmem:[#allocation7 + $0x670] sm:$0xf0] }
 0x4c5   :  { %v15486_v0 = vld [vmem:[#allocation7 + $0x914] sm:$0xf]  ;;  %v11059_v41 = vor.u32 %v15398_v55, %v11056_v56  ;;  %7764 = vmatpush.bf16.msrb.mxu1 %v11635_v57 }
 0x4c6   :  { %v11408_v27 = vld [vmem:[#allocation7 + $0x930] sm:$0xf0] }
 0x4c7   :  { %v15614_v46 = vld [vmem:[#allocation7 + $0xd14] sm:$0xf]  ;;  %v11411_v62 = vor.u32 %v15486_v0, %v11408_v27  ;;  %7740 = vmatpush.bf16.msrb.mxu3 %v11059_v41  ;;  %v7522_v41 = vpop.f32.mrf.mxu2 }
 0x4c8   :  { %v11920_v36 = vld [vmem:[#allocation7 + $0xd30] sm:$0xf0] }
 0x4c9   :  { %v15534_v28 = vld [vmem:[#allocation7 + $0xa94] sm:$0xf]  ;;  %v11923_v11 = vor.u32 %v15614_v46, %v11920_v36  ;;  %7750 = vmatpush.bf16.msra.mxu0 %v11411_v62  ;;  %v17034_v62 = vadd.f32 %v7522_v41, %v7510_v48 }
 0x4ca   :  { %v11600_v42 = vld [vmem:[#allocation7 + $0xab0] sm:$0xf0] }
 0x4cb   :  { %v15390_v16 = vld [vmem:[#allocation7 + $0x614] sm:$0xf]  ;;  %v11603_v24 = vor.u32 %v15534_v28, %v11600_v42  ;;  %7776 = vmatpush.bf16.msrb.mxu2 %v11923_v11 }
 0x4cc   :  { %v11024_v45 = vld [vmem:[#allocation7 + $0x630] sm:$0xf0] }
 0x4cd   :  { %v15478_v5 = vld [vmem:[#allocation7 + $0x8d4] sm:$0xf]  ;;  %v11027_v12 = vor.u32 %v15390_v16, %v11024_v45  ;;  %7765 = vmatpush.bf16.msrb.mxu1 %v11603_v24  ;;  %v7498_v16 = vpop.f32.mrf.mxu0 }
 0x4ce   :  { %v11376_v17 = vld [vmem:[#allocation7 + $0x8f0] sm:$0xf0] }
 0x4cf   :  { %v15702_v23 = vld [vmem:[#allocation7 + $0xfd4] sm:$0xf]  ;;  %v11379_v34 = vor.u32 %v15478_v5, %v11376_v17  ;;  %7741 = vmatpush.bf16.msrb.mxu3 %v11027_v12 }
 0x4d0   :  { %v12272_v19 = vld [vmem:[#allocation7 + $0xff0] sm:$0xf0] }
 0x4d1   :  { %v15606_v9 = vld [vmem:[#allocation7 + $0xcd4] sm:$0xf]  ;;  %v12275_v35 = vor.u32 %v15702_v23, %v12272_v19  ;;  %7751 = vmatpush.bf16.msra.mxu0 %v11379_v34 }
 0x4d2   :  { %v11888_v59 = vld [vmem:[#allocation7 + $0xcf0] sm:$0xf0]  ;;  %7742 = vmatmul.bf16.vlgmr.msrb.gmra.mxu3 %v16857_v10 }
 0x4d3   :  { %v15526_v61 = vld [vmem:[#allocation7 + $0xa54] sm:$0xf]  ;;  %v11891_v33 = vor.u32 %v15606_v9, %v11888_v59  ;;  %7786 = vmatpush.bf16.msra.mxu3 %v12275_v35 }
 0x4d4   :  { %v11568_v30 = vld [vmem:[#allocation7 + $0xa70] sm:$0xf0] }
 0x4d5   :  { %v15470_v25 = vld [vmem:[#allocation7 + $0x894] sm:$0xf]  ;;  %v11571_v50 = vor.u32 %v15526_v61, %v11568_v30  ;;  %7777 = vmatpush.bf16.msrb.mxu2 %v11891_v33 }
 0x4d6   :  { %v11344_v38 = vld [vmem:[#allocation7 + $0x8b0] sm:$0xf0] }
 0x4d7   :  { %v15694_v43 = vld [vmem:[#allocation7 + $0xf94] sm:$0xf]  ;;  %v11347_v56 = vor.u32 %v15470_v25, %v11344_v38  ;;  %7766 = vmatpush.bf16.msrb.mxu1 %v11571_v50 }
 0x4d8   :  { %v12240_v2 = vld [vmem:[#allocation7 + $0xfb0] sm:$0xf0] }
 0x4d9   :  { %v15598_v22 = vld [vmem:[#allocation7 + $0xc94] sm:$0xf]  ;;  %v12243_v60 = vor.u32 %v15694_v43, %v12240_v2  ;;  %7752 = vmatpush.bf16.msra.mxu0 %v11347_v56 }
 0x4da   :  { %v11856_v21 = vld [vmem:[#allocation7 + $0xcb0] sm:$0xf0] }
 0x4db   :  { %v15518_v39 = vld [vmem:[#allocation7 + $0xa14] sm:$0xf]  ;;  %v11859_v46 = vor.u32 %v15598_v22, %v11856_v21  ;;  %7787 = vmatpush.bf16.msra.mxu3 %v12243_v60  ;;  %v7524_v22 = vpop.f32.mrf.mxu2 }
 0x4dc   :  { %v11536_v55 = vld [vmem:[#allocation7 + $0xa30] sm:$0xf0] }
 0x4dd   :  { %v15830_v0 = vld [vmem:[#allocation7 + $0x13d4] sm:$0xf]  ;;  %v11539_v53 = vor.u32 %v15518_v39, %v11536_v55  ;;  %7778 = vmatpush.bf16.msrb.mxu2 %v11859_v46 }
 0x4de   :  { %v12784_v27 = vld [vmem:[#allocation7 + $0x13f0] sm:$0xf0] }
 0x4df   :  { %v15462_v57 = vld [vmem:[#allocation7 + $0x854] sm:$0xf]  ;;  %v12787_v45 = vor.u32 %v15830_v0, %v12784_v27  ;;  %7767 = vmatpush.bf16.msrb.mxu1 %v11539_v53 }
 0x4e0   :  { %v11312_v36 = vld [vmem:[#allocation7 + $0x870] sm:$0xf0] }
 0x4e1   :  { %v15686_v3 = vld [vmem:[#allocation7 + $0xf54] sm:$0xf]  ;;  %v11315_v11 = vor.u32 %v15462_v57, %v11312_v36 }
 0x4e2   :  { %v12208_v6 = vld [vmem:[#allocation7 + $0xf70] sm:$0xf0]  ;;  %7768 = vmatmul.bf16.vlgmr.msrb.gmra.mxu1 %v16850_v44 }
 0x4e3   :  { %v15590_v28 = vld [vmem:[#allocation7 + $0xc54] sm:$0xf]  ;;  %v12211_v17 = vor.u32 %v15686_v3, %v12208_v6  ;;  %7812 = vmatpush.bf16.msra.mxu1 %v12787_v45  ;;  %7753 = vmatpush.bf16.msra.mxu0 %v11315_v11 }
 0x4e4   :  { %v11824_v42 = vld [vmem:[#allocation7 + $0xc70] sm:$0xf0] }
 0x4e5   :  { %v15822_v5 = vld [vmem:[#allocation7 + $0x1394] sm:$0xf]  ;;  %v11827_v9 = vor.u32 %v15590_v28, %v11824_v42  ;;  %7788 = vmatpush.bf16.msra.mxu3 %v12211_v17 }
 0x4e6   :  { %v12752_v23 = vld [vmem:[#allocation7 + $0x13b0] sm:$0xf0] }
 0x4e7   :  { %v15454_v19 = vld [vmem:[#allocation7 + $0x814] sm:$0xf]  ;;  %v12755_v26 = vor.u32 %v15822_v5, %v12752_v23  ;;  %7779 = vmatpush.bf16.msrb.mxu2 %v11827_v9  ;;  %v7535_v23 = vpop.f32.mrf.mxu3 }
 0x4e8   :  { %v11280_v24 = vld [vmem:[#allocation7 + $0x830] sm:$0xf0] }
 0x4e9   :  { %v15582_v59 = vld [vmem:[#allocation7 + $0xc14] sm:$0xf]  ;;  %v11283_v25 = vor.u32 %v15454_v19, %v11280_v24  ;;  %7813 = vmatpush.bf16.msra.mxu1 %v12755_v26 }
 0x4ea   :  { %v15678_v7 = vld [vmem:[#allocation7 + $0xf14] sm:$0xf] }
 0x4eb   :  { %v12176_v12 = vld [vmem:[#allocation7 + $0xf30] sm:$0xf0]  ;;  %7754 = vmatpush.bf16.msra.mxu0 %v11283_v25 }
 0x4ec   :  { %v11792_v61 = vld [vmem:[#allocation7 + $0xc30] sm:$0xf0]  ;;  %v12179_v51 = vor.u32 %v15678_v7, %v12176_v12  ;;  %v7561_v7 = vpop.f32.mrf.mxu1 }
 0x4ed   :  { %v15766_v30 = vld [vmem:[#allocation7 + $0x11d4] sm:$0xf]  ;;  %v11795_v43 = vor.u32 %v15582_v59, %v11792_v61  ;;  %v7536_v59 = vadd.f32 %v7535_v23, %v17034_v62 }
 0x4ee   :  { %v12528_v37 = vld [vmem:[#allocation7 + $0x11f0] sm:$0xf0]  ;;  %7789 = vmatpush.bf16.msra.mxu3 %v12179_v51  ;;  %7755 = vmatmul.bf16.vlgmr.msra.gmra.mxu0 %v16855_v63 }
 0x4ef   :  { %v15894_v34 = vld [vmem:[#allocation7 + $0x15d4] sm:$0xf]  ;;  %v12531_v2 = vor.u32 %v15766_v30, %v12528_v37  ;;  %7780 = vmatpush.bf16.msrb.mxu2 %v11795_v43 }
 0x4f0   :  { %v13040_v35 = vld [vmem:[#allocation7 + $0x15f0] sm:$0xf0] }
 0x4f1   :  { %v15814_v33 = vld [vmem:[#allocation7 + $0x1354] sm:$0xf]  ;;  %v13043_v21 = vor.u32 %v15894_v34, %v13040_v35  ;;  %7799 = vmatpush.bf16.msrb.mxu0 %v12531_v2 }
 0x4f2   :  { %v12720_v38 = vld [vmem:[#allocation7 + $0x1370] sm:$0xf0]  ;;  %7781 = vmatmul.bf16.vlgmr.msrb.gmra.mxu2 %v16859_v15 }
 0x4f3   :  { %v15670_v48 = vld [vmem:[#allocation7 + $0xed4] sm:$0xf]  ;;  %v12723_v56 = vor.u32 %v15814_v33, %v12720_v38  ;;  %7825 = vmatpush.bf16.msra.mxu2 %v13043_v21 }
 0x4f4   :  { %v12144_v50 = vld [vmem:[#allocation7 + $0xef0] sm:$0xf0] }
 0x4f5   :  { %v15758_v39 = vld [vmem:[#allocation7 + $0x1194] sm:$0xf]  ;;  %v12147_v27 = vor.u32 %v15670_v48, %v12144_v50  ;;  %7814 = vmatpush.bf16.msra.mxu1 %v12723_v56  ;;  %v7548_v56 = vpop.f32.mrf.mxu0 }
 0x4f6   :  { %v12496_v55 = vld [vmem:[#allocation7 + $0x11b0] sm:$0xf0] }
 0x4f7   :  { %v15886_v60 = vld [vmem:[#allocation7 + $0x1594] sm:$0xf]  ;;  %v12499_v36 = vor.u32 %v15758_v39, %v12496_v55  ;;  %7790 = vmatpush.bf16.msra.mxu3 %v12147_v27 }
 0x4f8   :  { %v13008_v0 = vld [vmem:[#allocation7 + $0x15b0] sm:$0xf0] }
 0x4f9   :  { %v15806_v57 = vld [vmem:[#allocation7 + $0x1314] sm:$0xf]  ;;  %v13011_v41 = vor.u32 %v15886_v60, %v13008_v0  ;;  %7800 = vmatpush.bf16.msrb.mxu0 %v12499_v36 }
 0x4fa   :  { %v12688_v46 = vld [vmem:[#allocation7 + $0x1330] sm:$0xf0] }
 0x4fb   :  { %v15662_v3 = vld [vmem:[#allocation7 + $0xe94] sm:$0xf]  ;;  %v12691_v42 = vor.u32 %v15806_v57, %v12688_v46  ;;  %7826 = vmatpush.bf16.msra.mxu2 %v13011_v41  ;;  %v7549_v57 = vadd.f32 %v7548_v56, %v7536_v59  ;;  %v7537_v46 = vpop.f32.mrf.mxu3  ;;  %v7563_v41 = vpop.f32.mrf.mxu1 }
 0x4fc   :  { %v12112_v6 = vld [vmem:[#allocation7 + $0xeb0] sm:$0xf0] }
 0x4fd   :  { %v15750_v53 = vld [vmem:[#allocation7 + $0x1154] sm:$0xf]  ;;  %v12115_v5 = vor.u32 %v15662_v3, %v12112_v6  ;;  %7815 = vmatpush.bf16.msra.mxu1 %v12691_v42 }
 0x4fe   :  { %v12464_v28 = vld [vmem:[#allocation7 + $0x1170] sm:$0xf0] }
 0x4ff   :  { %v15878_v16 = vld [vmem:[#allocation7 + $0x1554] sm:$0xf]  ;;  %v12467_v19 = vor.u32 %v15750_v53, %v12464_v28  ;;  %7791 = vmatpush.bf16.msra.mxu3 %v12115_v5 }
 0x500   :  { %v12976_v45 = vld [vmem:[#allocation7 + $0x1570] sm:$0xf0] }
 0x501   :  { %v15798_v11 = vld [vmem:[#allocation7 + $0x12d4] sm:$0xf]  ;;  %v12979_v12 = vor.u32 %v15878_v16, %v12976_v45  ;;  %7801 = vmatpush.bf16.msrb.mxu0 %v12467_v19  ;;  %v7562_v45 = vadd.f32 %v7561_v7, %v7549_v57 }
 0x502   :  { %v12656_v17 = vld [vmem:[#allocation7 + $0x12f0] sm:$0xf0] }
 0x503   :  { %v15654_v24 = vld [vmem:[#allocation7 + $0xe54] sm:$0xf]  ;;  %v12659_v37 = vor.u32 %v15798_v11, %v12656_v17  ;;  %7827 = vmatpush.bf16.msra.mxu2 %v12979_v12 }
 0x504   :  { %v12080_v9 = vld [vmem:[#allocation7 + $0xe70] sm:$0xf0] }
 0x505   :  { %v15742_v61 = vld [vmem:[#allocation7 + $0x1114] sm:$0xf]  ;;  %v12083_v35 = vor.u32 %v15654_v24, %v12080_v9  ;;  %7816 = vmatpush.bf16.msra.mxu1 %v12659_v37 }
 0x506   :  { %v12432_v30 = vld [vmem:[#allocation7 + $0x1130] sm:$0xf0] }
 0x507   :  { %v15870_v26 = vld [vmem:[#allocation7 + $0x1514] sm:$0xf]  ;;  %v12435_v33 = vor.u32 %v15742_v61, %v12432_v30  ;;  %7792 = vmatpush.bf16.msra.mxu3 %v12083_v35  ;;  %v7574_v35 = vpop.f32.mrf.mxu2 }
 0x508   :  { %v12944_v34 = vld [vmem:[#allocation7 + $0x1530] sm:$0xf0] }
 0x509   :  { %v15790_v25 = vld [vmem:[#allocation7 + $0x1294] sm:$0xf]  ;;  %v12947_v62 = vor.u32 %v15870_v26, %v12944_v34  ;;  %7802 = vmatpush.bf16.msrb.mxu0 %v12435_v33  ;;  %v17041_v33 = vadd.f32 %v7574_v35, %v7562_v45 }
 0x50a   :  { %v12624_v51 = vld [vmem:[#allocation7 + $0x12b0] sm:$0xf0] }
 0x50b   :  { %v15646_v38 = vld [vmem:[#allocation7 + $0xe14] sm:$0xf]  ;;  %v12627_v21 = vor.u32 %v15790_v25, %v12624_v51  ;;  %7828 = vmatpush.bf16.msra.mxu2 %v12947_v62 }
 0x50c   :  { %v12048_v43 = vld [vmem:[#allocation7 + $0xe30] sm:$0xf0] }
 0x50d   :  { %v15734_v2 = vld [vmem:[#allocation7 + $0x10d4] sm:$0xf]  ;;  %v12051_v60 = vor.u32 %v15646_v38, %v12048_v43  ;;  %7817 = vmatpush.bf16.msra.mxu1 %v12627_v21  ;;  %v7550_v38 = vpop.f32.mrf.mxu0 }
 0x50e   :  { %v12400_v48 = vld [vmem:[#allocation7 + $0x10f0] sm:$0xf0] }
 0x50f   :  { %v15958_v50 = vld [vmem:[#allocation7 + $0x17d4] sm:$0xf]  ;;  %v12403_v36 = vor.u32 %v15734_v2, %v12400_v48  ;;  %7793 = vmatpush.bf16.msra.mxu3 %v12051_v60 }
 0x510   :  { %v13296_v22 = vld [vmem:[#allocation7 + $0x17f0] sm:$0xf0] }
 0x511   :  { %v15862_v39 = vld [vmem:[#allocation7 + $0x14d4] sm:$0xf]  ;;  %v13299_v3 = vor.u32 %v15958_v50, %v13296_v22  ;;  %7803 = vmatpush.bf16.msrb.mxu0 %v12403_v36 }
 0x512   :  { %v12912_v55 = vld [vmem:[#allocation7 + $0x14f0] sm:$0xf0]  ;;  %7794 = vmatmul.bf16.vlgmr.msra.gmra.mxu3 %v16878_v32 }
 0x513   :  { %v15782_v0 = vld [vmem:[#allocation7 + $0x1254] sm:$0xf]  ;;  %v12915_v53 = vor.u32 %v15862_v39, %v12912_v55  ;;  %7838 = vmatpush.bf16.msrb.mxu3 %v13299_v3 }
 0x514   :  { %v12592_v27 = vld [vmem:[#allocation7 + $0x1270] sm:$0xf0] }
 0x515   :  { %v15726_v6 = vld [vmem:[#allocation7 + $0x1094] sm:$0xf]  ;;  %v12595_v5 = vor.u32 %v15782_v0, %v12592_v27  ;;  %7829 = vmatpush.bf16.msra.mxu2 %v12915_v53 }
 0x516   :  { %v12368_v28 = vld [vmem:[#allocation7 + $0x10b0] sm:$0xf0] }
 0x517   :  { %v15950_v42 = vld [vmem:[#allocation7 + $0x1794] sm:$0xf]  ;;  %v12371_v24 = vor.u32 %v15726_v6, %v12368_v28  ;;  %7818 = vmatpush.bf16.msra.mxu1 %v12595_v5 }
 0x518   :  { %v13264_v16 = vld [vmem:[#allocation7 + $0x17b0] sm:$0xf0] }
 0x519   :  { %v15854_v11 = vld [vmem:[#allocation7 + $0x1494] sm:$0xf]  ;;  %v13267_v9 = vor.u32 %v15950_v42, %v13264_v16  ;;  %7804 = vmatpush.bf16.msrb.mxu0 %v12371_v24 }
 0x51a   :  { %v12880_v17 = vld [vmem:[#allocation7 + $0x14b0] sm:$0xf0] }
 0x51b   :  { %v15774_v23 = vld [vmem:[#allocation7 + $0x1214] sm:$0xf]  ;;  %v12883_v30 = vor.u32 %v15854_v11, %v12880_v17  ;;  %7839 = vmatpush.bf16.msrb.mxu3 %v13267_v9  ;;  %v7576_v11 = vpop.f32.mrf.mxu2 }
 0x51c   :  { %v12560_v19 = vld [vmem:[#allocation7 + $0x1230] sm:$0xf0] }
 0x51d   :  { %v16086_v59 = vld [vmem:[#allocation7 + $0x1bd4] sm:$0xf]  ;;  %v12563_v7 = vor.u32 %v15774_v23, %v12560_v19  ;;  %7830 = vmatpush.bf16.msra.mxu2 %v12883_v30 }
 0x51e   :  { %v13808_v12 = vld [vmem:[#allocation7 + $0x1bf0] sm:$0xf0] }
 0x51f   :  { %v15718_v61 = vld [vmem:[#allocation7 + $0x1054] sm:$0xf]  ;;  %v13811_v43 = vor.u32 %v16086_v59, %v13808_v12  ;;  %7819 = vmatpush.bf16.msra.mxu1 %v12563_v7 }
 0x520   :  { %v12336_v37 = vld [vmem:[#allocation7 + $0x1070] sm:$0xf0] }
 0x521   :  { %v15942_v26 = vld [vmem:[#allocation7 + $0x1754] sm:$0xf]  ;;  %v12339_v62 = vor.u32 %v15718_v61, %v12336_v37 }
 0x522   :  { %v13232_v34 = vld [vmem:[#allocation7 + $0x1770] sm:$0xf0]  ;;  %7820 = vmatmul.bf16.vlgmr.msra.gmra.mxu1 %v16871_v1 }
 0x523   :  { %v15846_v25 = vld [vmem:[#allocation7 + $0x1454] sm:$0xf]  ;;  %v13235_v48 = vor.u32 %v15942_v26, %v13232_v34  ;;  %7864 = vmatpush.bf16.msrb.mxu1 %v13811_v43  ;;  %7805 = vmatpush.bf16.msrb.mxu0 %v12339_v62 }
 0x524   :  { %v12848_v51 = vld [vmem:[#allocation7 + $0x1470] sm:$0xf0] }
 0x525   :  { %v16078_v2 = vld [vmem:[#allocation7 + $0x1b94] sm:$0xf]  ;;  %v12851_v39 = vor.u32 %v15846_v25, %v12848_v51  ;;  %7840 = vmatpush.bf16.msrb.mxu3 %v13235_v48 }
 0x526   :  { %v13776_v50 = vld [vmem:[#allocation7 + $0x1bb0] sm:$0xf0] }
 0x527   :  { %v15710_v22 = vld [vmem:[#allocation7 + $0x1014] sm:$0xf]  ;;  %v13779_v46 = vor.u32 %v16078_v2, %v13776_v50  ;;  %7831 = vmatpush.bf16.msra.mxu2 %v12851_v39  ;;  %v7587_v50 = vpop.f32.mrf.mxu3 }
 0x528   :  { %v12304_v21 = vld [vmem:[#allocation7 + $0x1030] sm:$0xf0] }
 0x529   :  { %v15838_v55 = vld [vmem:[#allocation7 + $0x1414] sm:$0xf]  ;;  %v12307_v6 = vor.u32 %v15710_v22, %v12304_v21  ;;  %7865 = vmatpush.bf16.msrb.mxu1 %v13779_v46 }
 0x52a   :  { %v15934_v56 = vld [vmem:[#allocation7 + $0x1714] sm:$0xf] }
 0x52b   :  { %v13200_v60 = vld [vmem:[#allocation7 + $0x1730] sm:$0xf0]  ;;  %7806 = vmatpush.bf16.msrb.mxu0 %v12307_v6 }
 0x52c   :  { %v12816_v0 = vld [vmem:[#allocation7 + $0x1430] sm:$0xf0]  ;;  %v13203_v41 = vor.u32 %v15934_v56, %v13200_v60  ;;  %v7613_v56 = vpop.f32.mrf.mxu1 }
 0x52d   :  { %v16022_v27 = vld [vmem:[#allocation7 + $0x19d4] sm:$0xf]  ;;  %v12819_v42 = vor.u32 %v15838_v55, %v12816_v0  ;;  %v7588_v55 = vadd.f32 %v7587_v50, %v17041_v33 }
 0x52e   :  { %v13552_v57 = vld [vmem:[#allocation7 + $0x19f0] sm:$0xf0]  ;;  %7841 = vmatpush.bf16.msrb.mxu3 %v13203_v41  ;;  %7807 = vmatmul.bf16.vlgmr.msrb.gmra.mxu0 %v16876_v29 }
 0x52f   :  { %v16150_v36 = vld [vmem:[#allocation7 + $0x1dd4] sm:$0xf]  ;;  %v13555_v16 = vor.u32 %v16022_v27, %v13552_v57  ;;  %7832 = vmatpush.bf16.msra.mxu2 %v12819_v42 }
 0x530   :  { %v14064_v3 = vld [vmem:[#allocation7 + $0x1df0] sm:$0xf0] }
 0x531   :  { %v16070_v53 = vld [vmem:[#allocation7 + $0x1b54] sm:$0xf]  ;;  %v14067_v17 = vor.u32 %v16150_v36, %v14064_v3  ;;  %7851 = vmatpush.bf16.msra.mxu0 %v13555_v16 }
 0x532   :  { %v13744_v28 = vld [vmem:[#allocation7 + $0x1b70] sm:$0xf0]  ;;  %7833 = vmatmul.bf16.vlgmr.msra.gmra.mxu2 %v16880_v40 }
 0x533   :  { %v15926_v45 = vld [vmem:[#allocation7 + $0x16d4] sm:$0xf]  ;;  %v13747_v24 = vor.u32 %v16070_v53, %v13744_v28  ;;  %7877 = vmatpush.bf16.msrb.mxu2 %v14067_v17 }
 0x534   :  { %v13168_v5 = vld [vmem:[#allocation7 + $0x16f0] sm:$0xf0] }
 0x535   :  { %v16014_v23 = vld [vmem:[#allocation7 + $0x1994] sm:$0xf]  ;;  %v13171_v12 = vor.u32 %v15926_v45, %v13168_v5  ;;  %7866 = vmatpush.bf16.msrb.mxu1 %v13747_v24  ;;  %v7600_v24 = vpop.f32.mrf.mxu0 }
 0x536   :  { %v13520_v19 = vld [vmem:[#allocation7 + $0x19b0] sm:$0xf0] }
 0x537   :  { %v16142_v9 = vld [vmem:[#allocation7 + $0x1d94] sm:$0xf]  ;;  %v13523_v37 = vor.u32 %v16014_v23, %v13520_v19  ;;  %7842 = vmatpush.bf16.msrb.mxu3 %v13171_v12 }
 0x538   :  { %v14032_v59 = vld [vmem:[#allocation7 + $0x1db0] sm:$0xf0] }
 0x539   :  { %v16062_v61 = vld [vmem:[#allocation7 + $0x1b14] sm:$0xf]  ;;  %v14035_v35 = vor.u32 %v16142_v9, %v14032_v59  ;;  %7852 = vmatpush.bf16.msra.mxu0 %v13523_v37 }
 0x53a   :  { %v13712_v30 = vld [vmem:[#allocation7 + $0x1b30] sm:$0xf0] }
 0x53b   :  { %v15918_v26 = vld [vmem:[#allocation7 + $0x1694] sm:$0xf]  ;;  %v13715_v51 = vor.u32 %v16062_v61, %v13712_v30  ;;  %7878 = vmatpush.bf16.msrb.mxu2 %v14035_v35  ;;  %v7601_v61 = vadd.f32 %v7600_v24, %v7588_v55  ;;  %v7589_v30 = vpop.f32.mrf.mxu3  ;;  %v7615_v35 = vpop.f32.mrf.mxu1  ;;  %v10742_v55 = vld [vmem:[#allocation7 + $0x3d8] sm:$0xf] }
 0x53c   :  { %v13136_v34 = vld [vmem:[#allocation7 + $0x16b0] sm:$0xf0] }
 0x53d   :  { %v16006_v7 = vld [vmem:[#allocation7 + $0x1954] sm:$0xf]  ;;  %v13139_v2 = vor.u32 %v15918_v26, %v13136_v34  ;;  %7867 = vmatpush.bf16.msrb.mxu1 %v13715_v51 }
 0x53e   :  { %v13488_v25 = vld [vmem:[#allocation7 + $0x1970] sm:$0xf0] }
 0x53f   :  { %v16134_v38 = vld [vmem:[#allocation7 + $0x1d54] sm:$0xf]  ;;  %v13491_v22 = vor.u32 %v16006_v7, %v13488_v25  ;;  %7843 = vmatpush.bf16.msrb.mxu3 %v13139_v2 }
 0x540   :  { %v14000_v43 = vld [vmem:[#allocation7 + $0x1d70] sm:$0xf0] }
 0x541   :  { %v16054_v62 = vld [vmem:[#allocation7 + $0x1ad4] sm:$0xf]  ;;  %v14003_v60 = vor.u32 %v16134_v38, %v14000_v43  ;;  %7853 = vmatpush.bf16.msra.mxu0 %v13491_v22  ;;  %v7614_v43 = vadd.f32 %v7613_v56, %v7601_v61  ;;  %v15259_v61 = vld [vmem:[#allocation7 + $0x1f4] sm:$0xf0] }
 0x542   :  { %v13680_v48 = vld [vmem:[#allocation7 + $0x1af0] sm:$0xf0] }
 0x543   :  { %v15910_v21 = vld [vmem:[#allocation7 + $0x1654] sm:$0xf]  ;;  %v13683_v57 = vor.u32 %v16054_v62, %v13680_v48  ;;  %7879 = vmatpush.bf16.msrb.mxu2 %v14003_v60  ;;  %v15323_v60 = vld [vmem:[#allocation7 + $0x3f4] sm:$0xf0] }
 0x544   :  { %v13104_v39 = vld [vmem:[#allocation7 + $0x1670] sm:$0xf0] }
 0x545   :  { %v15998_v0 = vld [vmem:[#allocation7 + $0x1914] sm:$0xf]  ;;  %v13107_v3 = vor.u32 %v15910_v21, %v13104_v39  ;;  %7868 = vmatpush.bf16.msrb.mxu1 %v13683_v57 }
 0x546   :  { %v13456_v27 = vld [vmem:[#allocation7 + $0x1930] sm:$0xf0] }
 0x547   :  { %v16126_v46 = vld [vmem:[#allocation7 + $0x1d14] sm:$0xf]  ;;  %v13459_v53 = vor.u32 %v15998_v0, %v13456_v27  ;;  %7844 = vmatpush.bf16.msrb.mxu3 %v13107_v3  ;;  %v7626_v3 = vpop.f32.mrf.mxu2 }
 0x548   :  { %v13968_v36 = vld [vmem:[#allocation7 + $0x1d30] sm:$0xf0] }
 0x549   :  { %v16046_v6 = vld [vmem:[#allocation7 + $0x1a94] sm:$0xf]  ;;  %v13971_v33 = vor.u32 %v16126_v46, %v13968_v36  ;;  %7854 = vmatpush.bf16.msra.mxu0 %v13459_v53  ;;  %v17048_v53 = vadd.f32 %v7626_v3, %v7614_v43 }
 0x54a   :  { %v13648_v41 = vld [vmem:[#allocation7 + $0x1ab0] sm:$0xf0] }
 0x54b   :  { %v15902_v28 = vld [vmem:[#allocation7 + $0x1614] sm:$0xf]  ;;  %v13651_v17 = vor.u32 %v16046_v6, %v13648_v41  ;;  %7880 = vmatpush.bf16.msrb.mxu2 %v13971_v33 }
 0x54c   :  { %v13072_v42 = vld [vmem:[#allocation7 + $0x1630] sm:$0xf0] }
 0x54d   :  { %v15990_v16 = vld [vmem:[#allocation7 + $0x18d4] sm:$0xf]  ;;  %v13075_v9 = vor.u32 %v15902_v28, %v13072_v42  ;;  %7869 = vmatpush.bf16.msrb.mxu1 %v13651_v17  ;;  %v7602_v28 = vpop.f32.mrf.mxu0  ;;  %v10743_v42 = vor.u32 %v15323_v60, %v10742_v55  ;;  %v15379_v55 = vld [vmem:[#allocation7 + $0x5b4] sm:$0xf0] }
 0x54e   :  { %v13424_v45 = vld [vmem:[#allocation7 + $0x18f0] sm:$0xf0]  ;;  %v10934_v28 = vld [vmem:[#allocation7 + $0x558] sm:$0xf] }
 0x54f   :  { %v16214_v5 = vld [vmem:[#allocation7 + $0x1fd4] sm:$0xf]  ;;  %v13427_v37 = vor.u32 %v15990_v16, %v13424_v45  ;;  %7845 = vmatpush.bf16.msrb.mxu3 %v13075_v9  ;;  %v10710_v16 = vld [vmem:[#allocation7 + $0x398] sm:$0xf] }
 0x550   :  { %v14320_v11 = vld [vmem:[#allocation7 + $0x1ff0] sm:$0xf0] }
 0x551   :  { %v16118_v23 = vld [vmem:[#allocation7 + $0x1cd4] sm:$0xf]  ;;  %v14323_v26 = vor.u32 %v16214_v5, %v14320_v11  ;;  %7855 = vmatpush.bf16.msra.mxu0 %v13427_v37  ;;  %v15315_v5 = vld [vmem:[#allocation7 + $0x3b4] sm:$0xf0] }
 0x552   :  { %v13936_v19 = vld [vmem:[#allocation7 + $0x1cf0] sm:$0xf0]  ;;  %7846 = vmatmul.bf16.vlgmr.msrb.gmra.mxu3 %v16888_v52  ;;  %v10711_v30 = vor.u32 %v15315_v5, %v10710_v16  ;;  %v10998_v37 = vld [vmem:[#allocation7 + $0x5d8] sm:$0xf]  ;;  %v7639_v5 = vpop.f32.mrf.mxu3 }
 0x553   :  { %v16038_v59 = vld [vmem:[#allocation7 + $0x1a54] sm:$0xf]  ;;  %v13939_v7 = vor.u32 %v16118_v23, %v13936_v19  ;;  %7890 = vmatpush.bf16.msra.mxu3 %v14323_v26  ;;  %v15387_v26 = vld [vmem:[#allocation7 + $0x5f4] sm:$0xf0] }
 0x554   :  { %v13616_v12 = vld [vmem:[#allocation7 + $0x1a70] sm:$0xf0] }
 0x555   :  { %v15982_v34 = vld [vmem:[#allocation7 + $0x1894] sm:$0xf]  ;;  %v13619_v2 = vor.u32 %v16038_v59, %v13616_v12  ;;  %7881 = vmatpush.bf16.msrb.mxu2 %v13939_v7  ;;  %v10486_v12 = vld [vmem:[#allocation7 + $0x1d8] sm:$0xf] }
 0x556   :  { %v13392_v25 = vld [vmem:[#allocation7 + $0x18b0] sm:$0xf0]  ;;  %v10678_v7 = vld [vmem:[#allocation7 + $0x358] sm:$0xf] }
 0x557   :  { %v16206_v51 = vld [vmem:[#allocation7 + $0x1f94] sm:$0xf]  ;;  %v13395_v21 = vor.u32 %v15982_v34, %v13392_v25  ;;  %7870 = vmatpush.bf16.msrb.mxu1 %v13619_v2  ;;  %v15307_v25 = vld [vmem:[#allocation7 + $0x374] sm:$0xf0] }
 0x558   :  { %v14288_v38 = vld [vmem:[#allocation7 + $0x1fb0] sm:$0xf0] }
 0x559   :  { %v16110_v62 = vld [vmem:[#allocation7 + $0x1c94] sm:$0xf]  ;;  %v14291_v39 = vor.u32 %v16206_v51, %v14288_v38  ;;  %7856 = vmatpush.bf16.msra.mxu0 %v13395_v21  ;;  %v10487_v38 = vor.u32 %v15259_v61, %v10486_v12  ;;  %v10679_v21 = vor.u32 %v15307_v25, %v10678_v7  ;;  %v15235_v12 = vld [vmem:[#allocation7 + $0x134] sm:$0xf0] }
 0x55a   :  { %v13904_v48 = vld [vmem:[#allocation7 + $0x1cb0] sm:$0xf0] }
 0x55b   :  { %v16030_v50 = vld [vmem:[#allocation7 + $0x1a14] sm:$0xf]  ;;  %v13907_v27 = vor.u32 %v16110_v62, %v13904_v48  ;;  %7891 = vmatpush.bf16.msra.mxu3 %v14291_v39  ;;  %v7628_v62 = vpop.f32.mrf.mxu2  ;;  %v10999_v48 = vor.u32 %v15387_v26, %v10998_v37  ;;  %v10966_v39 = vld [vmem:[#allocation7 + $0x598] sm:$0xf] }
 0x55c   :  { %v13584_v22 = vld [vmem:[#allocation7 + $0x1a30] sm:$0xf0]  ;;  %v10967_v3 = vor.u32 %v15379_v55, %v10966_v39  ;;  %v15363_v37 = vld [vmem:[#allocation7 + $0x534] sm:$0xf0] }
 0x55d   :  { %v15974_v0 = vld [vmem:[#allocation7 + $0x1854] sm:$0xf]  ;;  %v13587_v56 = vor.u32 %v16030_v50, %v13584_v22  ;;  %7882 = vmatpush.bf16.msrb.mxu2 %v13907_v27  ;;  %v10454_v50 = vld [vmem:[#allocation7 + $0x198] sm:$0xf] }
 0x55e   :  { %v13360_v57 = vld [vmem:[#allocation7 + $0x1870] sm:$0xf0]  ;;  %v15251_v22 = vld [vmem:[#allocation7 + $0x1b4] sm:$0xf0] }
 0x55f   :  { %v16198_v46 = vld [vmem:[#allocation7 + $0x1f54] sm:$0xf]  ;;  %v13363_v33 = vor.u32 %v15974_v0, %v13360_v57  ;;  %7871 = vmatpush.bf16.msrb.mxu1 %v13587_v56  ;;  %v10646_v0 = vld [vmem:[#allocation7 + $0x318] sm:$0xf]  ;;  %v10455_v57 = vor.u32 %v15251_v22, %v10454_v50 }
 0x560   :  { %v14256_v36 = vld [vmem:[#allocation7 + $0x1f70] sm:$0xf0]  ;;  %v15299_v27 = vld [vmem:[#allocation7 + $0x334] sm:$0xf0] }
 0x561   :  { %v16102_v6 = vld [vmem:[#allocation7 + $0x1c54] sm:$0xf]  ;;  %v14259_v45 = vor.u32 %v16198_v46, %v14256_v36  ;;  %7857 = vmatpush.bf16.msra.mxu0 %v13363_v33  ;;  %v10422_v56 = vld [vmem:[#allocation7 + $0x158] sm:$0xf] }
 0x562   :  { %v13872_v41 = vld [vmem:[#allocation7 + $0x1c70] sm:$0xf0]  ;;  %7872 = vmatmul.bf16.vlgmr.msrb.gmra.mxu1 %v16893_v20  ;;  %v10614_v33 = vld [vmem:[#allocation7 + $0x2d8] sm:$0xf] }
 0x563   :  { %v15966_v11 = vld [vmem:[#allocation7 + $0x1814] sm:$0xf]  ;;  %v13875_v23 = vor.u32 %v16102_v6, %v13872_v41  ;;  %7916 = vmatpush.bf16.msra.mxu1 %v10743_v42  ;;  %7892 = vmatpush.bf16.msra.mxu3 %v14259_v45  ;;  %v15243_v6 = vld [vmem:[#allocation7 + $0x174] sm:$0xf0]  ;;  %v10647_v41 = vor.u32 %v15299_v27, %v10646_v0  ;;  %v7641_v27 = vpop.f32.mrf.mxu3 }
 0x564   :  { %v13328_v17 = vld [vmem:[#allocation7 + $0x1830] sm:$0xf0]  ;;  %v15371_v42 = vld [vmem:[#allocation7 + $0x574] sm:$0xf0] }
 0x565   :  { %v16094_v19 = vld [vmem:[#allocation7 + $0x1c14] sm:$0xf]  ;;  %v13331_v34 = vor.u32 %v15966_v11, %v13328_v17  ;;  %7883 = vmatpush.bf16.msrb.mxu2 %v13875_v23  ;;  %v15291_v45 = vld [vmem:[#allocation7 + $0x2f4] sm:$0xf0]  ;;  %v10423_v11 = vor.u32 %v15243_v6, %v10422_v56 }
 0x566   :  { %v16190_v24 = vld [vmem:[#allocation7 + $0x1f14] sm:$0xf]  ;;  %v10615_v61 = vor.u32 %v15291_v45, %v10614_v33  ;;  %v15451_v62 = vld [vmem:[#allocation7 + $0x7f4] sm:$0xf0] }
 0x567   :  { %v14224_v9 = vld [vmem:[#allocation7 + $0x1f30] sm:$0xf0]  ;;  %7917 = vmatpush.bf16.msra.mxu1 %v10711_v30  ;;  %7858 = vmatpush.bf16.msra.mxu0 %v13331_v34  ;;  %v10902_v30 = vld [vmem:[#allocation7 + $0x518] sm:$0xf] }
 0x568   :  { %v13840_v59 = vld [vmem:[#allocation7 + $0x1c30] sm:$0xf0]  ;;  %v14227_v35 = vor.u32 %v16190_v24, %v14224_v9  ;;  %v7665_v24 = vpop.f32.mrf.mxu1  ;;  %v10935_v9 = vor.u32 %v15371_v42, %v10934_v28  ;;  %v10582_v34 = vld [vmem:[#allocation7 + $0x298] sm:$0xf] }
 0x569   :  { %v13843_v51 = vor.u32 %v16094_v19, %v13840_v59  ;;  %v16182_v43 = vld [vmem:[#allocation7 + $0x1ed4] sm:$0xf]  ;;  %v7640_v19 = vadd.f32 %v7639_v5, %v17048_v53  ;;  %v10390_v59 = vld [vmem:[#allocation7 + $0x118] sm:$0xf]  ;;  %v10903_v53 = vor.u32 %v15363_v37, %v10902_v30 }
 0x56a   :  { %v14192_v2 = vld [vmem:[#allocation7 + $0x1ef0] sm:$0xf0]  ;;  %7893 = vmatpush.bf16.msra.mxu3 %v14227_v35  ;;  %7859 = vmatmul.bf16.vlgmr.msra.gmra.mxu0 %v16896_v47  ;;  %v15283_v35 = vld [vmem:[#allocation7 + $0x2b4] sm:$0xf0]  ;;  %v10391_v7 = vor.u32 %v15235_v12, %v10390_v59 }
 0x56b   :  { %v14195_v60 = vor.u32 %v16182_v43, %v14192_v2  ;;  %7884 = vmatpush.bf16.msrb.mxu2 %v13843_v51  ;;  %7903 = vmatpush.bf16.msrb.mxu0 %v10487_v38  ;;  %v16174_v46 = vld [vmem:[#allocation7 + $0x1e94] sm:$0xf]  ;;  %v10358_v38 = vld [vmem:[#allocation7 + $0xd8] sm:$0xf] }
 0x56c   :  { %v14160_v36 = vld [vmem:[#allocation7 + $0x1eb0] sm:$0xf0]  ;;  %7918 = vmatpush.bf16.msra.mxu1 %v10679_v21  ;;  %v15227_v43 = vld [vmem:[#allocation7 + $0xf4] sm:$0xf0]  ;;  %v7652_v21 = vpop.f32.mrf.mxu0 }
 0x56d   :  { %v14163_v16 = vor.u32 %v16174_v46, %v14160_v36  ;;  %v16166_v17 = vld [vmem:[#allocation7 + $0x1e54] sm:$0xf]  ;;  %v11254_v2 = vld [vmem:[#allocation7 + $0x7d8] sm:$0xf]  ;;  %v7653_v0 = vadd.f32 %v7652_v21, %v7640_v19 }
 0x56e   :  { %7885 = vmatmul.bf16.vlgmr.msrb.gmra.mxu2 %v16898_v54  ;;  %7894 = vmatpush.bf16.msra.mxu3 %v14195_v60  ;;  %v14128_v23 = vld [vmem:[#allocation7 + $0x1e70] sm:$0xf0]  ;;  %v10870_v50 = vld [vmem:[#allocation7 + $0x4d8] sm:$0xf]  ;;  %v11255_v46 = vor.u32 %v15451_v62, %v11254_v2 }
 0x56f   :  { %7929 = vmatpush.bf16.msra.mxu2 %v10999_v48  ;;  %7904 = vmatpush.bf16.msrb.mxu0 %v10455_v57  ;;  %v14131_v26 = vor.u32 %v16166_v17, %v14128_v23  ;;  %v16158_v25 = vld [vmem:[#allocation7 + $0x1e14] sm:$0xf]  ;;  %v10583_v48 = vor.u32 %v15283_v35, %v10582_v34  ;;  %v15355_v22 = vld [vmem:[#allocation7 + $0x4f4] sm:$0xf0]  ;;  %v10359_v57 = vor.u32 %v15227_v43, %v10358_v38 }
 0x570   :  { %7919 = vmatpush.bf16.msra.mxu1 %v10647_v41  ;;  %v14096_v51 = vld [vmem:[#allocation7 + $0x1e30] sm:$0xf0]  ;;  %v10550_v55 = vld [vmem:[#allocation7 + $0x258] sm:$0xf]  ;;  %v10871_v56 = vor.u32 %v15355_v22, %v10870_v50  ;;  %v7666_v42 = vadd.f32 %v7665_v24, %v7653_v0 }
 0x571   :  { %v14099_v39 = vor.u32 %v16158_v25, %v14096_v51  ;;  %v15275_v60 = vld [vmem:[#allocation7 + $0x274] sm:$0xf0] }
 0x572   :  { %7895 = vmatpush.bf16.msra.mxu3 %v14163_v16  ;;  %v10326_v36 = vld [vmem:[#allocation7 + $0x98] sm:$0xf]  ;;  %v10551_v16 = vor.u32 %v15275_v60, %v10550_v55 }
 0x573   :  { %7930 = vmatpush.bf16.msra.mxu2 %v10967_v3  ;;  %7905 = vmatpush.bf16.msrb.mxu0 %v10423_v11  ;;  %v7667_v3 = vpop.f32.mrf.mxu1  ;;  %v15219_v6 = vld [vmem:[#allocation7 + $0xb4] sm:$0xf0] }
 0x574   :  { %7920 = vmatpush.bf16.msra.mxu1 %v10615_v61  ;;  %v11222_v41 = vld [vmem:[#allocation7 + $0x798] sm:$0xf]  ;;  %v10327_v17 = vor.u32 %v15219_v6, %v10326_v36  ;;  %v7654_v25 = vpop.f32.mrf.mxu0 }
 0x575   :  { %v15443_v28 = vld [vmem:[#allocation7 + $0x7b4] sm:$0xf0] }
 0x576   :  { %7896 = vmatpush.bf16.msra.mxu3 %v14131_v26  ;;  %v10838_v33 = vld [vmem:[#allocation7 + $0x498] sm:$0xf]  ;;  %v11223_v23 = vor.u32 %v15443_v28, %v11222_v41  ;;  %v7678_v26 = vpop.f32.mrf.mxu2 }
 0x577   :  { %7931 = vmatpush.bf16.msra.mxu2 %v10935_v9  ;;  %7906 = vmatpush.bf16.msrb.mxu0 %v10391_v7  ;;  %v15347_v45 = vld [vmem:[#allocation7 + $0x4b4] sm:$0xf0]  ;;  %v17055_v7 = vadd.f32 %v7678_v26, %v7666_v42 }
 0x578   :  { %7921 = vmatpush.bf16.msra.mxu1 %v10583_v48  ;;  %v10518_v5 = vld [vmem:[#allocation7 + $0x218] sm:$0xf]  ;;  %v10839_v12 = vor.u32 %v15347_v45, %v10838_v33 }
 0x579   :  { %v15267_v11 = vld [vmem:[#allocation7 + $0x234] sm:$0xf0] }
 0x57a   :  { %7897 = vmatpush.bf16.msra.mxu3 %v14099_v39  ;;  %v11766_v19 = vld [vmem:[#allocation7 + $0xbd8] sm:$0xf]  ;;  %v10519_v24 = vor.u32 %v15267_v11, %v10518_v5 }
 0x57b   :  { %7932 = vmatpush.bf16.msra.mxu2 %v10903_v53  ;;  %7907 = vmatpush.bf16.msrb.mxu0 %v10359_v57  ;;  %v15579_v9 = vld [vmem:[#allocation7 + $0xbf4] sm:$0xf0] }
 0x57c   :  { %v10294_v59 = vld [vmem:[#allocation7 + $0x58] sm:$0xf]  ;;  %7922 = vmatpush.bf16.msra.mxu1 %v10551_v16  ;;  %v11767_v51 = vor.u32 %v15579_v9, %v11766_v19 }
 0x57d   :  { %v15211_v61 = vld [vmem:[#allocation7 + $0x74] sm:$0xf0]  ;;  %7898 = vmatmul.bf16.vlgmr.msra.gmra.mxu3 %v16903_v58 }
 0x57e   :  { %7942 = vmatpush.bf16.msrb.mxu3 %v11255_v46  ;;  %v11190_v30 = vld [vmem:[#allocation7 + $0x758] sm:$0xf]  ;;  %v10295_v53 = vor.u32 %v15211_v61, %v10294_v59  ;;  %v7680_v33 = vpop.f32.mrf.mxu2 }
 0x57f   :  { %7933 = vmatpush.bf16.msra.mxu2 %v10871_v56  ;;  %v15435_v37 = vld [vmem:[#allocation7 + $0x774] sm:$0xf0]  ;;  %7908 = vmatpush.bf16.msrb.mxu0 %v10327_v17 }
 0x580   :  { %v10806_v34 = vld [vmem:[#allocation7 + $0x458] sm:$0xf]  ;;  %v11191_v43 = vor.u32 %v15435_v37, %v11190_v30  ;;  %7923 = vmatpush.bf16.msra.mxu1 %v10519_v24 }
 0x581   :  { %v15339_v35 = vld [vmem:[#allocation7 + $0x474] sm:$0xf0] }
 0x582   :  { %v11734_v38 = vld [vmem:[#allocation7 + $0xb98] sm:$0xf]  ;;  %7943 = vmatpush.bf16.msrb.mxu3 %v11223_v23  ;;  %v10807_v50 = vor.u32 %v15339_v35, %v10806_v34 }
 0x583   :  { %v15571_v2 = vld [vmem:[#allocation7 + $0xbb4] sm:$0xf0]  ;;  %7934 = vmatpush.bf16.msra.mxu2 %v10839_v12  ;;  %7909 = vmatpush.bf16.msrb.mxu0 %v10295_v53 }
 0x584   :  { %v10262_v62 = vld [vmem:[#allocation7 + $0x18] sm:$0xf]  ;;  %7968 = vmatpush.bf16.msrb.mxu1 %v11767_v51  ;;  %v11735_v27 = vor.u32 %v15571_v2, %v11734_v38  ;;  %v7691_v2 = vpop.f32.mrf.mxu3 }
 0x585   :  { %v15203_v48 = vld [vmem:[#allocation7 + $0x34] sm:$0xf0]  ;;  %7924 = vmatmul.bf16.vlgmr.msra.gmra.mxu1 %v16837_v49 }
 0x586   :  { %v10774_v22 = vld [vmem:[#allocation7 + $0x418] sm:$0xf]  ;;  %7944 = vmatpush.bf16.msrb.mxu3 %v11191_v43  ;;  %v10263_v36 = vor.u32 %v15203_v48, %v10262_v62 }
 0x587   :  { %v11158_v21 = vld [vmem:[#allocation7 + $0x718] sm:$0xf]  ;;  %7935 = vmatpush.bf16.msra.mxu2 %v10807_v50 }
 0x588   :  { %v15427_v39 = vld [vmem:[#allocation7 + $0x734] sm:$0xf0]  ;;  %7969 = vmatpush.bf16.msrb.mxu1 %v11735_v27  ;;  %7910 = vmatpush.bf16.msrb.mxu0 %v10263_v36 }
 0x589   :  { %v15331_v55 = vld [vmem:[#allocation7 + $0x434] sm:$0xf0]  ;;  %v11159_v3 = vor.u32 %v15427_v39, %v11158_v21  ;;  %v7717_v21 = vpop.f32.mrf.mxu1 }
 0x58a   :  { %v11510_v60 = vld [vmem:[#allocation7 + $0x9d8] sm:$0xf]  ;;  %v10775_v41 = vor.u32 %v15331_v55, %v10774_v22  ;;  %v17061_v22 = vadd.f32 %v7691_v2, %v17055_v7 }
 0x58b   :  { %v15515_v0 = vld [vmem:[#allocation7 + $0x9f4] sm:$0xf0]  ;;  %7945 = vmatpush.bf16.msrb.mxu3 %v11159_v3  ;;  %7911 = vmatmul.bf16.vlgmr.msrb.gmra.mxu0 %v16840_v4 }
 0x58c   :  { %v12022_v57 = vld [vmem:[#allocation7 + $0xdd8] sm:$0xf]  ;;  %v11511_v28 = vor.u32 %v15515_v0, %v11510_v60  ;;  %7936 = vmatpush.bf16.msra.mxu2 %v10775_v41 }
 0x58d   :  { %v15643_v46 = vld [vmem:[#allocation7 + $0xdf4] sm:$0xf0] }
 0x58e   :  { %v11702_v56 = vld [vmem:[#allocation7 + $0xb58] sm:$0xf]  ;;  %v12023_v45 = vor.u32 %v15643_v46, %v12022_v57  ;;  %7955 = vmatpush.bf16.msra.mxu0 %v11511_v28  ;;  %v16459_v46 = vld [vmem:[#allocation8] sm:$0xff] }
 0x58f   :  { %v15563_v6 = vld [vmem:[#allocation7 + $0xb74] sm:$0xf0]  ;;  %7937 = vmatmul.bf16.vlgmr.msra.gmra.mxu2 %v16842_v8  ;;  %v1524_v36 = vperm.slane %v16459_v46, 5 }
 0x590   :  { %v11126_v42 = vld [vmem:[#allocation7 + $0x6d8] sm:$0xf]  ;;  %v11703_v17 = vor.u32 %v15563_v6, %v11702_v56  ;;  %7981 = vmatpush.bf16.msrb.mxu2 %v12023_v45 }
 0x591   :  { %v15419_v16 = vld [vmem:[#allocation7 + $0x6f4] sm:$0xf0] }
 0x592   :  { %v11478_v5 = vld [vmem:[#allocation7 + $0x998] sm:$0xf]  ;;  %v11127_v9 = vor.u32 %v15419_v16, %v11126_v42  ;;  %7970 = vmatpush.bf16.msrb.mxu1 %v11703_v17 }
 0x593   :  { %v15507_v11 = vld [vmem:[#allocation7 + $0x9b4] sm:$0xf0] }
 0x594   :  { %v11990_v23 = vld [vmem:[#allocation7 + $0xd98] sm:$0xf]  ;;  %v11479_v61 = vor.u32 %v15507_v11, %v11478_v5  ;;  %7946 = vmatpush.bf16.msrb.mxu3 %v11127_v9 }
 0x595   :  { %v15635_v19 = vld [vmem:[#allocation7 + $0xdb4] sm:$0xf0] }
 0x596   :  { %v11670_v59 = vld [vmem:[#allocation7 + $0xb18] sm:$0xf]  ;;  %v11991_v26 = vor.u32 %v15635_v19, %v11990_v23  ;;  %7956 = vmatpush.bf16.msra.mxu0 %v11479_v61  ;;  %v7704_v19 = vpop.f32.mrf.mxu0 }
 0x597   :  { %v15555_v12 = vld [vmem:[#allocation7 + $0xb34] sm:$0xf0]  ;;  %v7705_v61 = vadd.f32 %v7704_v19, %v1524_v36 }
 0x598   :  { %v11094_v30 = vld [vmem:[#allocation7 + $0x698] sm:$0xf]  ;;  %v11671_v35 = vor.u32 %v15555_v12, %v11670_v59  ;;  %7982 = vmatpush.bf16.msrb.mxu2 %v11991_v26 }
 0x599   :  { %v15411_v37 = vld [vmem:[#allocation7 + $0x6b4] sm:$0xf0] }
 0x59a   :  { %v11446_v24 = vld [vmem:[#allocation7 + $0x958] sm:$0xf]  ;;  %v11095_v38 = vor.u32 %v15411_v37, %v11094_v30  ;;  %7971 = vmatpush.bf16.msrb.mxu1 %v11671_v35  ;;  %v7693_v30 = vpop.f32.mrf.mxu3 }
 0x59b   :  { %v15499_v34 = vld [vmem:[#allocation7 + $0x974] sm:$0xf0] }
 0x59c   :  { %v11958_v25 = vld [vmem:[#allocation7 + $0xd58] sm:$0xf]  ;;  %v11447_v62 = vor.u32 %v15499_v34, %v11446_v24  ;;  %7947 = vmatpush.bf16.msrb.mxu3 %v11095_v38  ;;  %v7719_v34 = vpop.f32.mrf.mxu1 }
 0x59d   :  { %v15627_v51 = vld [vmem:[#allocation7 + $0xd74] sm:$0xf0] }
 0x59e   :  { %v11638_v53 = vld [vmem:[#allocation7 + $0xad8] sm:$0xf]  ;;  %v11959_v39 = vor.u32 %v15627_v51, %v11958_v25  ;;  %7957 = vmatpush.bf16.msra.mxu0 %v11447_v62 }
 0x59f   :  { %v15547_v43 = vld [vmem:[#allocation7 + $0xaf4] sm:$0xf0] }
 0x5a0   :  { %v11062_v48 = vld [vmem:[#allocation7 + $0x658] sm:$0xf]  ;;  %v11639_v0 = vor.u32 %v15547_v43, %v11638_v53  ;;  %7983 = vmatpush.bf16.msrb.mxu2 %v11959_v39  ;;  %v7718_v53 = vadd.f32 %v7717_v21, %v7705_v61 }
 0x5a1   :  { %v15403_v50 = vld [vmem:[#allocation7 + $0x674] sm:$0xf0] }
 0x5a2   :  { %v11414_v55 = vld [vmem:[#allocation7 + $0x918] sm:$0xf]  ;;  %v11063_v3 = vor.u32 %v15403_v50, %v11062_v48  ;;  %7972 = vmatpush.bf16.msrb.mxu1 %v11639_v0 }
 0x5a3   :  { %v15491_v60 = vld [vmem:[#allocation7 + $0x934] sm:$0xf0] }
 0x5a4   :  { %v11926_v27 = vld [vmem:[#allocation7 + $0xd18] sm:$0xf]  ;;  %v11415_v41 = vor.u32 %v15491_v60, %v11414_v55  ;;  %7948 = vmatpush.bf16.msrb.mxu3 %v11063_v3 }
 0x5a5   :  { %v15619_v57 = vld [vmem:[#allocation7 + $0xd34] sm:$0xf0] }
 0x5a6   :  { %v11606_v56 = vld [vmem:[#allocation7 + $0xa98] sm:$0xf]  ;;  %v11927_v16 = vor.u32 %v15619_v57, %v11926_v27  ;;  %7958 = vmatpush.bf16.msra.mxu0 %v11415_v41 }
 0x5a7   :  { %v15539_v6 = vld [vmem:[#allocation7 + $0xab4] sm:$0xf0] }
 0x5a8   :  { %v11030_v28 = vld [vmem:[#allocation7 + $0x618] sm:$0xf]  ;;  %v11607_v11 = vor.u32 %v15539_v6, %v11606_v56  ;;  %7984 = vmatpush.bf16.msrb.mxu2 %v11927_v16  ;;  %v7730_v56 = vpop.f32.mrf.mxu2 }
 0x5a9   :  { %v15395_v7 = vld [vmem:[#allocation7 + $0x634] sm:$0xf0] }
 0x5aa   :  { %v11382_v42 = vld [vmem:[#allocation7 + $0x8d8] sm:$0xf]  ;;  %v11031_v9 = vor.u32 %v15395_v7, %v11030_v28  ;;  %7973 = vmatpush.bf16.msrb.mxu1 %v11607_v11  ;;  %v17064_v28 = vadd.f32 %v7730_v56, %v7718_v53  ;;  %v7706_v7 = vpop.f32.mrf.mxu0 }
 0x5ab   :  { %v15483_v33 = vld [vmem:[#allocation7 + $0x8f4] sm:$0xf0] }
 0x5ac   :  { %v12278_v45 = vld [vmem:[#allocation7 + $0xfd8] sm:$0xf]  ;;  %v11383_v37 = vor.u32 %v15483_v33, %v11382_v42  ;;  %7949 = vmatpush.bf16.msrb.mxu3 %v11031_v9 }
 0x5ad   :  { %v15707_v5 = vld [vmem:[#allocation7 + $0xff4] sm:$0xf0] }
 0x5ae   :  { %v11894_v17 = vld [vmem:[#allocation7 + $0xcd8] sm:$0xf]  ;;  %v12279_v26 = vor.u32 %v15707_v5, %v12278_v45  ;;  %7959 = vmatpush.bf16.msra.mxu0 %v11383_v37 }
 0x5af   :  { %v15611_v23 = vld [vmem:[#allocation7 + $0xcf4] sm:$0xf0]  ;;  %7950 = vmatmul.bf16.vlgmr.msrb.gmra.mxu3 %v16857_v10 }
 0x5b0   :  { %v11574_v59 = vld [vmem:[#allocation7 + $0xa58] sm:$0xf]  ;;  %v11895_v35 = vor.u32 %v15611_v23, %v11894_v17  ;;  %7994 = vmatpush.bf16.msra.mxu3 %v12279_v26 }
 0x5b1   :  { %v15531_v12 = vld [vmem:[#allocation7 + $0xa74] sm:$0xf0] }
 0x5b2   :  { %v11350_v24 = vld [vmem:[#allocation7 + $0x898] sm:$0xf]  ;;  %v11575_v43 = vor.u32 %v15531_v12, %v11574_v59  ;;  %7985 = vmatpush.bf16.msrb.mxu2 %v11895_v35 }
 0x5b3   :  { %v15475_v25 = vld [vmem:[#allocation7 + $0x8b4] sm:$0xf0] }
 0x5b4   :  { %v12246_v51 = vld [vmem:[#allocation7 + $0xf98] sm:$0xf]  ;;  %v11351_v39 = vor.u32 %v15475_v25, %v11350_v24  ;;  %7974 = vmatpush.bf16.msrb.mxu1 %v11575_v43 }
 0x5b5   :  { %v15699_v38 = vld [vmem:[#allocation7 + $0xfb4] sm:$0xf0] }
 0x5b6   :  { %v11862_v2 = vld [vmem:[#allocation7 + $0xc98] sm:$0xf]  ;;  %v12247_v55 = vor.u32 %v15699_v38, %v12246_v51  ;;  %7960 = vmatpush.bf16.msra.mxu0 %v11351_v39 }
 0x5b7   :  { %v15603_v62 = vld [vmem:[#allocation7 + $0xcb4] sm:$0xf0] }
 0x5b8   :  { %v11542_v48 = vld [vmem:[#allocation7 + $0xa18] sm:$0xf]  ;;  %v11863_v57 = vor.u32 %v15603_v62, %v11862_v2  ;;  %7995 = vmatpush.bf16.msra.mxu3 %v12247_v55  ;;  %v7732_v62 = vpop.f32.mrf.mxu2 }
 0x5b9   :  { %v15523_v50 = vld [vmem:[#allocation7 + $0xa34] sm:$0xf0] }
 0x5ba   :  { %v12790_v60 = vld [vmem:[#allocation7 + $0x13d8] sm:$0xf]  ;;  %v11543_v21 = vor.u32 %v15523_v50, %v11542_v48  ;;  %7986 = vmatpush.bf16.msrb.mxu2 %v11863_v57 }
 0x5bb   :  { %v15835_v0 = vld [vmem:[#allocation7 + $0x13f4] sm:$0xf0] }
 0x5bc   :  { %v11318_v27 = vld [vmem:[#allocation7 + $0x858] sm:$0xf]  ;;  %v12791_v42 = vor.u32 %v15835_v0, %v12790_v60  ;;  %7975 = vmatpush.bf16.msrb.mxu1 %v11543_v21 }
 0x5bd   :  { %v15467_v46 = vld [vmem:[#allocation7 + $0x874] sm:$0xf0] }
 0x5be   :  { %v12214_v36 = vld [vmem:[#allocation7 + $0xf58] sm:$0xf]  ;;  %v11319_v33 = vor.u32 %v15467_v46, %v11318_v27 }
 0x5bf   :  { %v15691_v3 = vld [vmem:[#allocation7 + $0xf74] sm:$0xf0]  ;;  %7976 = vmatmul.bf16.vlgmr.msrb.gmra.mxu1 %v16850_v44 }
 0x5c0   :  { %v11830_v6 = vld [vmem:[#allocation7 + $0xc58] sm:$0xf]  ;;  %v12215_v45 = vor.u32 %v15691_v3, %v12214_v36  ;;  %8020 = vmatpush.bf16.msra.mxu1 %v12791_v42  ;;  %7961 = vmatpush.bf16.msra.mxu0 %v11319_v33 }
 0x5c1   :  { %v15595_v41 = vld [vmem:[#allocation7 + $0xc74] sm:$0xf0] }
 0x5c2   :  { %v12758_v16 = vld [vmem:[#allocation7 + $0x1398] sm:$0xf]  ;;  %v11831_v23 = vor.u32 %v15595_v41, %v11830_v6  ;;  %7996 = vmatpush.bf16.msra.mxu3 %v12215_v45 }
 0x5c3   :  { %v15827_v5 = vld [vmem:[#allocation7 + $0x13b4] sm:$0xf0] }
 0x5c4   :  { %v11286_v11 = vld [vmem:[#allocation7 + $0x818] sm:$0xf]  ;;  %v12759_v37 = vor.u32 %v15827_v5, %v12758_v16  ;;  %7987 = vmatpush.bf16.msrb.mxu2 %v11831_v23 }
 0x5c5   :  { %v15459_v17 = vld [vmem:[#allocation7 + $0x834] sm:$0xf0] }
 0x5c6   :  { %v11798_v19 = vld [vmem:[#allocation7 + $0xc18] sm:$0xf]  ;;  %v11287_v34 = vor.u32 %v15459_v17, %v11286_v11  ;;  %8021 = vmatpush.bf16.msra.mxu1 %v12759_v37  ;;  %v7743_v11 = vpop.f32.mrf.mxu3 }
 0x5c7   :  { %v12182_v9 = vld [vmem:[#allocation7 + $0xf18] sm:$0xf] }
 0x5c8   :  { %v15683_v59 = vld [vmem:[#allocation7 + $0xf34] sm:$0xf0]  ;;  %7962 = vmatpush.bf16.msra.mxu0 %v11287_v34 }
 0x5c9   :  { %v15587_v12 = vld [vmem:[#allocation7 + $0xc34] sm:$0xf0]  ;;  %v12183_v35 = vor.u32 %v15683_v59, %v12182_v9  ;;  %v7744_v9 = vadd.f32 %v7743_v11, %v17064_v28  ;;  %v7769_v59 = vpop.f32.mrf.mxu1 }
 0x5ca   :  { %v12534_v61 = vld [vmem:[#allocation7 + $0x11d8] sm:$0xf]  ;;  %v11799_v38 = vor.u32 %v15587_v12, %v11798_v19 }
 0x5cb   :  { %v15771_v30 = vld [vmem:[#allocation7 + $0x11f4] sm:$0xf0]  ;;  %7997 = vmatpush.bf16.msra.mxu3 %v12183_v35  ;;  %7963 = vmatmul.bf16.vlgmr.msra.gmra.mxu0 %v16855_v63 }
 0x5cc   :  { %v13046_v26 = vld [vmem:[#allocation7 + $0x15d8] sm:$0xf]  ;;  %v12535_v53 = vor.u32 %v15771_v30, %v12534_v61  ;;  %7988 = vmatpush.bf16.msrb.mxu2 %v11799_v38 }
 0x5cd   :  { %v15899_v24 = vld [vmem:[#allocation7 + $0x15f4] sm:$0xf0] }
 0x5ce   :  { %v12726_v25 = vld [vmem:[#allocation7 + $0x1358] sm:$0xf]  ;;  %v13047_v48 = vor.u32 %v15899_v24, %v13046_v26  ;;  %8007 = vmatpush.bf16.msrb.mxu0 %v12535_v53 }
 0x5cf   :  { %v15819_v51 = vld [vmem:[#allocation7 + $0x1374] sm:$0xf0]  ;;  %7989 = vmatmul.bf16.vlgmr.msrb.gmra.mxu2 %v16859_v15 }
 0x5d0   :  { %v12150_v43 = vld [vmem:[#allocation7 + $0xed8] sm:$0xf]  ;;  %v12727_v55 = vor.u32 %v15819_v51, %v12726_v25  ;;  %8033 = vmatpush.bf16.msra.mxu2 %v13047_v48 }
 0x5d1   :  { %v15675_v2 = vld [vmem:[#allocation7 + $0xef4] sm:$0xf0] }
 0x5d2   :  { %v12502_v50 = vld [vmem:[#allocation7 + $0x1198] sm:$0xf]  ;;  %v12151_v27 = vor.u32 %v15675_v2, %v12150_v43  ;;  %8022 = vmatpush.bf16.msra.mxu1 %v12727_v55 }
 0x5d3   :  { %v15763_v39 = vld [vmem:[#allocation7 + $0x11b4] sm:$0xf0] }
 0x5d4   :  { %v13014_v60 = vld [vmem:[#allocation7 + $0x1598] sm:$0xf]  ;;  %v12503_v36 = vor.u32 %v15763_v39, %v12502_v50  ;;  %7998 = vmatpush.bf16.msra.mxu3 %v12151_v27 }
 0x5d5   :  { %v15891_v0 = vld [vmem:[#allocation7 + $0x15b4] sm:$0xf0] }
 0x5d6   :  { %v12694_v57 = vld [vmem:[#allocation7 + $0x1318] sm:$0xf]  ;;  %v13015_v21 = vor.u32 %v15891_v0, %v13014_v60  ;;  %8008 = vmatpush.bf16.msrb.mxu0 %v12503_v36  ;;  %v7756_v60 = vpop.f32.mrf.mxu0  ;;  %v7745_v36 = vpop.f32.mrf.mxu3 }
 0x5d7   :  { %v15811_v46 = vld [vmem:[#allocation7 + $0x1334] sm:$0xf0] }
 0x5d8   :  { %v12118_v3 = vld [vmem:[#allocation7 + $0xe98] sm:$0xf]  ;;  %v12695_v7 = vor.u32 %v15811_v46, %v12694_v57  ;;  %8034 = vmatpush.bf16.msra.mxu2 %v13015_v21  ;;  %v7757_v46 = vadd.f32 %v7756_v60, %v7744_v9 }
 0x5d9   :  { %v15667_v56 = vld [vmem:[#allocation7 + $0xeb4] sm:$0xf0] }
 0x5da   :  { %v12470_v6 = vld [vmem:[#allocation7 + $0x1158] sm:$0xf]  ;;  %v12119_v33 = vor.u32 %v15667_v56, %v12118_v3  ;;  %8023 = vmatpush.bf16.msra.mxu1 %v12695_v7 }
 0x5db   :  { %v15755_v41 = vld [vmem:[#allocation7 + $0x1174] sm:$0xf0] }
 0x5dc   :  { %v12982_v42 = vld [vmem:[#allocation7 + $0x1558] sm:$0xf]  ;;  %v12471_v17 = vor.u32 %v15755_v41, %v12470_v6  ;;  %7999 = vmatpush.bf16.msra.mxu3 %v12119_v33  ;;  %v7771_v6 = vpop.f32.mrf.mxu1  ;;  %v7770_v33 = vadd.f32 %v7769_v59, %v7757_v46 }
 0x5dd   :  { %v15883_v16 = vld [vmem:[#allocation7 + $0x1574] sm:$0xf0] }
 0x5de   :  { %v12662_v45 = vld [vmem:[#allocation7 + $0x12d8] sm:$0xf]  ;;  %v12983_v12 = vor.u32 %v15883_v16, %v12982_v42  ;;  %8009 = vmatpush.bf16.msrb.mxu0 %v12471_v17 }
 0x5df   :  { %v15803_v5 = vld [vmem:[#allocation7 + $0x12f4] sm:$0xf0] }
 0x5e0   :  { %v12086_v23 = vld [vmem:[#allocation7 + $0xe58] sm:$0xf]  ;;  %v12663_v37 = vor.u32 %v15803_v5, %v12662_v45  ;;  %8035 = vmatpush.bf16.msra.mxu2 %v12983_v12 }
 0x5e1   :  { %v15659_v19 = vld [vmem:[#allocation7 + $0xe74] sm:$0xf0] }
 0x5e2   :  { %v12438_v61 = vld [vmem:[#allocation7 + $0x1118] sm:$0xf]  ;;  %v12087_v34 = vor.u32 %v15659_v19, %v12086_v23  ;;  %8024 = vmatpush.bf16.msra.mxu1 %v12663_v37 }
 0x5e3   :  { %v15747_v30 = vld [vmem:[#allocation7 + $0x1134] sm:$0xf0] }
 0x5e4   :  { %v12950_v26 = vld [vmem:[#allocation7 + $0x1518] sm:$0xf]  ;;  %v12439_v51 = vor.u32 %v15747_v30, %v12438_v61  ;;  %8000 = vmatpush.bf16.msra.mxu3 %v12087_v34 }
 0x5e5   :  { %v15875_v24 = vld [vmem:[#allocation7 + $0x1534] sm:$0xf0] }
 0x5e6   :  { %v12630_v35 = vld [vmem:[#allocation7 + $0x1298] sm:$0xf]  ;;  %v12951_v28 = vor.u32 %v15875_v24, %v12950_v26  ;;  %8010 = vmatpush.bf16.msrb.mxu0 %v12439_v51 }
 0x5e7   :  { %v15795_v25 = vld [vmem:[#allocation7 + $0x12b4] sm:$0xf0] }
 0x5e8   :  { %v12054_v38 = vld [vmem:[#allocation7 + $0xe18] sm:$0xf]  ;;  %v12631_v50 = vor.u32 %v15795_v25, %v12630_v35  ;;  %8036 = vmatpush.bf16.msra.mxu2 %v12951_v28  ;;  %v7782_v35 = vpop.f32.mrf.mxu2 }
 0x5e9   :  { %v15651_v53 = vld [vmem:[#allocation7 + $0xe34] sm:$0xf0] }
 0x5ea   :  { %v12406_v43 = vld [vmem:[#allocation7 + $0x10d8] sm:$0xf]  ;;  %v12055_v0 = vor.u32 %v15651_v53, %v12054_v38  ;;  %8025 = vmatpush.bf16.msra.mxu1 %v12631_v50  ;;  %v17071_v38 = vadd.f32 %v7782_v35, %v7770_v33  ;;  %v7758_v53 = vpop.f32.mrf.mxu0 }
 0x5eb   :  { %v15739_v2 = vld [vmem:[#allocation7 + $0x10f4] sm:$0xf0] }
 0x5ec   :  { %v13302_v62 = vld [vmem:[#allocation7 + $0x17d8] sm:$0xf]  ;;  %v12407_v3 = vor.u32 %v15739_v2, %v12406_v43  ;;  %8001 = vmatpush.bf16.msra.mxu3 %v12055_v0 }
 0x5ed   :  { %v15963_v48 = vld [vmem:[#allocation7 + $0x17f4] sm:$0xf0] }
 0x5ee   :  { %v12918_v39 = vld [vmem:[#allocation7 + $0x14d8] sm:$0xf]  ;;  %v13303_v56 = vor.u32 %v15963_v48, %v13302_v62  ;;  %8011 = vmatpush.bf16.msrb.mxu0 %v12407_v3 }
 0x5ef   :  { %v15867_v55 = vld [vmem:[#allocation7 + $0x14f4] sm:$0xf0]  ;;  %8002 = vmatmul.bf16.vlgmr.msra.gmra.mxu3 %v16878_v32 }
 0x5f0   :  { %v12598_v27 = vld [vmem:[#allocation7 + $0x1258] sm:$0xf]  ;;  %v12919_v41 = vor.u32 %v15867_v55, %v12918_v39  ;;  %8046 = vmatpush.bf16.msrb.mxu3 %v13303_v56 }
 0x5f1   :  { %v15787_v57 = vld [vmem:[#allocation7 + $0x1274] sm:$0xf0] }
 0x5f2   :  { %v12374_v21 = vld [vmem:[#allocation7 + $0x1098] sm:$0xf]  ;;  %v12599_v45 = vor.u32 %v15787_v57, %v12598_v27  ;;  %8037 = vmatpush.bf16.msra.mxu2 %v12919_v41 }
 0x5f3   :  { %v15731_v7 = vld [vmem:[#allocation7 + $0x10b4] sm:$0xf0] }
 0x5f4   :  { %v13270_v42 = vld [vmem:[#allocation7 + $0x1798] sm:$0xf]  ;;  %v12375_v19 = vor.u32 %v15731_v7, %v12374_v21  ;;  %8026 = vmatpush.bf16.msra.mxu1 %v12599_v45 }
 0x5f5   :  { %v15955_v16 = vld [vmem:[#allocation7 + $0x17b4] sm:$0xf0] }
 0x5f6   :  { %v12886_v5 = vld [vmem:[#allocation7 + $0x1498] sm:$0xf]  ;;  %v13271_v9 = vor.u32 %v15955_v16, %v13270_v42  ;;  %8012 = vmatpush.bf16.msrb.mxu0 %v12375_v19 }
 0x5f7   :  { %v15859_v11 = vld [vmem:[#allocation7 + $0x14b4] sm:$0xf0] }
 0x5f8   :  { %v12566_v17 = vld [vmem:[#allocation7 + $0x1218] sm:$0xf]  ;;  %v12887_v37 = vor.u32 %v15859_v11, %v12886_v5  ;;  %8047 = vmatpush.bf16.msrb.mxu3 %v13271_v9  ;;  %v7784_v11 = vpop.f32.mrf.mxu2 }
 0x5f9   :  { %v15779_v23 = vld [vmem:[#allocation7 + $0x1234] sm:$0xf0] }
 0x5fa   :  { %v13814_v12 = vld [vmem:[#allocation7 + $0x1bd8] sm:$0xf]  ;;  %v12567_v59 = vor.u32 %v15779_v23, %v12566_v17  ;;  %8038 = vmatpush.bf16.msra.mxu2 %v12887_v37 }
 0x5fb   :  { %v16091_v61 = vld [vmem:[#allocation7 + $0x1bf4] sm:$0xf0] }
 0x5fc   :  { %v12342_v30 = vld [vmem:[#allocation7 + $0x1058] sm:$0xf]  ;;  %v13815_v43 = vor.u32 %v16091_v61, %v13814_v12  ;;  %8027 = vmatpush.bf16.msra.mxu1 %v12567_v59 }
 0x5fd   :  { %v15723_v26 = vld [vmem:[#allocation7 + $0x1074] sm:$0xf0] }
 0x5fe   :  { %v13238_v24 = vld [vmem:[#allocation7 + $0x1758] sm:$0xf]  ;;  %v12343_v2 = vor.u32 %v15723_v26, %v12342_v30 }
 0x5ff   :  { %v15947_v34 = vld [vmem:[#allocation7 + $0x1774] sm:$0xf0]  ;;  %8028 = vmatmul.bf16.vlgmr.msra.gmra.mxu1 %v16871_v1 }
 0x600   :  { %v12854_v25 = vld [vmem:[#allocation7 + $0x1458] sm:$0xf]  ;;  %v13239_v62 = vor.u32 %v15947_v34, %v13238_v24  ;;  %8072 = vmatpush.bf16.msrb.mxu1 %v13815_v43  ;;  %8013 = vmatpush.bf16.msrb.mxu0 %v12343_v2 }
 0x601   :  { %v15851_v51 = vld [vmem:[#allocation7 + $0x1474] sm:$0xf0] }
 0x602   :  { %v13782_v28 = vld [vmem:[#allocation7 + $0x1b98] sm:$0xf]  ;;  %v12855_v55 = vor.u32 %v15851_v51, %v12854_v25  ;;  %8048 = vmatpush.bf16.msrb.mxu3 %v13239_v62 }
 0x603   :  { %v16083_v48 = vld [vmem:[#allocation7 + $0x1bb4] sm:$0xf0] }
 0x604   :  { %v12310_v50 = vld [vmem:[#allocation7 + $0x1018] sm:$0xf]  ;;  %v13783_v3 = vor.u32 %v16083_v48, %v13782_v28  ;;  %8039 = vmatpush.bf16.msra.mxu2 %v12855_v55 }
 0x605   :  { %v15715_v39 = vld [vmem:[#allocation7 + $0x1034] sm:$0xf0] }
 0x606   :  { %v12822_v60 = vld [vmem:[#allocation7 + $0x1418] sm:$0xf]  ;;  %v12311_v6 = vor.u32 %v15715_v39, %v12310_v50  ;;  %8073 = vmatpush.bf16.msrb.mxu1 %v13783_v3  ;;  %v7795_v50 = vpop.f32.mrf.mxu3 }
 0x607   :  { %v13206_v0 = vld [vmem:[#allocation7 + $0x1718] sm:$0xf] }
 0x608   :  { %v15939_v27 = vld [vmem:[#allocation7 + $0x1734] sm:$0xf0]  ;;  %8014 = vmatpush.bf16.msrb.mxu0 %v12311_v6 }
 0x609   :  { %v15843_v57 = vld [vmem:[#allocation7 + $0x1434] sm:$0xf0]  ;;  %v13207_v41 = vor.u32 %v15939_v27, %v13206_v0  ;;  %v7796_v0 = vadd.f32 %v7795_v50, %v17071_v38  ;;  %v7821_v27 = vpop.f32.mrf.mxu1 }
 0x60a   :  { %v13558_v46 = vld [vmem:[#allocation7 + $0x19d8] sm:$0xf]  ;;  %v12823_v16 = vor.u32 %v15843_v57, %v12822_v60 }
 0x60b   :  { %v16027_v36 = vld [vmem:[#allocation7 + $0x19f4] sm:$0xf0]  ;;  %8049 = vmatpush.bf16.msrb.mxu3 %v13207_v41  ;;  %8015 = vmatmul.bf16.vlgmr.msrb.gmra.mxu0 %v16876_v29 }
 0x60c   :  { %v14070_v56 = vld [vmem:[#allocation7 + $0x1dd8] sm:$0xf]  ;;  %v13559_v33 = vor.u32 %v16027_v36, %v13558_v46  ;;  %8040 = vmatpush.bf16.msra.mxu2 %v12823_v16 }
 0x60d   :  { %v16155_v21 = vld [vmem:[#allocation7 + $0x1df4] sm:$0xf0] }
 0x60e   :  { %v13750_v7 = vld [vmem:[#allocation7 + $0x1b58] sm:$0xf]  ;;  %v14071_v17 = vor.u32 %v16155_v21, %v14070_v56  ;;  %8059 = vmatpush.bf16.msra.mxu0 %v13559_v33 }
 0x60f   :  { %v16075_v42 = vld [vmem:[#allocation7 + $0x1b74] sm:$0xf0]  ;;  %8041 = vmatmul.bf16.vlgmr.msra.gmra.mxu2 %v16880_v40 }
 0x610   :  { %v13174_v45 = vld [vmem:[#allocation7 + $0x16d8] sm:$0xf]  ;;  %v13751_v9 = vor.u32 %v16075_v42, %v13750_v7  ;;  %8085 = vmatpush.bf16.msrb.mxu2 %v14071_v17 }
 0x611   :  { %v15931_v5 = vld [vmem:[#allocation7 + $0x16f4] sm:$0xf0] }
 0x612   :  { %v13526_v23 = vld [vmem:[#allocation7 + $0x1998] sm:$0xf]  ;;  %v13175_v30 = vor.u32 %v15931_v5, %v13174_v45  ;;  %8074 = vmatpush.bf16.msrb.mxu1 %v13751_v9 }
 0x613   :  { %v16019_v19 = vld [vmem:[#allocation7 + $0x19b4] sm:$0xf0] }
 0x614   :  { %v14038_v12 = vld [vmem:[#allocation7 + $0x1d98] sm:$0xf]  ;;  %v13527_v24 = vor.u32 %v16019_v19, %v13526_v23  ;;  %8050 = vmatpush.bf16.msrb.mxu3 %v13175_v30 }
 0x615   :  { %v16147_v61 = vld [vmem:[#allocation7 + $0x1db4] sm:$0xf0] }
 0x616   :  { %v13718_v37 = vld [vmem:[#allocation7 + $0x1b18] sm:$0xf]  ;;  %v14039_v59 = vor.u32 %v16147_v61, %v14038_v12  ;;  %8060 = vmatpush.bf16.msra.mxu0 %v13527_v24  ;;  %v7808_v12 = vpop.f32.mrf.mxu0  ;;  %v7797_v24 = vpop.f32.mrf.mxu3 }
 0x617   :  { %v16067_v26 = vld [vmem:[#allocation7 + $0x1b34] sm:$0xf0]  ;;  %v10488_v24 = vld [vmem:[#allocation7 + $0x1f8] sm:$0xf0] }
 0x618   :  { %v13142_v34 = vld [vmem:[#allocation7 + $0x1698] sm:$0xf]  ;;  %v13719_v53 = vor.u32 %v16067_v26, %v13718_v37  ;;  %8086 = vmatpush.bf16.msrb.mxu2 %v14039_v59  ;;  %v7809_v26 = vadd.f32 %v7808_v12, %v7796_v0 }
 0x619   :  { %v15923_v35 = vld [vmem:[#allocation7 + $0x16b4] sm:$0xf0] }
 0x61a   :  { %v13494_v25 = vld [vmem:[#allocation7 + $0x1958] sm:$0xf]  ;;  %v13143_v2 = vor.u32 %v15923_v35, %v13142_v34  ;;  %8075 = vmatpush.bf16.msrb.mxu1 %v13719_v53 }
 0x61b   :  { %v16011_v51 = vld [vmem:[#allocation7 + $0x1974] sm:$0xf0] }
 0x61c   :  { %v14006_v43 = vld [vmem:[#allocation7 + $0x1d58] sm:$0xf]  ;;  %v13495_v39 = vor.u32 %v16011_v51, %v13494_v25  ;;  %8051 = vmatpush.bf16.msrb.mxu3 %v13143_v2  ;;  %v7823_v25 = vpop.f32.mrf.mxu1  ;;  %v7822_v2 = vadd.f32 %v7821_v27, %v7809_v26  ;;  %v15255_v26 = vld [vmem:[#allocation7 + $0x1dc] sm:$0xf] }
 0x61d   :  { %v16139_v28 = vld [vmem:[#allocation7 + $0x1d74] sm:$0xf0] }
 0x61e   :  { %v13686_v62 = vld [vmem:[#allocation7 + $0x1ad8] sm:$0xf]  ;;  %v14007_v57 = vor.u32 %v16139_v28, %v14006_v43  ;;  %8061 = vmatpush.bf16.msra.mxu0 %v13495_v39 }
 0x61f   :  { %v16059_v48 = vld [vmem:[#allocation7 + $0x1af4] sm:$0xf0] }
 0x620   :  { %v13110_v55 = vld [vmem:[#allocation7 + $0x1658] sm:$0xf]  ;;  %v13687_v3 = vor.u32 %v16059_v48, %v13686_v62  ;;  %8087 = vmatpush.bf16.msrb.mxu2 %v14007_v57  ;;  %v15319_v57 = vld [vmem:[#allocation7 + $0x3dc] sm:$0xf] }
 0x621   :  { %v15915_v60 = vld [vmem:[#allocation7 + $0x1674] sm:$0xf0] }
 0x622   :  { %v13462_v46 = vld [vmem:[#allocation7 + $0x1918] sm:$0xf]  ;;  %v13111_v6 = vor.u32 %v15915_v60, %v13110_v55  ;;  %8076 = vmatpush.bf16.msrb.mxu1 %v13687_v3 }
 0x623   :  { %v16003_v36 = vld [vmem:[#allocation7 + $0x1934] sm:$0xf0] }
 0x624   :  { %v13974_v56 = vld [vmem:[#allocation7 + $0x1d18] sm:$0xf]  ;;  %v13463_v42 = vor.u32 %v16003_v36, %v13462_v46  ;;  %8052 = vmatpush.bf16.msrb.mxu3 %v13111_v6  ;;  %v10744_v46 = vld [vmem:[#allocation7 + $0x3f8] sm:$0xf0] }
 0x625   :  { %v16131_v21 = vld [vmem:[#allocation7 + $0x1d34] sm:$0xf0] }
 0x626   :  { %v13654_v41 = vld [vmem:[#allocation7 + $0x1a98] sm:$0xf]  ;;  %v13975_v38 = vor.u32 %v16131_v21, %v13974_v56  ;;  %8062 = vmatpush.bf16.msra.mxu0 %v13463_v42 }
 0x627   :  { %v16051_v7 = vld [vmem:[#allocation7 + $0x1ab4] sm:$0xf0] }
 0x628   :  { %v13078_v16 = vld [vmem:[#allocation7 + $0x1618] sm:$0xf]  ;;  %v13655_v23 = vor.u32 %v16051_v7, %v13654_v41  ;;  %8088 = vmatpush.bf16.msrb.mxu2 %v13975_v38  ;;  %v7834_v41 = vpop.f32.mrf.mxu2  ;;  %v15311_v38 = vld [vmem:[#allocation7 + $0x39c] sm:$0xf] }
 0x629   :  { %v15907_v33 = vld [vmem:[#allocation7 + $0x1634] sm:$0xf0] }
 0x62a   :  { %v13430_v45 = vld [vmem:[#allocation7 + $0x18d8] sm:$0xf]  ;;  %v13079_v61 = vor.u32 %v15907_v33, %v13078_v16  ;;  %8077 = vmatpush.bf16.msrb.mxu1 %v13655_v23  ;;  %v17078_v16 = vadd.f32 %v7834_v41, %v7822_v2  ;;  %v7810_v33 = vpop.f32.mrf.mxu0  ;;  %v10491_v2 = vor.u32 %v15255_v26, %v10488_v24  ;;  %v15231_v26 = vld [vmem:[#allocation7 + $0x11c] sm:$0xf] }
 0x62b   :  { %v15995_v5 = vld [vmem:[#allocation7 + $0x18f4] sm:$0xf0]  ;;  %v10392_v24 = vld [vmem:[#allocation7 + $0x138] sm:$0xf0] }
 0x62c   :  { %v14326_v11 = vld [vmem:[#allocation7 + $0x1fd8] sm:$0xf]  ;;  %v13431_v34 = vor.u32 %v15995_v5, %v13430_v45  ;;  %8053 = vmatpush.bf16.msrb.mxu3 %v13079_v61  ;;  %v10747_v45 = vor.u32 %v15319_v57, %v10744_v46  ;;  %v15375_v57 = vld [vmem:[#allocation7 + $0x59c] sm:$0xf] }
 0x62d   :  { %v16219_v17 = vld [vmem:[#allocation7 + $0x1ff4] sm:$0xf0]  ;;  %v10968_v46 = vld [vmem:[#allocation7 + $0x5b8] sm:$0xf0] }
 0x62e   :  { %v13942_v19 = vld [vmem:[#allocation7 + $0x1cd8] sm:$0xf]  ;;  %v14327_v35 = vor.u32 %v16219_v17, %v14326_v11  ;;  %8063 = vmatpush.bf16.msra.mxu0 %v13431_v34  ;;  %v10712_v17 = vld [vmem:[#allocation7 + $0x3b8] sm:$0xf0] }
 0x62f   :  { %v16123_v9 = vld [vmem:[#allocation7 + $0x1cf4] sm:$0xf0]  ;;  %8054 = vmatmul.bf16.vlgmr.msrb.gmra.mxu3 %v16888_v52  ;;  %v10715_v34 = vor.u32 %v15311_v38, %v10712_v17  ;;  %v10936_v38 = vld [vmem:[#allocation7 + $0x578] sm:$0xf0] }
 0x630   :  { %v13622_v30 = vld [vmem:[#allocation7 + $0x1a58] sm:$0xf]  ;;  %v13943_v51 = vor.u32 %v16123_v9, %v13942_v19  ;;  %8098 = vmatpush.bf16.msra.mxu3 %v14327_v35  ;;  %v15383_v35 = vld [vmem:[#allocation7 + $0x5dc] sm:$0xf] }
 0x631   :  { %v16043_v37 = vld [vmem:[#allocation7 + $0x1a74] sm:$0xf0]  ;;  %v10616_v17 = vld [vmem:[#allocation7 + $0x2f8] sm:$0xf0] }
 0x632   :  { %v13398_v59 = vld [vmem:[#allocation7 + $0x1898] sm:$0xf]  ;;  %v13623_v62 = vor.u32 %v16043_v37, %v13622_v30  ;;  %8089 = vmatpush.bf16.msrb.mxu2 %v13943_v51 }
 0x633   :  { %v15987_v53 = vld [vmem:[#allocation7 + $0x18b4] sm:$0xf0] }
 0x634   :  { %v14294_v43 = vld [vmem:[#allocation7 + $0x1f98] sm:$0xf]  ;;  %v13399_v60 = vor.u32 %v15987_v53, %v13398_v59  ;;  %8078 = vmatpush.bf16.msrb.mxu1 %v13623_v62  ;;  %v11000_v59 = vld [vmem:[#allocation7 + $0x5f8] sm:$0xf0] }
 0x635   :  { %v16211_v28 = vld [vmem:[#allocation7 + $0x1fb4] sm:$0xf0]  ;;  %v15303_v53 = vld [vmem:[#allocation7 + $0x35c] sm:$0xf] }
 0x636   :  { %v13910_v48 = vld [vmem:[#allocation7 + $0x1c98] sm:$0xf]  ;;  %v14295_v0 = vor.u32 %v16211_v28, %v14294_v43  ;;  %8064 = vmatpush.bf16.msra.mxu0 %v13399_v60  ;;  %v10680_v43 = vld [vmem:[#allocation7 + $0x378] sm:$0xf0] }
 0x637   :  { %v16115_v50 = vld [vmem:[#allocation7 + $0x1cb4] sm:$0xf0]  ;;  %v10456_v60 = vld [vmem:[#allocation7 + $0x1b8] sm:$0xf0] }
 0x638   :  { %v13590_v39 = vld [vmem:[#allocation7 + $0x1a18] sm:$0xf]  ;;  %v13911_v3 = vor.u32 %v16115_v50, %v13910_v48  ;;  %8099 = vmatpush.bf16.msra.mxu3 %v14295_v0  ;;  %v7836_v50 = vpop.f32.mrf.mxu2  ;;  %v10683_v0 = vor.u32 %v15303_v53, %v10680_v43  ;;  %v10584_v53 = vld [vmem:[#allocation7 + $0x2b8] sm:$0xf0]  ;;  %v10395_v43 = vor.u32 %v15231_v26, %v10392_v24 }
 0x639   :  { %v16035_v55 = vld [vmem:[#allocation7 + $0x1a34] sm:$0xf0]  ;;  %v15447_v50 = vld [vmem:[#allocation7 + $0x7dc] sm:$0xf] }
 0x63a   :  { %v13366_v36 = vld [vmem:[#allocation7 + $0x1858] sm:$0xf]  ;;  %v13591_v27 = vor.u32 %v16035_v55, %v13590_v39  ;;  %8090 = vmatpush.bf16.msrb.mxu2 %v13911_v3  ;;  %v11003_v39 = vor.u32 %v15383_v35, %v11000_v59  ;;  %v15247_v55 = vld [vmem:[#allocation7 + $0x19c] sm:$0xf] }
 0x63b   :  { %v15979_v56 = vld [vmem:[#allocation7 + $0x1874] sm:$0xf0]  ;;  %v15295_v3 = vld [vmem:[#allocation7 + $0x31c] sm:$0xf] }
 0x63c   :  { %v14262_v21 = vld [vmem:[#allocation7 + $0x1f58] sm:$0xf]  ;;  %v13367_v5 = vor.u32 %v15979_v56, %v13366_v36  ;;  %8079 = vmatpush.bf16.msrb.mxu1 %v13591_v27  ;;  %v10648_v56 = vld [vmem:[#allocation7 + $0x338] sm:$0xf0]  ;;  %v10971_v27 = vor.u32 %v15375_v57, %v10968_v46  ;;  %v7860_v57 = vpop.f32.mrf.mxu0 }
 0x63d   :  { %v16203_v6 = vld [vmem:[#allocation7 + $0x1f74] sm:$0xf0]  ;;  %v10651_v33 = vor.u32 %v15295_v3, %v10648_v56  ;;  %v15359_v35 = vld [vmem:[#allocation7 + $0x51c] sm:$0xf] }
 0x63e   :  { %v13878_v7 = vld [vmem:[#allocation7 + $0x1c58] sm:$0xf]  ;;  %v14263_v11 = vor.u32 %v16203_v6, %v14262_v21  ;;  %8065 = vmatpush.bf16.msra.mxu0 %v13367_v5  ;;  %v10459_v21 = vor.u32 %v15247_v55, %v10456_v60  ;;  %v10904_v59 = vld [vmem:[#allocation7 + $0x538] sm:$0xf0] }
 0x63f   :  { %v16107_v42 = vld [vmem:[#allocation7 + $0x1c74] sm:$0xf0]  ;;  %8080 = vmatmul.bf16.vlgmr.msrb.gmra.mxu1 %v16893_v20  ;;  %v15351_v60 = vld [vmem:[#allocation7 + $0x4dc] sm:$0xf] }
 0x640   :  { %v13334_v23 = vld [vmem:[#allocation7 + $0x1818] sm:$0xf]  ;;  %v13879_v9 = vor.u32 %v16107_v42, %v13878_v7  ;;  %8124 = vmatpush.bf16.msra.mxu1 %v10747_v45  ;;  %8100 = vmatpush.bf16.msra.mxu3 %v14263_v11  ;;  %v15239_v7 = vld [vmem:[#allocation7 + $0x15c] sm:$0xf] }
 0x641   :  { %v15971_v19 = vld [vmem:[#allocation7 + $0x1834] sm:$0xf0]  ;;  %v10424_v42 = vld [vmem:[#allocation7 + $0x178] sm:$0xf0] }
 0x642   :  { %v13846_v12 = vld [vmem:[#allocation7 + $0x1c18] sm:$0xf]  ;;  %v13335_v25 = vor.u32 %v15971_v19, %v13334_v23  ;;  %8091 = vmatpush.bf16.msrb.mxu2 %v13879_v9  ;;  %v15367_v45 = vld [vmem:[#allocation7 + $0x55c] sm:$0xf]  ;;  %v7847_v23 = vpop.f32.mrf.mxu3  ;;  %v10427_v19 = vor.u32 %v15239_v7, %v10424_v42 }
 0x643   :  { %v14230_v61 = vld [vmem:[#allocation7 + $0x1f18] sm:$0xf]  ;;  %v15287_v11 = vld [vmem:[#allocation7 + $0x2dc] sm:$0xf] }
 0x644   :  { %v16195_v30 = vld [vmem:[#allocation7 + $0x1f34] sm:$0xf0]  ;;  %8125 = vmatpush.bf16.msra.mxu1 %v10715_v34  ;;  %8066 = vmatpush.bf16.msra.mxu0 %v13335_v25  ;;  %v10619_v34 = vor.u32 %v15287_v11, %v10616_v17  ;;  %v10552_v3 = vld [vmem:[#allocation7 + $0x278] sm:$0xf0] }
 0x645   :  { %v16099_v37 = vld [vmem:[#allocation7 + $0x1c34] sm:$0xf0]  ;;  %v14231_v51 = vor.u32 %v16195_v30, %v14230_v61  ;;  %v7848_v61 = vadd.f32 %v7847_v23, %v17078_v16  ;;  %v7873_v30 = vpop.f32.mrf.mxu1  ;;  %v10907_v16 = vor.u32 %v15359_v35, %v10904_v59  ;;  %v15343_v17 = vld [vmem:[#allocation7 + $0x49c] sm:$0xf] }
 0x646   :  { %v13847_v28 = vor.u32 %v16099_v37, %v13846_v12  ;;  %v14198_v62 = vld [vmem:[#allocation7 + $0x1ed8] sm:$0xf]  ;;  %v10939_v37 = vor.u32 %v15367_v45, %v10936_v38  ;;  %v15439_v45 = vld [vmem:[#allocation7 + $0x79c] sm:$0xf] }
 0x647   :  { %v16187_v48 = vld [vmem:[#allocation7 + $0x1ef4] sm:$0xf0]  ;;  %8101 = vmatpush.bf16.msra.mxu3 %v14231_v51  ;;  %8067 = vmatmul.bf16.vlgmr.msra.gmra.mxu0 %v16896_v47  ;;  %v15279_v51 = vld [vmem:[#allocation7 + $0x29c] sm:$0xf]  ;;  %v7861_v56 = vadd.f32 %v7860_v57, %v7848_v61 }
 0x648   :  { %v14199_v36 = vor.u32 %v16187_v48, %v14198_v62  ;;  %8092 = vmatpush.bf16.msrb.mxu2 %v13847_v28  ;;  %8111 = vmatpush.bf16.msrb.mxu0 %v10491_v2  ;;  %v14166_v6 = vld [vmem:[#allocation7 + $0x1e98] sm:$0xf]  ;;  %v15223_v62 = vld [vmem:[#allocation7 + $0xdc] sm:$0xf]  ;;  %v10587_v55 = vor.u32 %v15279_v51, %v10584_v53  ;;  %v7886_v51 = vpop.f32.mrf.mxu2 }
 0x649   :  { %v16179_v41 = vld [vmem:[#allocation7 + $0x1eb4] sm:$0xf0]  ;;  %8126 = vmatpush.bf16.msra.mxu1 %v10683_v0  ;;  %v10360_v48 = vld [vmem:[#allocation7 + $0xf8] sm:$0xf0] }
 0x64a   :  { %v14167_v5 = vor.u32 %v16179_v41, %v14166_v6  ;;  %v14134_v9 = vld [vmem:[#allocation7 + $0x1e58] sm:$0xf]  ;;  %v10872_v0 = vld [vmem:[#allocation7 + $0x4f8] sm:$0xf0]  ;;  %v10363_v6 = vor.u32 %v15223_v62, %v10360_v48 }
 0x64b   :  { %8093 = vmatmul.bf16.vlgmr.msrb.gmra.mxu2 %v16898_v54  ;;  %8102 = vmatpush.bf16.msra.mxu3 %v14199_v36  ;;  %v16171_v12 = vld [vmem:[#allocation7 + $0x1e74] sm:$0xf0]  ;;  %v15271_v36 = vld [vmem:[#allocation7 + $0x25c] sm:$0xf]  ;;  %v10875_v42 = vor.u32 %v15351_v60, %v10872_v0 }
 0x64c   :  { %8137 = vmatpush.bf16.msra.mxu2 %v11003_v39  ;;  %8112 = vmatpush.bf16.msrb.mxu0 %v10459_v21  ;;  %v14135_v25 = vor.u32 %v16171_v12, %v14134_v9  ;;  %v14102_v28 = vld [vmem:[#allocation7 + $0x1e18] sm:$0xf]  ;;  %v11256_v39 = vld [vmem:[#allocation7 + $0x7f8] sm:$0xf0]  ;;  %v7849_v21 = vpop.f32.mrf.mxu3  ;;  %v10555_v11 = vor.u32 %v15271_v36, %v10552_v3 }
 0x64d   :  { %8127 = vmatpush.bf16.msra.mxu1 %v10651_v33  ;;  %v16163_v2 = vld [vmem:[#allocation7 + $0x1e34] sm:$0xf0]  ;;  %v11259_v41 = vor.u32 %v15447_v50, %v11256_v39  ;;  %v7875_v7 = vpop.f32.mrf.mxu1  ;;  %v10328_v33 = vld [vmem:[#allocation7 + $0xb8] sm:$0xf0] }
 0x64e   :  { %v14103_v46 = vor.u32 %v16163_v2, %v14102_v28  ;;  %v11224_v38 = vld [vmem:[#allocation7 + $0x7b8] sm:$0xf0]  ;;  %v7862_v2 = vpop.f32.mrf.mxu0 }
 0x64f   :  { %8103 = vmatpush.bf16.msra.mxu3 %v14167_v5  ;;  %v7874_v5 = vadd.f32 %v7873_v30, %v7861_v56  ;;  %v10840_v23 = vld [vmem:[#allocation7 + $0x4b8] sm:$0xf0]  ;;  %v11227_v61 = vor.u32 %v15439_v45, %v11224_v38 }
 0x650   :  { %8138 = vmatpush.bf16.msra.mxu2 %v10971_v27  ;;  %8113 = vmatpush.bf16.msrb.mxu0 %v10427_v19  ;;  %v15215_v27 = vld [vmem:[#allocation7 + $0x9c] sm:$0xf] }
 0x651   :  { %8128 = vmatpush.bf16.msra.mxu1 %v10619_v34  ;;  %v15263_v19 = vld [vmem:[#allocation7 + $0x21c] sm:$0xf]  ;;  %v10331_v12 = vor.u32 %v15215_v27, %v10328_v33  ;;  %v10843_v34 = vor.u32 %v15343_v17, %v10840_v23  ;;  %v17085_v28 = vadd.f32 %v7886_v51, %v7874_v5  ;;  %v7888_v23 = vpop.f32.mrf.mxu2 }
 0x652   :  { %v10520_v9 = vld [vmem:[#allocation7 + $0x238] sm:$0xf0] }
 0x653   :  { %8104 = vmatpush.bf16.msra.mxu3 %v14135_v25  ;;  %v11768_v26 = vld [vmem:[#allocation7 + $0xbf8] sm:$0xf0]  ;;  %v10523_v30 = vor.u32 %v15263_v19, %v10520_v9 }
 0x654   :  { %8139 = vmatpush.bf16.msra.mxu2 %v10939_v37  ;;  %8114 = vmatpush.bf16.msrb.mxu0 %v10395_v43  ;;  %v15575_v37 = vld [vmem:[#allocation7 + $0xbdc] sm:$0xf] }
 0x655   :  { %8129 = vmatpush.bf16.msra.mxu1 %v10587_v55  ;;  %v15207_v24 = vld [vmem:[#allocation7 + $0x5c] sm:$0xf]  ;;  %v11771_v62 = vor.u32 %v15575_v37, %v11768_v26 }
 0x656   :  { %v10296_v35 = vld [vmem:[#allocation7 + $0x78] sm:$0xf0] }
 0x657   :  { %8105 = vmatpush.bf16.msra.mxu3 %v14103_v46  ;;  %v15431_v59 = vld [vmem:[#allocation7 + $0x75c] sm:$0xf]  ;;  %v10299_v48 = vor.u32 %v15207_v24, %v10296_v35 }
 0x658   :  { %8140 = vmatpush.bf16.msra.mxu2 %v10907_v16  ;;  %8115 = vmatpush.bf16.msrb.mxu0 %v10363_v6  ;;  %v11192_v25 = vld [vmem:[#allocation7 + $0x778] sm:$0xf0] }
 0x659   :  { %8130 = vmatpush.bf16.msra.mxu1 %v10555_v11  ;;  %v15335_v53 = vld [vmem:[#allocation7 + $0x45c] sm:$0xf]  ;;  %v11195_v50 = vor.u32 %v15431_v59, %v11192_v25 }
 0x65a   :  { %8106 = vmatmul.bf16.vlgmr.msra.gmra.mxu3 %v16903_v58  ;;  %v10808_v43 = vld [vmem:[#allocation7 + $0x478] sm:$0xf0] }
 0x65b   :  { %8150 = vmatpush.bf16.msrb.mxu3 %v11259_v41  ;;  %v15567_v16 = vld [vmem:[#allocation7 + $0xb9c] sm:$0xf]  ;;  %v10811_v0 = vor.u32 %v15335_v53, %v10808_v43 }
 0x65c   :  { %8141 = vmatpush.bf16.msra.mxu2 %v10875_v42  ;;  %8116 = vmatpush.bf16.msrb.mxu0 %v10331_v12  ;;  %v11736_v39 = vld [vmem:[#allocation7 + $0xbb8] sm:$0xf0] }
 0x65d   :  { %v15199_v55 = vld [vmem:[#allocation7 + $0x1c] sm:$0xf]  ;;  %8131 = vmatpush.bf16.msra.mxu1 %v10523_v30  ;;  %v11739_v6 = vor.u32 %v15567_v16, %v11736_v39  ;;  %v7899_v39 = vpop.f32.mrf.mxu3 }
 0x65e   :  { %v10264_v60 = vld [vmem:[#allocation7 + $0x38] sm:$0xf0] }
 0x65f   :  { %8151 = vmatpush.bf16.msrb.mxu3 %v11227_v61  ;;  %v15327_v57 = vld [vmem:[#allocation7 + $0x41c] sm:$0xf]  ;;  %v10267_v7 = vor.u32 %v15199_v55, %v10264_v60 }
 0x660   :  { %8142 = vmatpush.bf16.msra.mxu2 %v10843_v34  ;;  %v15423_v46 = vld [vmem:[#allocation7 + $0x71c] sm:$0xf]  ;;  %8117 = vmatpush.bf16.msrb.mxu0 %v10299_v48 }
 0x661   :  { %v11160_v36 = vld [vmem:[#allocation7 + $0x738] sm:$0xf0]  ;;  %8176 = vmatpush.bf16.msrb.mxu1 %v11771_v62 }
 0x662   :  { %v10776_v3 = vld [vmem:[#allocation7 + $0x438] sm:$0xf0]  ;;  %v11163_v42 = vor.u32 %v15423_v46, %v11160_v36  ;;  %8132 = vmatmul.bf16.vlgmr.msra.gmra.mxu1 %v16837_v49 }
 0x663   :  { %v15511_v56 = vld [vmem:[#allocation7 + $0x9dc] sm:$0xf]  ;;  %8152 = vmatpush.bf16.msrb.mxu3 %v11195_v50  ;;  %v10779_v38 = vor.u32 %v15327_v57, %v10776_v3  ;;  %v17091_v57 = vadd.f32 %v7899_v39, %v17085_v28 }
 0x664   :  { %v11512_v21 = vld [vmem:[#allocation7 + $0x9f8] sm:$0xf0]  ;;  %8143 = vmatpush.bf16.msra.mxu2 %v10811_v0  ;;  %8118 = vmatpush.bf16.msrb.mxu0 %v10267_v7 }
 0x665   :  { %v15639_v41 = vld [vmem:[#allocation7 + $0xddc] sm:$0xf]  ;;  %v11515_v5 = vor.u32 %v15511_v56, %v11512_v21  ;;  %8177 = vmatpush.bf16.msrb.mxu1 %v11739_v6  ;;  %v16460_v6 = vld [vmem:[#allocation8] sm:$0xff] }
 0x666   :  { %v12024_v27 = vld [vmem:[#allocation7 + $0xdf8] sm:$0xf0] }
 0x667   :  { %v15559_v33 = vld [vmem:[#allocation7 + $0xb5c] sm:$0xf]  ;;  %v12027_v19 = vor.u32 %v15639_v41, %v12024_v27  ;;  %8153 = vmatpush.bf16.msrb.mxu3 %v11163_v42  ;;  %8119 = vmatmul.bf16.vlgmr.msrb.gmra.mxu0 %v16840_v4  ;;  %v7925_v4 = vpop.f32.mrf.mxu1  ;;  %v1525_v41 = vperm.slane %v16460_v6, 6 }
 0x668   :  { %v11704_v45 = vld [vmem:[#allocation7 + $0xb78] sm:$0xf0]  ;;  %8144 = vmatpush.bf16.msra.mxu2 %v10779_v38  ;;  %8163 = vmatpush.bf16.msra.mxu0 %v11515_v5 }
 0x669   :  { %v15415_v11 = vld [vmem:[#allocation7 + $0x6dc] sm:$0xf]  ;;  %v11707_v61 = vor.u32 %v15559_v33, %v11704_v45 }
 0x66a   :  { %v11128_v17 = vld [vmem:[#allocation7 + $0x6f8] sm:$0xf0] }
 0x66b   :  { %v15503_v9 = vld [vmem:[#allocation7 + $0x99c] sm:$0xf]  ;;  %v11131_v24 = vor.u32 %v15415_v11, %v11128_v17  ;;  %8178 = vmatpush.bf16.msrb.mxu1 %v11707_v61  ;;  %8145 = vmatmul.bf16.vlgmr.msra.gmra.mxu2 %v16842_v8  ;;  %v7912_v61 = vpop.f32.mrf.mxu0 }
 0x66c   :  { %v11480_v12 = vld [vmem:[#allocation7 + $0x9b8] sm:$0xf0]  ;;  %8189 = vmatpush.bf16.msrb.mxu2 %v12027_v19 }
 0x66d   :  { %v15631_v37 = vld [vmem:[#allocation7 + $0xd9c] sm:$0xf]  ;;  %v11483_v49 = vor.u32 %v15503_v9, %v11480_v12  ;;  %8154 = vmatpush.bf16.msrb.mxu3 %v11131_v24 }
 0x66e   :  { %v11992_v26 = vld [vmem:[#allocation7 + $0xdb8] sm:$0xf0] }
 0x66f   :  { %v15551_v34 = vld [vmem:[#allocation7 + $0xb1c] sm:$0xf]  ;;  %v11995_v51 = vor.u32 %v15631_v37, %v11992_v26  ;;  %8164 = vmatpush.bf16.msra.mxu0 %v11483_v49 }
 0x670   :  { %v11672_v35 = vld [vmem:[#allocation7 + $0xb38] sm:$0xf0] }
 0x671   :  { %v15407_v59 = vld [vmem:[#allocation7 + $0x69c] sm:$0xf]  ;;  %v11675_v43 = vor.u32 %v15551_v34, %v11672_v35  ;;  %8190 = vmatpush.bf16.msrb.mxu2 %v11995_v51  ;;  %v7913_v34 = vadd.f32 %v7912_v61, %v1525_v41  ;;  %v7901_v35 = vpop.f32.mrf.mxu3  ;;  %v7927_v51 = vpop.f32.mrf.mxu1 }
 0x672   :  { %v11096_v25 = vld [vmem:[#allocation7 + $0x6b8] sm:$0xf0]  ;;  %v7938_v41 = vpop.f32.mrf.mxu2 }
 0x673   :  { %v15495_v30 = vld [vmem:[#allocation7 + $0x95c] sm:$0xf]  ;;  %v11099_v16 = vor.u32 %v15407_v59, %v11096_v25  ;;  %8179 = vmatpush.bf16.msrb.mxu1 %v11675_v43 }
 0x674   :  { %v11448_v53 = vld [vmem:[#allocation7 + $0x978] sm:$0xf0] }
 0x675   :  { %v15623_v2 = vld [vmem:[#allocation7 + $0xd5c] sm:$0xf]  ;;  %v11451_v55 = vor.u32 %v15495_v30, %v11448_v53  ;;  %8155 = vmatpush.bf16.msrb.mxu3 %v11099_v16 }
 0x676   :  { %v11960_v62 = vld [vmem:[#allocation7 + $0xd78] sm:$0xf0] }
 0x677   :  { %v15543_v48 = vld [vmem:[#allocation7 + $0xadc] sm:$0xf]  ;;  %v11963_v46 = vor.u32 %v15623_v2, %v11960_v62  ;;  %8165 = vmatpush.bf16.msra.mxu0 %v11451_v55  ;;  %v7926_v62 = vadd.f32 %v7925_v4, %v7913_v34 }
 0x678   :  { %v11640_v50 = vld [vmem:[#allocation7 + $0xaf8] sm:$0xf0] }
 0x679   :  { %v15399_v60 = vld [vmem:[#allocation7 + $0x65c] sm:$0xf]  ;;  %v11643_v56 = vor.u32 %v15543_v48, %v11640_v50  ;;  %8191 = vmatpush.bf16.msrb.mxu2 %v11963_v46 }
 0x67a   :  { %v11064_v0 = vld [vmem:[#allocation7 + $0x678] sm:$0xf0] }
 0x67b   :  { %v15487_v36 = vld [vmem:[#allocation7 + $0x91c] sm:$0xf]  ;;  %v11067_v27 = vor.u32 %v15399_v60, %v11064_v0  ;;  %8180 = vmatpush.bf16.msrb.mxu1 %v11643_v56 }
 0x67c   :  { %v11416_v3 = vld [vmem:[#allocation7 + $0x938] sm:$0xf0] }
 0x67d   :  { %v15615_v8 = vld [vmem:[#allocation7 + $0xd1c] sm:$0xf]  ;;  %v11419_v33 = vor.u32 %v15487_v36, %v11416_v3  ;;  %8156 = vmatpush.bf16.msrb.mxu3 %v11067_v27 }
 0x67e   :  { %v11928_v21 = vld [vmem:[#allocation7 + $0xd38] sm:$0xf0] }
 0x67f   :  { %v15535_v7 = vld [vmem:[#allocation7 + $0xa9c] sm:$0xf]  ;;  %v11931_v5 = vor.u32 %v15615_v8, %v11928_v21  ;;  %8166 = vmatpush.bf16.msra.mxu0 %v11419_v33  ;;  %v7914_v33 = vpop.f32.mrf.mxu0 }
 0x680   :  { %v11608_v42 = vld [vmem:[#allocation7 + $0xab8] sm:$0xf0] }
 0x681   :  { %v15391_v45 = vld [vmem:[#allocation7 + $0x61c] sm:$0xf]  ;;  %v11611_v19 = vor.u32 %v15535_v7, %v11608_v42  ;;  %8192 = vmatpush.bf16.msrb.mxu2 %v11931_v5  ;;  %v17094_v42 = vadd.f32 %v7938_v41, %v7926_v62  ;;  %v7940_v62 = vpop.f32.mrf.mxu2 }
 0x682   :  { %v11032_v28 = vld [vmem:[#allocation7 + $0x638] sm:$0xf0] }
 0x683   :  { %v15479_v38 = vld [vmem:[#allocation7 + $0x8dc] sm:$0xf]  ;;  %v11035_v37 = vor.u32 %v15391_v45, %v11032_v28  ;;  %8181 = vmatpush.bf16.msrb.mxu1 %v11611_v19 }
 0x684   :  { %v11384_v11 = vld [vmem:[#allocation7 + $0x8f8] sm:$0xf0] }
 0x685   :  { %v15703_v17 = vld [vmem:[#allocation7 + $0xfdc] sm:$0xf]  ;;  %v11387_v49 = vor.u32 %v15479_v38, %v11384_v11  ;;  %8157 = vmatpush.bf16.msrb.mxu3 %v11035_v37 }
 0x686   :  { %v12280_v23 = vld [vmem:[#allocation7 + $0xff8] sm:$0xf0] }
 0x687   :  { %v15607_v9 = vld [vmem:[#allocation7 + $0xcdc] sm:$0xf]  ;;  %v12283_v59 = vor.u32 %v15703_v17, %v12280_v23  ;;  %8167 = vmatpush.bf16.msra.mxu0 %v11387_v49 }
 0x688   :  { %v11896_v12 = vld [vmem:[#allocation7 + $0xcf8] sm:$0xf0]  ;;  %8158 = vmatmul.bf16.vlgmr.msrb.gmra.mxu3 %v16857_v10 }
 0x689   :  { %v15527_v26 = vld [vmem:[#allocation7 + $0xa5c] sm:$0xf]  ;;  %v11899_v30 = vor.u32 %v15607_v9, %v11896_v12  ;;  %8202 = vmatpush.bf16.msra.mxu3 %v12283_v59 }
 0x68a   :  { %v11576_v24 = vld [vmem:[#allocation7 + $0xa78] sm:$0xf0] }
 0x68b   :  { %v15471_v25 = vld [vmem:[#allocation7 + $0x89c] sm:$0xf]  ;;  %v11579_v16 = vor.u32 %v15527_v26, %v11576_v24  ;;  %8193 = vmatpush.bf16.msrb.mxu2 %v11899_v30 }
 0x68c   :  { %v11352_v53 = vld [vmem:[#allocation7 + $0x8b8] sm:$0xf0] }
 0x68d   :  { %v15695_v43 = vld [vmem:[#allocation7 + $0xf9c] sm:$0xf]  ;;  %v11355_v60 = vor.u32 %v15471_v25, %v11352_v53  ;;  %8182 = vmatpush.bf16.msrb.mxu1 %v11579_v16 }
 0x68e   :  { %v12248_v2 = vld [vmem:[#allocation7 + $0xfb8] sm:$0xf0] }
 0x68f   :  { %v15599_v48 = vld [vmem:[#allocation7 + $0xc9c] sm:$0xf]  ;;  %v12251_v0 = vor.u32 %v15695_v43, %v12248_v2  ;;  %8168 = vmatpush.bf16.msra.mxu0 %v11355_v60 }
 0x690   :  { %v11864_v50 = vld [vmem:[#allocation7 + $0xcb8] sm:$0xf0] }
 0x691   :  { %v15519_v39 = vld [vmem:[#allocation7 + $0xa1c] sm:$0xf]  ;;  %v11867_v56 = vor.u32 %v15599_v48, %v11864_v50  ;;  %8203 = vmatpush.bf16.msra.mxu3 %v12251_v0 }
 0x692   :  { %v11544_v55 = vld [vmem:[#allocation7 + $0xa38] sm:$0xf0] }
 0x693   :  { %v15831_v46 = vld [vmem:[#allocation7 + $0x13dc] sm:$0xf]  ;;  %v11547_v4 = vor.u32 %v15519_v39, %v11544_v55  ;;  %8194 = vmatpush.bf16.msrb.mxu2 %v11867_v56 }
 0x694   :  { %v12792_v36 = vld [vmem:[#allocation7 + $0x13f8] sm:$0xf0] }
 0x695   :  { %v15463_v3 = vld [vmem:[#allocation7 + $0x85c] sm:$0xf]  ;;  %v12795_v45 = vor.u32 %v15831_v46, %v12792_v36  ;;  %8183 = vmatpush.bf16.msrb.mxu1 %v11547_v4 }
 0x696   :  { %v11320_v8 = vld [vmem:[#allocation7 + $0x878] sm:$0xf0] }
 0x697   :  { %v15687_v21 = vld [vmem:[#allocation7 + $0xf5c] sm:$0xf]  ;;  %v11323_v38 = vor.u32 %v15463_v3, %v11320_v8 }
 0x698   :  { %v12216_v6 = vld [vmem:[#allocation7 + $0xf78] sm:$0xf0]  ;;  %8184 = vmatmul.bf16.vlgmr.msrb.gmra.mxu1 %v16850_v44 }
 0x699   :  { %v15591_v27 = vld [vmem:[#allocation7 + $0xc5c] sm:$0xf]  ;;  %v12219_v5 = vor.u32 %v15687_v21, %v12216_v6  ;;  %8228 = vmatpush.bf16.msra.mxu1 %v12795_v45  ;;  %8169 = vmatpush.bf16.msra.mxu0 %v11323_v38 }
 0x69a   :  { %v11832_v7 = vld [vmem:[#allocation7 + $0xc78] sm:$0xf0] }
 0x69b   :  { %v15823_v28 = vld [vmem:[#allocation7 + $0x139c] sm:$0xf]  ;;  %v11835_v19 = vor.u32 %v15591_v27, %v11832_v7  ;;  %8204 = vmatpush.bf16.msra.mxu3 %v12219_v5 }
 0x69c   :  { %v12760_v11 = vld [vmem:[#allocation7 + $0x13b8] sm:$0xf0] }
 0x69d   :  { %v15455_v17 = vld [vmem:[#allocation7 + $0x81c] sm:$0xf]  ;;  %v12763_v24 = vor.u32 %v15823_v28, %v12760_v11  ;;  %8195 = vmatpush.bf16.msrb.mxu2 %v11835_v19  ;;  %v7951_v28 = vpop.f32.mrf.mxu3 }
 0x69e   :  { %v11288_v23 = vld [vmem:[#allocation7 + $0x838] sm:$0xf0] }
 0x69f   :  { %v15583_v9 = vld [vmem:[#allocation7 + $0xc1c] sm:$0xf]  ;;  %v11291_v49 = vor.u32 %v15455_v17, %v11288_v23  ;;  %8229 = vmatpush.bf16.msra.mxu1 %v12763_v24  ;;  %v7952_v17 = vadd.f32 %v7951_v28, %v17094_v42  ;;  %v7977_v23 = vpop.f32.mrf.mxu1 }
 0x6a0   :  { %v15679_v10 = vld [vmem:[#allocation7 + $0xf1c] sm:$0xf] }
 0x6a1   :  { %v12184_v12 = vld [vmem:[#allocation7 + $0xf38] sm:$0xf0]  ;;  %8170 = vmatpush.bf16.msra.mxu0 %v11291_v49 }
 0x6a2   :  { %v11800_v61 = vld [vmem:[#allocation7 + $0xc38] sm:$0xf0]  ;;  %v12187_v59 = vor.u32 %v15679_v10, %v12184_v12 }
 0x6a3   :  { %v15767_v37 = vld [vmem:[#allocation7 + $0x11dc] sm:$0xf]  ;;  %v11803_v30 = vor.u32 %v15583_v9, %v11800_v61 }
 0x6a4   :  { %v12536_v26 = vld [vmem:[#allocation7 + $0x11f8] sm:$0xf0]  ;;  %8205 = vmatpush.bf16.msra.mxu3 %v12187_v59  ;;  %8171 = vmatmul.bf16.vlgmr.msra.gmra.mxu0 %v16855_v63 }
 0x6a5   :  { %v15895_v34 = vld [vmem:[#allocation7 + $0x15dc] sm:$0xf]  ;;  %v12539_v53 = vor.u32 %v15767_v37, %v12536_v26  ;;  %8196 = vmatpush.bf16.msrb.mxu2 %v11803_v30 }
 0x6a6   :  { %v13048_v35 = vld [vmem:[#allocation7 + $0x15f8] sm:$0xf0] }
 0x6a7   :  { %v15815_v25 = vld [vmem:[#allocation7 + $0x135c] sm:$0xf]  ;;  %v13051_v16 = vor.u32 %v15895_v34, %v13048_v35  ;;  %8215 = vmatpush.bf16.msrb.mxu0 %v12539_v53 }
 0x6a8   :  { %v12728_v51 = vld [vmem:[#allocation7 + $0x1378] sm:$0xf0]  ;;  %8197 = vmatmul.bf16.vlgmr.msrb.gmra.mxu2 %v16859_v15 }
 0x6a9   :  { %v15671_v43 = vld [vmem:[#allocation7 + $0xedc] sm:$0xf]  ;;  %v12731_v39 = vor.u32 %v15815_v25, %v12728_v51  ;;  %8241 = vmatpush.bf16.msra.mxu2 %v13051_v16 }
 0x6aa   :  { %v12152_v2 = vld [vmem:[#allocation7 + $0xef8] sm:$0xf0] }
 0x6ab   :  { %v15759_v48 = vld [vmem:[#allocation7 + $0x119c] sm:$0xf]  ;;  %v12155_v0 = vor.u32 %v15671_v43, %v12152_v2  ;;  %8230 = vmatpush.bf16.msra.mxu1 %v12731_v39  ;;  %v7964_v2 = vpop.f32.mrf.mxu0  ;;  %v7953_v39 = vpop.f32.mrf.mxu3 }
 0x6ac   :  { %v12504_v50 = vld [vmem:[#allocation7 + $0x11b8] sm:$0xf0] }
 0x6ad   :  { %v15887_v55 = vld [vmem:[#allocation7 + $0x159c] sm:$0xf]  ;;  %v12507_v44 = vor.u32 %v15759_v48, %v12504_v50  ;;  %8206 = vmatpush.bf16.msra.mxu3 %v12155_v0  ;;  %v7965_v50 = vadd.f32 %v7964_v2, %v7952_v17 }
 0x6ae   :  { %v13016_v60 = vld [vmem:[#allocation7 + $0x15b8] sm:$0xf0] }
 0x6af   :  { %v15807_v46 = vld [vmem:[#allocation7 + $0x131c] sm:$0xf]  ;;  %v13019_v8 = vor.u32 %v15887_v55, %v13016_v60  ;;  %8216 = vmatpush.bf16.msrb.mxu0 %v12507_v44 }
 0x6b0   :  { %v12696_v36 = vld [vmem:[#allocation7 + $0x1338] sm:$0xf0] }
 0x6b1   :  { %v15663_v3 = vld [vmem:[#allocation7 + $0xe9c] sm:$0xf]  ;;  %v12699_v41 = vor.u32 %v15807_v46, %v12696_v36  ;;  %8242 = vmatpush.bf16.msra.mxu2 %v13019_v8  ;;  %v7979_v46 = vpop.f32.mrf.mxu1  ;;  %v7978_v8 = vadd.f32 %v7977_v23, %v7965_v50 }
 0x6b2   :  { %v12120_v56 = vld [vmem:[#allocation7 + $0xeb8] sm:$0xf0] }
 0x6b3   :  { %v15751_v21 = vld [vmem:[#allocation7 + $0x115c] sm:$0xf]  ;;  %v12123_v7 = vor.u32 %v15663_v3, %v12120_v56  ;;  %8231 = vmatpush.bf16.msra.mxu1 %v12699_v41 }
 0x6b4   :  { %v12472_v6 = vld [vmem:[#allocation7 + $0x1178] sm:$0xf0] }
 0x6b5   :  { %v15879_v4 = vld [vmem:[#allocation7 + $0x155c] sm:$0xf]  ;;  %v12475_v38 = vor.u32 %v15751_v21, %v12472_v6  ;;  %8207 = vmatpush.bf16.msra.mxu3 %v12123_v7 }
 0x6b6   :  { %v12984_v27 = vld [vmem:[#allocation7 + $0x1578] sm:$0xf0] }
 0x6b7   :  { %v15799_v33 = vld [vmem:[#allocation7 + $0x12dc] sm:$0xf]  ;;  %v12987_v63 = vor.u32 %v15879_v4, %v12984_v27  ;;  %8217 = vmatpush.bf16.msrb.mxu0 %v12475_v38 }
 0x6b8   :  { %v12664_v45 = vld [vmem:[#allocation7 + $0x12f8] sm:$0xf0] }
 0x6b9   :  { %v15655_v5 = vld [vmem:[#allocation7 + $0xe5c] sm:$0xf]  ;;  %v12667_v10 = vor.u32 %v15799_v33, %v12664_v45  ;;  %8243 = vmatpush.bf16.msra.mxu2 %v12987_v63 }
 0x6ba   :  { %v12088_v11 = vld [vmem:[#allocation7 + $0xe78] sm:$0xf0] }
 0x6bb   :  { %v15743_v19 = vld [vmem:[#allocation7 + $0x111c] sm:$0xf]  ;;  %v12091_v61 = vor.u32 %v15655_v5, %v12088_v11  ;;  %8232 = vmatpush.bf16.msra.mxu1 %v12667_v10 }
 0x6bc   :  { %v12440_v9 = vld [vmem:[#allocation7 + $0x1138] sm:$0xf0] }
 0x6bd   :  { %v15871_v12 = vld [vmem:[#allocation7 + $0x151c] sm:$0xf]  ;;  %v12443_v24 = vor.u32 %v15743_v19, %v12440_v9  ;;  %8208 = vmatpush.bf16.msra.mxu3 %v12091_v61  ;;  %v7990_v19 = vpop.f32.mrf.mxu2 }
 0x6be   :  { %v12952_v15 = vld [vmem:[#allocation7 + $0x1538] sm:$0xf0] }
 0x6bf   :  { %v15791_v37 = vld [vmem:[#allocation7 + $0x129c] sm:$0xf]  ;;  %v12955_v42 = vor.u32 %v15871_v12, %v12952_v15  ;;  %8218 = vmatpush.bf16.msrb.mxu0 %v12443_v24  ;;  %v17101_v12 = vadd.f32 %v7990_v19, %v7978_v8  ;;  %v7966_v15 = vpop.f32.mrf.mxu0 }
 0x6c0   :  { %v12632_v26 = vld [vmem:[#allocation7 + $0x12b8] sm:$0xf0] }
 0x6c1   :  { %v15647_v34 = vld [vmem:[#allocation7 + $0xe1c] sm:$0xf]  ;;  %v12635_v30 = vor.u32 %v15791_v37, %v12632_v26  ;;  %8244 = vmatpush.bf16.msra.mxu2 %v12955_v42 }
 0x6c2   :  { %v12056_v35 = vld [vmem:[#allocation7 + $0xe38] sm:$0xf0] }
 0x6c3   :  { %v15735_v49 = vld [vmem:[#allocation7 + $0x10dc] sm:$0xf]  ;;  %v12059_v62 = vor.u32 %v15647_v34, %v12056_v35  ;;  %8233 = vmatpush.bf16.msra.mxu1 %v12635_v30 }
 0x6c4   :  { %v12408_v59 = vld [vmem:[#allocation7 + $0x10f8] sm:$0xf0] }
 0x6c5   :  { %v15959_v25 = vld [vmem:[#allocation7 + $0x17dc] sm:$0xf]  ;;  %v12411_v55 = vor.u32 %v15735_v49, %v12408_v59  ;;  %8209 = vmatpush.bf16.msra.mxu3 %v12059_v62 }
 0x6c6   :  { %v13304_v51 = vld [vmem:[#allocation7 + $0x17f8] sm:$0xf0] }
 0x6c7   :  { %v15863_v53 = vld [vmem:[#allocation7 + $0x14dc] sm:$0xf]  ;;  %v13307_v60 = vor.u32 %v15959_v25, %v13304_v51  ;;  %8219 = vmatpush.bf16.msrb.mxu0 %v12411_v55 }
 0x6c8   :  { %v12920_v43 = vld [vmem:[#allocation7 + $0x14f8] sm:$0xf0]  ;;  %8210 = vmatmul.bf16.vlgmr.msra.gmra.mxu3 %v16878_v32 }
 0x6c9   :  { %v15783_v16 = vld [vmem:[#allocation7 + $0x125c] sm:$0xf]  ;;  %v12923_v36 = vor.u32 %v15863_v53, %v12920_v43  ;;  %8254 = vmatpush.bf16.msrb.mxu3 %v13307_v60 }
 0x6ca   :  { %v12600_v48 = vld [vmem:[#allocation7 + $0x1278] sm:$0xf0] }
 0x6cb   :  { %v15727_v0 = vld [vmem:[#allocation7 + $0x109c] sm:$0xf]  ;;  %v12603_v21 = vor.u32 %v15783_v16, %v12600_v48  ;;  %8245 = vmatpush.bf16.msra.mxu2 %v12923_v36  ;;  %v7992_v36 = vpop.f32.mrf.mxu2 }
 0x6cc   :  { %v12376_v44 = vld [vmem:[#allocation7 + $0x10b8] sm:$0xf0] }
 0x6cd   :  { %v15951_v3 = vld [vmem:[#allocation7 + $0x179c] sm:$0xf]  ;;  %v12379_v7 = vor.u32 %v15727_v0, %v12376_v44  ;;  %8234 = vmatpush.bf16.msra.mxu1 %v12603_v21 }
 0x6ce   :  { %v13272_v56 = vld [vmem:[#allocation7 + $0x17b8] sm:$0xf0] }
 0x6cf   :  { %v15855_v6 = vld [vmem:[#allocation7 + $0x149c] sm:$0xf]  ;;  %v13275_v33 = vor.u32 %v15951_v3, %v13272_v56  ;;  %8220 = vmatpush.bf16.msrb.mxu0 %v12379_v7 }
 0x6d0   :  { %v12888_v41 = vld [vmem:[#allocation7 + $0x14b8] sm:$0xf0] }
 0x6d1   :  { %v15775_v4 = vld [vmem:[#allocation7 + $0x121c] sm:$0xf]  ;;  %v12891_v5 = vor.u32 %v15855_v6, %v12888_v41  ;;  %8255 = vmatpush.bf16.msrb.mxu3 %v13275_v33 }
 0x6d2   :  { %v12568_v27 = vld [vmem:[#allocation7 + $0x1238] sm:$0xf0] }
 0x6d3   :  { %v16087_v45 = vld [vmem:[#allocation7 + $0x1bdc] sm:$0xf]  ;;  %v12571_v23 = vor.u32 %v15775_v4, %v12568_v27  ;;  %8246 = vmatpush.bf16.msra.mxu2 %v12891_v5 }
 0x6d4   :  { %v13816_v28 = vld [vmem:[#allocation7 + $0x1bf8] sm:$0xf0] }
 0x6d5   :  { %v15719_v38 = vld [vmem:[#allocation7 + $0x105c] sm:$0xf]  ;;  %v13819_v61 = vor.u32 %v16087_v45, %v13816_v28  ;;  %8235 = vmatpush.bf16.msra.mxu1 %v12571_v23 }
 0x6d6   :  { %v12344_v11 = vld [vmem:[#allocation7 + $0x1078] sm:$0xf0] }
 0x6d7   :  { %v15943_v17 = vld [vmem:[#allocation7 + $0x175c] sm:$0xf]  ;;  %v12347_v26 = vor.u32 %v15719_v38, %v12344_v11 }
 0x6d8   :  { %v13240_v63 = vld [vmem:[#allocation7 + $0x1778] sm:$0xf0]  ;;  %8236 = vmatmul.bf16.vlgmr.msra.gmra.mxu1 %v16871_v1 }
 0x6d9   :  { %v15847_v9 = vld [vmem:[#allocation7 + $0x145c] sm:$0xf]  ;;  %v13243_v24 = vor.u32 %v15943_v17, %v13240_v63  ;;  %8280 = vmatpush.bf16.msrb.mxu1 %v13819_v61  ;;  %8221 = vmatpush.bf16.msrb.mxu0 %v12347_v26 }
 0x6da   :  { %v12856_v10 = vld [vmem:[#allocation7 + $0x1478] sm:$0xf0] }
 0x6db   :  { %v16079_v37 = vld [vmem:[#allocation7 + $0x1b9c] sm:$0xf]  ;;  %v12859_v42 = vor.u32 %v15847_v9, %v12856_v10  ;;  %8256 = vmatpush.bf16.msrb.mxu3 %v13243_v24  ;;  %v8003_v9 = vpop.f32.mrf.mxu3 }
 0x6dc   :  { %v13784_v34 = vld [vmem:[#allocation7 + $0x1bb8] sm:$0xf0] }
 0x6dd   :  { %v15711_v35 = vld [vmem:[#allocation7 + $0x101c] sm:$0xf]  ;;  %v13787_v43 = vor.u32 %v16079_v37, %v13784_v34  ;;  %8247 = vmatpush.bf16.msra.mxu2 %v12859_v42  ;;  %v8029_v37 = vpop.f32.mrf.mxu1 }
 0x6de   :  { %v12312_v49 = vld [vmem:[#allocation7 + $0x1038] sm:$0xf0] }
 0x6df   :  { %v15839_v59 = vld [vmem:[#allocation7 + $0x141c] sm:$0xf]  ;;  %v12315_v16 = vor.u32 %v15711_v35, %v12312_v49  ;;  %8281 = vmatpush.bf16.msrb.mxu1 %v13787_v43 }
 0x6e0   :  { %v15935_v32 = vld [vmem:[#allocation7 + $0x171c] sm:$0xf] }
 0x6e1   :  { %v13208_v25 = vld [vmem:[#allocation7 + $0x1738] sm:$0xf0]  ;;  %8222 = vmatpush.bf16.msrb.mxu0 %v12315_v16  ;;  %v8004_v16 = vadd.f32 %v8003_v9, %v17101_v12 }
 0x6e2   :  { %v12824_v51 = vld [vmem:[#allocation7 + $0x1438] sm:$0xf0]  ;;  %v13211_v48 = vor.u32 %v15935_v32, %v13208_v25 }
 0x6e3   :  { %v16023_v30 = vld [vmem:[#allocation7 + $0x19dc] sm:$0xf]  ;;  %v12827_v55 = vor.u32 %v15839_v59, %v12824_v51 }
 0x6e4   :  { %v13560_v53 = vld [vmem:[#allocation7 + $0x19f8] sm:$0xf0]  ;;  %8257 = vmatpush.bf16.msrb.mxu3 %v13211_v48  ;;  %8223 = vmatmul.bf16.vlgmr.msrb.gmra.mxu0 %v16876_v29 }
 0x6e5   :  { %v16151_v2 = vld [vmem:[#allocation7 + $0x1ddc] sm:$0xf]  ;;  %v13563_v60 = vor.u32 %v16023_v30, %v13560_v53  ;;  %8248 = vmatpush.bf16.msra.mxu2 %v12827_v55  ;;  %v8016_v55 = vpop.f32.mrf.mxu0 }
 0x6e6   :  { %v14072_v62 = vld [vmem:[#allocation7 + $0x1df8] sm:$0xf0]  ;;  %v8017_v36 = vadd.f32 %v8016_v55, %v8004_v16  ;;  %v16260_v55 = vld [vmem:[#allocation10 + $0x140] sm:$0xf0] }
 0x6e7   :  { %v16071_v50 = vld [vmem:[#allocation7 + $0x1b5c] sm:$0xf]  ;;  %v14075_v44 = vor.u32 %v16151_v2, %v14072_v62  ;;  %8267 = vmatpush.bf16.msra.mxu0 %v13563_v60 }
 0x6e8   :  { %v13752_v39 = vld [vmem:[#allocation7 + $0x1b78] sm:$0xf0]  ;;  %8249 = vmatmul.bf16.vlgmr.msra.gmra.mxu2 %v16880_v40 }
 0x6e9   :  { %v15927_v0 = vld [vmem:[#allocation7 + $0x16dc] sm:$0xf]  ;;  %v13755_v8 = vor.u32 %v16071_v50, %v13752_v39  ;;  %8293 = vmatpush.bf16.msrb.mxu2 %v14075_v44  ;;  %v8005_v44 = vpop.f32.mrf.mxu3 }
 0x6ea   :  { %v13176_v46 = vld [vmem:[#allocation7 + $0x16f8] sm:$0xf0] }
 0x6eb   :  { %v16015_v3 = vld [vmem:[#allocation7 + $0x199c] sm:$0xf]  ;;  %v13179_v41 = vor.u32 %v15927_v0, %v13176_v46  ;;  %8282 = vmatpush.bf16.msrb.mxu1 %v13755_v8 }
 0x6ec   :  { %v13528_v56 = vld [vmem:[#allocation7 + $0x19b8] sm:$0xf0] }
 0x6ed   :  { %v16143_v21 = vld [vmem:[#allocation7 + $0x1d9c] sm:$0xf]  ;;  %v13531_v1 = vor.u32 %v16015_v3, %v13528_v56  ;;  %8258 = vmatpush.bf16.msrb.mxu3 %v13179_v41 }
 0x6ee   :  { %v14040_v6 = vld [vmem:[#allocation7 + $0x1db8] sm:$0xf0] }
 0x6ef   :  { %v16063_v4 = vld [vmem:[#allocation7 + $0x1b1c] sm:$0xf]  ;;  %v14043_v45 = vor.u32 %v16143_v21, %v14040_v6  ;;  %8268 = vmatpush.bf16.msra.mxu0 %v13531_v1  ;;  %v8031_v21 = vpop.f32.mrf.mxu1 }
 0x6f0   :  { %v13720_v27 = vld [vmem:[#allocation7 + $0x1b38] sm:$0xf0] }
 0x6f1   :  { %v15919_v7 = vld [vmem:[#allocation7 + $0x169c] sm:$0xf]  ;;  %v13723_v5 = vor.u32 %v16063_v4, %v13720_v27  ;;  %8294 = vmatpush.bf16.msrb.mxu2 %v14043_v45  ;;  %v17107_v27 = vadd.f32 %v8029_v37, %v8017_v36 }
 0x6f2   :  { %v13144_v33 = vld [vmem:[#allocation7 + $0x16b8] sm:$0xf0] }
 0x6f3   :  { %v16007_v28 = vld [vmem:[#allocation7 + $0x195c] sm:$0xf]  ;;  %v13147_v63 = vor.u32 %v15919_v7, %v13144_v33  ;;  %8283 = vmatpush.bf16.msrb.mxu1 %v13723_v5 }
 0x6f4   :  { %v13496_v38 = vld [vmem:[#allocation7 + $0x1978] sm:$0xf0] }
 0x6f5   :  { %v16135_v11 = vld [vmem:[#allocation7 + $0x1d5c] sm:$0xf]  ;;  %v13499_v10 = vor.u32 %v16007_v28, %v13496_v38  ;;  %8259 = vmatpush.bf16.msrb.mxu3 %v13147_v63 }
 0x6f6   :  { %v14008_v17 = vld [vmem:[#allocation7 + $0x1d78] sm:$0xf0] }
 0x6f7   :  { %v16055_v19 = vld [vmem:[#allocation7 + $0x1adc] sm:$0xf]  ;;  %v14011_v26 = vor.u32 %v16135_v11, %v14008_v17  ;;  %8269 = vmatpush.bf16.msra.mxu0 %v13499_v10  ;;  %v14514_v11 = vld [vmem:[#allocation10 + $0x168] sm:$0xf] }
 0x6f8   :  { %v13688_v23 = vld [vmem:[#allocation7 + $0x1af8] sm:$0xf0] }
 0x6f9   :  { %v15911_v15 = vld [vmem:[#allocation7 + $0x165c] sm:$0xf]  ;;  %v13691_v34 = vor.u32 %v16055_v19, %v13688_v23  ;;  %8295 = vmatpush.bf16.msrb.mxu2 %v14011_v26 }
 0x6fa   :  { %v13112_v61 = vld [vmem:[#allocation7 + $0x1678] sm:$0xf0] }
 0x6fb   :  { %v15999_v24 = vld [vmem:[#allocation7 + $0x191c] sm:$0xf]  ;;  %v13115_v40 = vor.u32 %v15911_v15, %v13112_v61  ;;  %8284 = vmatpush.bf16.msrb.mxu1 %v13691_v34  ;;  %v17109_v15 = vpop.f32.mrf.mxu2  ;;  %v14502_v34 = vld [vmem:[#allocation10 + $0x150] sm:$0xf] }
 0x6fc   :  { %v13464_v29 = vld [vmem:[#allocation7 + $0x1938] sm:$0xf0] }
 0x6fd   :  { %v16127_v35 = vld [vmem:[#allocation7 + $0x1d1c] sm:$0xf]  ;;  %v13467_v32 = vor.u32 %v15999_v24, %v13464_v29  ;;  %8260 = vmatpush.bf16.msrb.mxu3 %v13115_v40  ;;  %v8018_v24 = vpop.f32.mrf.mxu0  ;;  %v16263_v40 = vld [vmem:[#allocation10 + $0x158] sm:$0xf0] }
 0x6fe   :  { %v13976_v49 = vld [vmem:[#allocation7 + $0x1d38] sm:$0xf0]  ;;  %v14382_v24 = vld [vmem:[#allocation10 + $0x60] sm:$0xf] }
 0x6ff   :  { %v16047_v42 = vld [vmem:[#allocation7 + $0x1a9c] sm:$0xf]  ;;  %v13979_v53 = vor.u32 %v16127_v35, %v13976_v49  ;;  %8270 = vmatpush.bf16.msra.mxu0 %v13467_v32 }
 0x700   :  { %v13656_v59 = vld [vmem:[#allocation7 + $0x1ab8] sm:$0xf0] }
 0x701   :  { %v15903_v25 = vld [vmem:[#allocation7 + $0x161c] sm:$0xf]  ;;  %v13659_v48 = vor.u32 %v16047_v42, %v13656_v59  ;;  %8296 = vmatpush.bf16.msrb.mxu2 %v13979_v53  ;;  %v14418_v53 = vld [vmem:[#allocation10 + $0xa8] sm:$0xf] }
 0x702   :  { %v13080_v51 = vld [vmem:[#allocation7 + $0x1638] sm:$0xf0] }
 0x703   :  { %v15991_v30 = vld [vmem:[#allocation7 + $0x18dc] sm:$0xf]  ;;  %v13083_v60 = vor.u32 %v15903_v25, %v13080_v51  ;;  %8285 = vmatpush.bf16.msrb.mxu1 %v13659_v48  ;;  %v8044_v44 = vpop.f32.mrf.mxu2 }
 0x704   :  { %v13432_v43 = vld [vmem:[#allocation7 + $0x18f8] sm:$0xf0] }
 0x705   :  { %v16215_v2 = vld [vmem:[#allocation7 + $0x1fdc] sm:$0xf]  ;;  %v13435_v3 = vor.u32 %v15991_v30, %v13432_v43  ;;  %8261 = vmatpush.bf16.msrb.mxu3 %v13083_v60 }
 0x706   :  { %v14328_v62 = vld [vmem:[#allocation7 + $0x1ff8] sm:$0xf0] }
 0x707   :  { %v16119_v50 = vld [vmem:[#allocation7 + $0x1cdc] sm:$0xf]  ;;  %v14331_v56 = vor.u32 %v16215_v2, %v14328_v62  ;;  %8271 = vmatpush.bf16.msra.mxu0 %v13435_v3  ;;  %v14503_v2 = vor.u32 %v16263_v40, %v14502_v34  ;;  %v14610_v62 = vld [vmem:[#allocation10 + $0x228] sm:$0xf]  ;;  %v14454_v40 = vld [vmem:[#allocation10 + $0xf0] sm:$0xf] }
 0x708   :  { %v13944_v39 = vld [vmem:[#allocation7 + $0x1cf8] sm:$0xf0]  ;;  %8262 = vmatmul.bf16.vlgmr.msrb.gmra.mxu3 %v16888_v52 }
 0x709   :  { %v16039_v0 = vld [vmem:[#allocation7 + $0x1a5c] sm:$0xf]  ;;  %v13947_v6 = vor.u32 %v16119_v50, %v13944_v39  ;;  %8306 = vmatpush.bf16.msra.mxu3 %v14331_v56  ;;  %v14490_v39 = vld [vmem:[#allocation10 + $0x138] sm:$0xf]  ;;  %v14406_v56 = vld [vmem:[#allocation10 + $0x90] sm:$0xf] }
 0x70a   :  { %v13624_v46 = vld [vmem:[#allocation7 + $0x1a78] sm:$0xf0]  ;;  %v14491_v21 = vor.u32 %v16260_v55, %v14490_v39  ;;  %v14442_v39 = vld [vmem:[#allocation10 + $0xd8] sm:$0xf]  ;;  %v16248_v55 = vld [vmem:[#allocation10 + $0xe0] sm:$0xf0] }
 0x70b   :  { %v15983_v8 = vld [vmem:[#allocation7 + $0x189c] sm:$0xf]  ;;  %v13627_v1 = vor.u32 %v16039_v0, %v13624_v46  ;;  %8297 = vmatpush.bf16.msrb.mxu2 %v13947_v6  ;;  %v14598_v6 = vld [vmem:[#allocation10 + $0x210] sm:$0xf] }
 0x70c   :  { %v13400_v41 = vld [vmem:[#allocation7 + $0x18b8] sm:$0xf0] }
 0x70d   :  { %v16207_v12 = vld [vmem:[#allocation7 + $0x1f9c] sm:$0xf]  ;;  %v13403_v38 = vor.u32 %v15983_v8, %v13400_v41  ;;  %8286 = vmatpush.bf16.msrb.mxu1 %v13627_v1  ;;  %v16239_v8 = vld [vmem:[#allocation10 + $0x98] sm:$0xf0]  ;;  %v16257_v1 = vld [vmem:[#allocation10 + $0x128] sm:$0xf0] }
 0x70e   :  { %v14296_v4 = vld [vmem:[#allocation7 + $0x1fb8] sm:$0xf0]  ;;  %v16287_v41 = vld [vmem:[#allocation10 + $0x218] sm:$0xf0] }
 0x70f   :  { %v16111_v7 = vld [vmem:[#allocation7 + $0x1c9c] sm:$0xf]  ;;  %v14299_v5 = vor.u32 %v16207_v12, %v14296_v4  ;;  %8272 = vmatpush.bf16.msra.mxu0 %v13403_v38  ;;  %v14478_v4 = vld [vmem:[#allocation10 + $0x120] sm:$0xf]  ;;  %v16236_v38 = vld [vmem:[#allocation10 + $0x80] sm:$0xf0] }
 0x710   :  { %v13912_v33 = vld [vmem:[#allocation7 + $0x1cb8] sm:$0xf0] }
 0x711   :  { %v16031_v45 = vld [vmem:[#allocation7 + $0x1a1c] sm:$0xf]  ;;  %v13915_v19 = vor.u32 %v16111_v7, %v13912_v33  ;;  %8307 = vmatpush.bf16.msra.mxu3 %v14299_v5  ;;  %v14479_v5 = vor.u32 %v16257_v1, %v14478_v4  ;;  %v14430_v4 = vld [vmem:[#allocation10 + $0xc0] sm:$0xf]  ;;  %v16245_v1 = vld [vmem:[#allocation10 + $0xc8] sm:$0xf0] }
 0x712   :  { %v13592_v28 = vld [vmem:[#allocation7 + $0x1a38] sm:$0xf0] }
 0x713   :  { %v16266_v17 = vld [vmem:[#allocation10 + $0x170] sm:$0xf0]  ;;  %v13595_v61 = vor.u32 %v16031_v45, %v13592_v28  ;;  %8298 = vmatpush.bf16.msrb.mxu2 %v13915_v19  ;;  %v14599_v45 = vor.u32 %v16287_v41, %v14598_v6  ;;  %v14394_v28 = vld [vmem:[#allocation10 + $0x78] sm:$0xf]  ;;  %v14466_v19 = vld [vmem:[#allocation10 + $0x108] sm:$0xf]  ;;  %v14443_v6 = vor.u32 %v16248_v55, %v14442_v39 }
 0x714   :  { %v15975_v63 = vld [vmem:[#allocation7 + $0x185c] sm:$0xf]  ;;  %v14515_v29 = vor.u32 %v16266_v17, %v14514_v11  ;;  %v14586_v11 = vld [vmem:[#allocation10 + $0x1f8] sm:$0xf]  ;;  %v16284_v17 = vld [vmem:[#allocation10 + $0x200] sm:$0xf0] }
 0x715   :  { %v13368_v23 = vld [vmem:[#allocation7 + $0x1878] sm:$0xf0]  ;;  %8287 = vmatpush.bf16.msrb.mxu1 %v13595_v61  ;;  %v14550_v41 = vld [vmem:[#allocation10 + $0x1b0] sm:$0xf] }
 0x716   :  { %v16199_v9 = vld [vmem:[#allocation7 + $0x1f5c] sm:$0xf]  ;;  %v13371_v35 = vor.u32 %v15975_v63, %v13368_v23 }
 0x717   :  { %v14264_v10 = vld [vmem:[#allocation7 + $0x1f78] sm:$0xf0] }
 0x718   :  { %v16103_v37 = vld [vmem:[#allocation7 + $0x1c5c] sm:$0xf]  ;;  %v14267_v49 = vor.u32 %v16199_v9, %v14264_v10  ;;  %8273 = vmatpush.bf16.msra.mxu0 %v13371_v35  ;;  %8288 = vmatmul.bf16.vlgmr.msrb.gmra.mxu1 %v16893_v20  ;;  %v14407_v20 = vor.u32 %v16239_v8, %v14406_v56  ;;  %v17115_v9 = vpop.f32.mrf.mxu3  ;;  %v14395_v10 = vor.u32 %v16236_v38, %v14394_v28  ;;  %v14574_v35 = vld [vmem:[#allocation10 + $0x1e0] sm:$0xf]  ;;  %v16227_v56 = vld [vmem:[#allocation10 + $0x38] sm:$0xf0] }
 0x719   :  { %v13880_v26 = vld [vmem:[#allocation7 + $0x1c78] sm:$0xf0]  ;;  %9636 = vmatpush.bf16.msra.mxu1 %v14515_v29  ;;  %v16233_v29 = vld [vmem:[#allocation10 + $0x68] sm:$0xf0]  ;;  %v14694_v8 = vld [vmem:[#allocation10 + $0x2d0] sm:$0xf] }
 0x71a   :  { %v15967_v42 = vld [vmem:[#allocation7 + $0x181c] sm:$0xf]  ;;  %v13883_v32 = vor.u32 %v16103_v37, %v13880_v26  ;;  %8308 = vmatpush.bf16.msra.mxu3 %v14267_v49  ;;  %v17117_v26 = vpop.f32.mrf.mxu1  ;;  %v14346_v28 = vld [vmem:[#allocation10 + $0x18] sm:$0xf] }
 0x71b   :  { %v13336_v59 = vld [vmem:[#allocation7 + $0x1838] sm:$0xf0] }
 0x71c   :  { %v16095_v25 = vld [vmem:[#allocation7 + $0x1c1c] sm:$0xf]  ;;  %v13339_v48 = vor.u32 %v15967_v42, %v13336_v59  ;;  %8299 = vmatpush.bf16.msrb.mxu2 %v13883_v32  ;;  %v16251_v42 = vld [vmem:[#allocation10 + $0xf8] sm:$0xf0]  ;;  %v14383_v59 = vor.u32 %v16233_v29, %v14382_v24  ;;  %v14886_v24 = vld [vmem:[#allocation10 + $0x450] sm:$0xf] }
 0x71d   :  { %v16191_v51 = vld [vmem:[#allocation7 + $0x1f1c] sm:$0xf]  ;;  %9637 = vmatpush.bf16.msra.mxu1 %v14503_v2  ;;  %v14455_v2 = vor.u32 %v16251_v42, %v14454_v40  ;;  %v14526_v42 = vld [vmem:[#allocation10 + $0x180] sm:$0xf] }
 0x71e   :  { %v14232_v30 = vld [vmem:[#allocation7 + $0x1f38] sm:$0xf0]  ;;  %8274 = vmatpush.bf16.msra.mxu0 %v13339_v48  ;;  %v17119_v48 = vpop.f32.mrf.mxu0 }
 0x71f   :  { %v13848_v52 = vld [vmem:[#allocation7 + $0x1c38] sm:$0xf0]  ;;  %v14235_v50 = vor.u32 %v16191_v51, %v14232_v30  ;;  %v14370_v51 = vld [vmem:[#allocation10 + $0x48] sm:$0xf] }
 0x720   :  { %v16242_v43 = vld [vmem:[#allocation10 + $0xb0] sm:$0xf0]  ;;  %v13851_v60 = vor.u32 %v16095_v25, %v13848_v52 }
 0x721   :  { %v16290_v16 = vld [vmem:[#allocation10 + $0x230] sm:$0xf0]  ;;  %v14419_v0 = vor.u32 %v16242_v43, %v14418_v53  ;;  %8309 = vmatpush.bf16.msra.mxu3 %v14235_v50  ;;  %8275 = vmatmul.bf16.vlgmr.msra.gmra.mxu0 %v16896_v47  ;;  %v14587_v47 = vor.u32 %v16284_v17, %v14586_v11  ;;  %v14706_v53 = vld [vmem:[#allocation10 + $0x2e8] sm:$0xf]  ;;  %v14682_v11 = vld [vmem:[#allocation10 + $0x2b8] sm:$0xf] }
 0x722   :  { %v16183_v46 = vld [vmem:[#allocation7 + $0x1edc] sm:$0xf]  ;;  %v14611_v3 = vor.u32 %v16290_v16, %v14610_v62  ;;  %8300 = vmatpush.bf16.msrb.mxu2 %v13851_v60  ;;  %9638 = vmatpush.bf16.msra.mxu1 %v14491_v21  ;;  %v14562_v62 = vld [vmem:[#allocation10 + $0x1c8] sm:$0xf]  ;;  %v8057_v60 = vpop.f32.mrf.mxu3  ;;  %v8083_v44 = vpop.f32.mrf.mxu1  ;;  %v16311_v21 = vld [vmem:[#allocation10 + $0x2d8] sm:$0xf0] }
 0x723   :  { %v14200_v36 = vld [vmem:[#allocation7 + $0x1ef8] sm:$0xf0]  ;;  %9623 = vmatpush.bf16.msrb.mxu0 %v14419_v0  ;;  %v16308_v17 = vld [vmem:[#allocation10 + $0x2c0] sm:$0xf0]  ;;  %v14658_v60 = vld [vmem:[#allocation10 + $0x288] sm:$0xf] }
 0x724   :  { %v14203_v12 = vor.u32 %v16183_v46, %v14200_v36  ;;  %v16175_v7 = vld [vmem:[#allocation7 + $0x1e9c] sm:$0xf]  ;;  %v14358_v36 = vld [vmem:[#allocation10 + $0x30] sm:$0xf] }
 0x725   :  { %v14168_v33 = vld [vmem:[#allocation7 + $0x1eb8] sm:$0xf0]  ;;  %8301 = vmatmul.bf16.vlgmr.msrb.gmra.mxu2 %v16898_v54  ;;  %v16281_v54 = vld [vmem:[#allocation10 + $0x1e8] sm:$0xf0] }
 0x726   :  { %9649 = vmatpush.bf16.msra.mxu2 %v14611_v3  ;;  %8310 = vmatpush.bf16.msra.mxu3 %v14203_v12  ;;  %v14171_v63 = vor.u32 %v16175_v7, %v14168_v33  ;;  %v16254_v23 = vld [vmem:[#allocation10 + $0x110] sm:$0xf0]  ;;  %v14575_v30 = vor.u32 %v16281_v54, %v14574_v35  ;;  %v16275_v12 = vld [vmem:[#allocation10 + $0x1b8] sm:$0xf0]  ;;  %v14695_v7 = vor.u32 %v16311_v21, %v14694_v8  ;;  %v14898_v33 = vld [vmem:[#allocation10 + $0x468] sm:$0xf] }
 0x727   :  { %9624 = vmatpush.bf16.msrb.mxu0 %v14407_v20  ;;  %v16167_v61 = vld [vmem:[#allocation7 + $0x1e5c] sm:$0xf]  ;;  %9639 = vmatpush.bf16.msra.mxu1 %v14479_v5  ;;  %v14467_v34 = vor.u32 %v16254_v23, %v14466_v19  ;;  %v14359_v20 = vor.u32 %v16227_v56, %v14358_v36  ;;  %v14551_v38 = vor.u32 %v16275_v12, %v14550_v41  ;;  %v16224_v5 = vld [vmem:[#allocation10 + $0x20] sm:$0xf0]  ;;  %v14538_v23 = vld [vmem:[#allocation10 + $0x198] sm:$0xf] }
 0x728   :  { %v14136_v37 = vld [vmem:[#allocation7 + $0x1e78] sm:$0xf0]  ;;  %v14431_v19 = vor.u32 %v16245_v1, %v14430_v4  ;;  %v14347_v29 = vor.u32 %v16224_v5, %v14346_v28  ;;  %v16359_v35 = vld [vmem:[#allocation10 + $0x458] sm:$0xf0]  ;;  %v14334_v54 = vld [vmem:[#allocation10] sm:$0xf] }
 0x729   :  { %v14139_v49 = vor.u32 %v16167_v61, %v14136_v37  ;;  %v16159_v32 = vld [vmem:[#allocation7 + $0x1e1c] sm:$0xf]  ;;  %v8320_v61 = vmax.f32 %v16971_v18, 0.0  ;;  %v8070_v37 = vpop.f32.mrf.mxu0  ;;  %v16335_v56 = vld [vmem:[#allocation10 + $0x398] sm:$0xf0] }
 0x72a   :  { %9650 = vmatpush.bf16.msra.mxu2 %v14599_v45  ;;  %8311 = vmatpush.bf16.msra.mxu3 %v14171_v63  ;;  %v14104_v25 = vld [vmem:[#allocation7 + $0x1e38] sm:$0xf0]  ;;  %v17121_v63 = vpop.f32.mrf.mxu2  ;;  %v14982_v21 = vld [vmem:[#allocation10 + $0x510] sm:$0xf]  ;;  %v14862_v41 = vld [vmem:[#allocation10 + $0x420] sm:$0xf] }
 0x72b   :  { %9625 = vmatpush.bf16.msrb.mxu0 %v14395_v10  ;;  %v16230_v52 = vld [vmem:[#allocation10 + $0x50] sm:$0xf0]  ;;  %9640 = vmatpush.bf16.msra.mxu1 %v14467_v34  ;;  %v14107_v50 = vor.u32 %v16159_v32, %v14104_v25  ;;  %v16272_v10 = vld [vmem:[#allocation10 + $0x1a0] sm:$0xf0]  ;;  %v14683_v34 = vor.u32 %v16308_v17, %v14682_v11  ;;  %v16269_v32 = vld [vmem:[#allocation10 + $0x188] sm:$0xf0]  ;;  %v17125_v18 = vpack.c.bf16 %v8320_v61, %v8320_v61 }
 0x72c   :  { %v16314_v43 = vld [vmem:[#allocation10 + $0x2f0] sm:$0xf0]  ;;  %v14371_v0 = vor.u32 %v16230_v52, %v14370_v51  ;;  %v14539_v40 = vor.u32 %v16272_v10, %v14538_v23  ;;  %v14802_v25 = vld [vmem:[#allocation10 + $0x3a8] sm:$0xf]  ;;  %v14527_v39 = vor.u32 %v16269_v32, %v14526_v42  ;;  %v16353_v12 = vld [vmem:[#allocation10 + $0x428] sm:$0xf0]  ;;  %v17136_v10 = vpop.f32.mrf.mxu3 }
 0x72d   :  { %v16278_v16 = vld [vmem:[#allocation10 + $0x1d0] sm:$0xf0]  ;;  %v14707_v46 = vor.u32 %v16314_v43, %v14706_v53  ;;  %v14994_v52 = vld [vmem:[#allocation10 + $0x528] sm:$0xf]  ;;  %v16332_v28 = vld [vmem:[#allocation10 + $0x380] sm:$0xf0] }
 0x72e   :  { %9651 = vmatpush.bf16.msra.mxu2 %v14587_v47  ;;  %8312 = vmatpush.bf16.msra.mxu3 %v14139_v49  ;;  %v14563_v3 = vor.u32 %v16278_v16, %v14562_v62  ;;  %v16362_v45 = vld [vmem:[#allocation10 + $0x470] sm:$0xf0]  ;;  %v16221_v49 = vld [vmem:[#allocation10 + $0x8] sm:$0xf0]  ;;  %v14874_v62 = vld [vmem:[#allocation10 + $0x438] sm:$0xf] }
 0x72f   :  { %9626 = vmatpush.bf16.msrb.mxu0 %v14383_v59  ;;  %9641 = vmatpush.bf16.msra.mxu1 %v14455_v2  ;;  %v14899_v47 = vor.u32 %v16362_v45, %v14898_v33  ;;  %v16305_v59 = vld [vmem:[#allocation10 + $0x2a8] sm:$0xf0]  ;;  %v16338_v51 = vld [vmem:[#allocation10 + $0x3b0] sm:$0xf0]  ;;  %v14335_v43 = vor.u32 %v16221_v49, %v14334_v54  ;;  %v16356_v16 = vld [vmem:[#allocation10 + $0x440] sm:$0xf0] }
 0x730   :  { %v16386_v53 = vld [vmem:[#allocation10 + $0x530] sm:$0xf0]  ;;  %v14803_v55 = vor.u32 %v16338_v51, %v14802_v25  ;;  %v14875_v8 = vor.u32 %v16356_v16, %v14874_v62  ;;  %v14778_v45 = vld [vmem:[#allocation10 + $0x378] sm:$0xf]  ;;  %v16380_v11 = vld [vmem:[#allocation10 + $0x500] sm:$0xf0]  ;;  %v8043_v62 = vadd.f32 %v17109_v15, %v17107_v27 }
 0x731   :  { %v14995_v44 = vor.u32 %v16386_v53, %v14994_v52  ;;  %v14970_v5 = vld [vmem:[#allocation10 + $0x4f8] sm:$0xf]  ;;  %v16350_v23 = vld [vmem:[#allocation10 + $0x410] sm:$0xf0]  ;;  %v14779_v61 = vor.u32 %v16332_v28, %v14778_v45  ;;  %v14958_v49 = vld [vmem:[#allocation10 + $0x4e0] sm:$0xf] }
 0x732   :  { %9652 = vmatpush.bf16.msra.mxu2 %v14575_v30  ;;  %8313 = vmatpush.bf16.msra.mxu3 %v14107_v50  ;;  %v14887_v30 = vor.u32 %v16359_v35, %v14886_v24  ;;  %v8319_v50 = vmax.f32 %v16940_v31, 0.0  ;;  %v8096_v36 = vpop.f32.mrf.mxu2  ;;  %v14634_v37 = vld [vmem:[#allocation10 + $0x258] sm:$0xf]  ;;  %v8133_v24 = vpop.f32.mrf.mxu1  ;;  %v16329_v35 = vld [vmem:[#allocation10 + $0x368] sm:$0xf0] }
 0x733   :  { %9627 = vmatpush.bf16.msrb.mxu0 %v14371_v0  ;;  %9642 = vmatpush.bf16.msra.mxu1 %v14443_v6  ;;  %v16302_v0 = vld [vmem:[#allocation10 + $0x290] sm:$0xf0]  ;;  %v16383_v6 = vld [vmem:[#allocation10 + $0x518] sm:$0xf0]  ;;  %v16293_v52 = vld [vmem:[#allocation10 + $0x248] sm:$0xf0] }
 0x734   :  { %v14659_v31 = vor.u32 %v16302_v0, %v14658_v60  ;;  %v17130_v4 = vpack.c.bf16 %v8319_v50, %v8319_v50  ;;  %v14983_v33 = vor.u32 %v16383_v6, %v14982_v21  ;;  %v16461_v32 = vld [vmem:[#allocation8] sm:$0xff]  ;;  %v14946_v50 = vld [vmem:[#allocation10 + $0x4c8] sm:$0xf]  ;;  %v8322_v36 = vmax.f32 %v17031_v14, 0.0  ;;  %v14742_v15 = vld [vmem:[#allocation10 + $0x330] sm:$0xf] }
 0x735   :  { %8314 = vmatmul.bf16.vlgmr.msra.gmra.mxu3 %v16903_v58  ;;  %v14670_v58 = vld [vmem:[#allocation10 + $0x2a0] sm:$0xf]  ;;  %v1526_v25 = vperm.slane %v16461_v32, 7  ;;  %v14826_v0 = vld [vmem:[#allocation10 + $0x3d8] sm:$0xf] }
 0x736   :  { %9662 = vmatpush.bf16.msrb.mxu3 %v14707_v46  ;;  %9653 = vmatpush.bf16.msra.mxu2 %v14563_v3  ;;  %v14671_v2 = vor.u32 %v16305_v59, %v14670_v58  ;;  %v8321_v46 = vmax.f32 %v17001_v13, 0.0  ;;  %v14790_v3 = vld [vmem:[#allocation10 + $0x390] sm:$0xf]  ;;  %v16299_v13 = vld [vmem:[#allocation10 + $0x278] sm:$0xf0] }
 0x737   :  { %9628 = vmatpush.bf16.msrb.mxu0 %v14359_v20  ;;  %9643 = vmatpush.bf16.msra.mxu1 %v14431_v19  ;;  %v14791_v1 = vor.u32 %v16335_v56, %v14790_v3  ;;  %v14646_v20 = vld [vmem:[#allocation10 + $0x270] sm:$0xf]  ;;  %v14850_v19 = vld [vmem:[#allocation10 + $0x408] sm:$0xf]  ;;  %v16347_v59 = vld [vmem:[#allocation10 + $0x3f8] sm:$0xf0]  ;;  %v8109_v56 = vpop.f32.mrf.mxu3 }
 0x738   :  { %v14647_v17 = vor.u32 %v16299_v13, %v14646_v20  ;;  %v14851_v54 = vor.u32 %v16350_v23, %v14850_v19  ;;  %v14838_v58 = vld [vmem:[#allocation10 + $0x3f0] sm:$0xf]  ;;  %v16323_v6 = vld [vmem:[#allocation10 + $0x338] sm:$0xf0]  ;;  %v14814_v14 = vld [vmem:[#allocation10 + $0x3c0] sm:$0xf] }
 0x739   :  { %v14839_v16 = vor.u32 %v16347_v59, %v14838_v58  ;;  %v16371_v20 = vld [vmem:[#allocation10 + $0x4b8] sm:$0xf0]  ;;  %v16341_v13 = vld [vmem:[#allocation10 + $0x3c8] sm:$0xf0]  ;;  %v14516_v28 = vld [vmem:[#allocation10 + $0x174] sm:$0xf0] }
 0x73a   :  { %9663 = vmatpush.bf16.msrb.mxu3 %v14695_v7  ;;  %9654 = vmatpush.bf16.msra.mxu2 %v14551_v38  ;;  %v17132_v7 = vpack.c.bf16 %v8321_v46, %v8321_v46  ;;  %v14863_v38 = vor.u32 %v16353_v12, %v14862_v41  ;;  %v16344_v46 = vld [vmem:[#allocation10 + $0x3e0] sm:$0xf0]  ;;  %v8135_v21 = vpop.f32.mrf.mxu1  ;;  %v16265_v45 = vld [vmem:[#allocation10 + $0x16c] sm:$0xf]  ;;  %v14815_v19 = vor.u32 %v16341_v13, %v14814_v14  ;;  %v14922_v23 = vld [vmem:[#allocation10 + $0x498] sm:$0xf] }
 0x73b   :  { %9688 = vmatpush.bf16.msrb.mxu1 %v14899_v47  ;;  %9629 = vmatpush.bf16.msrb.mxu0 %v14347_v29  ;;  %v16296_v47 = vld [vmem:[#allocation10 + $0x260] sm:$0xf0]  ;;  %v14971_v29 = vor.u32 %v16380_v11, %v14970_v5  ;;  %v14827_v12 = vor.u32 %v16344_v46, %v14826_v0  ;;  %v14730_v5 = vld [vmem:[#allocation10 + $0x318] sm:$0xf]  ;;  %v14910_v58 = vld [vmem:[#allocation10 + $0x480] sm:$0xf] }
 0x73c   :  { %9644 = vmatmul.bf16.vlgmr.msra.gmra.mxu1 %v17125_v18  ;;  %v14635_v42 = vor.u32 %v16296_v47, %v14634_v37  ;;  %v16320_v11 = vld [vmem:[#allocation10 + $0x320] sm:$0xf0]  ;;  %v8324_v37 = vmax.f32 %v17091_v57, 0.0  ;;  %v16365_v32 = vld [vmem:[#allocation10 + $0x488] sm:$0xf0] }
 0x73d   :  { %v16241_v57 = vld [vmem:[#allocation10 + $0xac] sm:$0xf]  ;;  %v14408_v0 = vld [vmem:[#allocation10 + $0x9c] sm:$0xf0]  ;;  %v14480_v56 = vld [vmem:[#allocation10 + $0x12c] sm:$0xf0] }
 0x73e   :  { %9664 = vmatpush.bf16.msrb.mxu3 %v14683_v34  ;;  %9655 = vmatpush.bf16.msra.mxu2 %v14539_v40  ;;  %v14766_v34 = vld [vmem:[#allocation10 + $0x360] sm:$0xf]  ;;  %v16377_v40 = vld [vmem:[#allocation10 + $0x4e8] sm:$0xf0] }
 0x73f   :  { %9689 = vmatpush.bf16.msrb.mxu1 %v14887_v30  ;;  %9630 = vmatpush.bf16.msrb.mxu0 %v14335_v43  ;;  %v14767_v51 = vor.u32 %v16329_v35, %v14766_v34  ;;  %v14622_v30 = vld [vmem:[#allocation10 + $0x240] sm:$0xf]  ;;  %v14959_v53 = vor.u32 %v16377_v40, %v14958_v49  ;;  %v14754_v43 = vld [vmem:[#allocation10 + $0x348] sm:$0xf]  ;;  %v14731_v35 = vor.u32 %v16320_v11, %v14730_v5  ;;  %v8159_v14 = vpop.f32.mrf.mxu3  ;;  %v16280_v5 = vld [vmem:[#allocation10 + $0x1e4] sm:$0xf] }
 0x740   :  { %v14623_v60 = vor.u32 %v16293_v52, %v14622_v30  ;;  %v14504_v49 = vld [vmem:[#allocation10 + $0x15c] sm:$0xf0]  ;;  %v14612_v52 = vld [vmem:[#allocation10 + $0x234] sm:$0xf0] }
 0x741   :  { %v14718_v40 = vld [vmem:[#allocation10 + $0x300] sm:$0xf] }
 0x742   :  { %9665 = vmatpush.bf16.msrb.mxu3 %v14671_v2  ;;  %9656 = vmatpush.bf16.msra.mxu2 %v14527_v39  ;;  %v16326_v2 = vld [vmem:[#allocation10 + $0x350] sm:$0xf0] }
 0x743   :  { %9675 = vmatpush.bf16.msra.mxu0 %v14803_v55  ;;  %9690 = vmatpush.bf16.msrb.mxu1 %v14875_v8  ;;  %v16374_v39 = vld [vmem:[#allocation10 + $0x4d0] sm:$0xf0]  ;;  %v8120_v55 = vpop.f32.mrf.mxu0  ;;  %v14755_v8 = vor.u32 %v16326_v2, %v14754_v43  ;;  %v16259_v43 = vld [vmem:[#allocation10 + $0x13c] sm:$0xf]  ;;  %v14492_v2 = vld [vmem:[#allocation10 + $0x144] sm:$0xf0] }
 0x744   :  { %9631 = vmatmul.bf16.vlgmr.msrb.gmra.mxu0 %v17130_v4  ;;  %v8121_v3 = vadd.f32 %v8120_v55, %v1526_v25  ;;  %v14947_v27 = vor.u32 %v16374_v39, %v14946_v50  ;;  %v14420_v25 = vld [vmem:[#allocation10 + $0xb4] sm:$0xf0]  ;;  %v14495_v46 = vor.u32 %v16259_v43, %v14492_v2  ;;  %v16226_v2 = vld [vmem:[#allocation10 + $0x34] sm:$0xf] }
 0x745   :  { %9657 = vmatmul.bf16.vlgmr.msra.gmra.mxu2 %v17132_v7 }
 0x746   :  { %9701 = vmatpush.bf16.msrb.mxu2 %v14995_v44  ;;  %9666 = vmatpush.bf16.msrb.mxu3 %v14659_v31  ;;  %v8056_v44 = vadd.f32 %v17115_v9, %v8043_v62  ;;  %v8134_v41 = vadd.f32 %v8133_v24, %v8121_v3  ;;  %v17143_v9 = vpack.c.bf16 %v8322_v36, %v8322_v36  ;;  %v8323_v62 = vmax.f32 %v17061_v22, 0.0  ;;  %v16286_v36 = vld [vmem:[#allocation10 + $0x214] sm:$0xf]  ;;  %v16256_v3 = vld [vmem:[#allocation10 + $0x124] sm:$0xf] }
 0x747   :  { %9676 = vmatpush.bf16.msra.mxu0 %v14791_v1  ;;  %9691 = vmatpush.bf16.msrb.mxu1 %v14863_v38  ;;  %v14934_v1 = vld [vmem:[#allocation10 + $0x4b0] sm:$0xf] }
 0x748   :  { %v8069_v31 = vadd.f32 %v17119_v48, %v8056_v44  ;;  %v14935_v38 = vor.u32 %v16371_v20, %v14934_v1  ;;  %v14600_v44 = vld [vmem:[#allocation10 + $0x21c] sm:$0xf0]  ;;  %v16253_v1 = vld [vmem:[#allocation10 + $0x10c] sm:$0xf]  ;;  %v14468_v20 = vld [vmem:[#allocation10 + $0x114] sm:$0xf0] }
 0x749   :  { %v14471_v11 = vor.u32 %v16253_v1, %v14468_v20  ;;  %v16401_v1 = vld [vmem:[#allocation10 + $0x5a8] sm:$0xf0] }
 0x74a   :  { %9702 = vmatpush.bf16.msrb.mxu2 %v14983_v33  ;;  %9667 = vmatpush.bf16.msrb.mxu3 %v14647_v17  ;;  %v14743_v33 = vor.u32 %v16323_v6, %v14742_v15  ;;  %v8082_v48 = vadd.f32 %v17117_v26, %v8069_v31  ;;  %v8146_v17 = vpop.f32.mrf.mxu2  ;;  %v16235_v15 = vld [vmem:[#allocation10 + $0x7c] sm:$0xf]  ;;  %v14396_v6 = vld [vmem:[#allocation10 + $0x84] sm:$0xf0]  ;;  %v14483_v31 = vor.u32 %v16256_v3, %v14480_v56  ;;  %v14900_v3 = vld [vmem:[#allocation10 + $0x474] sm:$0xf0] }
 0x74b   :  { %9677 = vmatpush.bf16.msra.mxu0 %v14779_v61  ;;  %9692 = vmatpush.bf16.msrb.mxu1 %v14851_v54  ;;  %v16368_v61 = vld [vmem:[#allocation10 + $0x4a0] sm:$0xf0]  ;;  %v17148_v47 = vadd.f32 %v8146_v17, %v8134_v41  ;;  %v8122_v24 = vpop.f32.mrf.mxu0  ;;  %v16262_v54 = vld [vmem:[#allocation10 + $0x154] sm:$0xf]  ;;  %v16283_v41 = vld [vmem:[#allocation10 + $0x1fc] sm:$0xf]  ;;  %v14399_v13 = vor.u32 %v16235_v15, %v14396_v6 }
 0x74c   :  { %v8095_v34 = vadd.f32 %v17121_v63, %v8082_v48  ;;  %v14923_v26 = vor.u32 %v16368_v61, %v14922_v23  ;;  %v14507_v30 = vor.u32 %v16262_v54, %v14504_v49  ;;  %v16289_v63 = vld [vmem:[#allocation10 + $0x22c] sm:$0xf]  ;;  %v14576_v48 = vld [vmem:[#allocation10 + $0x1ec] sm:$0xf0]  ;;  %v15090_v17 = vld [vmem:[#allocation10 + $0x5e8] sm:$0xf] }
 0x74d   :  { %v14615_v55 = vor.u32 %v16289_v63, %v14612_v52  ;;  %v16250_v23 = vld [vmem:[#allocation10 + $0xf4] sm:$0xf]  ;;  %v14456_v61 = vld [vmem:[#allocation10 + $0xfc] sm:$0xf0]  ;;  %v16277_v54 = vld [vmem:[#allocation10 + $0x1cc] sm:$0xf]  ;;  %v8160_v49 = vadd.f32 %v8159_v14, %v17148_v47  ;;  %v8161_v63 = vpop.f32.mrf.mxu3 }
 0x74e   :  { %9703 = vmatpush.bf16.msrb.mxu2 %v14971_v29  ;;  %9668 = vmatpush.bf16.msrb.mxu3 %v14635_v42  ;;  %v14519_v29 = vor.u32 %v16265_v45, %v14516_v28  ;;  %v16317_v42 = vld [vmem:[#allocation10 + $0x308] sm:$0xf0]  ;;  %v8108_v59 = vadd.f32 %v17136_v10, %v8095_v34  ;;  %v14911_v10 = vor.u32 %v16365_v32, %v14910_v58  ;;  %v16232_v28 = vld [vmem:[#allocation10 + $0x64] sm:$0xf]  ;;  %v16407_v58 = vld [vmem:[#allocation10 + $0x5d8] sm:$0xf0] }
 0x74f   :  { %9678 = vmatpush.bf16.msra.mxu0 %v14767_v51  ;;  %9693 = vmatpush.bf16.msrb.mxu1 %v14839_v16  ;;  %v17152_v51 = vpack.c.bf16 %v8324_v37, %v8324_v37  ;;  %v14423_v16 = vor.u32 %v16241_v57, %v14420_v25  ;;  %v16229_v34 = vld [vmem:[#allocation10 + $0x4c] sm:$0xf]  ;;  %v16247_v32 = vld [vmem:[#allocation10 + $0xdc] sm:$0xf]  ;;  %v14444_v57 = vld [vmem:[#allocation10 + $0xe4] sm:$0xf0] }
 0x750   :  { %v8325_v50 = vmax.f32 %v8108_v59, 0.0  ;;  %v16271_v15 = vld [vmem:[#allocation10 + $0x19c] sm:$0xf] }
 0x752   :  { %9704 = vmatpush.bf16.msrb.mxu2 %v14959_v53  ;;  %9669 = vmatpush.bf16.msrb.mxu3 %v14623_v60  ;;  %v14719_v53 = vor.u32 %v16317_v42, %v14718_v40  ;;  %v8148_v39 = vpop.f32.mrf.mxu2  ;;  %v16238_v60 = vld [vmem:[#allocation10 + $0x94] sm:$0xf]  ;;  %v17158_v21 = vpack.c.bf16 %v8325_v50, %v8325_v50  ;;  %v14564_v40 = vld [vmem:[#allocation10 + $0x1d4] sm:$0xf0]  ;;  %v15078_v42 = vld [vmem:[#allocation10 + $0x5d0] sm:$0xf] }
 0x753   :  { %9679 = vmatpush.bf16.msra.mxu0 %v14755_v8  ;;  %9694 = vmatpush.bf16.msrb.mxu1 %v14827_v12  ;;  %v17156_v8 = vpack.c.bf16 %v8323_v62, %v8323_v62  ;;  %v14411_v22 = vor.u32 %v16238_v60, %v14408_v0  ;;  %v14588_v12 = vld [vmem:[#allocation10 + $0x204] sm:$0xf0]  ;;  %v8172_v59 = vpop.f32.mrf.mxu0  ;;  %v15079_v25 = vor.u32 %v16407_v58, %v15078_v42  ;;  %v14360_v62 = vld [vmem:[#allocation10 + $0x3c] sm:$0xf0]  ;;  %v15066_v39 = vld [vmem:[#allocation10 + $0x5b8] sm:$0xf] }
 0x754   :  { %v14591_v45 = vor.u32 %v16283_v41, %v14588_v12  ;;  %v14567_v43 = vor.u32 %v16277_v54, %v14564_v40  ;;  %v14552_v50 = vld [vmem:[#allocation10 + $0x1bc] sm:$0xf0]  ;;  %v16244_v60 = vld [vmem:[#allocation10 + $0xc4] sm:$0xf]  ;;  %v14432_v0 = vld [vmem:[#allocation10 + $0xcc] sm:$0xf0] }
 0x755   :  { %9670 = vmatmul.bf16.vlgmr.msrb.gmra.mxu3 %v17143_v9  ;;  %v14540_v41 = vld [vmem:[#allocation10 + $0x1a4] sm:$0xf0]  ;;  %v15054_v12 = vld [vmem:[#allocation10 + $0x5a0] sm:$0xf]  ;;  %v16334_v58 = vld [vmem:[#allocation10 + $0x394] sm:$0xf] }
 0x756   :  { %9705 = vmatpush.bf16.msrb.mxu2 %v14947_v27  ;;  %v14603_v27 = vor.u32 %v16286_v36, %v14600_v44  ;;  %v14363_v36 = vor.u32 %v16226_v2, %v14360_v62  ;;  %v16361_v44 = vld [vmem:[#allocation10 + $0x46c] sm:$0xf]  ;;  %v16352_v2 = vld [vmem:[#allocation10 + $0x424] sm:$0xf]  ;;  %v14864_v62 = vld [vmem:[#allocation10 + $0x42c] sm:$0xf0] }
 0x757   :  { %9680 = vmatpush.bf16.msra.mxu0 %v14743_v33  ;;  %9695 = vmatpush.bf16.msrb.mxu1 %v14815_v19  ;;  %v8185_v33 = vpop.f32.mrf.mxu1  ;;  %v16410_v19 = vld [vmem:[#allocation10 + $0x5f0] sm:$0xf0]  ;;  %v14903_v14 = vor.u32 %v16361_v44, %v14900_v3  ;;  %v16349_v3 = vld [vmem:[#allocation10 + $0x40c] sm:$0xf] }
 0x758   :  { %v15091_v37 = vor.u32 %v16410_v19, %v15090_v17  ;;  %v14528_v17 = vld [vmem:[#allocation10 + $0x18c] sm:$0xf0]  ;;  %v16337_v19 = vld [vmem:[#allocation10 + $0x3ac] sm:$0xf] }
 0x75a   :  { %9706 = vmatpush.bf16.msrb.mxu2 %v14935_v38  ;;  %9696 = vmatmul.bf16.vlgmr.msrb.gmra.mxu1 %v17152_v51  ;;  %v14384_v38 = vld [vmem:[#allocation10 + $0x6c] sm:$0xf0]  ;;  %v17165_v6 = vpop.f32.mrf.mxu2 }
 0x75b   :  { %9740 = vmatpush.bf16.msra.mxu1 %v14519_v29  ;;  %9681 = vmatpush.bf16.msra.mxu0 %v14731_v35  ;;  %v14387_v24 = vor.u32 %v16232_v28, %v14384_v38  ;;  %v14579_v29 = vor.u32 %v16280_v5, %v14576_v48  ;;  %v14372_v35 = vld [vmem:[#allocation10 + $0x54] sm:$0xf0]  ;;  %v8174_v20 = vpop.f32.mrf.mxu0  ;;  %v14888_v28 = vld [vmem:[#allocation10 + $0x45c] sm:$0xf0]  ;;  %v16220_v38 = vld [vmem:[#allocation10 + $0x4] sm:$0xf] }
 0x75c   :  { %9714 = vmatpush.bf16.msra.mxu3 %v15091_v37  ;;  %v14375_v52 = vor.u32 %v16229_v34, %v14372_v35  ;;  %v14336_v5 = vld [vmem:[#allocation10 + $0xc] sm:$0xf0]  ;;  %v16268_v48 = vld [vmem:[#allocation10 + $0x184] sm:$0xf]  ;;  %v16398_v37 = vld [vmem:[#allocation10 + $0x590] sm:$0xf0] }
 0x75d   :  { %v14996_v34 = vld [vmem:[#allocation10 + $0x534] sm:$0xf0]  ;;  %v14339_v54 = vor.u32 %v16220_v38, %v14336_v5  ;;  %v14531_v40 = vor.u32 %v16268_v48, %v14528_v17  ;;  %v15006_v20 = vld [vmem:[#allocation10 + $0x540] sm:$0xf]  ;;  %v16346_v5 = vld [vmem:[#allocation10 + $0x3f4] sm:$0xf] }
 0x75e   :  { %9707 = vmatpush.bf16.msrb.mxu2 %v14923_v26  ;;  %v14459_v26 = vor.u32 %v16250_v23, %v14456_v61  ;;  %v14804_v23 = vld [vmem:[#allocation10 + $0x3b4] sm:$0xf0]  ;;  %v15042_v61 = vld [vmem:[#allocation10 + $0x588] sm:$0xf] }
 0x75f   :  { %9741 = vmatpush.bf16.msra.mxu1 %v14507_v30  ;;  %9682 = vmatpush.bf16.msra.mxu0 %v14719_v53  ;;  %v8173_v30 = vadd.f32 %v8172_v59, %v8160_v49  ;;  %v8187_v53 = vpop.f32.mrf.mxu1  ;;  %v15043_v35 = vor.u32 %v16398_v37, %v15042_v61  ;;  %v16355_v49 = vld [vmem:[#allocation10 + $0x43c] sm:$0xf]  ;;  %v14807_v42 = vor.u32 %v16337_v19, %v14804_v23  ;;  %v14708_v38 = vld [vmem:[#allocation10 + $0x2f4] sm:$0xf0]  ;;  %v16325_v23 = vld [vmem:[#allocation10 + $0x34c] sm:$0xf] }
 0x760   :  { %9715 = vmatpush.bf16.msra.mxu3 %v15079_v25  ;;  %v15030_v25 = vld [vmem:[#allocation10 + $0x570] sm:$0xf]  ;;  %v14984_v53 = vld [vmem:[#allocation10 + $0x51c] sm:$0xf0]  ;;  %v14756_v61 = vld [vmem:[#allocation10 + $0x354] sm:$0xf0] }
 0x761   :  { %v17163_v47 = vadd.f32 %v8185_v33, %v8173_v30  ;;  %v15055_v33 = vor.u32 %v16401_v1, %v15054_v12  ;;  %v16395_v30 = vld [vmem:[#allocation10 + $0x578] sm:$0xf0]  ;;  %v16376_v1 = vld [vmem:[#allocation10 + $0x4e4] sm:$0xf]  ;;  %v16373_v37 = vld [vmem:[#allocation10 + $0x4cc] sm:$0xf] }
 0x762   :  { %9708 = vmatpush.bf16.msrb.mxu2 %v14911_v10  ;;  %9683 = vmatmul.bf16.vlgmr.msra.gmra.mxu0 %v17156_v8  ;;  %v16274_v10 = vld [vmem:[#allocation10 + $0x1b4] sm:$0xf]  ;;  %v8200_v59 = vpop.f32.mrf.mxu2 }
 0x763   :  { %9727 = vmatpush.bf16.msrb.mxu0 %v14423_v16  ;;  %9742 = vmatpush.bf16.msra.mxu1 %v14495_v46  ;;  %v14447_v16 = vor.u32 %v16247_v32, %v14444_v57  ;;  %v14555_v56 = vor.u32 %v16274_v10, %v14552_v50  ;;  %v14792_v57 = vld [vmem:[#allocation10 + $0x39c] sm:$0xf0] }
 0x764   :  { %v14795_v10 = vor.u32 %v16334_v58, %v14792_v57  ;;  %v14759_v58 = vor.u32 %v16325_v23, %v14756_v61  ;;  %v16322_v57 = vld [vmem:[#allocation10 + $0x334] sm:$0xf]  ;;  %v14618_v23 = vld [vmem:[#allocation10 + $0x230] sm:$0xf]  ;;  %v16291_v61 = vld [vmem:[#allocation10 + $0x238] sm:$0xf0] }
 0x765   :  { %9709 = vmatmul.bf16.vlgmr.msrb.gmra.mxu2 %v17158_v21 }
 0x766   :  { %9753 = vmatpush.bf16.msra.mxu2 %v14615_v55  ;;  %v16404_v55 = vld [vmem:[#allocation10 + $0x5c0] sm:$0xf0] }
 0x767   :  { %9728 = vmatpush.bf16.msrb.mxu0 %v14411_v22  ;;  %9743 = vmatpush.bf16.msra.mxu1 %v14483_v31  ;;  %v15067_v46 = vor.u32 %v16404_v55, %v15066_v39  ;;  %v16223_v22 = vld [vmem:[#allocation10 + $0x1c] sm:$0xf]  ;;  %v14435_v31 = vor.u32 %v16244_v60, %v14432_v0  ;;  %v14780_v39 = vld [vmem:[#allocation10 + $0x384] sm:$0xf0]  ;;  %v15018_v55 = vld [vmem:[#allocation10 + $0x558] sm:$0xf]  ;;  %v14867_v0 = vor.u32 %v16352_v2, %v14864_v62 }
 0x768   :  { %v16392_v60 = vld [vmem:[#allocation10 + $0x560] sm:$0xf0]  ;;  %v14816_v62 = vld [vmem:[#allocation10 + $0x3cc] sm:$0xf0] }
 0x769   :  { %9716 = vmatpush.bf16.msra.mxu3 %v15067_v46  ;;  %v16379_v46 = vld [vmem:[#allocation10 + $0x4fc] sm:$0xf]  ;;  %v15019_v44 = vor.u32 %v16392_v60, %v15018_v55  ;;  %v16340_v2 = vld [vmem:[#allocation10 + $0x3c4] sm:$0xf] }
 0x76a   :  { %9754 = vmatpush.bf16.msra.mxu2 %v14603_v27  ;;  %v14348_v27 = vld [vmem:[#allocation10 + $0x24] sm:$0xf0]  ;;  %v16319_v60 = vld [vmem:[#allocation10 + $0x31c] sm:$0xf] }
 0x76b   :  { %9729 = vmatpush.bf16.msrb.mxu0 %v14399_v13  ;;  %9744 = vmatpush.bf16.msra.mxu1 %v14471_v11  ;;  %v16358_v13 = vld [vmem:[#allocation10 + $0x454] sm:$0xf]  ;;  %v14543_v11 = vor.u32 %v16271_v15, %v14540_v41  ;;  %v16328_v15 = vld [vmem:[#allocation10 + $0x364] sm:$0xf]  ;;  %v17172_v41 = vpop.f32.mrf.mxu1 }
 0x76d   :  { %9717 = vmatpush.bf16.msra.mxu3 %v15055_v33  ;;  %v14960_v33 = vld [vmem:[#allocation10 + $0x4ec] sm:$0xf0] }
 0x76e   :  { %9755 = vmatpush.bf16.msra.mxu2 %v14591_v45  ;;  %v14351_v45 = vor.u32 %v16223_v22, %v14348_v27  ;;  %v17170_v22 = vpop.f32.mrf.mxu3  ;;  %v14963_v19 = vor.u32 %v16376_v1, %v14960_v33  ;;  %v14720_v33 = vld [vmem:[#allocation10 + $0x30c] sm:$0xf0] }
 0x76f   :  { %9730 = vmatpush.bf16.msrb.mxu0 %v14387_v24  ;;  %9745 = vmatpush.bf16.msra.mxu1 %v14459_v26  ;;  %v14891_v24 = vor.u32 %v16358_v13, %v14888_v28  ;;  %v14876_v26 = vld [vmem:[#allocation10 + $0x444] sm:$0xf0]  ;;  %v16313_v28 = vld [vmem:[#allocation10 + $0x2ec] sm:$0xf] }
 0x770   :  { %v14879_v63 = vor.u32 %v16355_v49, %v14876_v26  ;;  %v14711_v48 = vor.u32 %v16313_v28, %v14708_v38  ;;  %v16343_v49 = vld [vmem:[#allocation10 + $0x3dc] sm:$0xf]  ;;  %v14828_v26 = vld [vmem:[#allocation10 + $0x3e4] sm:$0xf0]  ;;  %v16364_v28 = vld [vmem:[#allocation10 + $0x484] sm:$0xf] }
 0x771   :  { %9718 = vmatpush.bf16.msra.mxu3 %v15043_v35  ;;  %v14696_v35 = vld [vmem:[#allocation10 + $0x2dc] sm:$0xf0]  ;;  %v14912_v38 = vld [vmem:[#allocation10 + $0x48c] sm:$0xf0] }
 0x772   :  { %9756 = vmatpush.bf16.msra.mxu2 %v14579_v29  ;;  %v16385_v29 = vld [vmem:[#allocation10 + $0x52c] sm:$0xf] }
 0x773   :  { %9731 = vmatpush.bf16.msrb.mxu0 %v14375_v52  ;;  %9746 = vmatpush.bf16.msra.mxu1 %v14447_v16  ;;  %v14999_v32 = vor.u32 %v16385_v29, %v14996_v34  ;;  %v16382_v52 = vld [vmem:[#allocation10 + $0x514] sm:$0xf]  ;;  %v16331_v16 = vld [vmem:[#allocation10 + $0x37c] sm:$0xf]  ;;  %v14948_v29 = vld [vmem:[#allocation10 + $0x4d4] sm:$0xf0]  ;;  %v8239_v59 = vpop.f32.mrf.mxu1 }
 0x774   :  { %v14987_v50 = vor.u32 %v16382_v52, %v14984_v53  ;;  %v14783_v27 = vor.u32 %v16331_v16, %v14780_v39  ;;  %v16310_v34 = vld [vmem:[#allocation10 + $0x2d4] sm:$0xf]  ;;  %v14936_v52 = vld [vmem:[#allocation10 + $0x4bc] sm:$0xf0]  ;;  %v16307_v53 = vld [vmem:[#allocation10 + $0x2bc] sm:$0xf] }
 0x775   :  { %v16267_v39 = vld [vmem:[#allocation10 + $0x178] sm:$0xf0]  ;;  %v16298_v59 = vld [vmem:[#allocation10 + $0x274] sm:$0xf] }
 0x776   :  { %9757 = vmatpush.bf16.msra.mxu2 %v14567_v43  ;;  %v15031_v43 = vor.u32 %v16395_v30, %v15030_v25  ;;  %v14744_v25 = vld [vmem:[#allocation10 + $0x33c] sm:$0xf0]  ;;  %v16370_v30 = vld [vmem:[#allocation10 + $0x4b4] sm:$0xf] }
 0x777   :  { %9732 = vmatpush.bf16.msrb.mxu0 %v14363_v36  ;;  %9747 = vmatpush.bf16.msra.mxu1 %v14435_v31  ;;  %v14972_v36 = vld [vmem:[#allocation10 + $0x504] sm:$0xf0]  ;;  %v14768_v31 = vld [vmem:[#allocation10 + $0x36c] sm:$0xf0]  ;;  %v14747_v16 = vor.u32 %v16322_v57, %v14744_v25  ;;  %v14939_v55 = vor.u32 %v16370_v30, %v14936_v52  ;;  %v14606_v25 = vld [vmem:[#allocation10 + $0x218] sm:$0xf] }
 0x778   :  { %9719 = vmatpush.bf16.msra.mxu3 %v15031_v43  ;;  %v14975_v12 = vor.u32 %v16379_v46, %v14972_v36  ;;  %v14771_v17 = vor.u32 %v16328_v15, %v14768_v31  ;;  %v14684_v43 = vld [vmem:[#allocation10 + $0x2c4] sm:$0xf0]  ;;  %v16367_v46 = vld [vmem:[#allocation10 + $0x49c] sm:$0xf]  ;;  %v17176_v36 = vpop.f32.mrf.mxu2  ;;  %v16288_v30 = vld [vmem:[#allocation10 + $0x220] sm:$0xf0] }
 0x779   :  { %v14486_v52 = vld [vmem:[#allocation10 + $0x128] sm:$0xf] }
 0x77a   :  { %9758 = vmatpush.bf16.msra.mxu2 %v14555_v56  ;;  %9748 = vmatmul.bf16.vlgmr.msra.gmra.mxu1 %v17125_v18  ;;  %v14852_v56 = vld [vmem:[#allocation10 + $0x414] sm:$0xf0] }
 0x77b   :  { %9792 = vmatpush.bf16.msrb.mxu1 %v14903_v14  ;;  %9733 = vmatpush.bf16.msrb.mxu0 %v14351_v45  ;;  %v16389_v14 = vld [vmem:[#allocation10 + $0x548] sm:$0xf0]  ;;  %v14855_v13 = vor.u32 %v16349_v3, %v14852_v56  ;;  %v14924_v3 = vld [vmem:[#allocation10 + $0x4a4] sm:$0xf0]  ;;  %v16304_v56 = vld [vmem:[#allocation10 + $0x2a4] sm:$0xf] }
 0x77c   :  { %9720 = vmatpush.bf16.msra.mxu3 %v15019_v44  ;;  %v15007_v45 = vor.u32 %v16389_v14, %v15006_v20  ;;  %v14819_v44 = vor.u32 %v16340_v2, %v14816_v62  ;;  %v16264_v14 = vld [vmem:[#allocation10 + $0x160] sm:$0xf0]  ;;  %v14402_v2 = vld [vmem:[#allocation10 + $0x80] sm:$0xf]  ;;  %v14607_v62 = vor.u32 %v16288_v30, %v14606_v25  ;;  %v14438_v30 = vld [vmem:[#allocation10 + $0xc8] sm:$0xf] }
 0x77d   :  { %v16276_v25 = vld [vmem:[#allocation10 + $0x1c0] sm:$0xf0] }
 0x77e   :  { %9759 = vmatpush.bf16.msra.mxu2 %v14543_v11  ;;  %v14840_v11 = vld [vmem:[#allocation10 + $0x3fc] sm:$0xf0] }
 0x77f   :  { %9793 = vmatpush.bf16.msrb.mxu1 %v14891_v24  ;;  %9734 = vmatpush.bf16.msrb.mxu0 %v14339_v54  ;;  %v14843_v24 = vor.u32 %v16346_v5, %v14840_v11  ;;  %v17174_v54 = vpop.f32.mrf.mxu0  ;;  %v14426_v5 = vld [vmem:[#allocation10 + $0xb0] sm:$0xf]  ;;  %v16243_v11 = vld [vmem:[#allocation10 + $0xb8] sm:$0xf0] }
 0x780   :  { %9721 = vmatpush.bf16.msra.mxu3 %v15007_v45  ;;  %v14927_v45 = vor.u32 %v16367_v46, %v14924_v3  ;;  %v14474_v46 = vld [vmem:[#allocation10 + $0x110] sm:$0xf] }
 0x782   :  { %9760 = vmatpush.bf16.msra.mxu2 %v14531_v40  ;;  %9735 = vmatmul.bf16.vlgmr.msrb.gmra.mxu0 %v17130_v4  ;;  %v14699_v40 = vor.u32 %v16310_v34, %v14696_v35  ;;  %v16261_v34 = vld [vmem:[#allocation10 + $0x148] sm:$0xf0]  ;;  %v14915_v35 = vor.u32 %v16364_v28, %v14912_v38  ;;  %v14462_v28 = vld [vmem:[#allocation10 + $0xf8] sm:$0xf]  ;;  %v16252_v38 = vld [vmem:[#allocation10 + $0x100] sm:$0xf0] }
 0x783   :  { %9779 = vmatpush.bf16.msra.mxu0 %v14807_v42  ;;  %9794 = vmatpush.bf16.msrb.mxu1 %v14879_v63  ;;  %v8213_v42 = vpop.f32.mrf.mxu3  ;;  %v14831_v63 = vor.u32 %v16343_v49, %v14828_v26  ;;  %v14427_v49 = vor.u32 %v16243_v11, %v14426_v5  ;;  %v14414_v26 = vld [vmem:[#allocation10 + $0x98] sm:$0xf] }
 0x784   :  { %9766 = vmatpush.bf16.msrb.mxu3 %v14711_v48  ;;  %v16301_v48 = vld [vmem:[#allocation10 + $0x28c] sm:$0xf]  ;;  %v14619_v42 = vor.u32 %v16291_v61, %v14618_v23  ;;  %v14570_v23 = vld [vmem:[#allocation10 + $0x1d0] sm:$0xf]  ;;  %v16279_v61 = vld [vmem:[#allocation10 + $0x1d8] sm:$0xf0] }
 0x785   :  { %9761 = vmatmul.bf16.vlgmr.msra.gmra.mxu2 %v17132_v7 }
 0x786   :  { %9805 = vmatpush.bf16.msrb.mxu2 %v14999_v32  ;;  %v14951_v32 = vor.u32 %v16373_v37, %v14948_v29  ;;  %v14498_v29 = vld [vmem:[#allocation10 + $0x140] sm:$0xf] }
 0x787   :  { %9780 = vmatpush.bf16.msra.mxu0 %v14795_v10  ;;  %9795 = vmatpush.bf16.msrb.mxu1 %v14867_v0  ;;  %v14687_v10 = vor.u32 %v16307_v53, %v14684_v43  ;;  %v14732_v0 = vld [vmem:[#allocation10 + $0x324] sm:$0xf0]  ;;  %v8226_v15 = vpop.f32.mrf.mxu0  ;;  %v14499_v57 = vor.u32 %v16261_v34, %v14498_v29  ;;  %v16258_v53 = vld [vmem:[#allocation10 + $0x130] sm:$0xf0]  ;;  %v16249_v29 = vld [vmem:[#allocation10 + $0xe8] sm:$0xf0]  ;;  %v8199_v34 = vadd.f32 %v17165_v6, %v17163_v47 }
 0x788   :  { %9767 = vmatpush.bf16.msrb.mxu3 %v14699_v40  ;;  %v14735_v20 = vor.u32 %v16319_v60, %v14732_v0  ;;  %v8252_v40 = vpop.f32.mrf.mxu2  ;;  %v16285_v60 = vld [vmem:[#allocation10 + $0x208] sm:$0xf0]  ;;  %v14906_v6 = vld [vmem:[#allocation10 + $0x470] sm:$0xf] }
 0x789   :  { %v14571_v40 = vor.u32 %v16279_v61, %v14570_v23  ;;  %v14798_v23 = vld [vmem:[#allocation10 + $0x398] sm:$0xf]  ;;  %v16336_v61 = vld [vmem:[#allocation10 + $0x3a0] sm:$0xf0] }
 0x78a   :  { %9806 = vmatpush.bf16.msrb.mxu2 %v14987_v50  ;;  %v14522_v50 = vld [vmem:[#allocation10 + $0x170] sm:$0xf] }
 0x78b   :  { %9781 = vmatpush.bf16.msra.mxu0 %v14783_v27  ;;  %9796 = vmatpush.bf16.msrb.mxu1 %v14855_v13  ;;  %v14672_v27 = vld [vmem:[#allocation10 + $0x2ac] sm:$0xf0]  ;;  %v14523_v31 = vor.u32 %v16267_v39, %v14522_v50  ;;  %v16316_v13 = vld [vmem:[#allocation10 + $0x304] sm:$0xf]  ;;  %v14636_v50 = vld [vmem:[#allocation10 + $0x264] sm:$0xf0]  ;;  %v14487_v39 = vor.u32 %v16258_v53, %v14486_v52  ;;  %v17181_v3 = vpop.f32.mrf.mxu3 }
 0x78c   :  { %9768 = vmatpush.bf16.msrb.mxu3 %v14687_v10  ;;  %v14675_v1 = vor.u32 %v16304_v56, %v14672_v27  ;;  %v16237_v10 = vld [vmem:[#allocation10 + $0x88] sm:$0xf0]  ;;  %v14390_v27 = vld [vmem:[#allocation10 + $0x68] sm:$0xf]  ;;  %v16363_v53 = vld [vmem:[#allocation10 + $0x478] sm:$0xf0] }
 0x78d   :  { %v14403_v56 = vor.u32 %v16237_v10, %v14402_v2  ;;  %v14354_v2 = vld [vmem:[#allocation10 + $0x20] sm:$0xf] }
 0x78e   :  { %9807 = vmatpush.bf16.msrb.mxu2 %v14975_v12  ;;  %v14510_v12 = vld [vmem:[#allocation10 + $0x158] sm:$0xf] }
 0x78f   :  { %9782 = vmatpush.bf16.msra.mxu0 %v14771_v17  ;;  %9797 = vmatpush.bf16.msrb.mxu1 %v14843_v24  ;;  %v14660_v17 = vld [vmem:[#allocation10 + $0x294] sm:$0xf0]  ;;  %v14723_v24 = vor.u32 %v16316_v13, %v14720_v33  ;;  %v14582_v13 = vld [vmem:[#allocation10 + $0x1e8] sm:$0xf]  ;;  %v16282_v33 = vld [vmem:[#allocation10 + $0x1f0] sm:$0xf0] }
 0x790   :  { %9769 = vmatpush.bf16.msrb.mxu3 %v14675_v1  ;;  %v14663_v37 = vor.u32 %v16301_v48, %v14660_v17  ;;  %v16292_v1 = vld [vmem:[#allocation10 + $0x244] sm:$0xf]  ;;  %v14583_v11 = vor.u32 %v16282_v33, %v14582_v13  ;;  %v14378_v48 = vld [vmem:[#allocation10 + $0x50] sm:$0xf]  ;;  %v16231_v17 = vld [vmem:[#allocation10 + $0x58] sm:$0xf0] }
 0x791   :  { %v15002_v33 = vld [vmem:[#allocation10 + $0x530] sm:$0xf] }
 0x792   :  { %9808 = vmatpush.bf16.msrb.mxu2 %v14963_v19  ;;  %v14511_v19 = vor.u32 %v16264_v14, %v14510_v12  ;;  %v16234_v12 = vld [vmem:[#allocation10 + $0x70] sm:$0xf0] }
 0x793   :  { %9783 = vmatpush.bf16.msra.mxu0 %v14759_v58  ;;  %9798 = vmatpush.bf16.msrb.mxu1 %v14831_v63  ;;  %v16240_v58 = vld [vmem:[#allocation10 + $0xa0] sm:$0xf0]  ;;  %v14391_v5 = vor.u32 %v16234_v12, %v14390_v27  ;;  %v16222_v27 = vld [vmem:[#allocation10 + $0x10] sm:$0xf0] }
 0x794   :  { %9770 = vmatpush.bf16.msrb.mxu3 %v14663_v37  ;;  %v14415_v43 = vor.u32 %v16240_v58, %v14414_v26  ;;  %v16228_v58 = vld [vmem:[#allocation10 + $0x40] sm:$0xf0] }
 0x795   :  { %v17183_v15 = vpop.f32.mrf.mxu1 }
 0x796   :  { %9809 = vmatpush.bf16.msrb.mxu2 %v14951_v32  ;;  %v14648_v32 = vld [vmem:[#allocation10 + $0x27c] sm:$0xf0] }
 0x797   :  { %9784 = vmatpush.bf16.msra.mxu0 %v14747_v16  ;;  %9799 = vmatpush.bf16.msrb.mxu1 %v14819_v44  ;;  %v14651_v63 = vor.u32 %v16298_v59, %v14648_v32  ;;  %v16295_v16 = vld [vmem:[#allocation10 + $0x25c] sm:$0xf]  ;;  %v8212_v59 = vadd.f32 %v17170_v22, %v8199_v34  ;;  %v14546_v22 = vld [vmem:[#allocation10 + $0x1a0] sm:$0xf]  ;;  %v16384_v34 = vld [vmem:[#allocation10 + $0x520] sm:$0xf0] }
 0x798   :  { %v14639_v0 = vor.u32 %v16295_v16, %v14636_v50  ;;  %v16255_v44 = vld [vmem:[#allocation10 + $0x118] sm:$0xf0]  ;;  %v16273_v50 = vld [vmem:[#allocation10 + $0x1a8] sm:$0xf0] }
 0x799   :  { %9771 = vmatpush.bf16.msrb.mxu3 %v14651_v63  ;;  %v14475_v14 = vor.u32 %v16255_v44, %v14474_v46  ;;  %v16246_v63 = vld [vmem:[#allocation10 + $0xd0] sm:$0xf0]  ;;  %v8225_v52 = vadd.f32 %v17174_v54, %v8212_v59  ;;  %v14894_v54 = vld [vmem:[#allocation10 + $0x458] sm:$0xf]  ;;  %v16360_v46 = vld [vmem:[#allocation10 + $0x460] sm:$0xf0]  ;;  %v14547_v44 = vor.u32 %v16273_v50, %v14546_v22 }
 0x79a   :  { %9810 = vmatpush.bf16.msrb.mxu2 %v14939_v55  ;;  %9800 = vmatmul.bf16.vlgmr.msrb.gmra.mxu1 %v17152_v51  ;;  %v14594_v55 = vld [vmem:[#allocation10 + $0x200] sm:$0xf]  ;;  %v14439_v16 = vor.u32 %v16246_v63, %v14438_v30  ;;  %v14895_v13 = vor.u32 %v16360_v46, %v14894_v54  ;;  %v16381_v59 = vld [vmem:[#allocation10 + $0x508] sm:$0xf0]  ;;  %v14846_v22 = vld [vmem:[#allocation10 + $0x3f8] sm:$0xf] }
 0x79b   :  { %9844 = vmatpush.bf16.msra.mxu1 %v14523_v31  ;;  %9785 = vmatpush.bf16.msra.mxu0 %v14735_v20  ;;  %v14595_v31 = vor.u32 %v16285_v60, %v14594_v55  ;;  %v14624_v20 = vld [vmem:[#allocation10 + $0x24c] sm:$0xf0]  ;;  %v14907_v55 = vor.u32 %v16363_v53, %v14906_v6  ;;  %v8238_v60 = vadd.f32 %v17172_v41, %v8225_v52  ;;  %v16409_v52 = vld [vmem:[#allocation10 + $0x5ec] sm:$0xf]  ;;  %v16348_v50 = vld [vmem:[#allocation10 + $0x400] sm:$0xf0] }
 0x79d   :  { %9772 = vmatpush.bf16.msrb.mxu3 %v14639_v0  ;;  %v8291_v26 = vpop.f32.mrf.mxu1  ;;  %v8251_v12 = vadd.f32 %v17176_v36, %v8238_v60 }
 0x79e   :  { %9811 = vmatpush.bf16.msrb.mxu2 %v14927_v45  ;;  %v14627_v45 = vor.u32 %v16292_v1, %v14624_v20  ;;  %v17185_v37 = vpop.f32.mrf.mxu0  ;;  %v16270_v1 = vld [vmem:[#allocation10 + $0x190] sm:$0xf0]  ;;  %v14810_v20 = vld [vmem:[#allocation10 + $0x3b0] sm:$0xf] }
 0x79f   :  { %9845 = vmatpush.bf16.msra.mxu1 %v14511_v19  ;;  %9786 = vmatpush.bf16.msra.mxu0 %v14723_v24  ;;  %v14463_v19 = vor.u32 %v16252_v38, %v14462_v28  ;;  %v14450_v24 = vld [vmem:[#allocation10 + $0xe0] sm:$0xf]  ;;  %v8264_v41 = vadd.f32 %v17181_v3, %v8251_v12  ;;  %v14870_v3 = vld [vmem:[#allocation10 + $0x428] sm:$0xf]  ;;  %v14954_v12 = vld [vmem:[#allocation10 + $0x4d0] sm:$0xf] }
 0x7a0   :  { %v14451_v32 = vor.u32 %v16249_v29, %v14450_v24  ;;  %v14882_v38 = vld [vmem:[#allocation10 + $0x440] sm:$0xf]  ;;  %v14990_v29 = vld [vmem:[#allocation10 + $0x518] sm:$0xf] }
 0x7a1   :  { %9773 = vmatpush.bf16.msrb.mxu3 %v14627_v45  ;;  %v16387_v45 = vld [vmem:[#allocation10 + $0x538] sm:$0xf0]  ;;  %v8277_v36 = vadd.f32 %v17185_v37, %v8264_v41  ;;  %v14991_v26 = vor.u32 %v16384_v34, %v14990_v29  ;;  %v16333_v37 = vld [vmem:[#allocation10 + $0x388] sm:$0xf0]  ;;  %v14822_v29 = vld [vmem:[#allocation10 + $0x3c8] sm:$0xf] }
 0x7a2   :  { %9812 = vmatpush.bf16.msrb.mxu2 %v14915_v35  ;;  %9787 = vmatmul.bf16.vlgmr.msra.gmra.mxu0 %v17156_v8  ;;  %v8265_v35 = vpop.f32.mrf.mxu3  ;;  %v16342_v34 = vld [vmem:[#allocation10 + $0x3d0] sm:$0xf0] }
 0x7a3   :  { %9831 = vmatpush.bf16.msrb.mxu0 %v14427_v49  ;;  %9846 = vmatpush.bf16.msra.mxu1 %v14499_v57  ;;  %v14379_v49 = vor.u32 %v16231_v17, %v14378_v48  ;;  %v14558_v57 = vld [vmem:[#allocation10 + $0x1b8] sm:$0xf]  ;;  %v16354_v35 = vld [vmem:[#allocation10 + $0x430] sm:$0xf0] }
 0x7a5   :  { %9813 = vmatmul.bf16.vlgmr.msrb.gmra.mxu2 %v17158_v21 }
 0x7a6   :  { %9857 = vmatpush.bf16.msra.mxu2 %v14619_v42  ;;  %v14366_v42 = vld [vmem:[#allocation10 + $0x38] sm:$0xf] }
 0x7a7   :  { %9832 = vmatpush.bf16.msrb.mxu0 %v14415_v43  ;;  %9847 = vmatpush.bf16.msra.mxu1 %v14487_v39  ;;  %v14367_v47 = vor.u32 %v16228_v58, %v14366_v42  ;;  %v14559_v43 = vor.u32 %v16276_v25, %v14558_v57  ;;  %v8278_v39 = vpop.f32.mrf.mxu0  ;;  %v14871_v42 = vor.u32 %v16354_v35, %v14870_v3  ;;  %v14978_v58 = vld [vmem:[#allocation10 + $0x500] sm:$0xf]  ;;  %v14858_v57 = vld [vmem:[#allocation10 + $0x410] sm:$0xf]  ;;  %v16351_v25 = vld [vmem:[#allocation10 + $0x418] sm:$0xf0] }
 0x7a8   :  { %v8302_v10 = vpop.f32.mrf.mxu2  ;;  %v14979_v53 = vor.u32 %v16381_v59, %v14978_v58  ;;  %v14823_v58 = vor.u32 %v16342_v34, %v14822_v29  ;;  %v14930_v59 = vld [vmem:[#allocation10 + $0x4a0] sm:$0xf]  ;;  %v16303_v29 = vld [vmem:[#allocation10 + $0x298] sm:$0xf0] }
 0x7aa   :  { %9858 = vmatpush.bf16.msra.mxu2 %v14607_v62  ;;  %v16225_v62 = vld [vmem:[#allocation10 + $0x28] sm:$0xf0] }
 0x7ab   :  { %9833 = vmatpush.bf16.msrb.mxu0 %v14403_v56  ;;  %9848 = vmatpush.bf16.msra.mxu1 %v14475_v14  ;;  %v14355_v0 = vor.u32 %v16225_v62, %v14354_v2  ;;  %v14342_v56 = vld [vmem:[#allocation10 + $0x8] sm:$0xf]  ;;  %v16339_v14 = vld [vmem:[#allocation10 + $0x3b8] sm:$0xf0]  ;;  %v16330_v2 = vld [vmem:[#allocation10 + $0x370] sm:$0xf0]  ;;  %v14859_v62 = vor.u32 %v16351_v25, %v14858_v57 }
 0x7ac   :  { %v14343_v28 = vor.u32 %v16222_v27, %v14342_v56  ;;  %v14811_v48 = vor.u32 %v16339_v14, %v14810_v20  ;;  %v14762_v56 = vld [vmem:[#allocation10 + $0x350] sm:$0xf]  ;;  %v16327_v27 = vld [vmem:[#allocation10 + $0x358] sm:$0xf0]  ;;  %v14834_v14 = vld [vmem:[#allocation10 + $0x3e0] sm:$0xf] }
 0x7ae   :  { %9859 = vmatpush.bf16.msra.mxu2 %v14595_v31  ;;  %v14534_v31 = vld [vmem:[#allocation10 + $0x188] sm:$0xf] }
 0x7af   :  { %9834 = vmatpush.bf16.msrb.mxu0 %v14391_v5  ;;  %9849 = vmatpush.bf16.msra.mxu1 %v14463_v19  ;;  %v16357_v5 = vld [vmem:[#allocation10 + $0x448] sm:$0xf0]  ;;  %v15003_v19 = vor.u32 %v16387_v45, %v15002_v33 }
 0x7b0   :  { %v8304_v17 = vpop.f32.mrf.mxu2  ;;  %v14883_v24 = vor.u32 %v16357_v5, %v14882_v38  ;;  %v16403_v38 = vld [vmem:[#allocation10 + $0x5bc] sm:$0xf] }
 0x7b1   :  { %v16324_v17 = vld [vmem:[#allocation10 + $0x340] sm:$0xf0] }
 0x7b2   :  { %9860 = vmatpush.bf16.msra.mxu2 %v14583_v11  ;;  %v14535_v11 = vor.u32 %v16270_v1, %v14534_v31  ;;  %v14847_v31 = vor.u32 %v16348_v50, %v14846_v22  ;;  %v16375_v1 = vld [vmem:[#allocation10 + $0x4d8] sm:$0xf0]  ;;  %v15032_v22 = vld [vmem:[#allocation10 + $0x57c] sm:$0xf0] }
 0x7b3   :  { %9835 = vmatpush.bf16.msrb.mxu0 %v14379_v49  ;;  %9850 = vmatpush.bf16.msra.mxu1 %v14451_v32  ;;  %v14799_v49 = vor.u32 %v16336_v61, %v14798_v23  ;;  %v14942_v61 = vld [vmem:[#allocation10 + $0x4b8] sm:$0xf] }
 0x7b6   :  { %9861 = vmatpush.bf16.msra.mxu2 %v14571_v40  ;;  %v14786_v40 = vld [vmem:[#allocation10 + $0x380] sm:$0xf] }
 0x7b7   :  { %9836 = vmatpush.bf16.msrb.mxu0 %v14367_v47  ;;  %9851 = vmatpush.bf16.msra.mxu1 %v14439_v16  ;;  %v14787_v63 = vor.u32 %v16333_v37, %v14786_v40  ;;  %v16378_v16 = vld [vmem:[#allocation10 + $0x4f0] sm:$0xf0]  ;;  %v14738_v40 = vld [vmem:[#allocation10 + $0x320] sm:$0xf]  ;;  %v16321_v37 = vld [vmem:[#allocation10 + $0x328] sm:$0xf0] }
 0x7b8   :  { %v8315_v30 = vpop.f32.mrf.mxu3 }
 0x7b9   :  { %v9645_v6 = vpop.f32.mrf.mxu1 }
 0x7ba   :  { %9862 = vmatpush.bf16.msra.mxu2 %v14559_v43  ;;  %9852 = vmatmul.bf16.vlgmr.msra.gmra.mxu1 %v17125_v18  ;;  %v8290_v18 = vadd.f32 %v17183_v15, %v8277_v36  ;;  %v15092_v15 = vld [vmem:[#allocation10 + $0x5f4] sm:$0xf0]  ;;  %v17199_v43 = vld [vmem:[#allocation11] sm:$0x7] }
 0x7bb   :  { %9896 = vmatpush.bf16.msrb.mxu1 %v14907_v55  ;;  %9837 = vmatpush.bf16.msrb.mxu0 %v14355_v0  ;;  %v8593_v39 = vperm.slane %v17199_v43, 0  ;;  %v15095_v55 = vor.u32 %v16409_v52, %v15092_v15  ;;  %v16406_v0 = vld [vmem:[#allocation10 + $0x5d4] sm:$0xf]  ;;  %v14750_v36 = vld [vmem:[#allocation10 + $0x338] sm:$0xf] }
 0x7bc   :  { %v8303_v32 = vadd.f32 %v8302_v10, %v8290_v18  ;;  %v14966_v10 = vld [vmem:[#allocation10 + $0x4e8] sm:$0xf]  ;;  %v14751_v35 = vor.u32 %v16324_v17, %v14750_v36  ;;  %v16397_v52 = vld [vmem:[#allocation10 + $0x58c] sm:$0xf]  ;;  %v16306_v36 = vld [vmem:[#allocation10 + $0x2b0] sm:$0xf0] }
 0x7bd   :  { %v14967_v46 = vor.u32 %v16378_v16, %v14966_v10 }
 0x7be   :  { %9863 = vmatpush.bf16.msra.mxu2 %v14547_v44  ;;  %v8316_v47 = vadd.f32 %v8315_v30, %v8303_v32  ;;  %v15080_v44 = vld [vmem:[#allocation10 + $0x5dc] sm:$0xf0]  ;;  %v16369_v32 = vld [vmem:[#allocation10 + $0x4a8] sm:$0xf0] }
 0x7bf   :  { %9897 = vmatpush.bf16.msrb.mxu1 %v14895_v13  ;;  %9838 = vmatpush.bf16.msrb.mxu0 %v14343_v28  ;;  %v16345_v13 = vld [vmem:[#allocation10 + $0x3e8] sm:$0xf0]  ;;  %v15083_v41 = vor.u32 %v16406_v0, %v15080_v44  ;;  %v14763_v28 = vor.u32 %v16327_v27, %v14762_v56  ;;  %v14931_v15 = vor.u32 %v16369_v32, %v14930_v59  ;;  %v15008_v44 = vld [vmem:[#allocation10 + $0x54c] sm:$0xf0] }
 0x7c0   :  { %v8317_v45 = vpop.f32.mrf.mxu3  ;;  %v14835_v23 = vor.u32 %v16345_v13, %v14834_v14  ;;  %v14702_v14 = vld [vmem:[#allocation10 + $0x2d8] sm:$0xf]  ;;  %v16312_v13 = vld [vmem:[#allocation10 + $0x2e0] sm:$0xf0]  ;;  %v15098_v32 = vld [vmem:[#allocation10 + $0x5f0] sm:$0xf] }
 0x7c1   :  { %v9632_v20 = vpop.f32.mrf.mxu0  ;;  %v9647_v5 = vpop.f32.mrf.mxu1 }
 0x7c2   :  { %9864 = vmatpush.bf16.msra.mxu2 %v14535_v11  ;;  %9839 = vmatmul.bf16.vlgmr.msrb.gmra.mxu0 %v17130_v4  ;;  %v14774_v4 = vld [vmem:[#allocation10 + $0x368] sm:$0xf]  ;;  %v9633_v33 = vadd.f32 %v9632_v20, %v8593_v39  ;;  %v14955_v11 = vor.u32 %v16375_v1, %v14954_v12  ;;  %v16315_v12 = vld [vmem:[#allocation10 + $0x2f8] sm:$0xf0] }
 0x7c3   :  { %9883 = vmatpush.bf16.msra.mxu0 %v14811_v48  ;;  %9898 = vmatpush.bf16.msrb.mxu1 %v14883_v24  ;;  %v14775_v60 = vor.u32 %v16330_v2, %v14774_v4  ;;  %v15068_v48 = vld [vmem:[#allocation10 + $0x5c4] sm:$0xf0]  ;;  %v16372_v24 = vld [vmem:[#allocation10 + $0x4c0] sm:$0xf0]  ;;  %v16366_v2 = vld [vmem:[#allocation10 + $0x490] sm:$0xf0] }
 0x7c4   :  { %v15071_v3 = vor.u32 %v16403_v38, %v15068_v48  ;;  %v14943_v18 = vor.u32 %v16372_v24, %v14942_v61  ;;  %v14918_v4 = vld [vmem:[#allocation10 + $0x488] sm:$0xf]  ;;  %v16309_v38 = vld [vmem:[#allocation10 + $0x2c8] sm:$0xf0]  ;;  %v14666_v24 = vld [vmem:[#allocation10 + $0x290] sm:$0xf] }
 0x7c5   :  { %9865 = vmatmul.bf16.vlgmr.msra.gmra.mxu2 %v17132_v7  ;;  %v8326_v7 = vmax.f32 %v8316_v47, 0.0  ;;  %v15044_v47 = vld [vmem:[#allocation10 + $0x594] sm:$0xf0]  ;;  %v14919_v16 = vor.u32 %v16366_v2, %v14918_v4  ;;  %v14678_v48 = vld [vmem:[#allocation10 + $0x2a8] sm:$0xf]  ;;  %v14667_v34 = vor.u32 %v16303_v29, %v14666_v24  ;;  %v16427_v24 = vld [vmem:[#allocation13 + $0x78] sm:$0xff] }
 0x7c6   :  { %9909 = vmatpush.bf16.msrb.mxu2 %v15003_v19  ;;  %v9646_v19 = vadd.f32 %v9645_v6, %v9633_v33  ;;  %v14726_v6 = vld [vmem:[#allocation10 + $0x308] sm:$0xf]  ;;  %v14679_v61 = vor.u32 %v16306_v36, %v14678_v48  ;;  %v15074_v2 = vld [vmem:[#allocation10 + $0x5c0] sm:$0xf]  ;;  %v16426_v29 = vld [vmem:[#allocation13 + $0x70] sm:$0xff] }
 0x7c7   :  { %9884 = vmatpush.bf16.msra.mxu0 %v14799_v49  ;;  %9899 = vmatpush.bf16.msrb.mxu1 %v14871_v42  ;;  %v17202_v54 = vpack.c.bf16 %v8326_v7, %v8326_v7  ;;  %v16400_v49 = vld [vmem:[#allocation10 + $0x5a4] sm:$0xf]  ;;  %v16394_v7 = vld [vmem:[#allocation10 + $0x574] sm:$0xf] }
 0x7c8   :  { %v9658_v42 = vpop.f32.mrf.mxu2  ;;  %v15035_v39 = vor.u32 %v16394_v7, %v15032_v22  ;;  %v15062_v7 = vld [vmem:[#allocation10 + $0x5a8] sm:$0xf]  ;;  %v16402_v22 = vld [vmem:[#allocation10 + $0x5b0] sm:$0xf0] }
 0x7c9   :  { %9722 = vmatmul.bf16.vlgmr.msra.gmra.mxu3 %v17202_v54  ;;  %v9659_v57 = vadd.f32 %v9658_v42, %v9646_v19  ;;  %v9634_v25 = vpop.f32.mrf.mxu0  ;;  %v14630_v42 = vld [vmem:[#allocation10 + $0x248] sm:$0xf] }
 0x7ca   :  { %9910 = vmatpush.bf16.msrb.mxu2 %v14991_v26  ;;  %9818 = vmatpush.bf16.msra.mxu3 %v15095_v55  ;;  %v15056_v26 = vld [vmem:[#allocation10 + $0x5ac] sm:$0xf0]  ;;  %v16391_v55 = vld [vmem:[#allocation10 + $0x55c] sm:$0xf] }
 0x7cb   :  { %9885 = vmatpush.bf16.msra.mxu0 %v14787_v63  ;;  %9900 = vmatpush.bf16.msrb.mxu1 %v14859_v62  ;;  %v15059_v30 = vor.u32 %v16400_v49, %v15056_v26  ;;  %v14739_v63 = vor.u32 %v16321_v37, %v14738_v40  ;;  %v15047_v62 = vor.u32 %v16397_v52, %v15044_v47  ;;  %v14642_v26 = vld [vmem:[#allocation10 + $0x260] sm:$0xf]  ;;  %v16297_v40 = vld [vmem:[#allocation10 + $0x268] sm:$0xf0]  ;;  %v15086_v52 = vld [vmem:[#allocation10 + $0x5d8] sm:$0xf] }
 0x7cc   :  { %v14643_v37 = vor.u32 %v16297_v40, %v14642_v26  ;;  %v16424_v26 = vld [vmem:[#allocation13 + $0x60] sm:$0xff] }
 0x7ce   :  { %9911 = vmatpush.bf16.msrb.mxu2 %v14979_v53  ;;  %9819 = vmatpush.bf16.msra.mxu3 %v15083_v41  ;;  %v16318_v53 = vld [vmem:[#allocation10 + $0x310] sm:$0xf0]  ;;  %v14703_v41 = vor.u32 %v16312_v13, %v14702_v14  ;;  %v15014_v13 = vld [vmem:[#allocation10 + $0x548] sm:$0xf] }
 0x7cf   :  { %9886 = vmatpush.bf16.msra.mxu0 %v14775_v60  ;;  %9901 = vmatpush.bf16.msrb.mxu1 %v14847_v31  ;;  %v14727_v10 = vor.u32 %v16318_v53, %v14726_v6  ;;  %v15020_v60 = vld [vmem:[#allocation10 + $0x564] sm:$0xf0]  ;;  %v14714_v31 = vld [vmem:[#allocation10 + $0x2f0] sm:$0xf] }
 0x7d0   :  { %v9660_v50 = vpop.f32.mrf.mxu2  ;;  %v15023_v0 = vor.u32 %v16391_v55, %v15020_v60  ;;  %v14715_v20 = vor.u32 %v16315_v12, %v14714_v31  ;;  %v15063_v60 = vor.u32 %v16402_v22, %v15062_v7  ;;  %v15026_v12 = vld [vmem:[#allocation10 + $0x560] sm:$0xf] }
 0x7d2   :  { %9912 = vmatpush.bf16.msrb.mxu2 %v14967_v46  ;;  %9820 = vmatpush.bf16.msra.mxu3 %v15071_v3  ;;  %v14654_v3 = vld [vmem:[#allocation10 + $0x278] sm:$0xf] }
 0x7d3   :  { %9887 = vmatpush.bf16.msra.mxu0 %v14763_v28  ;;  %9902 = vmatpush.bf16.msrb.mxu1 %v14835_v23  ;;  %v14690_v28 = vld [vmem:[#allocation10 + $0x2c0] sm:$0xf] }
 0x7d6   :  { %9913 = vmatpush.bf16.msrb.mxu2 %v14955_v11  ;;  %9821 = vmatpush.bf16.msra.mxu3 %v15059_v30  ;;  %v14691_v11 = vor.u32 %v16309_v38, %v14690_v28  ;;  %v8594_v30 = vperm.slane %v17199_v43, 1 }
 0x7d7   :  { %9888 = vmatpush.bf16.msra.mxu0 %v14751_v35  ;;  %9903 = vmatpush.bf16.msrb.mxu1 %v14823_v58  ;;  %v9697_v27 = vpop.f32.mrf.mxu1  ;;  %v16300_v35 = vld [vmem:[#allocation10 + $0x280] sm:$0xf0]  ;;  %v16294_v58 = vld [vmem:[#allocation10 + $0x250] sm:$0xf0] }
 0x7d8   :  { %v9671_v46 = vpop.f32.mrf.mxu3  ;;  %v14631_v25 = vor.u32 %v16294_v58, %v14630_v42 }
 0x7d9   :  { %9774 = vmatmul.bf16.vlgmr.msrb.gmra.mxu3 %v17143_v9  ;;  %v9672_v56 = vadd.f32 %v9671_v46, %v9659_v57  ;;  %v16411_v57 = vld [vmem:[#allocation10 + $0x5f8] sm:$0xf0] }
 0x7da   :  { %9914 = vmatpush.bf16.msrb.mxu2 %v14943_v18  ;;  %9904 = vmatmul.bf16.vlgmr.msrb.gmra.mxu1 %v17152_v51  ;;  %v16388_v51 = vld [vmem:[#allocation10 + $0x544] sm:$0xf]  ;;  %v14655_v18 = vor.u32 %v16300_v35, %v14654_v3  ;;  %v16399_v46 = vld [vmem:[#allocation10 + $0x598] sm:$0xf0]  ;;  %v8595_v3 = vperm.slane %v17199_v43, 2  ;;  %v16425_v35 = vld [vmem:[#allocation13 + $0x68] sm:$0xff] }
 0x7db   :  { %9889 = vmatpush.bf16.msra.mxu0 %v14739_v63  ;;  %9822 = vmatpush.bf16.msra.mxu3 %v15047_v62  ;;  %v15011_v1 = vor.u32 %v16388_v51, %v15008_v44  ;;  %v15099_v63 = vor.u32 %v16411_v57, %v15098_v32  ;;  %v16405_v62 = vld [vmem:[#allocation10 + $0x5c8] sm:$0xf0]  ;;  %v16419_v51 = vld [vmem:[#allocation13 + $0x38] sm:$0xff]  ;;  %v16422_v32 = vld [vmem:[#allocation13 + $0x50] sm:$0xff] }
 0x7dc   :  { %10150 = vmatpush.bf16.msra.mxu1 %v16427_v24  ;;  %v16421_v57 = vld [vmem:[#allocation13 + $0x48] sm:$0xff] }
 0x7de   :  { %9915 = vmatpush.bf16.msrb.mxu2 %v14931_v15  ;;  %v16408_v15 = vld [vmem:[#allocation10 + $0x5e0] sm:$0xf0] }
 0x7df   :  { %9890 = vmatpush.bf16.msra.mxu0 %v14727_v10  ;;  %9823 = vmatpush.bf16.msra.mxu3 %v15035_v39  ;;  %v9684_v33 = vpop.f32.mrf.mxu0  ;;  %v15087_v53 = vor.u32 %v16408_v15, %v15086_v52  ;;  %v16420_v52 = vld [vmem:[#allocation13 + $0x40] sm:$0xff] }
 0x7e0   :  { %v9685_v45 = vadd.f32 %v9684_v33, %v9672_v56  ;;  %v15038_v56 = vld [vmem:[#allocation10 + $0x578] sm:$0xf]  ;;  %v16390_v33 = vld [vmem:[#allocation10 + $0x550] sm:$0xf0]  ;;  %10151 = vmatpush.bf16.msra.mxu1 %v16426_v29 }
 0x7e2   :  { %9916 = vmatpush.bf16.msrb.mxu2 %v14919_v16  ;;  %9891 = vmatmul.bf16.vlgmr.msra.gmra.mxu0 %v17156_v8  ;;  %v9673_v8 = vpop.f32.mrf.mxu3  ;;  %v9698_v5 = vadd.f32 %v9697_v27, %v9685_v45  ;;  %v15075_v16 = vor.u32 %v16405_v62, %v15074_v2  ;;  %v16396_v27 = vld [vmem:[#allocation10 + $0x580] sm:$0xf0]  ;;  %v16417_v45 = vld [vmem:[#allocation13 + $0x28] sm:$0xff] }
 0x7e3   :  { %9824 = vmatpush.bf16.msra.mxu3 %v15023_v0  ;;  %v15050_v0 = vld [vmem:[#allocation10 + $0x590] sm:$0xf]  ;;  %10137 = vmatpush.bf16.msrb.mxu0 %v16419_v51  ;;  %v15039_v31 = vor.u32 %v16396_v27, %v15038_v56 }
 0x7e4   :  { %v15051_v44 = vor.u32 %v16399_v46, %v15050_v0  ;;  %10152 = vmatpush.bf16.msra.mxu1 %v16425_v35  ;;  %v16435_v0 = vld [vmem:[#allocation13 + $0xb8] sm:$0xff]  ;;  %v16433_v27 = vld [vmem:[#allocation13 + $0xa8] sm:$0xff] }
 0x7e5   :  { %9917 = vmatmul.bf16.vlgmr.msrb.gmra.mxu2 %v17158_v21  ;;  %v9699_v21 = vpop.f32.mrf.mxu1 }
 0x7e6   :  { %v16416_v21 = vld [vmem:[#allocation13 + $0x20] sm:$0xff]  ;;  %10163 = vmatpush.bf16.msra.mxu2 %v16435_v0 }
 0x7e7   :  { %9825 = vmatpush.bf16.msra.mxu3 %v15011_v1  ;;  %v9686_v23 = vpop.f32.mrf.mxu0  ;;  %v16393_v1 = vld [vmem:[#allocation10 + $0x568] sm:$0xf0] }
 0x7e8   :  { %v9710_v17 = vpop.f32.mrf.mxu2  ;;  %v15027_v14 = vor.u32 %v16393_v1, %v15026_v12  ;;  %10153 = vmatpush.bf16.msra.mxu1 %v16424_v26  ;;  %v16430_v12 = vld [vmem:[#allocation13 + $0x90] sm:$0xff]  ;;  %v16429_v1 = vld [vmem:[#allocation13 + $0x88] sm:$0xff] }
 0x7e9   :  { %v17210_v19 = vadd.f32 %v9710_v17, %v9698_v5  ;;  %v16415_v5 = vld [vmem:[#allocation13 + $0x18] sm:$0xff]  ;;  %v16413_v17 = vld [vmem:[#allocation13 + $0x8] sm:$0xff] }
 0x7ea   :  { %9826 = vmatmul.bf16.vlgmr.msra.gmra.mxu3 %v17202_v54 }
 0x7eb   :  { %9870 = vmatpush.bf16.msrb.mxu3 %v14715_v20  ;;  %v16418_v20 = vld [vmem:[#allocation13 + $0x30] sm:$0xff] }
 0x7ec   :  { %10138 = vmatpush.bf16.msrb.mxu0 %v16418_v20  ;;  %v16428_v20 = vld [vmem:[#allocation13 + $0x80] sm:$0xff] }
 0x7ef   :  { %9871 = vmatpush.bf16.msrb.mxu3 %v14703_v41  ;;  %v15015_v41 = vor.u32 %v16390_v33, %v15014_v13 }
 0x7f0   :  { %v9712_v49 = vpop.f32.mrf.mxu2  ;;  %10139 = vmatpush.bf16.msrb.mxu0 %v16417_v45 }
 0x7f3   :  { %9872 = vmatpush.bf16.msrb.mxu3 %v14691_v11  ;;  %v16414_v11 = vld [vmem:[#allocation13 + $0x10] sm:$0xff] }
 0x7f4   :  { %10140 = vmatpush.bf16.msrb.mxu0 %v16416_v21 }
 0x7f7   :  { %9873 = vmatpush.bf16.msrb.mxu3 %v14679_v61  ;;  %v9749_v59 = vpop.f32.mrf.mxu1  ;;  %v16412_v61 = vld [vmem:[#allocation13] sm:$0xff] }
 0x7f8   :  { %10141 = vmatpush.bf16.msrb.mxu0 %v16415_v5 }
 0x7fb   :  { %9874 = vmatpush.bf16.msrb.mxu3 %v14667_v34 }
 0x7fc   :  { %10142 = vmatpush.bf16.msrb.mxu0 %v16414_v11 }
 0x7ff   :  { %9875 = vmatpush.bf16.msrb.mxu3 %v14655_v18  ;;  %v9736_v47 = vpop.f32.mrf.mxu0  ;;  %v9751_v4 = vpop.f32.mrf.mxu1 }
 0x800   :  { %v9737_v6 = vadd.f32 %v9736_v47, %v8594_v30  ;;  %10143 = vmatpush.bf16.msrb.mxu0 %v16413_v17 }
 0x802   :  { %v9750_v10 = vadd.f32 %v9749_v59, %v9737_v6 }
 0x803   :  { %9876 = vmatpush.bf16.msrb.mxu3 %v14643_v37  ;;  %v16423_v37 = vld [vmem:[#allocation13 + $0x58] sm:$0xff] }
 0x804   :  { %10144 = vmatpush.bf16.msrb.mxu0 %v16412_v61  ;;  %10154 = vmatpush.bf16.msra.mxu1 %v16423_v37  ;;  %v16451_v61 = vld [vmem:[#allocation14] ss:$0 sm:$0xff] }
 0x807   :  { %9877 = vmatpush.bf16.msrb.mxu3 %v14631_v25  ;;  %v9738_v55 = vpop.f32.mrf.mxu0 }
 0x808   :  { %v9762_v50 = vpop.f32.mrf.mxu2  ;;  %10155 = vmatpush.bf16.msra.mxu1 %v16422_v32 }
 0x809   :  { %v17214_v39 = vadd.f32 %v9762_v50, %v9750_v10 }
 0x80a   :  { %9878 = vmatmul.bf16.vlgmr.msrb.gmra.mxu3 %v17143_v9 }
 0x80b   :  { %9922 = vmatpush.bf16.msra.mxu3 %v15099_v63 }
 0x80c   :  { %10156 = vmatpush.bf16.msra.mxu1 %v16421_v57 }
 0x80f   :  { %9923 = vmatpush.bf16.msra.mxu3 %v15087_v53 }
 0x810   :  { %v9764_v9 = vpop.f32.mrf.mxu2  ;;  %10157 = vmatpush.bf16.msra.mxu1 %v16420_v52 }
 0x813   :  { %9924 = vmatpush.bf16.msra.mxu3 %v15075_v16 }
 0x817   :  { %9925 = vmatpush.bf16.msra.mxu3 %v15063_v60  ;;  %v9801_v8 = vpop.f32.mrf.mxu1 }
 0x81b   :  { %9926 = vmatpush.bf16.msra.mxu3 %v15051_v44  ;;  %v16434_v44 = vld [vmem:[#allocation13 + $0xb0] sm:$0xff] }
 0x81c   :  { %10164 = vmatpush.bf16.msra.mxu2 %v16434_v44 }
 0x81f   :  { %9927 = vmatpush.bf16.msra.mxu3 %v15039_v31  ;;  %v9788_v28 = vpop.f32.mrf.mxu0  ;;  %v9803_v38 = vpop.f32.mrf.mxu1  ;;  %v16431_v31 = vld [vmem:[#allocation13 + $0x98] sm:$0xff] }
 0x820   :  { %10165 = vmatpush.bf16.msra.mxu2 %v16433_v27 }
 0x823   :  { %9928 = vmatpush.bf16.msra.mxu3 %v15027_v14 }
 0x827   :  { %9929 = vmatpush.bf16.msra.mxu3 %v15015_v41  ;;  %v9790_v36 = vpop.f32.mrf.mxu0 }
 0x828   :  { %v9814_v48 = vpop.f32.mrf.mxu2 }
 0x82a   :  { %9930 = vmatmul.bf16.vlgmr.msra.gmra.mxu3 %v17202_v54 }
 0x830   :  { %v9816_v23 = vpop.f32.mrf.mxu2 }
 0x837   :  { %v9853_v34 = vpop.f32.mrf.mxu1 }
 0x83f   :  { %v9840_v54 = vpop.f32.mrf.mxu0  ;;  %v9855_v18 = vpop.f32.mrf.mxu1 }
 0x840   :  { %v9841_v49 = vadd.f32 %v9840_v54, %v8595_v3 }
 0x842   :  { %v9854_v40 = vadd.f32 %v9853_v34, %v9841_v49 }
 0x847   :  { %v9842_v59 = vpop.f32.mrf.mxu0 }
 0x848   :  { %v9866_v42 = vpop.f32.mrf.mxu2 }
 0x849   :  { %v9867_v58 = vadd.f32 %v9866_v42, %v9854_v40 }
 0x84c   :  { %v9723_v30 = vpop.f32.mrf.mxu3 }
 0x84d   :  { %v9724_v43 = vadd.f32 %v9723_v30, %v17210_v19 }
 0x84f   :  { %v9935_v63 = vmax.f32 %v9724_v43, 0.0 }
 0x850   :  { %v9868_v25 = vpop.f32.mrf.mxu2 }
 0x851   :  { %v9938_v15 = vpack.c.bf16 %v9935_v63, %v9935_v63 }
 0x853   :  { %10145 = vmatmul.bf16.vlgmr.msrb.gmra.mxu0 %v9938_v15 }
 0x854   :  { %v9725_v47 = vpop.f32.mrf.mxu3 }
 0x857   :  { %v9905_v6 = vpop.f32.mrf.mxu1 }
 0x85c   :  { %v9775_v4 = vpop.f32.mrf.mxu3 }
 0x85d   :  { %v9776_v62 = vadd.f32 %v9775_v4, %v17214_v39  ;;  %v16432_v39 = vld [vmem:[#allocation13 + $0xa0] sm:$0xff] }
 0x85e   :  { %10166 = vmatpush.bf16.msra.mxu2 %v16432_v39 }
 0x85f   :  { %v9892_v53 = vpop.f32.mrf.mxu0  ;;  %v9907_v2 = vpop.f32.mrf.mxu1  ;;  %v9789_v10 = vadd.f32 %v9788_v28, %v9776_v62 }
 0x861   :  { %v9802_v7 = vadd.f32 %v9801_v8, %v9789_v10 }
 0x862   :  { %10167 = vmatpush.bf16.msra.mxu2 %v16431_v31 }
 0x863   :  { %v9815_v50 = vadd.f32 %v9814_v48, %v9802_v7 }
 0x864   :  { %v9777_v55 = vpop.f32.mrf.mxu3 }
 0x866   :  { %10168 = vmatpush.bf16.msra.mxu2 %v16430_v12 }
 0x867   :  { %v9894_v22 = vpop.f32.mrf.mxu0 }
 0x868   :  { %v9918_v16 = vpop.f32.mrf.mxu2 }
 0x86a   :  { %10169 = vmatpush.bf16.msra.mxu2 %v16429_v1 }
 0x86d   :  { %v9827_v60 = vpop.f32.mrf.mxu3 }
 0x86e   :  { %v9828_v46 = vadd.f32 %v9827_v60, %v9815_v50  ;;  %10170 = vmatpush.bf16.msra.mxu2 %v16428_v20 }
 0x870   :  { %v9920_v19 = vpop.f32.mrf.mxu2  ;;  %v9936_v51 = vmax.f32 %v9828_v46, 0.0 }
 0x872   :  { %v9939_v56 = vpack.c.bf16 %v9936_v51, %v9936_v51 }
 0x874   :  { %10158 = vmatmul.bf16.vlgmr.msra.gmra.mxu1 %v9939_v56 }
 0x875   :  { %v9829_v9 = vpop.f32.mrf.mxu3 }
 0x88d   :  { %v9879_v14 = vpop.f32.mrf.mxu3 }
 0x88e   :  { %v9880_v13 = vadd.f32 %v9879_v14, %v9867_v58 }
 0x890   :  { %v9893_v33 = vadd.f32 %v9892_v53, %v9880_v13 }
 0x892   :  { %v9906_v45 = vadd.f32 %v9905_v6, %v9893_v33 }
 0x894   :  { %v9919_v8 = vadd.f32 %v9918_v16, %v9906_v45 }
 0x895   :  { %v9881_v41 = vpop.f32.mrf.mxu3 }
 0x8ad   :  { %v9931_v21 = vpop.f32.mrf.mxu3 }
 0x8ae   :  { %v9932_v28 = vadd.f32 %v9931_v21, %v9919_v8 }
 0x8b0   :  { %v9937_v38 = vmax.f32 %v9932_v28, 0.0 }
 0x8b2   :  { %v9940_v5 = vpack.c.bf16 %v9937_v38, %v9937_v38 }
 0x8b4   :  { %10171 = vmatmul.bf16.vlgmr.msra.gmra.mxu2 %v9940_v5 }
 0x8b5   :  { %v9933_v11 = vpop.f32.mrf.mxu3 }
 0x8d0   :  { %v10146_v48 = vpop.f32.mrf.mxu0 }
 0x8d1   :  { %v10147_v24 = vadd.f32 %v16451_v61, %v10146_v48 }
 0x8d8   :  { %v10148_v36 = vpop.f32.mrf.mxu0 }
 0x8f1   :  { %v10159_v17 = vpop.f32.mrf.mxu1 }
 0x8f2   :  { %v10160_v29 = vadd.f32 %v10159_v17, %v10147_v24 }
 0x8f9   :  { %v10161_v23 = vpop.f32.mrf.mxu1 }
 0x937   :  { %v10172_v34 = vpop.f32.mrf.mxu2 }
 0x938   :  { %v10173_v3 = vadd.f32 %v10172_v34, %v10160_v29 }
 0x93a   :  { %10176 = vmax.xlane.f32.xlu0 %v10173_v3 }
 0x93f   :  { %v10174_v35 = vpop.f32.mrf.mxu2 }
 0x9ad   :  { %v10177_v54 = vpop.xlane.xlu0 %10176 }
 0x9ae   :  { %v10178_v49 = vsub.f32 %v10173_v3, %v10177_v54 }
 0x9b0   :  { %v10179_v18 = vmul.f32 1.442695, %v10178_v49 }
 0x9b2   :  { %16452 = vpow2.f32 %v10179_v18 }
 0x9b8   :  { %v16453_v26 = vpop.eup %16452 }
 0x9b9   :  { %10181 = vadd.xlane.f32.xlu0 %v16453_v26 }
 0xa2c   :  { %v10182_v40 = vpop.xlane.xlu0 %10181 }
 0xa2d   :  { %16454 = vrcp.f32 %v10182_v40  ;;  %v10194_v59 = vand.u32 2147483648, %v10182_v40  ;;  %v10192_v57 = vand.u32 2147483647, %v10182_v40  ;;  %vm10188_vm3 = vweird.f32 %v10182_v40 }
 0xa2f   :  { %v10195_v30 = vor.u32 1.1754944e-38, %v10194_v59  ;;  %vm10193_vm5 = vcmp.eq.f32.partialorder %v10192_v57, 8.507059e+37 }
 0xa33   :  { %v16455_v37 = vpop.eup %16454 }
 0xa34   :  { %v10184_v42 = vmul.f32 %v16455_v37, %v10182_v40  ;;  %vm10189_vm2 = vweird.f32 %v16455_v37 }
 0xa35   :  { %vm10190_vm4 = vmor %vm10188_vm3, %vm10189_vm2 }
 0xa36   :  { %v10185_v58 = vsub.f32 1.0, %v10184_v42 }
 0xa38   :  { %v10186_v32 = vmul.f32 %v16455_v37, %v10185_v58 }
 0xa3a   :  { %v10187_v25 = vadd.f32 %v16455_v37, %v10186_v32 }
 0xa3c   :  { %v10191_v43 = vsel %vm10190_vm4, %v16455_v37, %v10187_v25 }
 0xa3d   :  { %v10196_v63 = vsel %vm10193_vm5, %v10195_v30, %v10191_v43 }
 0xa3e   :  { %v10197_v52 = vmul.f32 %v16453_v26, %v10196_v63 }
 0xa40   :  { %10198 = vst [vmem:[#allocation16] sm:$0xff] %v10197_v52 }
 0xa41   :  { %10209 = dma.vmem_to_hbm [thread:$0]  %s10205_s26, 128, %s10207_s29, [#allocation4]  }
 0xa42   :  { %16688 = dma.done.wait [#allocation4], 128  }
 0xa43   :  { %16689 = vsyncadd [#allocation4], 4294967168 }
 0xa44   :  { %10214 = vsyncpa [#allocation3], 1 }
 0xa45   :  { %10215 = vsyncpa [#allocation6], 1 }
 0xa46   :  { %10216 = vsyncpa [#allocation9], 1 }
 0xa47   :  { %10217 = vsyncpa [#allocation12], 1 }
 0xa48   :  { %10218 = vsyncpa [#allocation15], 1 }
 0xa49   :  { %10219 = vsyncpa [#allocation4], 1 }

</bundles_post_ra>
